<compile_context>
chip_gen: v7x
topology: tpu7x:2x2x1
jax: 0.10.0
libtpu: 0.0.40
codegen_flags: <defaults>
</compile_context>

<pallas_src>
import jax
import jax.numpy as jnp
from jax.experimental import pallas as pl
from jax.experimental.pallas import tpu as pltpu


_TILE_M = 512                      # lane-axis tile (multiple of 128)
_VMEM_LIMIT = 32 * 1024 * 1024     # explicit scoped-VMEM cap, safe on v5e/v6e/v7x


def _round_up(x, m):
    return ((x + m - 1) // m) * m


# ---------------------------------------------------------------------------
# Pallas kernel: K-split GEMM (bf16 x bf16 -> f32 acc) + bias + SiLU (+ res)
# ---------------------------------------------------------------------------
def _make_conv_kernel(n_src, has_res):
    def kernel(*refs):
        x_refs = refs[:n_src]                  # each (K_i, TM)   bf16
        w_refs = refs[n_src:2 * n_src]         # each (Cout, K_i) bf16, BN folded
        b_ref = refs[2 * n_src]                # (Cout, 1) f32
        res_ref = refs[2 * n_src + 1] if has_res else None
        o_ref = refs[-1]                       # (Cout, TM) bf16

        acc = jnp.dot(w_refs[0][...], x_refs[0][...],
                      preferred_element_type=jnp.float32)
        for i in range(1, n_src):              # concat-free K-split accumulation
            acc += jnp.dot(w_refs[i][...], x_refs[i][...],
                           preferred_element_type=jnp.float32)
        y = acc + b_ref[...]                                     # fp32 epilogue
        y = y * pl.reciprocal(1.0 + jnp.exp(-y), approx=True)    # SiLU (EUP)
        if has_res:
            y = y + res_ref[...].astype(jnp.float32)             # fused shortcut
        o_ref[...] = y.astype(o_ref.dtype)
    return kernel


def _fused_gemm(xs, ws, bias, residual=None):
    """SiLU(sum_i ws[i] @ xs[i] + bias) (+ residual) -> (Cout, M) bf16."""
    cout = ws[0].shape[0]
    M = xs[0].shape[1]
    TM = min(_TILE_M, _round_up(M, 128))
    M_pad = _round_up(M, TM)

    xs_p = [jnp.pad(x.astype(jnp.bfloat16), ((0, 0), (0, M_pad - M))) for x in xs]
    operands = xs_p + list(ws) + [bias]
    in_specs = ([pl.BlockSpec((x.shape[0], TM), lambda m: (0, m)) for x in xs_p]
                + [pl.BlockSpec(w.shape, lambda m: (0, 0)) for w in ws]
                + [pl.BlockSpec((cout, 1), lambda m: (0, 0))])
    has_res = residual is not None
    if has_res:
        res_p = jnp.pad(residual.astype(jnp.bfloat16), ((0, 0), (0, M_pad - M)))
        operands.append(res_p)
        in_specs.append(pl.BlockSpec((cout, TM), lambda m: (0, m)))

    out = pl.pallas_call(
        _make_conv_kernel(len(xs), has_res),
        out_shape=jax.ShapeDtypeStruct((cout, M_pad), jnp.bfloat16),
        grid=(M_pad // TM,),
        in_specs=in_specs,
        out_specs=pl.BlockSpec((cout, TM), lambda m: (0, m)),
        compiler_params=pltpu.CompilerParams(
            dimension_semantics=("parallel",),
            vmem_limit_bytes=_VMEM_LIMIT),
    )(*operands)
    return out[:, :M]


# ---------------------------------------------------------------------------
# Conv wrappers (channel-major activations), maxpool, Focus
# ---------------------------------------------------------------------------
def conv_bn_silu(x, p, residual=None):
    """BaseConv: Conv2d(bias=False) + eval-BatchNorm (folded) + SiLU."""
    k, s = p["ksize"], p["stride"]
    C, N, H, W = x.shape
    if k == 1 and s == 1:
        cols, Hout, Wout = x.reshape(C, N * H * W), H, W
    else:
        # TODO(synk): 3x3 convs still materialize the (bf16, M-tiled) im2col in
        # HBM; in-kernel patch building from a haloed tile would cut activation
        # traffic by up to ~9x at large resolutions.
        pad = (k - 1) // 2
        Hout = (H + 2 * pad - k) // s + 1
        Wout = (W + 2 * pad - k) // s + 1
        xp = jnp.pad(x, ((0, 0), (0, 0), (pad, pad), (pad, pad)))
        taps = [xp[:, :, dy:dy + s * Hout:s, dx:dx + s * Wout:s]
                for dy in range(k) for dx in range(k)]
        cols = jnp.concatenate(taps, axis=0).reshape(k * k * C, N * Hout * Wout)
    res2d = None
    if residual is not None:
        res2d = residual.reshape(residual.shape[0], N * Hout * Wout)
    out = _fused_gemm([cols], [p["w"]], p["bias"], res2d)
    return out.reshape(-1, N, Hout, Wout)


def conv1x1_multi_bn_silu(srcs, p):
    """1x1 conv over a channel-concat of `srcs` WITHOUT materializing the concat."""
    _, N, H, W = srcs[0].shape
    M = N * H * W
    xs, ws, off = [], [], 0
    for s in srcs:
        c = s.shape[0]
        xs.append(s.reshape(c, M))
        ws.append(p["w"][:, off:off + c])
        off += c
    out = _fused_gemm(xs, ws, p["bias"])
    return out.reshape(-1, N, H, W)


def maxpool_same(x, k):
    # PyTorch MaxPool2d(k, stride=1, padding=k//2), channel-major layout
    pad = k // 2
    return jax.lax.reduce_window(
        x, jnp.array(-jnp.inf, x.dtype), jax.lax.max,
        window_dimensions=(1, 1, k, k), window_strides=(1, 1, 1, 1),
        padding=[(0, 0), (0, 0), (pad, pad), (pad, pad)])


# ---------------------------------------------------------------------------
# Deterministic parameter construction (matches PyTorch module structure)
# ---------------------------------------------------------------------------
class ParamGen:
    def __init__(self, key):
        self.key = key

    def next(self):
        self.key, sub = jax.random.split(self.key)
        return sub


def make_base_conv(pg, cin, cout, ksize, stride):
    k_w, k_g, k_b = jax.random.split(pg.next(), 3)
    fan_in = cin * ksize * ksize
    # packed weight: K = (ky, kx, cin)-major, matching the im2col tap order
    w = jax.random.normal(k_w, (ksize * ksize * cin, cout), jnp.float32)
    w = w / jnp.sqrt(float(fan_in))
    gamma = 1.0 + 0.1 * jax.random.normal(k_g, (cout,), jnp.float32)
    beta = 0.1 * jax.random.normal(k_b, (cout,), jnp.float32)
    running_mean = jnp.zeros((cout,), jnp.float32)
    running_var = jnp.ones((cout,), jnp.float32)
    eps = 1e-3  # YOLOX BaseConv BatchNorm eps
    scale = gamma / jnp.sqrt(running_var + eps)
    bias = beta - running_mean * scale
    w_folded = (w * scale[None, :]).T          # BN scale folded -> (Cout, K)
    return dict(w=w_folded.astype(jnp.bfloat16),
                bias=bias.reshape(cout, 1),    # fp32 epilogue bias
                ksize=ksize, stride=stride)


def make_bottleneck(pg, cin, cout, shortcut, expansion=1.0):
    hidden = int(cout * expansion)
    return dict(conv1=make_base_conv(pg, cin, hidden, 1, 1),
                conv2=make_base_conv(pg, hidden, cout, 3, 1),
                use_add=bool(shortcut and cin == cout))


def make_csp_layer(pg, cin, cout, n, shortcut=True, expansion=0.5):
    hidden = int(cout * expansion)
    return dict(conv1=make_base_conv(pg, cin, hidden, 1, 1),
                conv2=make_base_conv(pg, cin, hidden, 1, 1),
                conv3=make_base_conv(pg, 2 * hidden, cout, 1, 1),
                m=[make_bottleneck(pg, hidden, hidden, shortcut) for _ in range(n)])


def make_spp(pg, cin, cout):
    hidden = cin // 2
    return dict(conv1=make_base_conv(pg, cin, hidden, 1, 1),
                conv2=make_base_conv(pg, hidden * 4, cout, 1, 1))


def make_cspdarknet(key, dep_mul, wid_mul):
    pg = ParamGen(key)
    bc = int(wid_mul * 64)
    bd = max(round(dep_mul * 3), 1)
    return dict(
        stem=dict(conv=make_base_conv(pg, 3 * 4, bc, 3, 1)),
        dark2=dict(conv=make_base_conv(pg, bc, bc * 2, 3, 2),
                   csp=make_csp_layer(pg, bc * 2, bc * 2, bd)),
        dark3=dict(conv=make_base_conv(pg, bc * 2, bc * 4, 3, 2),
                   csp=make_csp_layer(pg, bc * 4, bc * 4, bd * 3)),
        dark4=dict(conv=make_base_conv(pg, bc * 4, bc * 8, 3, 2),
                   csp=make_csp_layer(pg, bc * 8, bc * 8, bd * 3)),
        dark5=dict(conv=make_base_conv(pg, bc * 8, bc * 16, 3, 2),
                   spp=make_spp(pg, bc * 16, bc * 16),
                   csp=make_csp_layer(pg, bc * 16, bc * 16, bd, shortcut=False)),
    )


# ---------------------------------------------------------------------------
# Forward passes (channel-major (C, N, H, W) bf16 inside)
# ---------------------------------------------------------------------------
def bottleneck_fwd(x, p):
    y = conv_bn_silu(x, p["conv1"])
    # shortcut add fused into conv2's epilogue
    return conv_bn_silu(y, p["conv2"], residual=x if p["use_add"] else None)


def csp_fwd(x, p):
    # TODO(synk): the 1x1 conv1/conv2 pair and bottleneck chains are still
    # separate pallas_calls; full chain fusion with VMEM-resident intermediates
    # is not implemented.
    x1 = conv_bn_silu(x, p["conv1"])
    x2 = conv_bn_silu(x, p["conv2"])
    for bp in p["m"]:
        x1 = bottleneck_fwd(x1, bp)
    return conv1x1_multi_bn_silu([x1, x2], p["conv3"])   # concat-free conv3


def spp_fwd(x, p):
    x = conv_bn_silu(x, p["conv1"])
    pools = [x] + [maxpool_same(x, k) for k in (5, 9, 13)]
    return conv1x1_multi_bn_silu(pools, p["conv2"])      # concat-free conv2


def focus_fwd(x, p):
    # pixel-unshuffle: (C,N,H,W) -> (4C,N,H/2,W/2), YOLOX channel order
    tl = x[:, :, ::2, ::2]
    bl = x[:, :, 1::2, ::2]
    tr = x[:, :, ::2, 1::2]
    br = x[:, :, 1::2, 1::2]
    return conv_bn_silu(jnp.concatenate([tl, bl, tr, br], axis=0), p["conv"])


def cspdarknet_fwd(x_nchw, params, out_features=("dark3", "dark4", "dark5")):
    # internal layout: channel-major, bf16
    x = jnp.transpose(x_nchw, (1, 0, 2, 3)).astype(jnp.bfloat16)
    outputs = {}
    x = focus_fwd(x, params["stem"]); outputs["stem"] = x
    x = conv_bn_silu(x, params["dark2"]["conv"])
    x = csp_fwd(x, params["dark2"]["csp"]); outputs["dark2"] = x
    x = conv_bn_silu(x, params["dark3"]["conv"])
    x = csp_fwd(x, params["dark3"]["csp"]); outputs["dark3"] = x
    x = conv_bn_silu(x, params["dark4"]["conv"])
    x = csp_fwd(x, params["dark4"]["csp"]); outputs["dark4"] = x
    x = conv_bn_silu(x, params["dark5"]["conv"])
    x = spp_fwd(x, params["dark5"]["spp"])
    x = csp_fwd(x, params["dark5"]["csp"]); outputs["dark5"] = x
    # back to the PyTorch NCHW / float32 output convention
    return {k: jnp.transpose(v, (1, 0, 2, 3)).astype(jnp.float32)
            for k, v in outputs.items() if k in out_features}


# ---------------------------------------------------------------------------
if __name__ == "__main__":
    key = jax.random.PRNGKey(0)
    k_params, k_x = jax.random.split(key)

    # small config: wid_mul=0.125 -> base_channels=8, dep_mul=0.33 -> base_depth=1
    params = make_cspdarknet(k_params, dep_mul=0.33, wid_mul=0.125)

    # input: NCHW, batch=2, 3 channels, 64x64 (divisible by 32 for dark5)
    x = jax.random.normal(k_x, (2, 3, 64, 64), jnp.float32)

    fwd = jax.jit(lambda inp: cspdarknet_fwd(inp, params))
    outs = jax.block_until_ready(fwd(x))

    # sanity: expected output shapes (NCHW)
    assert outs["dark3"].shape == (2, 32, 8, 8)
    assert outs["dark4"].shape == (2, 64, 4, 4)
    assert outs["dark5"].shape == (2, 128, 2, 2)
    assert all(bool(jnp.all(jnp.isfinite(v))) for v in outs.values())
    print("KERNEL_OK")
</pallas_src>

<mosaic_0001>
module attributes {stable_mosaic.version = 11 : i64} {
  func.func @kernel(%arg0: i32, %arg1: memref<108x512xbf16, #tpu.memory_space<vmem>>, %arg2: memref<8x108xbf16, #tpu.memory_space<vmem>>, %arg3: memref<8x1xf32, #tpu.memory_space<vmem>>, %arg4: memref<8x512xbf16, #tpu.memory_space<vmem>>) attributes {dimension_semantics = [#tpu.dimension_semantics<parallel>], iteration_bounds = array<i64: 4>, scalar_prefetch = 0 : i64, scratch_operands = 0 : i64, tpu.core_type = #tpu.core_type<tc>, window_params = [{transform_indices = @transform_0, window_bounds = array<i64: 108, 512>}, {pipeline_mode = #tpu.pipeline_mode<synchronous>, transform_indices = @transform_1, window_bounds = array<i64: 8, 108>}, {pipeline_mode = #tpu.pipeline_mode<synchronous>, transform_indices = @transform_2, window_bounds = array<i64: 8, 1>}, {transform_indices = @transform_3, window_bounds = array<i64: 8, 512>}]} {
    %c0 = arith.constant 0 : index
    %c0_0 = arith.constant 0 : index
    %0 = vector.load %arg2[%c0, %c0_0] : memref<8x108xbf16, #tpu.memory_space<vmem>>, vector<8x108xbf16>
    %c0_1 = arith.constant 0 : index
    %c0_2 = arith.constant 0 : index
    %1 = vector.load %arg1[%c0_1, %c0_2] : memref<108x512xbf16, #tpu.memory_space<vmem>>, vector<108x512xbf16>
    %cst = arith.constant dense<0.000000e+00> : vector<8x512xf32>
    %2 = tpu.matmul %0, %1, %cst {dimension_numbers = #tpu.dot_dimension_numbers<[1], [0], [0], [1], [0, 0, 1, 1], [], []>} : vector<8x108xbf16>, vector<108x512xbf16>, vector<8x512xf32> -> vector<8x512xf32>
    %c0_3 = arith.constant 0 : index
    %c0_4 = arith.constant 0 : index
    %3 = vector.load %arg3[%c0_3, %c0_4] : memref<8x1xf32, #tpu.memory_space<vmem>>, vector<8x1xf32>
    %4 = vector.broadcast %3 : vector<8x1xf32> to vector<8x512xf32>
    %5 = arith.addf %2, %4 : vector<8x512xf32>
    %cst_5 = arith.constant 0.000000e+00 : f32
    %6 = vector.broadcast %cst_5 : f32 to vector<8x512xf32>
    %7 = arith.subf %6, %5 : vector<8x512xf32>
    %8 = math.exp %7 : vector<8x512xf32>
    %cst_6 = arith.constant 1.000000e+00 : f32
    %9 = vector.broadcast %cst_6 : f32 to vector<8x512xf32>
    %10 = arith.addf %9, %8 : vector<8x512xf32>
    %11 = tpu.reciprocal %10 {approx = true} : vector<8x512xf32> -> vector<8x512xf32>
    %12 = arith.mulf %5, %11 : vector<8x512xf32>
    %13 = arith.truncf %12 : vector<8x512xf32> to vector<8x512xbf16>
    %c0_7 = arith.constant 0 : index
    %c0_8 = arith.constant 0 : index
    %14 = vector.load %arg4[%c0_7, %c0_8] : memref<8x512xbf16, #tpu.memory_space<vmem>>, vector<8x512xbf16>
    tpu.vector_store %arg4[%c0_7, %c0_8], %13 {strides = array<i32>} : memref<8x512xbf16, #tpu.memory_space<vmem>>, vector<8x512xbf16>,
    return
  }
  func.func @transform_0(%arg0: i32) -> (i32, i32) {
    %c0_i32 = arith.constant 0 : i32
    %c0_i32_0 = arith.constant 0 : i32
    return %c0_i32, %arg0 : i32, i32
  }
  func.func @transform_1(%arg0: i32) -> (i32, i32) {
    %c0_i32 = arith.constant 0 : i32
    %c0_i32_0 = arith.constant 0 : i32
    %c0_i32_1 = arith.constant 0 : i32
    return %c0_i32, %c0_i32_0 : i32, i32
  }
  func.func @transform_2(%arg0: i32) -> (i32, i32) {
    %c0_i32 = arith.constant 0 : i32
    %c0_i32_0 = arith.constant 0 : i32
    %c0_i32_1 = arith.constant 0 : i32
    return %c0_i32, %c0_i32_0 : i32, i32
  }
  func.func @transform_3(%arg0: i32) -> (i32, i32) {
    %c0_i32 = arith.constant 0 : i32
    %c0_i32_0 = arith.constant 0 : i32
    return %c0_i32, %arg0 : i32, i32
  }
}

module attributes {stable_mosaic.version = 11 : i64} {
  func.func @kernel(%arg0: i32, %arg1: memref<72x512xbf16, #tpu.memory_space<vmem>>, %arg2: memref<16x72xbf16, #tpu.memory_space<vmem>>, %arg3: memref<16x1xf32, #tpu.memory_space<vmem>>, %arg4: memref<16x512xbf16, #tpu.memory_space<vmem>>) attributes {dimension_semantics = [#tpu.dimension_semantics<parallel>], iteration_bounds = array<i64: 1>, scalar_prefetch = 0 : i64, scratch_operands = 0 : i64, tpu.core_type = #tpu.core_type<tc>, window_params = [{transform_indices = @transform_0, window_bounds = array<i64: 72, 512>}, {pipeline_mode = #tpu.pipeline_mode<synchronous>, transform_indices = @transform_1, window_bounds = array<i64: 16, 72>}, {pipeline_mode = #tpu.pipeline_mode<synchronous>, transform_indices = @transform_2, window_bounds = array<i64: 16, 1>}, {transform_indices = @transform_3, window_bounds = array<i64: 16, 512>}]} {
    %c0 = arith.constant 0 : index
    %c0_0 = arith.constant 0 : index
    %0 = vector.load %arg2[%c0, %c0_0] : memref<16x72xbf16, #tpu.memory_space<vmem>>, vector<16x72xbf16>
    %c0_1 = arith.constant 0 : index
    %c0_2 = arith.constant 0 : index
    %1 = vector.load %arg1[%c0_1, %c0_2] : memref<72x512xbf16, #tpu.memory_space<vmem>>, vector<72x512xbf16>
    %cst = arith.constant dense<0.000000e+00> : vector<16x512xf32>
    %2 = tpu.matmul %0, %1, %cst {dimension_numbers = #tpu.dot_dimension_numbers<[1], [0], [0], [1], [0, 0, 1, 1], [], []>} : vector<16x72xbf16>, vector<72x512xbf16>, vector<16x512xf32> -> vector<16x512xf32>
    %c0_3 = arith.constant 0 : index
    %c0_4 = arith.constant 0 : index
    %3 = vector.load %arg3[%c0_3, %c0_4] : memref<16x1xf32, #tpu.memory_space<vmem>>, vector<16x1xf32>
    %4 = vector.broadcast %3 : vector<16x1xf32> to vector<16x512xf32>
    %5 = arith.addf %2, %4 : vector<16x512xf32>
    %cst_5 = arith.constant 0.000000e+00 : f32
    %6 = vector.broadcast %cst_5 : f32 to vector<16x512xf32>
    %7 = arith.subf %6, %5 : vector<16x512xf32>
    %8 = math.exp %7 : vector<16x512xf32>
    %cst_6 = arith.constant 1.000000e+00 : f32
    %9 = vector.broadcast %cst_6 : f32 to vector<16x512xf32>
    %10 = arith.addf %9, %8 : vector<16x512xf32>
    %11 = tpu.reciprocal %10 {approx = true} : vector<16x512xf32> -> vector<16x512xf32>
    %12 = arith.mulf %5, %11 : vector<16x512xf32>
    %13 = arith.truncf %12 : vector<16x512xf32> to vector<16x512xbf16>
    %c0_7 = arith.constant 0 : index
    %c0_8 = arith.constant 0 : index
    %14 = vector.load %arg4[%c0_7, %c0_8] : memref<16x512xbf16, #tpu.memory_space<vmem>>, vector<16x512xbf16>
    tpu.vector_store %arg4[%c0_7, %c0_8], %13 {strides = array<i32>} : memref<16x512xbf16, #tpu.memory_space<vmem>>, vector<16x512xbf16>,
    return
  }
  func.func @transform_0(%arg0: i32) -> (i32, i32) {
    %c0_i32 = arith.constant 0 : i32
    %c0_i32_0 = arith.constant 0 : i32
    return %c0_i32, %arg0 : i32, i32
  }
  func.func @transform_1(%arg0: i32) -> (i32, i32) {
    %c0_i32 = arith.constant 0 : i32
    %c0_i32_0 = arith.constant 0 : i32
    %c0_i32_1 = arith.constant 0 : i32
    return %c0_i32, %c0_i32_0 : i32, i32
  }
  func.func @transform_2(%arg0: i32) -> (i32, i32) {
    %c0_i32 = arith.constant 0 : i32
    %c0_i32_0 = arith.constant 0 : i32
    %c0_i32_1 = arith.constant 0 : i32
    return %c0_i32, %c0_i32_0 : i32, i32
  }
  func.func @transform_3(%arg0: i32) -> (i32, i32) {
    %c0_i32 = arith.constant 0 : i32
    %c0_i32_0 = arith.constant 0 : i32
    return %c0_i32, %arg0 : i32, i32
  }
}

module attributes {stable_mosaic.version = 11 : i64} {
  func.func @kernel(%arg0: i32, %arg1: memref<16x512xbf16, #tpu.memory_space<vmem>>, %arg2: memref<8x16xbf16, #tpu.memory_space<vmem>>, %arg3: memref<8x1xf32, #tpu.memory_space<vmem>>, %arg4: memref<8x512xbf16, #tpu.memory_space<vmem>>) attributes {dimension_semantics = [#tpu.dimension_semantics<parallel>], iteration_bounds = array<i64: 1>, scalar_prefetch = 0 : i64, scratch_operands = 0 : i64, tpu.core_type = #tpu.core_type<tc>, window_params = [{transform_indices = @transform_0, window_bounds = array<i64: 16, 512>}, {pipeline_mode = #tpu.pipeline_mode<synchronous>, transform_indices = @transform_1, window_bounds = array<i64: 8, 16>}, {pipeline_mode = #tpu.pipeline_mode<synchronous>, transform_indices = @transform_2, window_bounds = array<i64: 8, 1>}, {transform_indices = @transform_3, window_bounds = array<i64: 8, 512>}]} {
    %c0 = arith.constant 0 : index
    %c0_0 = arith.constant 0 : index
    %0 = vector.load %arg2[%c0, %c0_0] : memref<8x16xbf16, #tpu.memory_space<vmem>>, vector<8x16xbf16>
    %c0_1 = arith.constant 0 : index
    %c0_2 = arith.constant 0 : index
    %1 = vector.load %arg1[%c0_1, %c0_2] : memref<16x512xbf16, #tpu.memory_space<vmem>>, vector<16x512xbf16>
    %cst = arith.constant dense<0.000000e+00> : vector<8x512xf32>
    %2 = tpu.matmul %0, %1, %cst {dimension_numbers = #tpu.dot_dimension_numbers<[1], [0], [0], [1], [0, 0, 1, 1], [], []>} : vector<8x16xbf16>, vector<16x512xbf16>, vector<8x512xf32> -> vector<8x512xf32>
    %c0_3 = arith.constant 0 : index
    %c0_4 = arith.constant 0 : index
    %3 = vector.load %arg3[%c0_3, %c0_4] : memref<8x1xf32, #tpu.memory_space<vmem>>, vector<8x1xf32>
    %4 = vector.broadcast %3 : vector<8x1xf32> to vector<8x512xf32>
    %5 = arith.addf %2, %4 : vector<8x512xf32>
    %cst_5 = arith.constant 0.000000e+00 : f32
    %6 = vector.broadcast %cst_5 : f32 to vector<8x512xf32>
    %7 = arith.subf %6, %5 : vector<8x512xf32>
    %8 = math.exp %7 : vector<8x512xf32>
    %cst_6 = arith.constant 1.000000e+00 : f32
    %9 = vector.broadcast %cst_6 : f32 to vector<8x512xf32>
    %10 = arith.addf %9, %8 : vector<8x512xf32>
    %11 = tpu.reciprocal %10 {approx = true} : vector<8x512xf32> -> vector<8x512xf32>
    %12 = arith.mulf %5, %11 : vector<8x512xf32>
    %13 = arith.truncf %12 : vector<8x512xf32> to vector<8x512xbf16>
    %c0_7 = arith.constant 0 : index
    %c0_8 = arith.constant 0 : index
    %14 = vector.load %arg4[%c0_7, %c0_8] : memref<8x512xbf16, #tpu.memory_space<vmem>>, vector<8x512xbf16>
    tpu.vector_store %arg4[%c0_7, %c0_8], %13 {strides = array<i32>} : memref<8x512xbf16, #tpu.memory_space<vmem>>, vector<8x512xbf16>,
    return
  }
  func.func @transform_0(%arg0: i32) -> (i32, i32) {
    %c0_i32 = arith.constant 0 : i32
    %c0_i32_0 = arith.constant 0 : i32
    return %c0_i32, %arg0 : i32, i32
  }
  func.func @transform_1(%arg0: i32) -> (i32, i32) {
    %c0_i32 = arith.constant 0 : i32
    %c0_i32_0 = arith.constant 0 : i32
    %c0_i32_1 = arith.constant 0 : i32
    return %c0_i32, %c0_i32_0 : i32, i32
  }
  func.func @transform_2(%arg0: i32) -> (i32, i32) {
    %c0_i32 = arith.constant 0 : i32
    %c0_i32_0 = arith.constant 0 : i32
    %c0_i32_1 = arith.constant 0 : i32
    return %c0_i32, %c0_i32_0 : i32, i32
  }
  func.func @transform_3(%arg0: i32) -> (i32, i32) {
    %c0_i32 = arith.constant 0 : i32
    %c0_i32_0 = arith.constant 0 : i32
    return %c0_i32, %arg0 : i32, i32
  }
}

module attributes {stable_mosaic.version = 11 : i64} {
  func.func @kernel(%arg0: i32, %arg1: memref<8x512xbf16, #tpu.memory_space<vmem>>, %arg2: memref<8x8xbf16, #tpu.memory_space<vmem>>, %arg3: memref<8x1xf32, #tpu.memory_space<vmem>>, %arg4: memref<8x512xbf16, #tpu.memory_space<vmem>>) attributes {dimension_semantics = [#tpu.dimension_semantics<parallel>], iteration_bounds = array<i64: 1>, scalar_prefetch = 0 : i64, scratch_operands = 0 : i64, tpu.core_type = #tpu.core_type<tc>, window_params = [{transform_indices = @transform_0, window_bounds = array<i64: 8, 512>}, {pipeline_mode = #tpu.pipeline_mode<synchronous>, transform_indices = @transform_1, window_bounds = array<i64: 8, 8>}, {pipeline_mode = #tpu.pipeline_mode<synchronous>, transform_indices = @transform_2, window_bounds = array<i64: 8, 1>}, {transform_indices = @transform_3, window_bounds = array<i64: 8, 512>}]} {
    %c0 = arith.constant 0 : index
    %c0_0 = arith.constant 0 : index
    %0 = vector.load %arg2[%c0, %c0_0] : memref<8x8xbf16, #tpu.memory_space<vmem>>, vector<8x8xbf16>
    %c0_1 = arith.constant 0 : index
    %c0_2 = arith.constant 0 : index
    %1 = vector.load %arg1[%c0_1, %c0_2] : memref<8x512xbf16, #tpu.memory_space<vmem>>, vector<8x512xbf16>
    %cst = arith.constant dense<0.000000e+00> : vector<8x512xf32>
    %2 = tpu.matmul %0, %1, %cst {dimension_numbers = #tpu.dot_dimension_numbers<[1], [0], [0], [1], [0, 0, 1, 1], [], []>} : vector<8x8xbf16>, vector<8x512xbf16>, vector<8x512xf32> -> vector<8x512xf32>
    %c0_3 = arith.constant 0 : index
    %c0_4 = arith.constant 0 : index
    %3 = vector.load %arg3[%c0_3, %c0_4] : memref<8x1xf32, #tpu.memory_space<vmem>>, vector<8x1xf32>
    %4 = vector.broadcast %3 : vector<8x1xf32> to vector<8x512xf32>
    %5 = arith.addf %2, %4 : vector<8x512xf32>
    %cst_5 = arith.constant 0.000000e+00 : f32
    %6 = vector.broadcast %cst_5 : f32 to vector<8x512xf32>
    %7 = arith.subf %6, %5 : vector<8x512xf32>
    %8 = math.exp %7 : vector<8x512xf32>
    %cst_6 = arith.constant 1.000000e+00 : f32
    %9 = vector.broadcast %cst_6 : f32 to vector<8x512xf32>
    %10 = arith.addf %9, %8 : vector<8x512xf32>
    %11 = tpu.reciprocal %10 {approx = true} : vector<8x512xf32> -> vector<8x512xf32>
    %12 = arith.mulf %5, %11 : vector<8x512xf32>
    %13 = arith.truncf %12 : vector<8x512xf32> to vector<8x512xbf16>
    %c0_7 = arith.constant 0 : index
    %c0_8 = arith.constant 0 : index
    %14 = vector.load %arg4[%c0_7, %c0_8] : memref<8x512xbf16, #tpu.memory_space<vmem>>, vector<8x512xbf16>
    tpu.vector_store %arg4[%c0_7, %c0_8], %13 {strides = array<i32>} : memref<8x512xbf16, #tpu.memory_space<vmem>>, vector<8x512xbf16>,
    return
  }
  func.func @transform_0(%arg0: i32) -> (i32, i32) {
    %c0_i32 = arith.constant 0 : i32
    %c0_i32_0 = arith.constant 0 : i32
    return %c0_i32, %arg0 : i32, i32
  }
  func.func @transform_1(%arg0: i32) -> (i32, i32) {
    %c0_i32 = arith.constant 0 : i32
    %c0_i32_0 = arith.constant 0 : i32
    %c0_i32_1 = arith.constant 0 : i32
    return %c0_i32, %c0_i32_0 : i32, i32
  }
  func.func @transform_2(%arg0: i32) -> (i32, i32) {
    %c0_i32 = arith.constant 0 : i32
    %c0_i32_0 = arith.constant 0 : i32
    %c0_i32_1 = arith.constant 0 : i32
    return %c0_i32, %c0_i32_0 : i32, i32
  }
  func.func @transform_3(%arg0: i32) -> (i32, i32) {
    %c0_i32 = arith.constant 0 : i32
    %c0_i32_0 = arith.constant 0 : i32
    return %c0_i32, %arg0 : i32, i32
  }
}

module attributes {stable_mosaic.version = 11 : i64} {
  func.func @kernel(%arg0: i32, %arg1: memref<72x512xbf16, #tpu.memory_space<vmem>>, %arg2: memref<8x72xbf16, #tpu.memory_space<vmem>>, %arg3: memref<8x1xf32, #tpu.memory_space<vmem>>, %arg4: memref<8x512xbf16, #tpu.memory_space<vmem>>, %arg5: memref<8x512xbf16, #tpu.memory_space<vmem>>) attributes {dimension_semantics = [#tpu.dimension_semantics<parallel>], iteration_bounds = array<i64: 1>, scalar_prefetch = 0 : i64, scratch_operands = 0 : i64, tpu.core_type = #tpu.core_type<tc>, window_params = [{transform_indices = @transform_0, window_bounds = array<i64: 72, 512>}, {pipeline_mode = #tpu.pipeline_mode<synchronous>, transform_indices = @transform_1, window_bounds = array<i64: 8, 72>}, {pipeline_mode = #tpu.pipeline_mode<synchronous>, transform_indices = @transform_2, window_bounds = array<i64: 8, 1>}, {transform_indices = @transform_3, window_bounds = array<i64: 8, 512>}, {transform_indices = @transform_4, window_bounds = array<i64: 8, 512>}]} {
    %c0 = arith.constant 0 : index
    %c0_0 = arith.constant 0 : index
    %0 = vector.load %arg2[%c0, %c0_0] : memref<8x72xbf16, #tpu.memory_space<vmem>>, vector<8x72xbf16>
    %c0_1 = arith.constant 0 : index
    %c0_2 = arith.constant 0 : index
    %1 = vector.load %arg1[%c0_1, %c0_2] : memref<72x512xbf16, #tpu.memory_space<vmem>>, vector<72x512xbf16>
    %cst = arith.constant dense<0.000000e+00> : vector<8x512xf32>
    %2 = tpu.matmul %0, %1, %cst {dimension_numbers = #tpu.dot_dimension_numbers<[1], [0], [0], [1], [0, 0, 1, 1], [], []>} : vector<8x72xbf16>, vector<72x512xbf16>, vector<8x512xf32> -> vector<8x512xf32>
    %c0_3 = arith.constant 0 : index
    %c0_4 = arith.constant 0 : index
    %3 = vector.load %arg3[%c0_3, %c0_4] : memref<8x1xf32, #tpu.memory_space<vmem>>, vector<8x1xf32>
    %4 = vector.broadcast %3 : vector<8x1xf32> to vector<8x512xf32>
    %5 = arith.addf %2, %4 : vector<8x512xf32>
    %cst_5 = arith.constant 0.000000e+00 : f32
    %6 = vector.broadcast %cst_5 : f32 to vector<8x512xf32>
    %7 = arith.subf %6, %5 : vector<8x512xf32>
    %8 = math.exp %7 : vector<8x512xf32>
    %cst_6 = arith.constant 1.000000e+00 : f32
    %9 = vector.broadcast %cst_6 : f32 to vector<8x512xf32>
    %10 = arith.addf %9, %8 : vector<8x512xf32>
    %11 = tpu.reciprocal %10 {approx = true} : vector<8x512xf32> -> vector<8x512xf32>
    %12 = arith.mulf %5, %11 : vector<8x512xf32>
    %c0_7 = arith.constant 0 : index
    %c0_8 = arith.constant 0 : index
    %13 = vector.load %arg4[%c0_7, %c0_8] : memref<8x512xbf16, #tpu.memory_space<vmem>>, vector<8x512xbf16>
    %14 = arith.extf %13 : vector<8x512xbf16> to vector<8x512xf32>
    %15 = arith.addf %12, %14 : vector<8x512xf32>
    %16 = arith.truncf %15 : vector<8x512xf32> to vector<8x512xbf16>
    %c0_9 = arith.constant 0 : index
    %c0_10 = arith.constant 0 : index
    %17 = vector.load %arg5[%c0_9, %c0_10] : memref<8x512xbf16, #tpu.memory_space<vmem>>, vector<8x512xbf16>
    tpu.vector_store %arg5[%c0_9, %c0_10], %16 {strides = array<i32>} : memref<8x512xbf16, #tpu.memory_space<vmem>>, vector<8x512xbf16>,
    return
  }
  func.func @transform_0(%arg0: i32) -> (i32, i32) {
    %c0_i32 = arith.constant 0 : i32
    %c0_i32_0 = arith.constant 0 : i32
    return %c0_i32, %arg0 : i32, i32
  }
  func.func @transform_1(%arg0: i32) -> (i32, i32) {
    %c0_i32 = arith.constant 0 : i32
    %c0_i32_0 = arith.constant 0 : i32
    %c0_i32_1 = arith.constant 0 : i32
    return %c0_i32, %c0_i32_0 : i32, i32
  }
  func.func @transform_2(%arg0: i32) -> (i32, i32) {
    %c0_i32 = arith.constant 0 : i32
    %c0_i32_0 = arith.constant 0 : i32
    %c0_i32_1 = arith.constant 0 : i32
    return %c0_i32, %c0_i32_0 : i32, i32
  }
  func.func @transform_3(%arg0: i32) -> (i32, i32) {
    %c0_i32 = arith.constant 0 : i32
    %c0_i32_0 = arith.constant 0 : i32
    return %c0_i32, %arg0 : i32, i32
  }
  func.func @transform_4(%arg0: i32) -> (i32, i32) {
    %c0_i32 = arith.constant 0 : i32
    %c0_i32_0 = arith.constant 0 : i32
    return %c0_i32, %arg0 : i32, i32
  }
}

module attributes {stable_mosaic.version = 11 : i64} {
  func.func @kernel(%arg0: i32, %arg1: memref<8x512xbf16, #tpu.memory_space<vmem>>, %arg2: memref<8x512xbf16, #tpu.memory_space<vmem>>, %arg3: memref<16x8xbf16, #tpu.memory_space<vmem>>, %arg4: memref<16x8xbf16, #tpu.memory_space<vmem>>, %arg5: memref<16x1xf32, #tpu.memory_space<vmem>>, %arg6: memref<16x512xbf16, #tpu.memory_space<vmem>>) attributes {dimension_semantics = [#tpu.dimension_semantics<parallel>], iteration_bounds = array<i64: 1>, scalar_prefetch = 0 : i64, scratch_operands = 0 : i64, tpu.core_type = #tpu.core_type<tc>, window_params = [{transform_indices = @transform_0, window_bounds = array<i64: 8, 512>}, {transform_indices = @transform_1, window_bounds = array<i64: 8, 512>}, {pipeline_mode = #tpu.pipeline_mode<synchronous>, transform_indices = @transform_2, window_bounds = array<i64: 16, 8>}, {pipeline_mode = #tpu.pipeline_mode<synchronous>, transform_indices = @transform_3, window_bounds = array<i64: 16, 8>}, {pipeline_mode = #tpu.pipeline_mode<synchronous>, transform_indices = @transform_4, window_bounds = array<i64: 16, 1>}, {transform_indices = @transform_5, window_bounds = array<i64: 16, 512>}]} {
    %c0 = arith.constant 0 : index
    %c0_0 = arith.constant 0 : index
    %0 = vector.load %arg3[%c0, %c0_0] : memref<16x8xbf16, #tpu.memory_space<vmem>>, vector<16x8xbf16>
    %c0_1 = arith.constant 0 : index
    %c0_2 = arith.constant 0 : index
    %1 = vector.load %arg1[%c0_1, %c0_2] : memref<8x512xbf16, #tpu.memory_space<vmem>>, vector<8x512xbf16>
    %cst = arith.constant dense<0.000000e+00> : vector<16x512xf32>
    %2 = tpu.matmul %0, %1, %cst {dimension_numbers = #tpu.dot_dimension_numbers<[1], [0], [0], [1], [0, 0, 1, 1], [], []>} : vector<16x8xbf16>, vector<8x512xbf16>, vector<16x512xf32> -> vector<16x512xf32>
    %c0_3 = arith.constant 0 : index
    %c0_4 = arith.constant 0 : index
    %3 = vector.load %arg4[%c0_3, %c0_4] : memref<16x8xbf16, #tpu.memory_space<vmem>>, vector<16x8xbf16>
    %c0_5 = arith.constant 0 : index
    %c0_6 = arith.constant 0 : index
    %4 = vector.load %arg2[%c0_5, %c0_6] : memref<8x512xbf16, #tpu.memory_space<vmem>>, vector<8x512xbf16>
    %cst_7 = arith.constant dense<0.000000e+00> : vector<16x512xf32>
    %5 = tpu.matmul %3, %4, %cst_7 {dimension_numbers = #tpu.dot_dimension_numbers<[1], [0], [0], [1], [0, 0, 1, 1], [], []>} : vector<16x8xbf16>, vector<8x512xbf16>, vector<16x512xf32> -> vector<16x512xf32>
    %6 = arith.addf %2, %5 : vector<16x512xf32>
    %c0_8 = arith.constant 0 : index
    %c0_9 = arith.constant 0 : index
    %7 = vector.load %arg5[%c0_8, %c0_9] : memref<16x1xf32, #tpu.memory_space<vmem>>, vector<16x1xf32>
    %8 = vector.broadcast %7 : vector<16x1xf32> to vector<16x512xf32>
    %9 = arith.addf %6, %8 : vector<16x512xf32>
    %cst_10 = arith.constant 0.000000e+00 : f32
    %10 = vector.broadcast %cst_10 : f32 to vector<16x512xf32>
    %11 = arith.subf %10, %9 : vector<16x512xf32>
    %12 = math.exp %11 : vector<16x512xf32>
    %cst_11 = arith.constant 1.000000e+00 : f32
    %13 = vector.broadcast %cst_11 : f32 to vector<16x512xf32>
    %14 = arith.addf %13, %12 : vector<16x512xf32>
    %15 = tpu.reciprocal %14 {approx = true} : vector<16x512xf32> -> vector<16x512xf32>
    %16 = arith.mulf %9, %15 : vector<16x512xf32>
    %17 = arith.truncf %16 : vector<16x512xf32> to vector<16x512xbf16>
    %c0_12 = arith.constant 0 : index
    %c0_13 = arith.constant 0 : index
    %18 = vector.load %arg6[%c0_12, %c0_13] : memref<16x512xbf16, #tpu.memory_space<vmem>>, vector<16x512xbf16>
    tpu.vector_store %arg6[%c0_12, %c0_13], %17 {strides = array<i32>} : memref<16x512xbf16, #tpu.memory_space<vmem>>, vector<16x512xbf16>,
    return
  }
  func.func @transform_0(%arg0: i32) -> (i32, i32) {
    %c0_i32 = arith.constant 0 : i32
    %c0_i32_0 = arith.constant 0 : i32
    return %c0_i32, %arg0 : i32, i32
  }
  func.func @transform_1(%arg0: i32) -> (i32, i32) {
    %c0_i32 = arith.constant 0 : i32
    %c0_i32_0 = arith.constant 0 : i32
    return %c0_i32, %arg0 : i32, i32
  }
  func.func @transform_2(%arg0: i32) -> (i32, i32) {
    %c0_i32 = arith.constant 0 : i32
    %c0_i32_0 = arith.constant 0 : i32
    %c0_i32_1 = arith.constant 0 : i32
    return %c0_i32, %c0_i32_0 : i32, i32
  }
  func.func @transform_3(%arg0: i32) -> (i32, i32) {
    %c0_i32 = arith.constant 0 : i32
    %c0_i32_0 = arith.constant 0 : i32
    %c0_i32_1 = arith.constant 0 : i32
    return %c0_i32, %c0_i32_0 : i32, i32
  }
  func.func @transform_4(%arg0: i32) -> (i32, i32) {
    %c0_i32 = arith.constant 0 : i32
    %c0_i32_0 = arith.constant 0 : i32
    %c0_i32_1 = arith.constant 0 : i32
    return %c0_i32, %c0_i32_0 : i32, i32
  }
  func.func @transform_5(%arg0: i32) -> (i32, i32) {
    %c0_i32 = arith.constant 0 : i32
    %c0_i32_0 = arith.constant 0 : i32
    return %c0_i32, %arg0 : i32, i32
  }
}

module attributes {stable_mosaic.version = 11 : i64} {
  func.func @kernel(%arg0: i32, %arg1: memref<16x128xbf16, #tpu.memory_space<vmem>>, %arg2: memref<16x16xbf16, #tpu.memory_space<vmem>>, %arg3: memref<16x1xf32, #tpu.memory_space<vmem>>, %arg4: memref<16x128xbf16, #tpu.memory_space<vmem>>) attributes {dimension_semantics = [#tpu.dimension_semantics<parallel>], iteration_bounds = array<i64: 1>, scalar_prefetch = 0 : i64, scratch_operands = 0 : i64, tpu.core_type = #tpu.core_type<tc>, window_params = [{transform_indices = @transform_0, window_bounds = array<i64: 16, 128>}, {pipeline_mode = #tpu.pipeline_mode<synchronous>, transform_indices = @transform_1, window_bounds = array<i64: 16, 16>}, {pipeline_mode = #tpu.pipeline_mode<synchronous>, transform_indices = @transform_2, window_bounds = array<i64: 16, 1>}, {transform_indices = @transform_3, window_bounds = array<i64: 16, 128>}]} {
    %c0 = arith.constant 0 : index
    %c0_0 = arith.constant 0 : index
    %0 = vector.load %arg2[%c0, %c0_0] : memref<16x16xbf16, #tpu.memory_space<vmem>>, vector<16x16xbf16>
    %c0_1 = arith.constant 0 : index
    %c0_2 = arith.constant 0 : index
    %1 = vector.load %arg1[%c0_1, %c0_2] : memref<16x128xbf16, #tpu.memory_space<vmem>>, vector<16x128xbf16>
    %cst = arith.constant dense<0.000000e+00> : vector<16x128xf32>
    %2 = tpu.matmul %0, %1, %cst {dimension_numbers = #tpu.dot_dimension_numbers<[1], [0], [0], [1], [0, 0, 1, 1], [], []>} : vector<16x16xbf16>, vector<16x128xbf16>, vector<16x128xf32> -> vector<16x128xf32>
    %c0_3 = arith.constant 0 : index
    %c0_4 = arith.constant 0 : index
    %3 = vector.load %arg3[%c0_3, %c0_4] : memref<16x1xf32, #tpu.memory_space<vmem>>, vector<16x1xf32>
    %4 = vector.broadcast %3 : vector<16x1xf32> to vector<16x128xf32>
    %5 = arith.addf %2, %4 : vector<16x128xf32>
    %cst_5 = arith.constant 0.000000e+00 : f32
    %6 = vector.broadcast %cst_5 : f32 to vector<16x128xf32>
    %7 = arith.subf %6, %5 : vector<16x128xf32>
    %8 = math.exp %7 : vector<16x128xf32>
    %cst_6 = arith.constant 1.000000e+00 : f32
    %9 = vector.broadcast %cst_6 : f32 to vector<16x128xf32>
    %10 = arith.addf %9, %8 : vector<16x128xf32>
    %11 = tpu.reciprocal %10 {approx = true} : vector<16x128xf32> -> vector<16x128xf32>
    %12 = arith.mulf %5, %11 : vector<16x128xf32>
    %13 = arith.truncf %12 : vector<16x128xf32> to vector<16x128xbf16>
    %c0_7 = arith.constant 0 : index
    %c0_8 = arith.constant 0 : index
    %14 = vector.load %arg4[%c0_7, %c0_8] : memref<16x128xbf16, #tpu.memory_space<vmem>>, vector<16x128xbf16>
    tpu.vector_store %arg4[%c0_7, %c0_8], %13 {strides = array<i32>} : memref<16x128xbf16, #tpu.memory_space<vmem>>, vector<16x128xbf16>,
    return
  }
  func.func @transform_0(%arg0: i32) -> (i32, i32) {
    %c0_i32 = arith.constant 0 : i32
    %c0_i32_0 = arith.constant 0 : i32
    return %c0_i32, %arg0 : i32, i32
  }
  func.func @transform_1(%arg0: i32) -> (i32, i32) {
    %c0_i32 = arith.constant 0 : i32
    %c0_i32_0 = arith.constant 0 : i32
    %c0_i32_1 = arith.constant 0 : i32
    return %c0_i32, %c0_i32_0 : i32, i32
  }
  func.func @transform_2(%arg0: i32) -> (i32, i32) {
    %c0_i32 = arith.constant 0 : i32
    %c0_i32_0 = arith.constant 0 : i32
    %c0_i32_1 = arith.constant 0 : i32
    return %c0_i32, %c0_i32_0 : i32, i32
  }
  func.func @transform_3(%arg0: i32) -> (i32, i32) {
    %c0_i32 = arith.constant 0 : i32
    %c0_i32_0 = arith.constant 0 : i32
    return %c0_i32, %arg0 : i32, i32
  }
}

module attributes {stable_mosaic.version = 11 : i64} {
  func.func @kernel(%arg0: i32, %arg1: memref<32x128xbf16, #tpu.memory_space<vmem>>, %arg2: memref<16x32xbf16, #tpu.memory_space<vmem>>, %arg3: memref<16x1xf32, #tpu.memory_space<vmem>>, %arg4: memref<16x128xbf16, #tpu.memory_space<vmem>>) attributes {dimension_semantics = [#tpu.dimension_semantics<parallel>], iteration_bounds = array<i64: 1>, scalar_prefetch = 0 : i64, scratch_operands = 0 : i64, tpu.core_type = #tpu.core_type<tc>, window_params = [{transform_indices = @transform_0, window_bounds = array<i64: 32, 128>}, {pipeline_mode = #tpu.pipeline_mode<synchronous>, transform_indices = @transform_1, window_bounds = array<i64: 16, 32>}, {pipeline_mode = #tpu.pipeline_mode<synchronous>, transform_indices = @transform_2, window_bounds = array<i64: 16, 1>}, {transform_indices = @transform_3, window_bounds = array<i64: 16, 128>}]} {
    %c0 = arith.constant 0 : index
    %c0_0 = arith.constant 0 : index
    %0 = vector.load %arg2[%c0, %c0_0] : memref<16x32xbf16, #tpu.memory_space<vmem>>, vector<16x32xbf16>
    %c0_1 = arith.constant 0 : index
    %c0_2 = arith.constant 0 : index
    %1 = vector.load %arg1[%c0_1, %c0_2] : memref<32x128xbf16, #tpu.memory_space<vmem>>, vector<32x128xbf16>
    %cst = arith.constant dense<0.000000e+00> : vector<16x128xf32>
    %2 = tpu.matmul %0, %1, %cst {dimension_numbers = #tpu.dot_dimension_numbers<[1], [0], [0], [1], [0, 0, 1, 1], [], []>} : vector<16x32xbf16>, vector<32x128xbf16>, vector<16x128xf32> -> vector<16x128xf32>
    %c0_3 = arith.constant 0 : index
    %c0_4 = arith.constant 0 : index
    %3 = vector.load %arg3[%c0_3, %c0_4] : memref<16x1xf32, #tpu.memory_space<vmem>>, vector<16x1xf32>
    %4 = vector.broadcast %3 : vector<16x1xf32> to vector<16x128xf32>
    %5 = arith.addf %2, %4 : vector<16x128xf32>
    %cst_5 = arith.constant 0.000000e+00 : f32
    %6 = vector.broadcast %cst_5 : f32 to vector<16x128xf32>
    %7 = arith.subf %6, %5 : vector<16x128xf32>
    %8 = math.exp %7 : vector<16x128xf32>
    %cst_6 = arith.constant 1.000000e+00 : f32
    %9 = vector.broadcast %cst_6 : f32 to vector<16x128xf32>
    %10 = arith.addf %9, %8 : vector<16x128xf32>
    %11 = tpu.reciprocal %10 {approx = true} : vector<16x128xf32> -> vector<16x128xf32>
    %12 = arith.mulf %5, %11 : vector<16x128xf32>
    %13 = arith.truncf %12 : vector<16x128xf32> to vector<16x128xbf16>
    %c0_7 = arith.constant 0 : index
    %c0_8 = arith.constant 0 : index
    %14 = vector.load %arg4[%c0_7, %c0_8] : memref<16x128xbf16, #tpu.memory_space<vmem>>, vector<16x128xbf16>
    tpu.vector_store %arg4[%c0_7, %c0_8], %13 {strides = array<i32>} : memref<16x128xbf16, #tpu.memory_space<vmem>>, vector<16x128xbf16>,
    return
  }
  func.func @transform_0(%arg0: i32) -> (i32, i32) {
    %c0_i32 = arith.constant 0 : i32
    %c0_i32_0 = arith.constant 0 : i32
    return %c0_i32, %arg0 : i32, i32
  }
  func.func @transform_1(%arg0: i32) -> (i32, i32) {
    %c0_i32 = arith.constant 0 : i32
    %c0_i32_0 = arith.constant 0 : i32
    %c0_i32_1 = arith.constant 0 : i32
    return %c0_i32, %c0_i32_0 : i32, i32
  }
  func.func @transform_2(%arg0: i32) -> (i32, i32) {
    %c0_i32 = arith.constant 0 : i32
    %c0_i32_0 = arith.constant 0 : i32
    %c0_i32_1 = arith.constant 0 : i32
    return %c0_i32, %c0_i32_0 : i32, i32
  }
  func.func @transform_3(%arg0: i32) -> (i32, i32) {
    %c0_i32 = arith.constant 0 : i32
    %c0_i32_0 = arith.constant 0 : i32
    return %c0_i32, %arg0 : i32, i32
  }
}

module attributes {stable_mosaic.version = 11 : i64} {
  func.func @kernel(%arg0: i32, %arg1: memref<144x128xbf16, #tpu.memory_space<vmem>>, %arg2: memref<32x144xbf16, #tpu.memory_space<vmem>>, %arg3: memref<32x1xf32, #tpu.memory_space<vmem>>, %arg4: memref<32x128xbf16, #tpu.memory_space<vmem>>) attributes {dimension_semantics = [#tpu.dimension_semantics<parallel>], iteration_bounds = array<i64: 1>, scalar_prefetch = 0 : i64, scratch_operands = 0 : i64, tpu.core_type = #tpu.core_type<tc>, window_params = [{transform_indices = @transform_0, window_bounds = array<i64: 144, 128>}, {pipeline_mode = #tpu.pipeline_mode<synchronous>, transform_indices = @transform_1, window_bounds = array<i64: 32, 144>}, {pipeline_mode = #tpu.pipeline_mode<synchronous>, transform_indices = @transform_2, window_bounds = array<i64: 32, 1>}, {transform_indices = @transform_3, window_bounds = array<i64: 32, 128>}]} {
    %c0 = arith.constant 0 : index
    %c0_0 = arith.constant 0 : index
    %0 = vector.load %arg2[%c0, %c0_0] : memref<32x144xbf16, #tpu.memory_space<vmem>>, vector<32x144xbf16>
    %c0_1 = arith.constant 0 : index
    %c0_2 = arith.constant 0 : index
    %1 = vector.load %arg1[%c0_1, %c0_2] : memref<144x128xbf16, #tpu.memory_space<vmem>>, vector<144x128xbf16>
    %cst = arith.constant dense<0.000000e+00> : vector<32x128xf32>
    %2 = tpu.matmul %0, %1, %cst {dimension_numbers = #tpu.dot_dimension_numbers<[1], [0], [0], [1], [0, 0, 1, 1], [], []>} : vector<32x144xbf16>, vector<144x128xbf16>, vector<32x128xf32> -> vector<32x128xf32>
    %c0_3 = arith.constant 0 : index
    %c0_4 = arith.constant 0 : index
    %3 = vector.load %arg3[%c0_3, %c0_4] : memref<32x1xf32, #tpu.memory_space<vmem>>, vector<32x1xf32>
    %4 = vector.broadcast %3 : vector<32x1xf32> to vector<32x128xf32>
    %5 = arith.addf %2, %4 : vector<32x128xf32>
    %cst_5 = arith.constant 0.000000e+00 : f32
    %6 = vector.broadcast %cst_5 : f32 to vector<32x128xf32>
    %7 = arith.subf %6, %5 : vector<32x128xf32>
    %8 = math.exp %7 : vector<32x128xf32>
    %cst_6 = arith.constant 1.000000e+00 : f32
    %9 = vector.broadcast %cst_6 : f32 to vector<32x128xf32>
    %10 = arith.addf %9, %8 : vector<32x128xf32>
    %11 = tpu.reciprocal %10 {approx = true} : vector<32x128xf32> -> vector<32x128xf32>
    %12 = arith.mulf %5, %11 : vector<32x128xf32>
    %13 = arith.truncf %12 : vector<32x128xf32> to vector<32x128xbf16>
    %c0_7 = arith.constant 0 : index
    %c0_8 = arith.constant 0 : index
    %14 = vector.load %arg4[%c0_7, %c0_8] : memref<32x128xbf16, #tpu.memory_space<vmem>>, vector<32x128xbf16>
    tpu.vector_store %arg4[%c0_7, %c0_8], %13 {strides = array<i32>} : memref<32x128xbf16, #tpu.memory_space<vmem>>, vector<32x128xbf16>,
    return
  }
  func.func @transform_0(%arg0: i32) -> (i32, i32) {
    %c0_i32 = arith.constant 0 : i32
    %c0_i32_0 = arith.constant 0 : i32
    return %c0_i32, %arg0 : i32, i32
  }
  func.func @transform_1(%arg0: i32) -> (i32, i32) {
    %c0_i32 = arith.constant 0 : i32
    %c0_i32_0 = arith.constant 0 : i32
    %c0_i32_1 = arith.constant 0 : i32
    return %c0_i32, %c0_i32_0 : i32, i32
  }
  func.func @transform_2(%arg0: i32) -> (i32, i32) {
    %c0_i32 = arith.constant 0 : i32
    %c0_i32_0 = arith.constant 0 : i32
    %c0_i32_1 = arith.constant 0 : i32
    return %c0_i32, %c0_i32_0 : i32, i32
  }
  func.func @transform_3(%arg0: i32) -> (i32, i32) {
    %c0_i32 = arith.constant 0 : i32
    %c0_i32_0 = arith.constant 0 : i32
    return %c0_i32, %arg0 : i32, i32
  }
}

module attributes {stable_mosaic.version = 11 : i64} {
  func.func @kernel(%arg0: i32, %arg1: memref<16x128xbf16, #tpu.memory_space<vmem>>, %arg2: memref<16x128xbf16, #tpu.memory_space<vmem>>, %arg3: memref<32x16xbf16, #tpu.memory_space<vmem>>, %arg4: memref<32x16xbf16, #tpu.memory_space<vmem>>, %arg5: memref<32x1xf32, #tpu.memory_space<vmem>>, %arg6: memref<32x128xbf16, #tpu.memory_space<vmem>>) attributes {dimension_semantics = [#tpu.dimension_semantics<parallel>], iteration_bounds = array<i64: 1>, scalar_prefetch = 0 : i64, scratch_operands = 0 : i64, tpu.core_type = #tpu.core_type<tc>, window_params = [{transform_indices = @transform_0, window_bounds = array<i64: 16, 128>}, {transform_indices = @transform_1, window_bounds = array<i64: 16, 128>}, {pipeline_mode = #tpu.pipeline_mode<synchronous>, transform_indices = @transform_2, window_bounds = array<i64: 32, 16>}, {pipeline_mode = #tpu.pipeline_mode<synchronous>, transform_indices = @transform_3, window_bounds = array<i64: 32, 16>}, {pipeline_mode = #tpu.pipeline_mode<synchronous>, transform_indices = @transform_4, window_bounds = array<i64: 32, 1>}, {transform_indices = @transform_5, window_bounds = array<i64: 32, 128>}]} {
    %c0 = arith.constant 0 : index
    %c0_0 = arith.constant 0 : index
    %0 = vector.load %arg3[%c0, %c0_0] : memref<32x16xbf16, #tpu.memory_space<vmem>>, vector<32x16xbf16>
    %c0_1 = arith.constant 0 : index
    %c0_2 = arith.constant 0 : index
    %1 = vector.load %arg1[%c0_1, %c0_2] : memref<16x128xbf16, #tpu.memory_space<vmem>>, vector<16x128xbf16>
    %cst = arith.constant dense<0.000000e+00> : vector<32x128xf32>
    %2 = tpu.matmul %0, %1, %cst {dimension_numbers = #tpu.dot_dimension_numbers<[1], [0], [0], [1], [0, 0, 1, 1], [], []>} : vector<32x16xbf16>, vector<16x128xbf16>, vector<32x128xf32> -> vector<32x128xf32>
    %c0_3 = arith.constant 0 : index
    %c0_4 = arith.constant 0 : index
    %3 = vector.load %arg4[%c0_3, %c0_4] : memref<32x16xbf16, #tpu.memory_space<vmem>>, vector<32x16xbf16>
    %c0_5 = arith.constant 0 : index
    %c0_6 = arith.constant 0 : index
    %4 = vector.load %arg2[%c0_5, %c0_6] : memref<16x128xbf16, #tpu.memory_space<vmem>>, vector<16x128xbf16>
    %cst_7 = arith.constant dense<0.000000e+00> : vector<32x128xf32>
    %5 = tpu.matmul %3, %4, %cst_7 {dimension_numbers = #tpu.dot_dimension_numbers<[1], [0], [0], [1], [0, 0, 1, 1], [], []>} : vector<32x16xbf16>, vector<16x128xbf16>, vector<32x128xf32> -> vector<32x128xf32>
    %6 = arith.addf %2, %5 : vector<32x128xf32>
    %c0_8 = arith.constant 0 : index
    %c0_9 = arith.constant 0 : index
    %7 = vector.load %arg5[%c0_8, %c0_9] : memref<32x1xf32, #tpu.memory_space<vmem>>, vector<32x1xf32>
    %8 = vector.broadcast %7 : vector<32x1xf32> to vector<32x128xf32>
    %9 = arith.addf %6, %8 : vector<32x128xf32>
    %cst_10 = arith.constant 0.000000e+00 : f32
    %10 = vector.broadcast %cst_10 : f32 to vector<32x128xf32>
    %11 = arith.subf %10, %9 : vector<32x128xf32>
    %12 = math.exp %11 : vector<32x128xf32>
    %cst_11 = arith.constant 1.000000e+00 : f32
    %13 = vector.broadcast %cst_11 : f32 to vector<32x128xf32>
    %14 = arith.addf %13, %12 : vector<32x128xf32>
    %15 = tpu.reciprocal %14 {approx = true} : vector<32x128xf32> -> vector<32x128xf32>
    %16 = arith.mulf %9, %15 : vector<32x128xf32>
    %17 = arith.truncf %16 : vector<32x128xf32> to vector<32x128xbf16>
    %c0_12 = arith.constant 0 : index
    %c0_13 = arith.constant 0 : index
    %18 = vector.load %arg6[%c0_12, %c0_13] : memref<32x128xbf16, #tpu.memory_space<vmem>>, vector<32x128xbf16>
    tpu.vector_store %arg6[%c0_12, %c0_13], %17 {strides = array<i32>} : memref<32x128xbf16, #tpu.memory_space<vmem>>, vector<32x128xbf16>,
    return
  }
  func.func @transform_0(%arg0: i32) -> (i32, i32) {
    %c0_i32 = arith.constant 0 : i32
    %c0_i32_0 = arith.constant 0 : i32
    return %c0_i32, %arg0 : i32, i32
  }
  func.func @transform_1(%arg0: i32) -> (i32, i32) {
    %c0_i32 = arith.constant 0 : i32
    %c0_i32_0 = arith.constant 0 : i32
    return %c0_i32, %arg0 : i32, i32
  }
  func.func @transform_2(%arg0: i32) -> (i32, i32) {
    %c0_i32 = arith.constant 0 : i32
    %c0_i32_0 = arith.constant 0 : i32
    %c0_i32_1 = arith.constant 0 : i32
    return %c0_i32, %c0_i32_0 : i32, i32
  }
  func.func @transform_3(%arg0: i32) -> (i32, i32) {
    %c0_i32 = arith.constant 0 : i32
    %c0_i32_0 = arith.constant 0 : i32
    %c0_i32_1 = arith.constant 0 : i32
    return %c0_i32, %c0_i32_0 : i32, i32
  }
  func.func @transform_4(%arg0: i32) -> (i32, i32) {
    %c0_i32 = arith.constant 0 : i32
    %c0_i32_0 = arith.constant 0 : i32
    %c0_i32_1 = arith.constant 0 : i32
    return %c0_i32, %c0_i32_0 : i32, i32
  }
  func.func @transform_5(%arg0: i32) -> (i32, i32) {
    %c0_i32 = arith.constant 0 : i32
    %c0_i32_0 = arith.constant 0 : i32
    return %c0_i32, %arg0 : i32, i32
  }
}

module attributes {stable_mosaic.version = 11 : i64} {
  func.func @kernel(%arg0: i32, %arg1: memref<144x128xbf16, #tpu.memory_space<vmem>>, %arg2: memref<16x144xbf16, #tpu.memory_space<vmem>>, %arg3: memref<16x1xf32, #tpu.memory_space<vmem>>, %arg4: memref<16x128xbf16, #tpu.memory_space<vmem>>, %arg5: memref<16x128xbf16, #tpu.memory_space<vmem>>) attributes {dimension_semantics = [#tpu.dimension_semantics<parallel>], iteration_bounds = array<i64: 1>, scalar_prefetch = 0 : i64, scratch_operands = 0 : i64, tpu.core_type = #tpu.core_type<tc>, window_params = [{transform_indices = @transform_0, window_bounds = array<i64: 144, 128>}, {pipeline_mode = #tpu.pipeline_mode<synchronous>, transform_indices = @transform_1, window_bounds = array<i64: 16, 144>}, {pipeline_mode = #tpu.pipeline_mode<synchronous>, transform_indices = @transform_2, window_bounds = array<i64: 16, 1>}, {transform_indices = @transform_3, window_bounds = array<i64: 16, 128>}, {transform_indices = @transform_4, window_bounds = array<i64: 16, 128>}]} {
    %c0 = arith.constant 0 : index
    %c0_0 = arith.constant 0 : index
    %0 = vector.load %arg2[%c0, %c0_0] : memref<16x144xbf16, #tpu.memory_space<vmem>>, vector<16x144xbf16>
    %c0_1 = arith.constant 0 : index
    %c0_2 = arith.constant 0 : index
    %1 = vector.load %arg1[%c0_1, %c0_2] : memref<144x128xbf16, #tpu.memory_space<vmem>>, vector<144x128xbf16>
    %cst = arith.constant dense<0.000000e+00> : vector<16x128xf32>
    %2 = tpu.matmul %0, %1, %cst {dimension_numbers = #tpu.dot_dimension_numbers<[1], [0], [0], [1], [0, 0, 1, 1], [], []>} : vector<16x144xbf16>, vector<144x128xbf16>, vector<16x128xf32> -> vector<16x128xf32>
    %c0_3 = arith.constant 0 : index
    %c0_4 = arith.constant 0 : index
    %3 = vector.load %arg3[%c0_3, %c0_4] : memref<16x1xf32, #tpu.memory_space<vmem>>, vector<16x1xf32>
    %4 = vector.broadcast %3 : vector<16x1xf32> to vector<16x128xf32>
    %5 = arith.addf %2, %4 : vector<16x128xf32>
    %cst_5 = arith.constant 0.000000e+00 : f32
    %6 = vector.broadcast %cst_5 : f32 to vector<16x128xf32>
    %7 = arith.subf %6, %5 : vector<16x128xf32>
    %8 = math.exp %7 : vector<16x128xf32>
    %cst_6 = arith.constant 1.000000e+00 : f32
    %9 = vector.broadcast %cst_6 : f32 to vector<16x128xf32>
    %10 = arith.addf %9, %8 : vector<16x128xf32>
    %11 = tpu.reciprocal %10 {approx = true} : vector<16x128xf32> -> vector<16x128xf32>
    %12 = arith.mulf %5, %11 : vector<16x128xf32>
    %c0_7 = arith.constant 0 : index
    %c0_8 = arith.constant 0 : index
    %13 = vector.load %arg4[%c0_7, %c0_8] : memref<16x128xbf16, #tpu.memory_space<vmem>>, vector<16x128xbf16>
    %14 = arith.extf %13 : vector<16x128xbf16> to vector<16x128xf32>
    %15 = arith.addf %12, %14 : vector<16x128xf32>
    %16 = arith.truncf %15 : vector<16x128xf32> to vector<16x128xbf16>
    %c0_9 = arith.constant 0 : index
    %c0_10 = arith.constant 0 : index
    %17 = vector.load %arg5[%c0_9, %c0_10] : memref<16x128xbf16, #tpu.memory_space<vmem>>, vector<16x128xbf16>
    tpu.vector_store %arg5[%c0_9, %c0_10], %16 {strides = array<i32>} : memref<16x128xbf16, #tpu.memory_space<vmem>>, vector<16x128xbf16>,
    return
  }
  func.func @transform_0(%arg0: i32) -> (i32, i32) {
    %c0_i32 = arith.constant 0 : i32
    %c0_i32_0 = arith.constant 0 : i32
    return %c0_i32, %arg0 : i32, i32
  }
  func.func @transform_1(%arg0: i32) -> (i32, i32) {
    %c0_i32 = arith.constant 0 : i32
    %c0_i32_0 = arith.constant 0 : i32
    %c0_i32_1 = arith.constant 0 : i32
    return %c0_i32, %c0_i32_0 : i32, i32
  }
  func.func @transform_2(%arg0: i32) -> (i32, i32) {
    %c0_i32 = arith.constant 0 : i32
    %c0_i32_0 = arith.constant 0 : i32
    %c0_i32_1 = arith.constant 0 : i32
    return %c0_i32, %c0_i32_0 : i32, i32
  }
  func.func @transform_3(%arg0: i32) -> (i32, i32) {
    %c0_i32 = arith.constant 0 : i32
    %c0_i32_0 = arith.constant 0 : i32
    return %c0_i32, %arg0 : i32, i32
  }
  func.func @transform_4(%arg0: i32) -> (i32, i32) {
    %c0_i32 = arith.constant 0 : i32
    %c0_i32_0 = arith.constant 0 : i32
    return %c0_i32, %arg0 : i32, i32
  }
}

module attributes {stable_mosaic.version = 11 : i64} {
  func.func @kernel(%arg0: i32, %arg1: memref<64x128xbf16, #tpu.memory_space<vmem>>, %arg2: memref<32x64xbf16, #tpu.memory_space<vmem>>, %arg3: memref<32x1xf32, #tpu.memory_space<vmem>>, %arg4: memref<32x128xbf16, #tpu.memory_space<vmem>>) attributes {dimension_semantics = [#tpu.dimension_semantics<parallel>], iteration_bounds = array<i64: 1>, scalar_prefetch = 0 : i64, scratch_operands = 0 : i64, tpu.core_type = #tpu.core_type<tc>, window_params = [{transform_indices = @transform_0, window_bounds = array<i64: 64, 128>}, {pipeline_mode = #tpu.pipeline_mode<synchronous>, transform_indices = @transform_1, window_bounds = array<i64: 32, 64>}, {pipeline_mode = #tpu.pipeline_mode<synchronous>, transform_indices = @transform_2, window_bounds = array<i64: 32, 1>}, {transform_indices = @transform_3, window_bounds = array<i64: 32, 128>}]} {
    %c0 = arith.constant 0 : index
    %c0_0 = arith.constant 0 : index
    %0 = vector.load %arg2[%c0, %c0_0] : memref<32x64xbf16, #tpu.memory_space<vmem>>, vector<32x64xbf16>
    %c0_1 = arith.constant 0 : index
    %c0_2 = arith.constant 0 : index
    %1 = vector.load %arg1[%c0_1, %c0_2] : memref<64x128xbf16, #tpu.memory_space<vmem>>, vector<64x128xbf16>
    %cst = arith.constant dense<0.000000e+00> : vector<32x128xf32>
    %2 = tpu.matmul %0, %1, %cst {dimension_numbers = #tpu.dot_dimension_numbers<[1], [0], [0], [1], [0, 0, 1, 1], [], []>} : vector<32x64xbf16>, vector<64x128xbf16>, vector<32x128xf32> -> vector<32x128xf32>
    %c0_3 = arith.constant 0 : index
    %c0_4 = arith.constant 0 : index
    %3 = vector.load %arg3[%c0_3, %c0_4] : memref<32x1xf32, #tpu.memory_space<vmem>>, vector<32x1xf32>
    %4 = vector.broadcast %3 : vector<32x1xf32> to vector<32x128xf32>
    %5 = arith.addf %2, %4 : vector<32x128xf32>
    %cst_5 = arith.constant 0.000000e+00 : f32
    %6 = vector.broadcast %cst_5 : f32 to vector<32x128xf32>
    %7 = arith.subf %6, %5 : vector<32x128xf32>
    %8 = math.exp %7 : vector<32x128xf32>
    %cst_6 = arith.constant 1.000000e+00 : f32
    %9 = vector.broadcast %cst_6 : f32 to vector<32x128xf32>
    %10 = arith.addf %9, %8 : vector<32x128xf32>
    %11 = tpu.reciprocal %10 {approx = true} : vector<32x128xf32> -> vector<32x128xf32>
    %12 = arith.mulf %5, %11 : vector<32x128xf32>
    %13 = arith.truncf %12 : vector<32x128xf32> to vector<32x128xbf16>
    %c0_7 = arith.constant 0 : index
    %c0_8 = arith.constant 0 : index
    %14 = vector.load %arg4[%c0_7, %c0_8] : memref<32x128xbf16, #tpu.memory_space<vmem>>, vector<32x128xbf16>
    tpu.vector_store %arg4[%c0_7, %c0_8], %13 {strides = array<i32>} : memref<32x128xbf16, #tpu.memory_space<vmem>>, vector<32x128xbf16>,
    return
  }
  func.func @transform_0(%arg0: i32) -> (i32, i32) {
    %c0_i32 = arith.constant 0 : i32
    %c0_i32_0 = arith.constant 0 : i32
    return %c0_i32, %arg0 : i32, i32
  }
  func.func @transform_1(%arg0: i32) -> (i32, i32) {
    %c0_i32 = arith.constant 0 : i32
    %c0_i32_0 = arith.constant 0 : i32
    %c0_i32_1 = arith.constant 0 : i32
    return %c0_i32, %c0_i32_0 : i32, i32
  }
  func.func @transform_2(%arg0: i32) -> (i32, i32) {
    %c0_i32 = arith.constant 0 : i32
    %c0_i32_0 = arith.constant 0 : i32
    %c0_i32_1 = arith.constant 0 : i32
    return %c0_i32, %c0_i32_0 : i32, i32
  }
  func.func @transform_3(%arg0: i32) -> (i32, i32) {
    %c0_i32 = arith.constant 0 : i32
    %c0_i32_0 = arith.constant 0 : i32
    return %c0_i32, %arg0 : i32, i32
  }
}

module attributes {stable_mosaic.version = 11 : i64} {
  func.func @kernel(%arg0: i32, %arg1: memref<32x128xbf16, #tpu.memory_space<vmem>>, %arg2: memref<32x32xbf16, #tpu.memory_space<vmem>>, %arg3: memref<32x1xf32, #tpu.memory_space<vmem>>, %arg4: memref<32x128xbf16, #tpu.memory_space<vmem>>) attributes {dimension_semantics = [#tpu.dimension_semantics<parallel>], iteration_bounds = array<i64: 1>, scalar_prefetch = 0 : i64, scratch_operands = 0 : i64, tpu.core_type = #tpu.core_type<tc>, window_params = [{transform_indices = @transform_0, window_bounds = array<i64: 32, 128>}, {pipeline_mode = #tpu.pipeline_mode<synchronous>, transform_indices = @transform_1, window_bounds = array<i64: 32, 32>}, {pipeline_mode = #tpu.pipeline_mode<synchronous>, transform_indices = @transform_2, window_bounds = array<i64: 32, 1>}, {transform_indices = @transform_3, window_bounds = array<i64: 32, 128>}]} {
    %c0 = arith.constant 0 : index
    %c0_0 = arith.constant 0 : index
    %0 = vector.load %arg2[%c0, %c0_0] : memref<32x32xbf16, #tpu.memory_space<vmem>>, vector<32x32xbf16>
    %c0_1 = arith.constant 0 : index
    %c0_2 = arith.constant 0 : index
    %1 = vector.load %arg1[%c0_1, %c0_2] : memref<32x128xbf16, #tpu.memory_space<vmem>>, vector<32x128xbf16>
    %cst = arith.constant dense<0.000000e+00> : vector<32x128xf32>
    %2 = tpu.matmul %0, %1, %cst {dimension_numbers = #tpu.dot_dimension_numbers<[1], [0], [0], [1], [0, 0, 1, 1], [], []>} : vector<32x32xbf16>, vector<32x128xbf16>, vector<32x128xf32> -> vector<32x128xf32>
    %c0_3 = arith.constant 0 : index
    %c0_4 = arith.constant 0 : index
    %3 = vector.load %arg3[%c0_3, %c0_4] : memref<32x1xf32, #tpu.memory_space<vmem>>, vector<32x1xf32>
    %4 = vector.broadcast %3 : vector<32x1xf32> to vector<32x128xf32>
    %5 = arith.addf %2, %4 : vector<32x128xf32>
    %cst_5 = arith.constant 0.000000e+00 : f32
    %6 = vector.broadcast %cst_5 : f32 to vector<32x128xf32>
    %7 = arith.subf %6, %5 : vector<32x128xf32>
    %8 = math.exp %7 : vector<32x128xf32>
    %cst_6 = arith.constant 1.000000e+00 : f32
    %9 = vector.broadcast %cst_6 : f32 to vector<32x128xf32>
    %10 = arith.addf %9, %8 : vector<32x128xf32>
    %11 = tpu.reciprocal %10 {approx = true} : vector<32x128xf32> -> vector<32x128xf32>
    %12 = arith.mulf %5, %11 : vector<32x128xf32>
    %13 = arith.truncf %12 : vector<32x128xf32> to vector<32x128xbf16>
    %c0_7 = arith.constant 0 : index
    %c0_8 = arith.constant 0 : index
    %14 = vector.load %arg4[%c0_7, %c0_8] : memref<32x128xbf16, #tpu.memory_space<vmem>>, vector<32x128xbf16>
    tpu.vector_store %arg4[%c0_7, %c0_8], %13 {strides = array<i32>} : memref<32x128xbf16, #tpu.memory_space<vmem>>, vector<32x128xbf16>,
    return
  }
  func.func @transform_0(%arg0: i32) -> (i32, i32) {
    %c0_i32 = arith.constant 0 : i32
    %c0_i32_0 = arith.constant 0 : i32
    return %c0_i32, %arg0 : i32, i32
  }
  func.func @transform_1(%arg0: i32) -> (i32, i32) {
    %c0_i32 = arith.constant 0 : i32
    %c0_i32_0 = arith.constant 0 : i32
    %c0_i32_1 = arith.constant 0 : i32
    return %c0_i32, %c0_i32_0 : i32, i32
  }
  func.func @transform_2(%arg0: i32) -> (i32, i32) {
    %c0_i32 = arith.constant 0 : i32
    %c0_i32_0 = arith.constant 0 : i32
    %c0_i32_1 = arith.constant 0 : i32
    return %c0_i32, %c0_i32_0 : i32, i32
  }
  func.func @transform_3(%arg0: i32) -> (i32, i32) {
    %c0_i32 = arith.constant 0 : i32
    %c0_i32_0 = arith.constant 0 : i32
    return %c0_i32, %arg0 : i32, i32
  }
}

module attributes {stable_mosaic.version = 11 : i64} {
  func.func @kernel(%arg0: i32, %arg1: memref<288x128xbf16, #tpu.memory_space<vmem>>, %arg2: memref<64x288xbf16, #tpu.memory_space<vmem>>, %arg3: memref<64x1xf32, #tpu.memory_space<vmem>>, %arg4: memref<64x128xbf16, #tpu.memory_space<vmem>>) attributes {dimension_semantics = [#tpu.dimension_semantics<parallel>], iteration_bounds = array<i64: 1>, scalar_prefetch = 0 : i64, scratch_operands = 0 : i64, tpu.core_type = #tpu.core_type<tc>, window_params = [{transform_indices = @transform_0, window_bounds = array<i64: 288, 128>}, {pipeline_mode = #tpu.pipeline_mode<synchronous>, transform_indices = @transform_1, window_bounds = array<i64: 64, 288>}, {pipeline_mode = #tpu.pipeline_mode<synchronous>, transform_indices = @transform_2, window_bounds = array<i64: 64, 1>}, {transform_indices = @transform_3, window_bounds = array<i64: 64, 128>}]} {
    %c0 = arith.constant 0 : index
    %c0_0 = arith.constant 0 : index
    %0 = vector.load %arg2[%c0, %c0_0] : memref<64x288xbf16, #tpu.memory_space<vmem>>, vector<64x288xbf16>
    %c0_1 = arith.constant 0 : index
    %c0_2 = arith.constant 0 : index
    %1 = vector.load %arg1[%c0_1, %c0_2] : memref<288x128xbf16, #tpu.memory_space<vmem>>, vector<288x128xbf16>
    %cst = arith.constant dense<0.000000e+00> : vector<64x128xf32>
    %2 = tpu.matmul %0, %1, %cst {dimension_numbers = #tpu.dot_dimension_numbers<[1], [0], [0], [1], [0, 0, 1, 1], [], []>} : vector<64x288xbf16>, vector<288x128xbf16>, vector<64x128xf32> -> vector<64x128xf32>
    %c0_3 = arith.constant 0 : index
    %c0_4 = arith.constant 0 : index
    %3 = vector.load %arg3[%c0_3, %c0_4] : memref<64x1xf32, #tpu.memory_space<vmem>>, vector<64x1xf32>
    %4 = vector.broadcast %3 : vector<64x1xf32> to vector<64x128xf32>
    %5 = arith.addf %2, %4 : vector<64x128xf32>
    %cst_5 = arith.constant 0.000000e+00 : f32
    %6 = vector.broadcast %cst_5 : f32 to vector<64x128xf32>
    %7 = arith.subf %6, %5 : vector<64x128xf32>
    %8 = math.exp %7 : vector<64x128xf32>
    %cst_6 = arith.constant 1.000000e+00 : f32
    %9 = vector.broadcast %cst_6 : f32 to vector<64x128xf32>
    %10 = arith.addf %9, %8 : vector<64x128xf32>
    %11 = tpu.reciprocal %10 {approx = true} : vector<64x128xf32> -> vector<64x128xf32>
    %12 = arith.mulf %5, %11 : vector<64x128xf32>
    %13 = arith.truncf %12 : vector<64x128xf32> to vector<64x128xbf16>
    %c0_7 = arith.constant 0 : index
    %c0_8 = arith.constant 0 : index
    %14 = vector.load %arg4[%c0_7, %c0_8] : memref<64x128xbf16, #tpu.memory_space<vmem>>, vector<64x128xbf16>
    tpu.vector_store %arg4[%c0_7, %c0_8], %13 {strides = array<i32>} : memref<64x128xbf16, #tpu.memory_space<vmem>>, vector<64x128xbf16>,
    return
  }
  func.func @transform_0(%arg0: i32) -> (i32, i32) {
    %c0_i32 = arith.constant 0 : i32
    %c0_i32_0 = arith.constant 0 : i32
    return %c0_i32, %arg0 : i32, i32
  }
  func.func @transform_1(%arg0: i32) -> (i32, i32) {
    %c0_i32 = arith.constant 0 : i32
    %c0_i32_0 = arith.constant 0 : i32
    %c0_i32_1 = arith.constant 0 : i32
    return %c0_i32, %c0_i32_0 : i32, i32
  }
  func.func @transform_2(%arg0: i32) -> (i32, i32) {
    %c0_i32 = arith.constant 0 : i32
    %c0_i32_0 = arith.constant 0 : i32
    %c0_i32_1 = arith.constant 0 : i32
    return %c0_i32, %c0_i32_0 : i32, i32
  }
  func.func @transform_3(%arg0: i32) -> (i32, i32) {
    %c0_i32 = arith.constant 0 : i32
    %c0_i32_0 = arith.constant 0 : i32
    return %c0_i32, %arg0 : i32, i32
  }
}

module attributes {stable_mosaic.version = 11 : i64} {
  func.func @kernel(%arg0: i32, %arg1: memref<288x128xbf16, #tpu.memory_space<vmem>>, %arg2: memref<32x288xbf16, #tpu.memory_space<vmem>>, %arg3: memref<32x1xf32, #tpu.memory_space<vmem>>, %arg4: memref<32x128xbf16, #tpu.memory_space<vmem>>, %arg5: memref<32x128xbf16, #tpu.memory_space<vmem>>) attributes {dimension_semantics = [#tpu.dimension_semantics<parallel>], iteration_bounds = array<i64: 1>, scalar_prefetch = 0 : i64, scratch_operands = 0 : i64, tpu.core_type = #tpu.core_type<tc>, window_params = [{transform_indices = @transform_0, window_bounds = array<i64: 288, 128>}, {pipeline_mode = #tpu.pipeline_mode<synchronous>, transform_indices = @transform_1, window_bounds = array<i64: 32, 288>}, {pipeline_mode = #tpu.pipeline_mode<synchronous>, transform_indices = @transform_2, window_bounds = array<i64: 32, 1>}, {transform_indices = @transform_3, window_bounds = array<i64: 32, 128>}, {transform_indices = @transform_4, window_bounds = array<i64: 32, 128>}]} {
    %c0 = arith.constant 0 : index
    %c0_0 = arith.constant 0 : index
    %0 = vector.load %arg2[%c0, %c0_0] : memref<32x288xbf16, #tpu.memory_space<vmem>>, vector<32x288xbf16>
    %c0_1 = arith.constant 0 : index
    %c0_2 = arith.constant 0 : index
    %1 = vector.load %arg1[%c0_1, %c0_2] : memref<288x128xbf16, #tpu.memory_space<vmem>>, vector<288x128xbf16>
    %cst = arith.constant dense<0.000000e+00> : vector<32x128xf32>
    %2 = tpu.matmul %0, %1, %cst {dimension_numbers = #tpu.dot_dimension_numbers<[1], [0], [0], [1], [0, 0, 1, 1], [], []>} : vector<32x288xbf16>, vector<288x128xbf16>, vector<32x128xf32> -> vector<32x128xf32>
    %c0_3 = arith.constant 0 : index
    %c0_4 = arith.constant 0 : index
    %3 = vector.load %arg3[%c0_3, %c0_4] : memref<32x1xf32, #tpu.memory_space<vmem>>, vector<32x1xf32>
    %4 = vector.broadcast %3 : vector<32x1xf32> to vector<32x128xf32>
    %5 = arith.addf %2, %4 : vector<32x128xf32>
    %cst_5 = arith.constant 0.000000e+00 : f32
    %6 = vector.broadcast %cst_5 : f32 to vector<32x128xf32>
    %7 = arith.subf %6, %5 : vector<32x128xf32>
    %8 = math.exp %7 : vector<32x128xf32>
    %cst_6 = arith.constant 1.000000e+00 : f32
    %9 = vector.broadcast %cst_6 : f32 to vector<32x128xf32>
    %10 = arith.addf %9, %8 : vector<32x128xf32>
    %11 = tpu.reciprocal %10 {approx = true} : vector<32x128xf32> -> vector<32x128xf32>
    %12 = arith.mulf %5, %11 : vector<32x128xf32>
    %c0_7 = arith.constant 0 : index
    %c0_8 = arith.constant 0 : index
    %13 = vector.load %arg4[%c0_7, %c0_8] : memref<32x128xbf16, #tpu.memory_space<vmem>>, vector<32x128xbf16>
    %14 = arith.extf %13 : vector<32x128xbf16> to vector<32x128xf32>
    %15 = arith.addf %12, %14 : vector<32x128xf32>
    %16 = arith.truncf %15 : vector<32x128xf32> to vector<32x128xbf16>
    %c0_9 = arith.constant 0 : index
    %c0_10 = arith.constant 0 : index
    %17 = vector.load %arg5[%c0_9, %c0_10] : memref<32x128xbf16, #tpu.memory_space<vmem>>, vector<32x128xbf16>
    tpu.vector_store %arg5[%c0_9, %c0_10], %16 {strides = array<i32>} : memref<32x128xbf16, #tpu.memory_space<vmem>>, vector<32x128xbf16>,
    return
  }
  func.func @transform_0(%arg0: i32) -> (i32, i32) {
    %c0_i32 = arith.constant 0 : i32
    %c0_i32_0 = arith.constant 0 : i32
    return %c0_i32, %arg0 : i32, i32
  }
  func.func @transform_1(%arg0: i32) -> (i32, i32) {
    %c0_i32 = arith.constant 0 : i32
    %c0_i32_0 = arith.constant 0 : i32
    %c0_i32_1 = arith.constant 0 : i32
    return %c0_i32, %c0_i32_0 : i32, i32
  }
  func.func @transform_2(%arg0: i32) -> (i32, i32) {
    %c0_i32 = arith.constant 0 : i32
    %c0_i32_0 = arith.constant 0 : i32
    %c0_i32_1 = arith.constant 0 : i32
    return %c0_i32, %c0_i32_0 : i32, i32
  }
  func.func @transform_3(%arg0: i32) -> (i32, i32) {
    %c0_i32 = arith.constant 0 : i32
    %c0_i32_0 = arith.constant 0 : i32
    return %c0_i32, %arg0 : i32, i32
  }
  func.func @transform_4(%arg0: i32) -> (i32, i32) {
    %c0_i32 = arith.constant 0 : i32
    %c0_i32_0 = arith.constant 0 : i32
    return %c0_i32, %arg0 : i32, i32
  }
}

module attributes {stable_mosaic.version = 11 : i64} {
  func.func @kernel(%arg0: i32, %arg1: memref<32x128xbf16, #tpu.memory_space<vmem>>, %arg2: memref<32x128xbf16, #tpu.memory_space<vmem>>, %arg3: memref<64x32xbf16, #tpu.memory_space<vmem>>, %arg4: memref<64x32xbf16, #tpu.memory_space<vmem>>, %arg5: memref<64x1xf32, #tpu.memory_space<vmem>>, %arg6: memref<64x128xbf16, #tpu.memory_space<vmem>>) attributes {dimension_semantics = [#tpu.dimension_semantics<parallel>], iteration_bounds = array<i64: 1>, scalar_prefetch = 0 : i64, scratch_operands = 0 : i64, tpu.core_type = #tpu.core_type<tc>, window_params = [{transform_indices = @transform_0, window_bounds = array<i64: 32, 128>}, {transform_indices = @transform_1, window_bounds = array<i64: 32, 128>}, {pipeline_mode = #tpu.pipeline_mode<synchronous>, transform_indices = @transform_2, window_bounds = array<i64: 64, 32>}, {pipeline_mode = #tpu.pipeline_mode<synchronous>, transform_indices = @transform_3, window_bounds = array<i64: 64, 32>}, {pipeline_mode = #tpu.pipeline_mode<synchronous>, transform_indices = @transform_4, window_bounds = array<i64: 64, 1>}, {transform_indices = @transform_5, window_bounds = array<i64: 64, 128>}]} {
    %c0 = arith.constant 0 : index
    %c0_0 = arith.constant 0 : index
    %0 = vector.load %arg3[%c0, %c0_0] : memref<64x32xbf16, #tpu.memory_space<vmem>>, vector<64x32xbf16>
    %c0_1 = arith.constant 0 : index
    %c0_2 = arith.constant 0 : index
    %1 = vector.load %arg1[%c0_1, %c0_2] : memref<32x128xbf16, #tpu.memory_space<vmem>>, vector<32x128xbf16>
    %cst = arith.constant dense<0.000000e+00> : vector<64x128xf32>
    %2 = tpu.matmul %0, %1, %cst {dimension_numbers = #tpu.dot_dimension_numbers<[1], [0], [0], [1], [0, 0, 1, 1], [], []>} : vector<64x32xbf16>, vector<32x128xbf16>, vector<64x128xf32> -> vector<64x128xf32>
    %c0_3 = arith.constant 0 : index
    %c0_4 = arith.constant 0 : index
    %3 = vector.load %arg4[%c0_3, %c0_4] : memref<64x32xbf16, #tpu.memory_space<vmem>>, vector<64x32xbf16>
    %c0_5 = arith.constant 0 : index
    %c0_6 = arith.constant 0 : index
    %4 = vector.load %arg2[%c0_5, %c0_6] : memref<32x128xbf16, #tpu.memory_space<vmem>>, vector<32x128xbf16>
    %cst_7 = arith.constant dense<0.000000e+00> : vector<64x128xf32>
    %5 = tpu.matmul %3, %4, %cst_7 {dimension_numbers = #tpu.dot_dimension_numbers<[1], [0], [0], [1], [0, 0, 1, 1], [], []>} : vector<64x32xbf16>, vector<32x128xbf16>, vector<64x128xf32> -> vector<64x128xf32>
    %6 = arith.addf %2, %5 : vector<64x128xf32>
    %c0_8 = arith.constant 0 : index
    %c0_9 = arith.constant 0 : index
    %7 = vector.load %arg5[%c0_8, %c0_9] : memref<64x1xf32, #tpu.memory_space<vmem>>, vector<64x1xf32>
    %8 = vector.broadcast %7 : vector<64x1xf32> to vector<64x128xf32>
    %9 = arith.addf %6, %8 : vector<64x128xf32>
    %cst_10 = arith.constant 0.000000e+00 : f32
    %10 = vector.broadcast %cst_10 : f32 to vector<64x128xf32>
    %11 = arith.subf %10, %9 : vector<64x128xf32>
    %12 = math.exp %11 : vector<64x128xf32>
    %cst_11 = arith.constant 1.000000e+00 : f32
    %13 = vector.broadcast %cst_11 : f32 to vector<64x128xf32>
    %14 = arith.addf %13, %12 : vector<64x128xf32>
    %15 = tpu.reciprocal %14 {approx = true} : vector<64x128xf32> -> vector<64x128xf32>
    %16 = arith.mulf %9, %15 : vector<64x128xf32>
    %17 = arith.truncf %16 : vector<64x128xf32> to vector<64x128xbf16>
    %c0_12 = arith.constant 0 : index
    %c0_13 = arith.constant 0 : index
    %18 = vector.load %arg6[%c0_12, %c0_13] : memref<64x128xbf16, #tpu.memory_space<vmem>>, vector<64x128xbf16>
    tpu.vector_store %arg6[%c0_12, %c0_13], %17 {strides = array<i32>} : memref<64x128xbf16, #tpu.memory_space<vmem>>, vector<64x128xbf16>,
    return
  }
  func.func @transform_0(%arg0: i32) -> (i32, i32) {
    %c0_i32 = arith.constant 0 : i32
    %c0_i32_0 = arith.constant 0 : i32
    return %c0_i32, %arg0 : i32, i32
  }
  func.func @transform_1(%arg0: i32) -> (i32, i32) {
    %c0_i32 = arith.constant 0 : i32
    %c0_i32_0 = arith.constant 0 : i32
    return %c0_i32, %arg0 : i32, i32
  }
  func.func @transform_2(%arg0: i32) -> (i32, i32) {
    %c0_i32 = arith.constant 0 : i32
    %c0_i32_0 = arith.constant 0 : i32
    %c0_i32_1 = arith.constant 0 : i32
    return %c0_i32, %c0_i32_0 : i32, i32
  }
  func.func @transform_3(%arg0: i32) -> (i32, i32) {
    %c0_i32 = arith.constant 0 : i32
    %c0_i32_0 = arith.constant 0 : i32
    %c0_i32_1 = arith.constant 0 : i32
    return %c0_i32, %c0_i32_0 : i32, i32
  }
  func.func @transform_4(%arg0: i32) -> (i32, i32) {
    %c0_i32 = arith.constant 0 : i32
    %c0_i32_0 = arith.constant 0 : i32
    %c0_i32_1 = arith.constant 0 : i32
    return %c0_i32, %c0_i32_0 : i32, i32
  }
  func.func @transform_5(%arg0: i32) -> (i32, i32) {
    %c0_i32 = arith.constant 0 : i32
    %c0_i32_0 = arith.constant 0 : i32
    return %c0_i32, %arg0 : i32, i32
  }
}

module attributes {stable_mosaic.version = 11 : i64} {
  func.func @kernel(%arg0: i32, %arg1: memref<576x128xbf16, #tpu.memory_space<vmem>>, %arg2: memref<128x576xbf16, #tpu.memory_space<vmem>>, %arg3: memref<128x1xf32, #tpu.memory_space<vmem>>, %arg4: memref<128x128xbf16, #tpu.memory_space<vmem>>) attributes {dimension_semantics = [#tpu.dimension_semantics<parallel>], iteration_bounds = array<i64: 1>, scalar_prefetch = 0 : i64, scratch_operands = 0 : i64, tpu.core_type = #tpu.core_type<tc>, window_params = [{transform_indices = @transform_0, window_bounds = array<i64: 576, 128>}, {pipeline_mode = #tpu.pipeline_mode<synchronous>, transform_indices = @transform_1, window_bounds = array<i64: 128, 576>}, {pipeline_mode = #tpu.pipeline_mode<synchronous>, transform_indices = @transform_2, window_bounds = array<i64: 128, 1>}, {transform_indices = @transform_3, window_bounds = array<i64: 128, 128>}]} {
    %c0 = arith.constant 0 : index
    %c0_0 = arith.constant 0 : index
    %0 = vector.load %arg2[%c0, %c0_0] : memref<128x576xbf16, #tpu.memory_space<vmem>>, vector<128x576xbf16>
    %c0_1 = arith.constant 0 : index
    %c0_2 = arith.constant 0 : index
    %1 = vector.load %arg1[%c0_1, %c0_2] : memref<576x128xbf16, #tpu.memory_space<vmem>>, vector<576x128xbf16>
    %cst = arith.constant dense<0.000000e+00> : vector<128x128xf32>
    %2 = tpu.matmul %0, %1, %cst {dimension_numbers = #tpu.dot_dimension_numbers<[1], [0], [0], [1], [0, 0, 1, 1], [], []>} : vector<128x576xbf16>, vector<576x128xbf16>, vector<128x128xf32> -> vector<128x128xf32>
    %c0_3 = arith.constant 0 : index
    %c0_4 = arith.constant 0 : index
    %3 = vector.load %arg3[%c0_3, %c0_4] : memref<128x1xf32, #tpu.memory_space<vmem>>, vector<128x1xf32>
    %4 = vector.broadcast %3 : vector<128x1xf32> to vector<128x128xf32>
    %5 = arith.addf %2, %4 : vector<128x128xf32>
    %cst_5 = arith.constant 0.000000e+00 : f32
    %6 = vector.broadcast %cst_5 : f32 to vector<128x128xf32>
    %7 = arith.subf %6, %5 : vector<128x128xf32>
    %8 = math.exp %7 : vector<128x128xf32>
    %cst_6 = arith.constant 1.000000e+00 : f32
    %9 = vector.broadcast %cst_6 : f32 to vector<128x128xf32>
    %10 = arith.addf %9, %8 : vector<128x128xf32>
    %11 = tpu.reciprocal %10 {approx = true} : vector<128x128xf32> -> vector<128x128xf32>
    %12 = arith.mulf %5, %11 : vector<128x128xf32>
    %13 = arith.truncf %12 : vector<128x128xf32> to vector<128x128xbf16>
    %c0_7 = arith.constant 0 : index
    %c0_8 = arith.constant 0 : index
    %14 = vector.load %arg4[%c0_7, %c0_8] : memref<128x128xbf16, #tpu.memory_space<vmem>>, vector<128x128xbf16>
    tpu.vector_store %arg4[%c0_7, %c0_8], %13 {strides = array<i32>} : memref<128x128xbf16, #tpu.memory_space<vmem>>, vector<128x128xbf16>,
    return
  }
  func.func @transform_0(%arg0: i32) -> (i32, i32) {
    %c0_i32 = arith.constant 0 : i32
    %c0_i32_0 = arith.constant 0 : i32
    return %c0_i32, %arg0 : i32, i32
  }
  func.func @transform_1(%arg0: i32) -> (i32, i32) {
    %c0_i32 = arith.constant 0 : i32
    %c0_i32_0 = arith.constant 0 : i32
    %c0_i32_1 = arith.constant 0 : i32
    return %c0_i32, %c0_i32_0 : i32, i32
  }
  func.func @transform_2(%arg0: i32) -> (i32, i32) {
    %c0_i32 = arith.constant 0 : i32
    %c0_i32_0 = arith.constant 0 : i32
    %c0_i32_1 = arith.constant 0 : i32
    return %c0_i32, %c0_i32_0 : i32, i32
  }
  func.func @transform_3(%arg0: i32) -> (i32, i32) {
    %c0_i32 = arith.constant 0 : i32
    %c0_i32_0 = arith.constant 0 : i32
    return %c0_i32, %arg0 : i32, i32
  }
}

module attributes {stable_mosaic.version = 11 : i64} {
  func.func @kernel(%arg0: i32, %arg1: memref<128x128xbf16, #tpu.memory_space<vmem>>, %arg2: memref<64x128xbf16, #tpu.memory_space<vmem>>, %arg3: memref<64x1xf32, #tpu.memory_space<vmem>>, %arg4: memref<64x128xbf16, #tpu.memory_space<vmem>>) attributes {dimension_semantics = [#tpu.dimension_semantics<parallel>], iteration_bounds = array<i64: 1>, scalar_prefetch = 0 : i64, scratch_operands = 0 : i64, tpu.core_type = #tpu.core_type<tc>, window_params = [{transform_indices = @transform_0, window_bounds = array<i64: 128, 128>}, {pipeline_mode = #tpu.pipeline_mode<synchronous>, transform_indices = @transform_1, window_bounds = array<i64: 64, 128>}, {pipeline_mode = #tpu.pipeline_mode<synchronous>, transform_indices = @transform_2, window_bounds = array<i64: 64, 1>}, {transform_indices = @transform_3, window_bounds = array<i64: 64, 128>}]} {
    %c0 = arith.constant 0 : index
    %c0_0 = arith.constant 0 : index
    %0 = vector.load %arg2[%c0, %c0_0] : memref<64x128xbf16, #tpu.memory_space<vmem>>, vector<64x128xbf16>
    %c0_1 = arith.constant 0 : index
    %c0_2 = arith.constant 0 : index
    %1 = vector.load %arg1[%c0_1, %c0_2] : memref<128x128xbf16, #tpu.memory_space<vmem>>, vector<128x128xbf16>
    %cst = arith.constant dense<0.000000e+00> : vector<64x128xf32>
    %2 = tpu.matmul %0, %1, %cst {dimension_numbers = #tpu.dot_dimension_numbers<[1], [0], [0], [1], [0, 0, 1, 1], [], []>} : vector<64x128xbf16>, vector<128x128xbf16>, vector<64x128xf32> -> vector<64x128xf32>
    %c0_3 = arith.constant 0 : index
    %c0_4 = arith.constant 0 : index
    %3 = vector.load %arg3[%c0_3, %c0_4] : memref<64x1xf32, #tpu.memory_space<vmem>>, vector<64x1xf32>
    %4 = vector.broadcast %3 : vector<64x1xf32> to vector<64x128xf32>
    %5 = arith.addf %2, %4 : vector<64x128xf32>
    %cst_5 = arith.constant 0.000000e+00 : f32
    %6 = vector.broadcast %cst_5 : f32 to vector<64x128xf32>
    %7 = arith.subf %6, %5 : vector<64x128xf32>
    %8 = math.exp %7 : vector<64x128xf32>
    %cst_6 = arith.constant 1.000000e+00 : f32
    %9 = vector.broadcast %cst_6 : f32 to vector<64x128xf32>
    %10 = arith.addf %9, %8 : vector<64x128xf32>
    %11 = tpu.reciprocal %10 {approx = true} : vector<64x128xf32> -> vector<64x128xf32>
    %12 = arith.mulf %5, %11 : vector<64x128xf32>
    %13 = arith.truncf %12 : vector<64x128xf32> to vector<64x128xbf16>
    %c0_7 = arith.constant 0 : index
    %c0_8 = arith.constant 0 : index
    %14 = vector.load %arg4[%c0_7, %c0_8] : memref<64x128xbf16, #tpu.memory_space<vmem>>, vector<64x128xbf16>
    tpu.vector_store %arg4[%c0_7, %c0_8], %13 {strides = array<i32>} : memref<64x128xbf16, #tpu.memory_space<vmem>>, vector<64x128xbf16>,
    return
  }
  func.func @transform_0(%arg0: i32) -> (i32, i32) {
    %c0_i32 = arith.constant 0 : i32
    %c0_i32_0 = arith.constant 0 : i32
    return %c0_i32, %arg0 : i32, i32
  }
  func.func @transform_1(%arg0: i32) -> (i32, i32) {
    %c0_i32 = arith.constant 0 : i32
    %c0_i32_0 = arith.constant 0 : i32
    %c0_i32_1 = arith.constant 0 : i32
    return %c0_i32, %c0_i32_0 : i32, i32
  }
  func.func @transform_2(%arg0: i32) -> (i32, i32) {
    %c0_i32 = arith.constant 0 : i32
    %c0_i32_0 = arith.constant 0 : i32
    %c0_i32_1 = arith.constant 0 : i32
    return %c0_i32, %c0_i32_0 : i32, i32
  }
  func.func @transform_3(%arg0: i32) -> (i32, i32) {
    %c0_i32 = arith.constant 0 : i32
    %c0_i32_0 = arith.constant 0 : i32
    return %c0_i32, %arg0 : i32, i32
  }
}

module attributes {stable_mosaic.version = 11 : i64} {
  func.func @kernel(%arg0: i32, %arg1: memref<64x128xbf16, #tpu.memory_space<vmem>>, %arg2: memref<64x128xbf16, #tpu.memory_space<vmem>>, %arg3: memref<64x128xbf16, #tpu.memory_space<vmem>>, %arg4: memref<64x128xbf16, #tpu.memory_space<vmem>>, %arg5: memref<128x64xbf16, #tpu.memory_space<vmem>>, %arg6: memref<128x64xbf16, #tpu.memory_space<vmem>>, %arg7: memref<128x64xbf16, #tpu.memory_space<vmem>>, %arg8: memref<128x64xbf16, #tpu.memory_space<vmem>>, %arg9: memref<128x1xf32, #tpu.memory_space<vmem>>, %arg10: memref<128x128xbf16, #tpu.memory_space<vmem>>) attributes {dimension_semantics = [#tpu.dimension_semantics<parallel>], iteration_bounds = array<i64: 1>, scalar_prefetch = 0 : i64, scratch_operands = 0 : i64, tpu.core_type = #tpu.core_type<tc>, window_params = [{transform_indices = @transform_0, window_bounds = array<i64: 64, 128>}, {transform_indices = @transform_1, window_bounds = array<i64: 64, 128>}, {transform_indices = @transform_2, window_bounds = array<i64: 64, 128>}, {transform_indices = @transform_3, window_bounds = array<i64: 64, 128>}, {pipeline_mode = #tpu.pipeline_mode<synchronous>, transform_indices = @transform_4, window_bounds = array<i64: 128, 64>}, {pipeline_mode = #tpu.pipeline_mode<synchronous>, transform_indices = @transform_5, window_bounds = array<i64: 128, 64>}, {pipeline_mode = #tpu.pipeline_mode<synchronous>, transform_indices = @transform_6, window_bounds = array<i64: 128, 64>}, {pipeline_mode = #tpu.pipeline_mode<synchronous>, transform_indices = @transform_7, window_bounds = array<i64: 128, 64>}, {pipeline_mode = #tpu.pipeline_mode<synchronous>, transform_indices = @transform_8, window_bounds = array<i64: 128, 1>}, {transform_indices = @transform_9, window_bounds = array<i64: 128, 128>}]} {
    %c0 = arith.constant 0 : index
    %c0_0 = arith.constant 0 : index
    %0 = vector.load %arg5[%c0, %c0_0] : memref<128x64xbf16, #tpu.memory_space<vmem>>, vector<128x64xbf16>
    %c0_1 = arith.constant 0 : index
    %c0_2 = arith.constant 0 : index
    %1 = vector.load %arg1[%c0_1, %c0_2] : memref<64x128xbf16, #tpu.memory_space<vmem>>, vector<64x128xbf16>
    %cst = arith.constant dense<0.000000e+00> : vector<128x128xf32>
    %2 = tpu.matmul %0, %1, %cst {dimension_numbers = #tpu.dot_dimension_numbers<[1], [0], [0], [1], [0, 0, 1, 1], [], []>} : vector<128x64xbf16>, vector<64x128xbf16>, vector<128x128xf32> -> vector<128x128xf32>
    %c0_3 = arith.constant 0 : index
    %c0_4 = arith.constant 0 : index
    %3 = vector.load %arg6[%c0_3, %c0_4] : memref<128x64xbf16, #tpu.memory_space<vmem>>, vector<128x64xbf16>
    %c0_5 = arith.constant 0 : index
    %c0_6 = arith.constant 0 : index
    %4 = vector.load %arg2[%c0_5, %c0_6] : memref<64x128xbf16, #tpu.memory_space<vmem>>, vector<64x128xbf16>
    %cst_7 = arith.constant dense<0.000000e+00> : vector<128x128xf32>
    %5 = tpu.matmul %3, %4, %cst_7 {dimension_numbers = #tpu.dot_dimension_numbers<[1], [0], [0], [1], [0, 0, 1, 1], [], []>} : vector<128x64xbf16>, vector<64x128xbf16>, vector<128x128xf32> -> vector<128x128xf32>
    %6 = arith.addf %2, %5 : vector<128x128xf32>
    %c0_8 = arith.constant 0 : index
    %c0_9 = arith.constant 0 : index
    %7 = vector.load %arg7[%c0_8, %c0_9] : memref<128x64xbf16, #tpu.memory_space<vmem>>, vector<128x64xbf16>
    %c0_10 = arith.constant 0 : index
    %c0_11 = arith.constant 0 : index
    %8 = vector.load %arg3[%c0_10, %c0_11] : memref<64x128xbf16, #tpu.memory_space<vmem>>, vector<64x128xbf16>
    %cst_12 = arith.constant dense<0.000000e+00> : vector<128x128xf32>
    %9 = tpu.matmul %7, %8, %cst_12 {dimension_numbers = #tpu.dot_dimension_numbers<[1], [0], [0], [1], [0, 0, 1, 1], [], []>} : vector<128x64xbf16>, vector<64x128xbf16>, vector<128x128xf32> -> vector<128x128xf32>
    %10 = arith.addf %6, %9 : vector<128x128xf32>
    %c0_13 = arith.constant 0 : index
    %c0_14 = arith.constant 0 : index
    %11 = vector.load %arg8[%c0_13, %c0_14] : memref<128x64xbf16, #tpu.memory_space<vmem>>, vector<128x64xbf16>
    %c0_15 = arith.constant 0 : index
    %c0_16 = arith.constant 0 : index
    %12 = vector.load %arg4[%c0_15, %c0_16] : memref<64x128xbf16, #tpu.memory_space<vmem>>, vector<64x128xbf16>
    %cst_17 = arith.constant dense<0.000000e+00> : vector<128x128xf32>
    %13 = tpu.matmul %11, %12, %cst_17 {dimension_numbers = #tpu.dot_dimension_numbers<[1], [0], [0], [1], [0, 0, 1, 1], [], []>} : vector<128x64xbf16>, vector<64x128xbf16>, vector<128x128xf32> -> vector<128x128xf32>
    %14 = arith.addf %10, %13 : vector<128x128xf32>
    %c0_18 = arith.constant 0 : index
    %c0_19 = arith.constant 0 : index
    %15 = vector.load %arg9[%c0_18, %c0_19] : memref<128x1xf32, #tpu.memory_space<vmem>>, vector<128x1xf32>
    %16 = vector.broadcast %15 : vector<128x1xf32> to vector<128x128xf32>
    %17 = arith.addf %14, %16 : vector<128x128xf32>
    %cst_20 = arith.constant 0.000000e+00 : f32
    %18 = vector.broadcast %cst_20 : f32 to vector<128x128xf32>
    %19 = arith.subf %18, %17 : vector<128x128xf32>
    %20 = math.exp %19 : vector<128x128xf32>
    %cst_21 = arith.constant 1.000000e+00 : f32
    %21 = vector.broadcast %cst_21 : f32 to vector<128x128xf32>
    %22 = arith.addf %21, %20 : vector<128x128xf32>
    %23 = tpu.reciprocal %22 {approx = true} : vector<128x128xf32> -> vector<128x128xf32>
    %24 = arith.mulf %17, %23 : vector<128x128xf32>
    %25 = arith.truncf %24 : vector<128x128xf32> to vector<128x128xbf16>
    %c0_22 = arith.constant 0 : index
    %c0_23 = arith.constant 0 : index
    %26 = vector.load %arg10[%c0_22, %c0_23] : memref<128x128xbf16, #tpu.memory_space<vmem>>, vector<128x128xbf16>
    tpu.vector_store %arg10[%c0_22, %c0_23], %25 {strides = array<i32>} : memref<128x128xbf16, #tpu.memory_space<vmem>>, vector<128x128xbf16>,
    return
  }
  func.func @transform_0(%arg0: i32) -> (i32, i32) {
    %c0_i32 = arith.constant 0 : i32
    %c0_i32_0 = arith.constant 0 : i32
    return %c0_i32, %arg0 : i32, i32
  }
  func.func @transform_1(%arg0: i32) -> (i32, i32) {
    %c0_i32 = arith.constant 0 : i32
    %c0_i32_0 = arith.constant 0 : i32
    return %c0_i32, %arg0 : i32, i32
  }
  func.func @transform_2(%arg0: i32) -> (i32, i32) {
    %c0_i32 = arith.constant 0 : i32
    %c0_i32_0 = arith.constant 0 : i32
    return %c0_i32, %arg0 : i32, i32
  }
  func.func @transform_3(%arg0: i32) -> (i32, i32) {
    %c0_i32 = arith.constant 0 : i32
    %c0_i32_0 = arith.constant 0 : i32
    return %c0_i32, %arg0 : i32, i32
  }
  func.func @transform_4(%arg0: i32) -> (i32, i32) {
    %c0_i32 = arith.constant 0 : i32
    %c0_i32_0 = arith.constant 0 : i32
    %c0_i32_1 = arith.constant 0 : i32
    return %c0_i32, %c0_i32_0 : i32, i32
  }
  func.func @transform_5(%arg0: i32) -> (i32, i32) {
    %c0_i32 = arith.constant 0 : i32
    %c0_i32_0 = arith.constant 0 : i32
    %c0_i32_1 = arith.constant 0 : i32
    return %c0_i32, %c0_i32_0 : i32, i32
  }
  func.func @transform_6(%arg0: i32) -> (i32, i32) {
    %c0_i32 = arith.constant 0 : i32
    %c0_i32_0 = arith.constant 0 : i32
    %c0_i32_1 = arith.constant 0 : i32
    return %c0_i32, %c0_i32_0 : i32, i32
  }
  func.func @transform_7(%arg0: i32) -> (i32, i32) {
    %c0_i32 = arith.constant 0 : i32
    %c0_i32_0 = arith.constant 0 : i32
    %c0_i32_1 = arith.constant 0 : i32
    return %c0_i32, %c0_i32_0 : i32, i32
  }
  func.func @transform_8(%arg0: i32) -> (i32, i32) {
    %c0_i32 = arith.constant 0 : i32
    %c0_i32_0 = arith.constant 0 : i32
    %c0_i32_1 = arith.constant 0 : i32
    return %c0_i32, %c0_i32_0 : i32, i32
  }
  func.func @transform_9(%arg0: i32) -> (i32, i32) {
    %c0_i32 = arith.constant 0 : i32
    %c0_i32_0 = arith.constant 0 : i32
    return %c0_i32, %arg0 : i32, i32
  }
}

module attributes {stable_mosaic.version = 11 : i64} {
  func.func @kernel(%arg0: i32, %arg1: memref<64x128xbf16, #tpu.memory_space<vmem>>, %arg2: memref<64x64xbf16, #tpu.memory_space<vmem>>, %arg3: memref<64x1xf32, #tpu.memory_space<vmem>>, %arg4: memref<64x128xbf16, #tpu.memory_space<vmem>>) attributes {dimension_semantics = [#tpu.dimension_semantics<parallel>], iteration_bounds = array<i64: 1>, scalar_prefetch = 0 : i64, scratch_operands = 0 : i64, tpu.core_type = #tpu.core_type<tc>, window_params = [{transform_indices = @transform_0, window_bounds = array<i64: 64, 128>}, {pipeline_mode = #tpu.pipeline_mode<synchronous>, transform_indices = @transform_1, window_bounds = array<i64: 64, 64>}, {pipeline_mode = #tpu.pipeline_mode<synchronous>, transform_indices = @transform_2, window_bounds = array<i64: 64, 1>}, {transform_indices = @transform_3, window_bounds = array<i64: 64, 128>}]} {
    %c0 = arith.constant 0 : index
    %c0_0 = arith.constant 0 : index
    %0 = vector.load %arg2[%c0, %c0_0] : memref<64x64xbf16, #tpu.memory_space<vmem>>, vector<64x64xbf16>
    %c0_1 = arith.constant 0 : index
    %c0_2 = arith.constant 0 : index
    %1 = vector.load %arg1[%c0_1, %c0_2] : memref<64x128xbf16, #tpu.memory_space<vmem>>, vector<64x128xbf16>
    %cst = arith.constant dense<0.000000e+00> : vector<64x128xf32>
    %2 = tpu.matmul %0, %1, %cst {dimension_numbers = #tpu.dot_dimension_numbers<[1], [0], [0], [1], [0, 0, 1, 1], [], []>} : vector<64x64xbf16>, vector<64x128xbf16>, vector<64x128xf32> -> vector<64x128xf32>
    %c0_3 = arith.constant 0 : index
    %c0_4 = arith.constant 0 : index
    %3 = vector.load %arg3[%c0_3, %c0_4] : memref<64x1xf32, #tpu.memory_space<vmem>>, vector<64x1xf32>
    %4 = vector.broadcast %3 : vector<64x1xf32> to vector<64x128xf32>
    %5 = arith.addf %2, %4 : vector<64x128xf32>
    %cst_5 = arith.constant 0.000000e+00 : f32
    %6 = vector.broadcast %cst_5 : f32 to vector<64x128xf32>
    %7 = arith.subf %6, %5 : vector<64x128xf32>
    %8 = math.exp %7 : vector<64x128xf32>
    %cst_6 = arith.constant 1.000000e+00 : f32
    %9 = vector.broadcast %cst_6 : f32 to vector<64x128xf32>
    %10 = arith.addf %9, %8 : vector<64x128xf32>
    %11 = tpu.reciprocal %10 {approx = true} : vector<64x128xf32> -> vector<64x128xf32>
    %12 = arith.mulf %5, %11 : vector<64x128xf32>
    %13 = arith.truncf %12 : vector<64x128xf32> to vector<64x128xbf16>
    %c0_7 = arith.constant 0 : index
    %c0_8 = arith.constant 0 : index
    %14 = vector.load %arg4[%c0_7, %c0_8] : memref<64x128xbf16, #tpu.memory_space<vmem>>, vector<64x128xbf16>
    tpu.vector_store %arg4[%c0_7, %c0_8], %13 {strides = array<i32>} : memref<64x128xbf16, #tpu.memory_space<vmem>>, vector<64x128xbf16>,
    return
  }
  func.func @transform_0(%arg0: i32) -> (i32, i32) {
    %c0_i32 = arith.constant 0 : i32
    %c0_i32_0 = arith.constant 0 : i32
    return %c0_i32, %arg0 : i32, i32
  }
  func.func @transform_1(%arg0: i32) -> (i32, i32) {
    %c0_i32 = arith.constant 0 : i32
    %c0_i32_0 = arith.constant 0 : i32
    %c0_i32_1 = arith.constant 0 : i32
    return %c0_i32, %c0_i32_0 : i32, i32
  }
  func.func @transform_2(%arg0: i32) -> (i32, i32) {
    %c0_i32 = arith.constant 0 : i32
    %c0_i32_0 = arith.constant 0 : i32
    %c0_i32_1 = arith.constant 0 : i32
    return %c0_i32, %c0_i32_0 : i32, i32
  }
  func.func @transform_3(%arg0: i32) -> (i32, i32) {
    %c0_i32 = arith.constant 0 : i32
    %c0_i32_0 = arith.constant 0 : i32
    return %c0_i32, %arg0 : i32, i32
  }
}

module attributes {stable_mosaic.version = 11 : i64} {
  func.func @kernel(%arg0: i32, %arg1: memref<64x128xbf16, #tpu.memory_space<vmem>>, %arg2: memref<64x128xbf16, #tpu.memory_space<vmem>>, %arg3: memref<128x64xbf16, #tpu.memory_space<vmem>>, %arg4: memref<128x64xbf16, #tpu.memory_space<vmem>>, %arg5: memref<128x1xf32, #tpu.memory_space<vmem>>, %arg6: memref<128x128xbf16, #tpu.memory_space<vmem>>) attributes {dimension_semantics = [#tpu.dimension_semantics<parallel>], iteration_bounds = array<i64: 1>, scalar_prefetch = 0 : i64, scratch_operands = 0 : i64, tpu.core_type = #tpu.core_type<tc>, window_params = [{transform_indices = @transform_0, window_bounds = array<i64: 64, 128>}, {transform_indices = @transform_1, window_bounds = array<i64: 64, 128>}, {pipeline_mode = #tpu.pipeline_mode<synchronous>, transform_indices = @transform_2, window_bounds = array<i64: 128, 64>}, {pipeline_mode = #tpu.pipeline_mode<synchronous>, transform_indices = @transform_3, window_bounds = array<i64: 128, 64>}, {pipeline_mode = #tpu.pipeline_mode<synchronous>, transform_indices = @transform_4, window_bounds = array<i64: 128, 1>}, {transform_indices = @transform_5, window_bounds = array<i64: 128, 128>}]} {
    %c0 = arith.constant 0 : index
    %c0_0 = arith.constant 0 : index
    %0 = vector.load %arg3[%c0, %c0_0] : memref<128x64xbf16, #tpu.memory_space<vmem>>, vector<128x64xbf16>
    %c0_1 = arith.constant 0 : index
    %c0_2 = arith.constant 0 : index
    %1 = vector.load %arg1[%c0_1, %c0_2] : memref<64x128xbf16, #tpu.memory_space<vmem>>, vector<64x128xbf16>
    %cst = arith.constant dense<0.000000e+00> : vector<128x128xf32>
    %2 = tpu.matmul %0, %1, %cst {dimension_numbers = #tpu.dot_dimension_numbers<[1], [0], [0], [1], [0, 0, 1, 1], [], []>} : vector<128x64xbf16>, vector<64x128xbf16>, vector<128x128xf32> -> vector<128x128xf32>
    %c0_3 = arith.constant 0 : index
    %c0_4 = arith.constant 0 : index
    %3 = vector.load %arg4[%c0_3, %c0_4] : memref<128x64xbf16, #tpu.memory_space<vmem>>, vector<128x64xbf16>
    %c0_5 = arith.constant 0 : index
    %c0_6 = arith.constant 0 : index
    %4 = vector.load %arg2[%c0_5, %c0_6] : memref<64x128xbf16, #tpu.memory_space<vmem>>, vector<64x128xbf16>
    %cst_7 = arith.constant dense<0.000000e+00> : vector<128x128xf32>
    %5 = tpu.matmul %3, %4, %cst_7 {dimension_numbers = #tpu.dot_dimension_numbers<[1], [0], [0], [1], [0, 0, 1, 1], [], []>} : vector<128x64xbf16>, vector<64x128xbf16>, vector<128x128xf32> -> vector<128x128xf32>
    %6 = arith.addf %2, %5 : vector<128x128xf32>
    %c0_8 = arith.constant 0 : index
    %c0_9 = arith.constant 0 : index
    %7 = vector.load %arg5[%c0_8, %c0_9] : memref<128x1xf32, #tpu.memory_space<vmem>>, vector<128x1xf32>
    %8 = vector.broadcast %7 : vector<128x1xf32> to vector<128x128xf32>
    %9 = arith.addf %6, %8 : vector<128x128xf32>
    %cst_10 = arith.constant 0.000000e+00 : f32
    %10 = vector.broadcast %cst_10 : f32 to vector<128x128xf32>
    %11 = arith.subf %10, %9 : vector<128x128xf32>
    %12 = math.exp %11 : vector<128x128xf32>
    %cst_11 = arith.constant 1.000000e+00 : f32
    %13 = vector.broadcast %cst_11 : f32 to vector<128x128xf32>
    %14 = arith.addf %13, %12 : vector<128x128xf32>
    %15 = tpu.reciprocal %14 {approx = true} : vector<128x128xf32> -> vector<128x128xf32>
    %16 = arith.mulf %9, %15 : vector<128x128xf32>
    %17 = arith.truncf %16 : vector<128x128xf32> to vector<128x128xbf16>
    %c0_12 = arith.constant 0 : index
    %c0_13 = arith.constant 0 : index
    %18 = vector.load %arg6[%c0_12, %c0_13] : memref<128x128xbf16, #tpu.memory_space<vmem>>, vector<128x128xbf16>
    tpu.vector_store %arg6[%c0_12, %c0_13], %17 {strides = array<i32>} : memref<128x128xbf16, #tpu.memory_space<vmem>>, vector<128x128xbf16>,
    return
  }
  func.func @transform_0(%arg0: i32) -> (i32, i32) {
    %c0_i32 = arith.constant 0 : i32
    %c0_i32_0 = arith.constant 0 : i32
    return %c0_i32, %arg0 : i32, i32
  }
  func.func @transform_1(%arg0: i32) -> (i32, i32) {
    %c0_i32 = arith.constant 0 : i32
    %c0_i32_0 = arith.constant 0 : i32
    return %c0_i32, %arg0 : i32, i32
  }
  func.func @transform_2(%arg0: i32) -> (i32, i32) {
    %c0_i32 = arith.constant 0 : i32
    %c0_i32_0 = arith.constant 0 : i32
    %c0_i32_1 = arith.constant 0 : i32
    return %c0_i32, %c0_i32_0 : i32, i32
  }
  func.func @transform_3(%arg0: i32) -> (i32, i32) {
    %c0_i32 = arith.constant 0 : i32
    %c0_i32_0 = arith.constant 0 : i32
    %c0_i32_1 = arith.constant 0 : i32
    return %c0_i32, %c0_i32_0 : i32, i32
  }
  func.func @transform_4(%arg0: i32) -> (i32, i32) {
    %c0_i32 = arith.constant 0 : i32
    %c0_i32_0 = arith.constant 0 : i32
    %c0_i32_1 = arith.constant 0 : i32
    return %c0_i32, %c0_i32_0 : i32, i32
  }
  func.func @transform_5(%arg0: i32) -> (i32, i32) {
    %c0_i32 = arith.constant 0 : i32
    %c0_i32_0 = arith.constant 0 : i32
    return %c0_i32, %arg0 : i32, i32
  }
}

module attributes {stable_mosaic.version = 11 : i64} {
  func.func @kernel(%arg0: i32, %arg1: memref<576x128xbf16, #tpu.memory_space<vmem>>, %arg2: memref<64x576xbf16, #tpu.memory_space<vmem>>, %arg3: memref<64x1xf32, #tpu.memory_space<vmem>>, %arg4: memref<64x128xbf16, #tpu.memory_space<vmem>>) attributes {dimension_semantics = [#tpu.dimension_semantics<parallel>], iteration_bounds = array<i64: 1>, scalar_prefetch = 0 : i64, scratch_operands = 0 : i64, tpu.core_type = #tpu.core_type<tc>, window_params = [{transform_indices = @transform_0, window_bounds = array<i64: 576, 128>}, {pipeline_mode = #tpu.pipeline_mode<synchronous>, transform_indices = @transform_1, window_bounds = array<i64: 64, 576>}, {pipeline_mode = #tpu.pipeline_mode<synchronous>, transform_indices = @transform_2, window_bounds = array<i64: 64, 1>}, {transform_indices = @transform_3, window_bounds = array<i64: 64, 128>}]} {
    %c0 = arith.constant 0 : index
    %c0_0 = arith.constant 0 : index
    %0 = vector.load %arg2[%c0, %c0_0] : memref<64x576xbf16, #tpu.memory_space<vmem>>, vector<64x576xbf16>
    %c0_1 = arith.constant 0 : index
    %c0_2 = arith.constant 0 : index
    %1 = vector.load %arg1[%c0_1, %c0_2] : memref<576x128xbf16, #tpu.memory_space<vmem>>, vector<576x128xbf16>
    %cst = arith.constant dense<0.000000e+00> : vector<64x128xf32>
    %2 = tpu.matmul %0, %1, %cst {dimension_numbers = #tpu.dot_dimension_numbers<[1], [0], [0], [1], [0, 0, 1, 1], [], []>} : vector<64x576xbf16>, vector<576x128xbf16>, vector<64x128xf32> -> vector<64x128xf32>
    %c0_3 = arith.constant 0 : index
    %c0_4 = arith.constant 0 : index
    %3 = vector.load %arg3[%c0_3, %c0_4] : memref<64x1xf32, #tpu.memory_space<vmem>>, vector<64x1xf32>
    %4 = vector.broadcast %3 : vector<64x1xf32> to vector<64x128xf32>
    %5 = arith.addf %2, %4 : vector<64x128xf32>
    %cst_5 = arith.constant 0.000000e+00 : f32
    %6 = vector.broadcast %cst_5 : f32 to vector<64x128xf32>
    %7 = arith.subf %6, %5 : vector<64x128xf32>
    %8 = math.exp %7 : vector<64x128xf32>
    %cst_6 = arith.constant 1.000000e+00 : f32
    %9 = vector.broadcast %cst_6 : f32 to vector<64x128xf32>
    %10 = arith.addf %9, %8 : vector<64x128xf32>
    %11 = tpu.reciprocal %10 {approx = true} : vector<64x128xf32> -> vector<64x128xf32>
    %12 = arith.mulf %5, %11 : vector<64x128xf32>
    %13 = arith.truncf %12 : vector<64x128xf32> to vector<64x128xbf16>
    %c0_7 = arith.constant 0 : index
    %c0_8 = arith.constant 0 : index
    %14 = vector.load %arg4[%c0_7, %c0_8] : memref<64x128xbf16, #tpu.memory_space<vmem>>, vector<64x128xbf16>
    tpu.vector_store %arg4[%c0_7, %c0_8], %13 {strides = array<i32>} : memref<64x128xbf16, #tpu.memory_space<vmem>>, vector<64x128xbf16>,
    return
  }
  func.func @transform_0(%arg0: i32) -> (i32, i32) {
    %c0_i32 = arith.constant 0 : i32
    %c0_i32_0 = arith.constant 0 : i32
    return %c0_i32, %arg0 : i32, i32
  }
  func.func @transform_1(%arg0: i32) -> (i32, i32) {
    %c0_i32 = arith.constant 0 : i32
    %c0_i32_0 = arith.constant 0 : i32
    %c0_i32_1 = arith.constant 0 : i32
    return %c0_i32, %c0_i32_0 : i32, i32
  }
  func.func @transform_2(%arg0: i32) -> (i32, i32) {
    %c0_i32 = arith.constant 0 : i32
    %c0_i32_0 = arith.constant 0 : i32
    %c0_i32_1 = arith.constant 0 : i32
    return %c0_i32, %c0_i32_0 : i32, i32
  }
  func.func @transform_3(%arg0: i32) -> (i32, i32) {
    %c0_i32 = arith.constant 0 : i32
    %c0_i32_0 = arith.constant 0 : i32
    return %c0_i32, %arg0 : i32, i32
  }
}

</mosaic_0001>

<bundles_post_ra>
// kernel: _lambda_.35
= control target key start
LH: loop header
LB: loop body
LE: loop exit
PB: predicated region body
PF: predicated region fallthrough
CT: control target
= control target key end

     0   :  { %s801_s12 = smov 0   ;;  %s803_s13 = smov 0   ;;  %s949_s0 = inlined_call_operand.vmem [shape: bf16[108,2048], index: 0, kind: input, shape index: {}]   ;;  %s950_s1 = inlined_call_operand.vmem [shape: bf16[8,108], index: 1, kind: input, shape index: {}]   ;;  %s951_s2 = inlined_call_operand.vmem [shape: f32[8,1], index: 2, kind: input, shape index: {}]   ;;  %s952_s3 = inlined_call_operand.vmem [shape: bf16[8,2048], index: 3, kind: output, shape index: {}]  }
   0x1   :  { %s805_s14 = smov 0  }
   0x2 LB: > { %s622_s15 = sadd.s32 4294967295, %s778_s14   ;;  %s818_s16 = sadd.s32 1, %s778_s14   ;;  %s778_s14 = sphi %s805_s14, %s955_s14   ;;  %s774_s13 = sphi %s803_s13, %s954_s13   ;;  %s770_s12 = sphi %s801_s12, %s953_s12  }
   0x3   : > { %s17_s17 = ssub.s32 %s778_s14, %s818_s16  ;;  %s20_s18 = sadd.s32 1, %s774_s13 }
   0x4   : > { %p18_p0 = scmp.eq.s32.totalorder %s17_s17, 0  ;;  %p27_p1 = scmp.ne.s32.totalorder %s774_s13, %s770_s12 }
   0x5   : > { %p28_p2 = scmp.eq.s32.totalorder %s778_s14, 0  ;;  %p625_p4 = scmp.ge.s32.totalorder %s778_s14, 4 }
   0x6   : > { %s827_s19 = scalar_select %p18_p0, %s774_s13, %s20_s18  }
   0x7   : > { %p29_p3 = por %p28_p2, %p27_p1  ;;  %127 = sbr.rel (%p625_p4) target bundleno = 32 (0x20), region = 24 }
   0xe   : > { %130 = sbr.rel (!%p29_p3) target bundleno = 32 (0x20), region = 28  ;;  %s132_s20 = sand.u32 (%p29_p3), 1, %s774_s13  }
   0xf   : > { %s667_s21 = sshll.u32 (%p29_p3), %s778_s14, 4  ;;  %s670_s22 = smul.u32 (%p29_p3), 224, %s132_s20 }
  0x10   : > { %s835_s25 = scalar_lea.vmem (%p29_p3), %s949_s0, %s667_s21 }
  0x11   : > { %v150_v0 = vld [vmem:[%s835_s25] sm:$0xff] (%p29_p3)  ;;  %v152_v1 = vld [vmem:[%s835_s25 + $0x8] sm:$0xff] (%p29_p3)  ;;  %s843_s26 = scalar_lea.vmem (%p29_p3), [#allocation2], %s670_s22 }
  0x12   : > { %v154_v2 = vld [vmem:[%s835_s25 + $0x40] sm:$0xff] (%p29_p3)  ;;  %v156_v3 = vld [vmem:[%s835_s25 + $0x48] sm:$0xff] (%p29_p3)  ;;  %151 = vst [vmem:[%s843_s26] sm:$0xff] (%p29_p3), %v150_v0  ;;  %153 = vst [vmem:[%s843_s26 + $0x8] sm:$0xff] (%p29_p3), %v152_v1 }
  0x13   : > { %v158_v4 = vld [vmem:[%s835_s25 + $0x80] sm:$0xff] (%p29_p3)  ;;  %v160_v5 = vld [vmem:[%s835_s25 + $0x88] sm:$0xff] (%p29_p3)  ;;  %155 = vst [vmem:[%s843_s26 + $0x10] sm:$0xff] (%p29_p3), %v154_v2  ;;  %157 = vst [vmem:[%s843_s26 + $0x18] sm:$0xff] (%p29_p3), %v156_v3 }
  0x14   : > { %159 = vst [vmem:[%s843_s26 + $0x20] sm:$0xff] (%p29_p3), %v158_v4  ;;  %161 = vst [vmem:[%s843_s26 + $0x28] sm:$0xff] (%p29_p3), %v160_v5  ;;  %v162_v6 = vld [vmem:[%s835_s25 + $0xc0] sm:$0xff] (%p29_p3)  ;;  %v164_v7 = vld [vmem:[%s835_s25 + $0xc8] sm:$0xff] (%p29_p3) }
  0x15   : > { %v166_v8 = vld [vmem:[%s835_s25 + $0x100] sm:$0xff]  ;;  %163 = vst [vmem:[%s843_s26 + $0x30] sm:$0xff] %v162_v6  ;;  %165 = vst [vmem:[%s843_s26 + $0x38] sm:$0xff] %v164_v7  ;;  %v168_v9 = vld [vmem:[%s835_s25 + $0x108] sm:$0xff] }
  0x16   : > { %167 = vst [vmem:[%s843_s26 + $0x40] sm:$0xff] %v166_v8  ;;  %v170_v10 = vld [vmem:[%s835_s25 + $0x140] sm:$0xff]  ;;  %v172_v11 = vld [vmem:[%s835_s25 + $0x148] sm:$0xff]  ;;  %169 = vst [vmem:[%s843_s26 + $0x48] sm:$0xff] %v168_v9 }
  0x17   : > { %171 = vst [vmem:[%s843_s26 + $0x50] sm:$0xff] %v170_v10  ;;  %173 = vst [vmem:[%s843_s26 + $0x58] sm:$0xff] %v172_v11  ;;  %v174_v12 = vld [vmem:[%s835_s25 + $0x180] sm:$0xff]  ;;  %v176_v13 = vld [vmem:[%s835_s25 + $0x188] sm:$0xff] }
  0x18   : > { %v178_v14 = vld [vmem:[%s835_s25 + $0x1c0] sm:$0xff]  ;;  %175 = vst [vmem:[%s843_s26 + $0x60] sm:$0xff] %v174_v12  ;;  %177 = vst [vmem:[%s843_s26 + $0x68] sm:$0xff] %v176_v13  ;;  %v180_v15 = vld [vmem:[%s835_s25 + $0x1c8] sm:$0xff] }
  0x19   : > { %179 = vst [vmem:[%s843_s26 + $0x70] sm:$0xff] %v178_v14  ;;  %v182_v16 = vld [vmem:[%s835_s25 + $0x200] sm:$0xff]  ;;  %v184_v17 = vld [vmem:[%s835_s25 + $0x208] sm:$0xff]  ;;  %181 = vst [vmem:[%s843_s26 + $0x78] sm:$0xff] %v180_v15 }
  0x1a   : > { %183 = vst [vmem:[%s843_s26 + $0x80] sm:$0xff] %v182_v16  ;;  %185 = vst [vmem:[%s843_s26 + $0x88] sm:$0xff] %v184_v17  ;;  %v186_v18 = vld [vmem:[%s835_s25 + $0x240] sm:$0xff]  ;;  %v188_v19 = vld [vmem:[%s835_s25 + $0x248] sm:$0xff] }
  0x1b   : > { %v190_v20 = vld [vmem:[%s835_s25 + $0x280] sm:$0xff]  ;;  %187 = vst [vmem:[%s843_s26 + $0x90] sm:$0xff] %v186_v18  ;;  %189 = vst [vmem:[%s843_s26 + $0x98] sm:$0xff] %v188_v19  ;;  %v192_v21 = vld [vmem:[%s835_s25 + $0x288] sm:$0xff] }
  0x1c   : > { %191 = vst [vmem:[%s843_s26 + $0xa0] sm:$0xff] %v190_v20  ;;  %v194_v22 = vld [vmem:[%s835_s25 + $0x2c0] sm:$0xff]  ;;  %v196_v23 = vld [vmem:[%s835_s25 + $0x2c8] sm:$0xff]  ;;  %193 = vst [vmem:[%s843_s26 + $0xa8] sm:$0xff] %v192_v21 }
  0x1d   : > { %195 = vst [vmem:[%s843_s26 + $0xb0] sm:$0xff] %v194_v22  ;;  %197 = vst [vmem:[%s843_s26 + $0xb8] sm:$0xff] %v196_v23  ;;  %v198_v24 = vld [vmem:[%s835_s25 + $0x300] sm:$0xff]  ;;  %v200_v25 = vld [vmem:[%s835_s25 + $0x308] sm:$0xff] }
  0x1e   : > { %v202_v26 = vld [vmem:[%s835_s25 + $0x340] sm:$0xff]  ;;  %199 = vst [vmem:[%s843_s26 + $0xc0] sm:$0xff] %v198_v24  ;;  %201 = vst [vmem:[%s843_s26 + $0xc8] sm:$0xff] %v200_v25  ;;  %v204_v27 = vld [vmem:[%s835_s25 + $0x348] sm:$0xff] }
  0x1f   : > { %203 = vst [vmem:[%s843_s26 + $0xd0] sm:$0xff] %v202_v26  ;;  %205 = vst [vmem:[%s843_s26 + $0xd8] sm:$0xff] %v204_v27 }
  0x20 PF: > { %p628_p5 = scmp.ge.s32.totalorder %s778_s14, 1  ;;  %p210_p6 = scmp.lt.s32.totalorder %s778_s14, 5 }
  0x22   : > { %p211_p7 = pnand %p628_p5, %p210_p6 }
  0x23   : > { %s217_s27 = sand.u32 (!%p211_p7), 1, %s770_s12   ;;  %v780_v28 = vmov (!%p211_p7), 0   ;;  %v277_v29 = vld [vmem:[%s951_s2] sm:$0xff] (!%p211_p7)  ;;  %vm423_vm0 = vcmask (!%p211_p7), 1045504   ;;  %vm419_vm1 = vcmask (!%p211_p7), 883712   ;;  %s629_s7 = sshll.u32 (!%p211_p7), %s622_s15, 2 }
  0x24   : > { %214 = sbr.rel (%p211_p7) target bundleno = 319 (0x13f), region = 51  ;;  %468 = vmatprep.mubr.bf16.mxu0 (!%p211_p7), %v780_v28  ;;  %509 = vmatprep.mubr.bf16.mxu1 (!%p211_p7), %v780_v28  ;;  %v248_v60 = vld [vmem:[%s950_s1] sm:$0xf] (!%p211_p7)  ;;  %p242_p8 = scmp.lt.s32.totalorder (!%p211_p7), %s629_s7, 15 }
  0x25   : > { %s671_s28 = smul.u32 (!%p211_p7), 224, %s217_s27  ;;  %697 = vset.pattern.permute.xlu0 (!%p211_p7), %v780_v28 }
  0x26   : > { %280 = vperm.xlu0 (!%p211_p7), %697, %v277_v29  }
  0x27   : > { %s901_s4 = scalar_lea.vmem (!%p211_p7), [#allocation2], %s671_s28 }
  0x28   : > { %v698_v30 = vld [vmem:[%s901_s4 + $0x4] ss:$16 sps:$4 sm:$0xff] (!%p211_p7)   ;;  %v700_v31 = vld [vmem:[%s901_s4 + $0xc] ss:$16 sps:$4 sm:$0xff] (!%p211_p7)   ;;  %v702_v32 = vld [vmem:[%s901_s4] ss:$16 sps:$4 sm:$0xff] (!%p211_p7)  }
  0x29   : > { %436 = vmatprep.subr.bf16.mxu0 (!%p211_p7), %v698_v30  ;;  %v703_v33 = vld [vmem:[%s901_s4 + $0x8] ss:$16 sps:$4 sm:$0xff] (!%p211_p7)   ;;  %477 = vmatprep.subr.bf16.mxu1 (!%p211_p7), %v700_v31  ;;  %v704_v34 = vld [vmem:[%s901_s4 + $0x24] ss:$16 sps:$4 sm:$0xff] (!%p211_p7)   ;;  %v706_v35 = vld [vmem:[%s901_s4 + $0x2c] ss:$16 sps:$4 sm:$0xff] (!%p211_p7)  }
  0x2a   : > { %437 = vmatpush1.bf16.msra.mxu0 (!%p211_p7), %v702_v32  ;;  %478 = vmatpush1.bf16.msra.mxu1 (!%p211_p7), %v703_v33  ;;  %v708_v36 = vld [vmem:[%s901_s4 + $0x20] ss:$16 sps:$4 sm:$0xff] (!%p211_p7)   ;;  %v709_v37 = vld [vmem:[%s901_s4 + $0x28] ss:$16 sps:$4 sm:$0xff] (!%p211_p7)   ;;  %v710_v38 = vld [vmem:[%s901_s4 + $0x44] ss:$16 sps:$4 sm:$0xff] (!%p211_p7)  }
  0x2b   : > { %438 = vmatprep.subr.bf16.mxu0 %v704_v34  ;;  %479 = vmatprep.subr.bf16.mxu1 %v706_v35  ;;  %v712_v39 = vld [vmem:[%s901_s4 + $0x4c] ss:$16 sps:$4 sm:$0xff]   ;;  %v714_v40 = vld [vmem:[%s901_s4 + $0x40] ss:$16 sps:$4 sm:$0xff]   ;;  %v715_v41 = vld [vmem:[%s901_s4 + $0x48] ss:$16 sps:$4 sm:$0xff]  }
  0x2c   : > { %v716_v42 = vld [vmem:[%s901_s4 + $0x64] ss:$16 sps:$4 sm:$0xff]   ;;  %v718_v43 = vld [vmem:[%s901_s4 + $0x6c] ss:$16 sps:$4 sm:$0xff]   ;;  %v720_v44 = vld [vmem:[%s901_s4 + $0x60] ss:$16 sps:$4 sm:$0xff]  }
  0x2d   : > { %v721_v45 = vld [vmem:[%s901_s4 + $0x68] ss:$16 sps:$4 sm:$0xff]   ;;  %v722_v46 = vld [vmem:[%s901_s4 + $0x84] ss:$16 sps:$4 sm:$0xff]   ;;  %v724_v47 = vld [vmem:[%s901_s4 + $0x8c] ss:$16 sps:$4 sm:$0xff]  }
  0x2e   : > { %439 = vmatpush1.bf16.msra.mxu0 %v708_v36  ;;  %480 = vmatpush1.bf16.msra.mxu1 %v709_v37  ;;  %v726_v48 = vld [vmem:[%s901_s4 + $0x80] ss:$16 sps:$4 sm:$0xff]   ;;  %v727_v49 = vld [vmem:[%s901_s4 + $0x88] ss:$16 sps:$4 sm:$0xff]   ;;  %v728_v50 = vld [vmem:[%s901_s4 + $0xa4] ss:$16 sps:$4 sm:$0xff]  }
  0x2f   : > { %440 = vmatprep.subr.bf16.mxu0 %v710_v38  ;;  %481 = vmatprep.subr.bf16.mxu1 %v712_v39  ;;  %v730_v51 = vld [vmem:[%s901_s4 + $0xac] ss:$16 sps:$4 sm:$0xff]   ;;  %v732_v52 = vld [vmem:[%s901_s4 + $0xa0] ss:$16 sps:$4 sm:$0xff]   ;;  %v733_v53 = vld [vmem:[%s901_s4 + $0xa8] ss:$16 sps:$4 sm:$0xff]  }
  0x30   : > { %v734_v54 = vld [vmem:[%s901_s4 + $0xc4] ss:$16 sps:$4 sm:$0x3f]   ;;  %v736_v55 = vld [vmem:[%s901_s4 + $0xcc] ss:$16 sps:$4 sm:$0x3f]  }
  0x31   : > { %v738_v56 = vld [vmem:[%s901_s4 + $0xc0] ss:$16 sps:$4 sm:$0x3f]   ;;  %v739_v57 = vld [vmem:[%s901_s4 + $0xc8] ss:$16 sps:$4 sm:$0x3f]  }
  0x32   : > { %441 = vmatpush1.bf16.msra.mxu0 %v714_v40  ;;  %482 = vmatpush1.bf16.msra.mxu1 %v715_v41  ;;  %v425_v58 = vsel %vm423_vm0, %v738_v56, 0  ;;  %v431_v59 = vsel %vm423_vm0, %v739_v57, 0  ;;  %s957_s7 = smov (!%p242_p8, %s629_s7), 15 }
  0x33   : > { %442 = vmatprep.subr.bf16.mxu0 %v716_v42  ;;  %483 = vmatprep.subr.bf16.mxu1 %v718_v43  ;;  %s630_s8 = sshll.u32 %s957_s7, 2 }
  0x34   : > { %s245_s11 = scalar_lea.vmem %s952_s3, %s630_s8 }
  0x36   : > { %443 = vmatpush1.bf16.msra.mxu0 %v720_v44  ;;  %484 = vmatpush1.bf16.msra.mxu1 %v721_v45 }
  0x37   : > { %444 = vmatprep.subr.bf16.mxu0 %v722_v46  ;;  %485 = vmatprep.subr.bf16.mxu1 %v724_v47 }
  0x3a   : > { %445 = vmatpush1.bf16.msra.mxu0 %v726_v48  ;;  %486 = vmatpush1.bf16.msra.mxu1 %v727_v49 }
  0x3b   : > { %446 = vmatprep.subr.bf16.mxu0 %v728_v50  ;;  %487 = vmatprep.subr.bf16.mxu1 %v730_v51 }
  0x3e   : > { %447 = vmatpush1.bf16.msra.mxu0 %v732_v52  ;;  %488 = vmatpush1.bf16.msra.mxu1 %v733_v53 }
  0x3f   : > { %659 = vmatprep.subr.msk.bf16.mxu0 %vm423_vm0, %v734_v54  ;;  %661 = vmatprep.subr.msk.bf16.mxu1 %vm423_vm0, %v736_v55 }
  0x42   : > { %449 = vmatpush1.bf16.msra.mxu0 %v425_v58  ;;  %490 = vmatpush1.bf16.msra.mxu1 %v431_v59 }
  0x45   : > { %660 = vmatmul.mubr.msk.bf16.vlgmr.msra.gmra.mrb[0].mxu0 %vm419_vm1, %v248_v60  ;;  %662 = vmatmul.mubr.msk.bf16.vlgmr.msra.gmra.mrb[0].mxu1 %vm419_vm1, %v248_v60 }
  0xa5   : > { %v281_v61 = vpop.permute.xlu0 %280 }
 0x118   : > { %v470_v62 = vpop.f32.mrb[0].mxu0  ;;  %v511_v63 = vpop.f32.mrb[0].mxu1 }
 0x119   : > { %v471_v0 = vadd.f32 %v470_v62, %v281_v61  ;;  %v512_v1 = vadd.f32 %v511_v63, %v281_v61  ;;  %v472_v2 = vpop.f32.mrb[1].mxu0  ;;  %v513_v3 = vpop.f32.mrb[1].mxu1 }
 0x11a   : > { %v473_v4 = vadd.f32 %v472_v2, %v281_v61  ;;  %v514_v5 = vadd.f32 %v513_v3, %v281_v61  ;;  %v474_v6 = vpop.f32.mrb[2].mxu0  ;;  %v515_v7 = vpop.f32.mrb[2].mxu1 }
 0x11b   : > { %v518_v8 = vsub.f32 0.0, %v471_v0  ;;  %v520_v9 = vsub.f32 0.0, %v512_v1  ;;  %v475_v10 = vpop.f32.mrb[3].mxu0  ;;  %v516_v11 = vpop.f32.mrb[3].mxu1 }
 0x11c   : > { %v519_v12 = vsub.f32 0.0, %v473_v4  ;;  %v521_v13 = vsub.f32 0.0, %v514_v5 }
 0x11d   : > { %v522_v14 = vmul.f32 1.442695, %v518_v8  ;;  %v526_v15 = vmul.f32 1.442695, %v520_v9 }
 0x11e   : > { %v524_v16 = vmul.f32 1.442695, %v519_v12  ;;  %v528_v17 = vmul.f32 1.442695, %v521_v13 }
 0x11f   : > { %740 = vpow2.f32 %v522_v14 }
 0x120   : > { %742 = vpow2.f32 %v526_v15 }
 0x121   : > { %744 = vpow2.f32 %v524_v16 }
 0x122   : > { %746 = vpow2.f32 %v528_v17 }
 0x129   : > { %v741_v18 = vpop.eup %740 }
 0x12a   : > { %v743_v19 = vpop.eup %742  ;;  %v530_v20 = vadd.f32 1.0, %v741_v18 }
 0x12b   : > { %v745_v21 = vpop.eup %744  ;;  %v532_v22 = vadd.f32 1.0, %v743_v19 }
 0x12c   : > { %v747_v23 = vpop.eup %746  ;;  %748 = vrcp.f32 %v530_v20  ;;  %v531_v24 = vadd.f32 1.0, %v745_v21 }
 0x12d   : > { %750 = vrcp.f32 %v532_v22  ;;  %v533_v25 = vadd.f32 1.0, %v747_v23 }
 0x12e   : > { %752 = vrcp.f32 %v531_v24 }
 0x12f   : > { %754 = vrcp.f32 %v533_v25 }
 0x136   : > { %v749_v26 = vpop.eup %748 }
 0x137   : > { %v751_v27 = vpop.eup %750  ;;  %v538_v28 = vmul.f32 %v749_v26, %v471_v0 }
 0x138   : > { %v753_v29 = vpop.eup %752  ;;  %v540_v30 = vmul.f32 %v751_v27, %v512_v1 }
 0x139   : > { %v755_v31 = vpop.eup %754  ;;  %v539_v32 = vmul.f32 %v753_v29, %v473_v4 }
 0x13a   : > { %v541_v33 = vmul.f32 %v755_v31, %v514_v5 }
 0x13b   : > { %v668_v34 = vpack.c.bf16 %v539_v32, %v538_v28 }
 0x13c   : > { %v669_v35 = vpack.c.bf16 %v541_v33, %v540_v30 }
 0x13d   : > { %558 = vst [vmem:[%s245_s11] sm:$0xff] %v668_v34 }
 0x13e   : > { %559 = vst [vmem:[%s245_s11 + $0x8] sm:$0xff] %v669_v35 }
 0x13f PF: > { %p10_p9 = scmp.ge.s32.totalorder %s818_s16, 6   ;;  %s953_s12 = smov %s774_s13 }
 0x140   : > { %s954_s13 = smov %s827_s19  ;;  %s955_s14 = smov %s818_s16 }
 0x141   :  { %12 = sbr.rel (!%p10_p9) target bundleno = 2 (0x2), region = 90 }

// kernel: _lambda_.36
= control target key start
LH: loop header
LB: loop body
LE: loop exit
PB: predicated region body
PF: predicated region fallthrough
CT: control target
= control target key end

     0   :  { %v421_v1 = vmov 0   ;;  %vm146_vm0 = vcmask 1043456   ;;  %vm142_vm1 = vcmask 588800   ;;  %s549_s0 = inlined_call_operand.vmem [shape: bf16[72,512], index: 0, kind: input, shape index: {}]   ;;  %s550_s2 = inlined_call_operand.vmem [shape: f32[16,1], index: 2, kind: input, shape index: {}]   ;;  %s551_s1 = inlined_call_operand.vmem [shape: bf16[16,72], index: 1, kind: input, shape index: {}]   ;;  %s552_s3 = inlined_call_operand.vmem [shape: bf16[16,512], index: 3, kind: output, shape index: {}]  }
   0x1   :  { %v360_v0 = vld [vmem:[%s549_s0 + $0x4] ss:$16 sps:$4 sm:$0xff]   ;;  %191 = vmatprep.mubr.bf16.mxu0 %v421_v1  ;;  %234 = vmatprep.mubr.bf16.mxu1 %v421_v1  ;;  %v362_v2 = vld [vmem:[%s549_s0 + $0xc] ss:$16 sps:$4 sm:$0xff]   ;;  %v364_v3 = vld [vmem:[%s549_s0] ss:$16 sps:$4 sm:$0xff]  }
   0x2   :  { %359 = vset.pattern.permute.xlu0 %v421_v1  ;;  %159 = vmatprep.subr.bf16.mxu0 %v360_v0  ;;  %v365_v4 = vld [vmem:[%s549_s0 + $0x8] ss:$16 sps:$4 sm:$0xff]   ;;  %v366_v5 = vld [vmem:[%s549_s0 + $0x24] ss:$16 sps:$4 sm:$0xff]   ;;  %v368_v6 = vld [vmem:[%s549_s0 + $0x2c] ss:$16 sps:$4 sm:$0xff]  }
   0x3   :  { %202 = vmatprep.subr.bf16.mxu1 %v362_v2  ;;  %160 = vmatpush1.bf16.msra.mxu0 %v364_v3  ;;  %v370_v7 = vld [vmem:[%s549_s0 + $0x20] ss:$16 sps:$4 sm:$0xff]   ;;  %v371_v8 = vld [vmem:[%s549_s0 + $0x28] ss:$16 sps:$4 sm:$0xff]   ;;  %v372_v9 = vld [vmem:[%s549_s0 + $0x44] ss:$16 sps:$4 sm:$0xff]  }
   0x4   :  { %203 = vmatpush1.bf16.msra.mxu1 %v365_v4  ;;  %161 = vmatprep.subr.bf16.mxu0 %v366_v5  ;;  %v374_v10 = vld [vmem:[%s549_s0 + $0x4c] ss:$16 sps:$4 sm:$0xff]   ;;  %v376_v11 = vld [vmem:[%s549_s0 + $0x40] ss:$16 sps:$4 sm:$0xff]   ;;  %v377_v12 = vld [vmem:[%s549_s0 + $0x48] ss:$16 sps:$4 sm:$0xff]  }
   0x5   :  { %204 = vmatprep.subr.bf16.mxu1 %v368_v6  ;;  %v378_v13 = vld [vmem:[%s549_s0 + $0x64] ss:$16 sps:$4 sm:$0xff]   ;;  %v380_v14 = vld [vmem:[%s549_s0 + $0x6c] ss:$16 sps:$4 sm:$0xff]   ;;  %v382_v17 = vld [vmem:[%s549_s0 + $0x60] ss:$16 sps:$4 sm:$0xff]  }
   0x6   :  { %v33_v15 = vld [vmem:[%s549_s0 + $0x80] sm:$0xff]  ;;  %v34_v16 = vld [vmem:[%s549_s0 + $0x88] sm:$0xff] }
   0x7   :  { %162 = vmatpush1.bf16.msra.mxu0 %v370_v7  ;;  %v383_v18 = vld [vmem:[%s549_s0 + $0x68] ss:$16 sps:$4 sm:$0xff]   ;;  %v343_v19 = vcombine.high %v33_v15, %v33_v15  ;;  %v35_v20 = vld [vmem:[%s550_s2] sm:$0xff]  ;;  %v345_v21 = vcombine.high %v34_v16, %v34_v16  ;;  %v342_v22 = vcombine.low %v33_v15, %v33_v15  ;;  %v344_v23 = vcombine.low %v34_v16, %v34_v16 }
   0x8   :  { %205 = vmatpush1.bf16.msra.mxu1 %v371_v8  ;;  %163 = vmatprep.subr.bf16.mxu0 %v372_v9  ;;  %v36_v24 = vld [vmem:[%s550_s2 + $0x8] sm:$0xff]  ;;  %v388_v27 = vld [vmem:[%s551_s1] sm:$0xff]  }
   0x9   :  { %206 = vmatprep.subr.bf16.mxu1 %v374_v10  ;;  %39 = vperm.xlu0 %359, %v35_v20   ;;  %v148_v25 = vsel %vm146_vm0, %v342_v22, 0  ;;  %v154_v26 = vsel %vm146_vm0, %v344_v23, 0 }
   0xb   :  { %164 = vmatpush1.bf16.msra.mxu0 %v376_v11 }
   0xc   :  { %207 = vmatpush1.bf16.msra.mxu1 %v377_v12  ;;  %165 = vmatprep.subr.bf16.mxu0 %v378_v13 }
   0xd   :  { %208 = vmatprep.subr.bf16.mxu1 %v380_v14  ;;  %44 = vperm.xlu0 %359, %v36_v24  }
   0xf   :  { %166 = vmatpush1.bf16.msra.mxu0 %v382_v17 }
  0x10   :  { %209 = vmatpush1.bf16.msra.mxu1 %v383_v18  ;;  %346 = vmatprep.subr.msk.bf16.mxu0 %vm146_vm0, %v343_v19 }
  0x11   :  { %348 = vmatprep.subr.msk.bf16.mxu1 %vm146_vm0, %v345_v21 }
  0x13   :  { %168 = vmatpush1.bf16.msra.mxu0 %v148_v25 }
  0x14   :  { %211 = vmatpush1.bf16.msra.mxu1 %v154_v26 }
  0x16   :  { %347 = vmatmul.mubr.msk.bf16.vlgmr.msra.gmra.mrb[0].mxu0 %vm142_vm1, %v388_v27 }
  0x17   :  { %349 = vmatmul.mubr.msk.bf16.vlgmr.msra.gmra.mrb[0].mxu1 %vm142_vm1, %v388_v27 }
  0x88   :  { %v40_v28 = vpop.permute.xlu0 %39 }
  0x8c   :  { %v45_v29 = vpop.permute.xlu0 %44 }
  0xe9   :  { %v193_v30 = vpop.f32.mrb[0].mxu0 }
  0xea   :  { %v236_v31 = vpop.f32.mrb[0].mxu1  ;;  %v505_v32 = vadd.f32 %v193_v30, %v40_v28  ;;  %v195_v34 = vpop.f32.mrb[1].mxu0 }
  0xeb   :  { %v507_v33 = vadd.f32 %v236_v31, %v40_v28  ;;  %v238_v35 = vpop.f32.mrb[1].mxu1  ;;  %v509_v36 = vadd.f32 %v195_v34, %v40_v28  ;;  %v197_v38 = vpop.f32.mrb[2].mxu0 }
  0xec   :  { %v511_v37 = vadd.f32 %v238_v35, %v40_v28  ;;  %v240_v39 = vpop.f32.mrb[2].mxu1  ;;  %v245_v40 = vsub.f32 0.0, %v505_v32  ;;  %v515_v42 = vadd.f32 %v197_v38, %v45_v29  ;;  %v199_v44 = vpop.f32.mrb[3].mxu0 }
  0xed   :  { %v247_v41 = vsub.f32 0.0, %v507_v33  ;;  %v517_v43 = vadd.f32 %v240_v39, %v45_v29  ;;  %v242_v45 = vpop.f32.mrb[3].mxu1  ;;  %v246_v46 = vsub.f32 0.0, %v509_v36  ;;  %v521_v48 = vadd.f32 %v199_v44, %v45_v29 }
  0xee   :  { %v248_v47 = vsub.f32 0.0, %v511_v37  ;;  %v523_v49 = vadd.f32 %v242_v45, %v45_v29  ;;  %v253_v50 = vmul.f32 1.442695, %v245_v40  ;;  %v249_v52 = vsub.f32 0.0, %v515_v42 }
  0xef   :  { %v257_v51 = vmul.f32 1.442695, %v247_v41  ;;  %v251_v53 = vsub.f32 0.0, %v517_v43  ;;  %v255_v54 = vmul.f32 1.442695, %v246_v46  ;;  %v250_v56 = vsub.f32 0.0, %v521_v48 }
  0xf0   :  { %v259_v55 = vmul.f32 1.442695, %v248_v47  ;;  %v252_v57 = vsub.f32 0.0, %v523_v49  ;;  %389 = vpow2.f32 %v253_v50  ;;  %v261_v58 = vmul.f32 1.442695, %v249_v52 }
  0xf1   :  { %391 = vpow2.f32 %v257_v51  ;;  %v265_v59 = vmul.f32 1.442695, %v251_v53  ;;  %v263_v60 = vmul.f32 1.442695, %v250_v56 }
  0xf2   :  { %393 = vpow2.f32 %v255_v54  ;;  %v267_v61 = vmul.f32 1.442695, %v252_v57 }
  0xf3   :  { %395 = vpow2.f32 %v259_v55 }
  0xf4   :  { %397 = vpow2.f32 %v261_v58 }
  0xf5   :  { %399 = vpow2.f32 %v265_v59 }
  0xf6   :  { %401 = vpow2.f32 %v263_v60 }
  0xf7   :  { %403 = vpow2.f32 %v267_v61 }
  0xfa   :  { %v390_v62 = vpop.eup %389 }
  0xfb   :  { %v392_v63 = vpop.eup %391  ;;  %v269_v0 = vadd.f32 1.0, %v390_v62 }
  0xfc   :  { %v394_v1 = vpop.eup %393  ;;  %v271_v2 = vadd.f32 1.0, %v392_v63 }
  0xfd   :  { %v396_v3 = vpop.eup %395  ;;  %405 = vrcp.f32 %v269_v0  ;;  %v270_v4 = vadd.f32 1.0, %v394_v1 }
  0xfe   :  { %v398_v5 = vpop.eup %397  ;;  %407 = vrcp.f32 %v271_v2  ;;  %v272_v6 = vadd.f32 1.0, %v396_v3 }
  0xff   :  { %v400_v7 = vpop.eup %399  ;;  %409 = vrcp.f32 %v270_v4  ;;  %v273_v8 = vadd.f32 1.0, %v398_v5 }
 0x100   :  { %v402_v9 = vpop.eup %401  ;;  %411 = vrcp.f32 %v272_v6  ;;  %v275_v10 = vadd.f32 1.0, %v400_v7 }
 0x101   :  { %v404_v11 = vpop.eup %403  ;;  %413 = vrcp.f32 %v273_v8  ;;  %v274_v12 = vadd.f32 1.0, %v402_v9 }
 0x102   :  { %415 = vrcp.f32 %v275_v10  ;;  %v276_v13 = vadd.f32 1.0, %v404_v11 }
 0x103   :  { %417 = vrcp.f32 %v274_v12 }
 0x104   :  { %419 = vrcp.f32 %v276_v13 }
 0x107   :  { %v406_v14 = vpop.eup %405 }
 0x108   :  { %v408_v15 = vpop.eup %407  ;;  %v285_v16 = vmul.f32 %v406_v14, %v505_v32 }
 0x109   :  { %v410_v17 = vpop.eup %409  ;;  %v287_v18 = vmul.f32 %v408_v15, %v507_v33 }
 0x10a   :  { %v412_v19 = vpop.eup %411  ;;  %v286_v20 = vmul.f32 %v410_v17, %v509_v36 }
 0x10b   :  { %v414_v21 = vpop.eup %413  ;;  %v288_v22 = vmul.f32 %v412_v19, %v511_v37 }
 0x10c   :  { %v416_v23 = vpop.eup %415  ;;  %v354_v24 = vpack.c.bf16 %v286_v20, %v285_v16  ;;  %v289_v25 = vmul.f32 %v414_v21, %v515_v42 }
 0x10d   :  { %v418_v26 = vpop.eup %417  ;;  %v355_v27 = vpack.c.bf16 %v288_v22, %v287_v18  ;;  %v291_v28 = vmul.f32 %v416_v23, %v517_v43 }
 0x10e   :  { %v420_v29 = vpop.eup %419  ;;  %317 = vst [vmem:[%s552_s3] sm:$0xff] %v354_v24  ;;  %v290_v30 = vmul.f32 %v418_v26, %v521_v48 }
 0x10f   :  { %318 = vst [vmem:[%s552_s3 + $0x8] sm:$0xff] %v355_v27  ;;  %v292_v31 = vmul.f32 %v420_v29, %v523_v49 }
 0x110   :  { %v356_v32 = vpack.c.bf16 %v290_v30, %v289_v25 }
 0x111   :  { %v357_v33 = vpack.c.bf16 %v292_v31, %v291_v28 }
 0x112   :  { %319 = vst [vmem:[%s552_s3 + $0x10] sm:$0xff] %v356_v32 }
 0x113   :  { %320 = vst [vmem:[%s552_s3 + $0x18] sm:$0xff] %v357_v33 }

// kernel: _lambda_.37
= control target key start
LH: loop header
LB: loop body
LE: loop exit
PB: predicated region body
PF: predicated region fallthrough
CT: control target
= control target key end

     0   :  { %v212_v1 = vmov 0   ;;  %vm46_vm0 = vcmask 130048   ;;  %s257_s0 = inlined_call_operand.vmem [shape: bf16[16,512], index: 0, kind: input, shape index: {}]   ;;  %s258_s2 = inlined_call_operand.vmem [shape: f32[8,1], index: 2, kind: input, shape index: {}]   ;;  %s259_s1 = inlined_call_operand.vmem [shape: bf16[8,16], index: 1, kind: input, shape index: {}]   ;;  %s260_s3 = inlined_call_operand.vmem [shape: bf16[8,512], index: 3, kind: output, shape index: {}]  }
   0x1   :  { %v190_v0 = vld [vmem:[%s257_s0 + $0x4] ss:$16 sps:$4 sm:$0xff]   ;;  %82 = vmatprep.mubr.bf16.mxu0 %v212_v1  ;;  %123 = vmatprep.mubr.bf16.mxu1 %v212_v1  ;;  %v192_v2 = vld [vmem:[%s257_s0 + $0xc] ss:$16 sps:$4 sm:$0xff]   ;;  %v194_v3 = vld [vmem:[%s257_s0] ss:$16 sps:$4 sm:$0xff]  }
   0x2   :  { %189 = vset.pattern.permute.xlu0 %v212_v1  ;;  %50 = vmatprep.subr.bf16.mxu0 %v190_v0  ;;  %v195_v4 = vld [vmem:[%s257_s0 + $0x8] ss:$16 sps:$4 sm:$0xff]   ;;  %v20_v5 = vld [vmem:[%s258_s2] sm:$0xff] }
   0x3   :  { %91 = vmatprep.subr.bf16.mxu1 %v192_v2  ;;  %51 = vmatpush1.bf16.msra.mxu0 %v194_v3  ;;  %v15_v6 = vld [vmem:[%s259_s1] sm:$0xf] }
   0x4   :  { %92 = vmatpush1.bf16.msra.mxu1 %v195_v4  ;;  %23 = vperm.xlu0 %189, %v20_v5  }
   0x6   :  { %182 = vmatmul.mubr.msk.bf16.vlgmr.msra.gmra.mrb[0].mxu0 %vm46_vm0, %v15_v6 }
   0x7   :  { %183 = vmatmul.mubr.msk.bf16.vlgmr.msra.gmra.mrb[0].mxu1 %vm46_vm0, %v15_v6 }
  0x83   :  { %v24_v7 = vpop.permute.xlu0 %23 }
  0xd9   :  { %v84_v8 = vpop.f32.mrb[0].mxu0 }
  0xda   :  { %v125_v9 = vpop.f32.mrb[0].mxu1  ;;  %v85_v10 = vadd.f32 %v84_v8, %v24_v7  ;;  %v86_v12 = vpop.f32.mrb[1].mxu0 }
  0xdb   :  { %v126_v11 = vadd.f32 %v125_v9, %v24_v7  ;;  %v127_v13 = vpop.f32.mrb[1].mxu1  ;;  %v87_v14 = vadd.f32 %v86_v12, %v24_v7  ;;  %v88_v16 = vpop.f32.mrb[2].mxu0 }
  0xdc   :  { %v128_v15 = vadd.f32 %v127_v13, %v24_v7  ;;  %v129_v17 = vpop.f32.mrb[2].mxu1  ;;  %v132_v18 = vsub.f32 0.0, %v85_v10  ;;  %v89_v20 = vpop.f32.mrb[3].mxu0 }
  0xdd   :  { %v134_v19 = vsub.f32 0.0, %v126_v11  ;;  %v130_v21 = vpop.f32.mrb[3].mxu1  ;;  %v133_v22 = vsub.f32 0.0, %v87_v14 }
  0xde   :  { %v135_v23 = vsub.f32 0.0, %v128_v15  ;;  %v136_v24 = vmul.f32 1.442695, %v132_v18 }
  0xdf   :  { %v140_v25 = vmul.f32 1.442695, %v134_v19  ;;  %v138_v26 = vmul.f32 1.442695, %v133_v22 }
  0xe0   :  { %v142_v27 = vmul.f32 1.442695, %v135_v23  ;;  %196 = vpow2.f32 %v136_v24 }
  0xe1   :  { %198 = vpow2.f32 %v140_v25 }
  0xe2   :  { %200 = vpow2.f32 %v138_v26 }
  0xe3   :  { %202 = vpow2.f32 %v142_v27 }
  0xea   :  { %v197_v28 = vpop.eup %196 }
  0xeb   :  { %v199_v29 = vpop.eup %198  ;;  %v144_v30 = vadd.f32 1.0, %v197_v28 }
  0xec   :  { %v201_v31 = vpop.eup %200  ;;  %v146_v32 = vadd.f32 1.0, %v199_v29 }
  0xed   :  { %v203_v33 = vpop.eup %202  ;;  %204 = vrcp.f32 %v144_v30  ;;  %v145_v34 = vadd.f32 1.0, %v201_v31 }
  0xee   :  { %206 = vrcp.f32 %v146_v32  ;;  %v147_v35 = vadd.f32 1.0, %v203_v33 }
  0xef   :  { %208 = vrcp.f32 %v145_v34 }
  0xf0   :  { %210 = vrcp.f32 %v147_v35 }
  0xf7   :  { %v205_v36 = vpop.eup %204 }
  0xf8   :  { %v207_v37 = vpop.eup %206  ;;  %v152_v38 = vmul.f32 %v205_v36, %v85_v10 }
  0xf9   :  { %v209_v39 = vpop.eup %208  ;;  %v154_v40 = vmul.f32 %v207_v37, %v126_v11 }
  0xfa   :  { %v211_v41 = vpop.eup %210  ;;  %v153_v42 = vmul.f32 %v209_v39, %v87_v14 }
  0xfb   :  { %v155_v43 = vmul.f32 %v211_v41, %v128_v15 }
  0xfc   :  { %v186_v44 = vpack.c.bf16 %v153_v42, %v152_v38 }
  0xfd   :  { %v187_v45 = vpack.c.bf16 %v155_v43, %v154_v40 }
  0xfe   :  { %172 = vst [vmem:[%s260_s3] sm:$0xff] %v186_v44 }
  0xff   :  { %173 = vst [vmem:[%s260_s3 + $0x8] sm:$0xff] %v187_v45 }

// kernel: _lambda_.39
= control target key start
LH: loop header
LB: loop body
LE: loop exit
PB: predicated region body
PF: predicated region fallthrough
CT: control target
= control target key end

     0   :  { %vm38_vm0 = vcmask 1043456   ;;  %v213_v2 = vmov 0   ;;  %vm34_vm1 = vcmask 64512   ;;  %s256_s0 = inlined_call_operand.vmem [shape: bf16[8,512], index: 0, kind: input, shape index: {}]   ;;  %s257_s2 = inlined_call_operand.vmem [shape: f32[8,1], index: 2, kind: input, shape index: {}]   ;;  %s258_s1 = inlined_call_operand.vmem [shape: bf16[8,8], index: 1, kind: input, shape index: {}]   ;;  %s259_s3 = inlined_call_operand.vmem [shape: bf16[8,512], index: 3, kind: output, shape index: {}]  }
   0x1   :  { %v16_v0 = vld [vmem:[%s256_s0] sm:$0xff]  ;;  %v17_v1 = vld [vmem:[%s256_s0 + $0x8] sm:$0xff]  ;;  %83 = vmatprep.mubr.bf16.mxu0 %v213_v2  ;;  %124 = vmatprep.mubr.bf16.mxu1 %v213_v2 }
   0x2   :  { %v180_v3 = vcombine.high %v16_v0, %v16_v0  ;;  %v182_v4 = vcombine.high %v17_v1, %v17_v1  ;;  %v179_v5 = vcombine.low %v16_v0, %v16_v0  ;;  %v181_v6 = vcombine.low %v17_v1, %v17_v1  ;;  %192 = vset.pattern.permute.xlu0 %v213_v2  ;;  %v18_v7 = vld [vmem:[%s257_s2] sm:$0xff] }
   0x3   :  { %21 = vperm.xlu0 %192, %v18_v7   ;;  %v15_v10 = vld [vmem:[%s258_s1] sm:$0xf] }
   0x4   :  { %183 = vmatprep.subr.msk.bf16.mxu0 %vm38_vm0, %v180_v3  ;;  %185 = vmatprep.subr.msk.bf16.mxu1 %vm38_vm0, %v182_v4  ;;  %v40_v8 = vsel %vm38_vm0, %v179_v5, 0  ;;  %v46_v9 = vsel %vm38_vm0, %v181_v6, 0 }
   0x5   :  { %52 = vmatpush1.bf16.msra.mxu0 %v40_v8  ;;  %93 = vmatpush1.bf16.msra.mxu1 %v46_v9 }
   0x8   :  { %184 = vmatmul.mubr.msk.bf16.vlgmr.msra.gmra.mrb[0].mxu0 %vm34_vm1, %v15_v10  ;;  %186 = vmatmul.mubr.msk.bf16.vlgmr.msra.gmra.mrb[0].mxu1 %vm34_vm1, %v15_v10 }
  0x82   :  { %v22_v11 = vpop.permute.xlu0 %21 }
  0xdb   :  { %v85_v12 = vpop.f32.mrb[0].mxu0  ;;  %v126_v13 = vpop.f32.mrb[0].mxu1 }
  0xdc   :  { %v86_v14 = vadd.f32 %v85_v12, %v22_v11  ;;  %v127_v15 = vadd.f32 %v126_v13, %v22_v11  ;;  %v87_v16 = vpop.f32.mrb[1].mxu0  ;;  %v128_v17 = vpop.f32.mrb[1].mxu1 }
  0xdd   :  { %v88_v18 = vadd.f32 %v87_v16, %v22_v11  ;;  %v129_v19 = vadd.f32 %v128_v17, %v22_v11  ;;  %v89_v20 = vpop.f32.mrb[2].mxu0  ;;  %v130_v21 = vpop.f32.mrb[2].mxu1 }
  0xde   :  { %v133_v22 = vsub.f32 0.0, %v86_v14  ;;  %v135_v23 = vsub.f32 0.0, %v127_v15  ;;  %v90_v24 = vpop.f32.mrb[3].mxu0  ;;  %v131_v25 = vpop.f32.mrb[3].mxu1 }
  0xdf   :  { %v134_v26 = vsub.f32 0.0, %v88_v18  ;;  %v136_v27 = vsub.f32 0.0, %v129_v19 }
  0xe0   :  { %v137_v28 = vmul.f32 1.442695, %v133_v22  ;;  %v141_v29 = vmul.f32 1.442695, %v135_v23 }
  0xe1   :  { %v139_v30 = vmul.f32 1.442695, %v134_v26  ;;  %v143_v31 = vmul.f32 1.442695, %v136_v27 }
  0xe2   :  { %197 = vpow2.f32 %v137_v28 }
  0xe3   :  { %199 = vpow2.f32 %v141_v29 }
  0xe4   :  { %201 = vpow2.f32 %v139_v30 }
  0xe5   :  { %203 = vpow2.f32 %v143_v31 }
  0xec   :  { %v198_v32 = vpop.eup %197 }
  0xed   :  { %v200_v33 = vpop.eup %199  ;;  %v145_v34 = vadd.f32 1.0, %v198_v32 }
  0xee   :  { %v202_v35 = vpop.eup %201  ;;  %v147_v36 = vadd.f32 1.0, %v200_v33 }
  0xef   :  { %v204_v37 = vpop.eup %203  ;;  %205 = vrcp.f32 %v145_v34  ;;  %v146_v38 = vadd.f32 1.0, %v202_v35 }
  0xf0   :  { %207 = vrcp.f32 %v147_v36  ;;  %v148_v39 = vadd.f32 1.0, %v204_v37 }
  0xf1   :  { %209 = vrcp.f32 %v146_v38 }
  0xf2   :  { %211 = vrcp.f32 %v148_v39 }
  0xf9   :  { %v206_v40 = vpop.eup %205 }
  0xfa   :  { %v208_v41 = vpop.eup %207  ;;  %v153_v42 = vmul.f32 %v206_v40, %v86_v14 }
  0xfb   :  { %v210_v43 = vpop.eup %209  ;;  %v155_v44 = vmul.f32 %v208_v41, %v127_v15 }
  0xfc   :  { %v212_v45 = vpop.eup %211  ;;  %v154_v46 = vmul.f32 %v210_v43, %v88_v18 }
  0xfd   :  { %v156_v47 = vmul.f32 %v212_v45, %v129_v19 }
  0xfe   :  { %v189_v48 = vpack.c.bf16 %v154_v46, %v153_v42 }
  0xff   :  { %v190_v49 = vpack.c.bf16 %v156_v47, %v155_v44 }
 0x100   :  { %173 = vst [vmem:[%s259_s3] sm:$0xff] %v189_v48 }
 0x101   :  { %174 = vst [vmem:[%s259_s3 + $0x8] sm:$0xff] %v190_v49 }

// kernel: _lambda_.40
= control target key start
LH: loop header
LB: loop body
LE: loop exit
PB: predicated region body
PF: predicated region fallthrough
CT: control target
= control target key end

     0   :  { %v362_v1 = vmov 0   ;;  %vm137_vm0 = vcmask 1043456   ;;  %vm133_vm1 = vcmask 588800   ;;  %s460_s0 = inlined_call_operand.vmem [shape: bf16[72,512], index: 0, kind: input, shape index: {}]   ;;  %s461_s2 = inlined_call_operand.vmem [shape: f32[8,1], index: 2, kind: input, shape index: {}]   ;;  %s462_s1 = inlined_call_operand.vmem [shape: bf16[8,72], index: 1, kind: input, shape index: {}]   ;;  %s463_s3 = inlined_call_operand.vmem [shape: bf16[8,512], index: 3, kind: input, shape index: {}]   ;;  %s464_s4 = inlined_call_operand.vmem [shape: bf16[8,512], index: 4, kind: output, shape index: {}]  }
   0x1   :  { %v318_v0 = vld [vmem:[%s460_s0 + $0x4] ss:$16 sps:$4 sm:$0xff]   ;;  %182 = vmatprep.mubr.bf16.mxu0 %v362_v1  ;;  %223 = vmatprep.mubr.bf16.mxu1 %v362_v1  ;;  %v320_v2 = vld [vmem:[%s460_s0 + $0xc] ss:$16 sps:$4 sm:$0xff]   ;;  %v322_v3 = vld [vmem:[%s460_s0] ss:$16 sps:$4 sm:$0xff]  }
   0x2   :  { %317 = vset.pattern.permute.xlu0 %v362_v1  ;;  %150 = vmatprep.subr.bf16.mxu0 %v318_v0  ;;  %v323_v4 = vld [vmem:[%s460_s0 + $0x8] ss:$16 sps:$4 sm:$0xff]   ;;  %v324_v5 = vld [vmem:[%s460_s0 + $0x24] ss:$16 sps:$4 sm:$0xff]   ;;  %v326_v6 = vld [vmem:[%s460_s0 + $0x2c] ss:$16 sps:$4 sm:$0xff]  }
   0x3   :  { %191 = vmatprep.subr.bf16.mxu1 %v320_v2  ;;  %151 = vmatpush1.bf16.msra.mxu0 %v322_v3  ;;  %v328_v7 = vld [vmem:[%s460_s0 + $0x20] ss:$16 sps:$4 sm:$0xff]   ;;  %v329_v8 = vld [vmem:[%s460_s0 + $0x28] ss:$16 sps:$4 sm:$0xff]   ;;  %v330_v9 = vld [vmem:[%s460_s0 + $0x44] ss:$16 sps:$4 sm:$0xff]  }
   0x4   :  { %192 = vmatpush1.bf16.msra.mxu1 %v323_v4  ;;  %152 = vmatprep.subr.bf16.mxu0 %v324_v5  ;;  %v332_v10 = vld [vmem:[%s460_s0 + $0x4c] ss:$16 sps:$4 sm:$0xff]   ;;  %v334_v11 = vld [vmem:[%s460_s0 + $0x40] ss:$16 sps:$4 sm:$0xff]   ;;  %v335_v12 = vld [vmem:[%s460_s0 + $0x48] ss:$16 sps:$4 sm:$0xff]  }
   0x5   :  { %193 = vmatprep.subr.bf16.mxu1 %v326_v6  ;;  %v336_v13 = vld [vmem:[%s460_s0 + $0x64] ss:$16 sps:$4 sm:$0xff]   ;;  %v338_v14 = vld [vmem:[%s460_s0 + $0x6c] ss:$16 sps:$4 sm:$0xff]   ;;  %v340_v18 = vld [vmem:[%s460_s0 + $0x60] ss:$16 sps:$4 sm:$0xff]  }
   0x6   :  { %v35_v15 = vld [vmem:[%s460_s0 + $0x80] sm:$0xff]  ;;  %v36_v16 = vld [vmem:[%s460_s0 + $0x88] sm:$0xff] }
   0x7   :  { %153 = vmatpush1.bf16.msra.mxu0 %v328_v7  ;;  %v37_v17 = vld [vmem:[%s461_s2] sm:$0xff]  ;;  %v341_v19 = vld [vmem:[%s460_s0 + $0x68] ss:$16 sps:$4 sm:$0xff]   ;;  %v305_v20 = vcombine.high %v35_v15, %v35_v15  ;;  %v307_v21 = vcombine.high %v36_v16, %v36_v16  ;;  %v304_v22 = vcombine.low %v35_v15, %v35_v15  ;;  %v306_v23 = vcombine.low %v36_v16, %v36_v16 }
   0x8   :  { %194 = vmatpush1.bf16.msra.mxu1 %v329_v8  ;;  %154 = vmatprep.subr.bf16.mxu0 %v330_v9  ;;  %v18_v26 = vld [vmem:[%s462_s1] sm:$0xf]  ;;  %v257_v57 = vld [vmem:[%s463_s3 + $0x8] sm:$0xff] }
   0x9   :  { %195 = vmatprep.subr.bf16.mxu1 %v332_v10  ;;  %40 = vperm.xlu0 %317, %v37_v17   ;;  %v139_v24 = vsel %vm137_vm0, %v304_v22, 0  ;;  %v145_v25 = vsel %vm137_vm0, %v306_v23, 0  ;;  %v256_v56 = vld [vmem:[%s463_s3] sm:$0xff]  ;;  %v260_v60 = vunpack.c.l.bf16 %v257_v57  ;;  %v261_v2 = vunpack.c.h.bf16 %v257_v57 }
   0xa   :  { %v258_v58 = vunpack.c.l.bf16 %v256_v56  ;;  %v259_v63 = vunpack.c.h.bf16 %v256_v56 }
   0xb   :  { %155 = vmatpush1.bf16.msra.mxu0 %v334_v11 }
   0xc   :  { %196 = vmatpush1.bf16.msra.mxu1 %v335_v12  ;;  %156 = vmatprep.subr.bf16.mxu0 %v336_v13 }
   0xd   :  { %197 = vmatprep.subr.bf16.mxu1 %v338_v14 }
   0xf   :  { %157 = vmatpush1.bf16.msra.mxu0 %v340_v18 }
  0x10   :  { %198 = vmatpush1.bf16.msra.mxu1 %v341_v19  ;;  %308 = vmatprep.subr.msk.bf16.mxu0 %vm137_vm0, %v305_v20 }
  0x11   :  { %310 = vmatprep.subr.msk.bf16.mxu1 %vm137_vm0, %v307_v21 }
  0x13   :  { %159 = vmatpush1.bf16.msra.mxu0 %v139_v24 }
  0x14   :  { %200 = vmatpush1.bf16.msra.mxu1 %v145_v25 }
  0x16   :  { %309 = vmatmul.mubr.msk.bf16.vlgmr.msra.gmra.mrb[0].mxu0 %vm133_vm1, %v18_v26 }
  0x17   :  { %311 = vmatmul.mubr.msk.bf16.vlgmr.msra.gmra.mrb[0].mxu1 %vm133_vm1, %v18_v26 }
  0x88   :  { %v41_v27 = vpop.permute.xlu0 %40 }
  0xe9   :  { %v184_v28 = vpop.f32.mrb[0].mxu0 }
  0xea   :  { %v225_v29 = vpop.f32.mrb[0].mxu1  ;;  %v185_v30 = vadd.f32 %v184_v28, %v41_v27  ;;  %v186_v32 = vpop.f32.mrb[1].mxu0 }
  0xeb   :  { %v226_v31 = vadd.f32 %v225_v29, %v41_v27  ;;  %v227_v33 = vpop.f32.mrb[1].mxu1  ;;  %v187_v34 = vadd.f32 %v186_v32, %v41_v27  ;;  %v188_v36 = vpop.f32.mrb[2].mxu0 }
  0xec   :  { %v228_v35 = vadd.f32 %v227_v33, %v41_v27  ;;  %v229_v37 = vpop.f32.mrb[2].mxu1  ;;  %v232_v38 = vsub.f32 0.0, %v185_v30  ;;  %v189_v40 = vpop.f32.mrb[3].mxu0 }
  0xed   :  { %v234_v39 = vsub.f32 0.0, %v226_v31  ;;  %v230_v41 = vpop.f32.mrb[3].mxu1  ;;  %v233_v42 = vsub.f32 0.0, %v187_v34 }
  0xee   :  { %v235_v43 = vsub.f32 0.0, %v228_v35  ;;  %v236_v44 = vmul.f32 1.442695, %v232_v38 }
  0xef   :  { %v240_v45 = vmul.f32 1.442695, %v234_v39  ;;  %v238_v46 = vmul.f32 1.442695, %v233_v42 }
  0xf0   :  { %v242_v47 = vmul.f32 1.442695, %v235_v43  ;;  %346 = vpow2.f32 %v236_v44 }
  0xf1   :  { %348 = vpow2.f32 %v240_v45 }
  0xf2   :  { %350 = vpow2.f32 %v238_v46 }
  0xf3   :  { %352 = vpow2.f32 %v242_v47 }
  0xfa   :  { %v347_v48 = vpop.eup %346 }
  0xfb   :  { %v349_v49 = vpop.eup %348  ;;  %v244_v50 = vadd.f32 1.0, %v347_v48 }
  0xfc   :  { %v351_v51 = vpop.eup %350  ;;  %v246_v52 = vadd.f32 1.0, %v349_v49 }
  0xfd   :  { %v353_v53 = vpop.eup %352  ;;  %354 = vrcp.f32 %v244_v50  ;;  %v245_v54 = vadd.f32 1.0, %v351_v51 }
  0xfe   :  { %356 = vrcp.f32 %v246_v52  ;;  %v247_v55 = vadd.f32 1.0, %v353_v53 }
  0xff   :  { %358 = vrcp.f32 %v245_v54 }
 0x100   :  { %360 = vrcp.f32 %v247_v55 }
 0x107   :  { %v355_v59 = vpop.eup %354 }
 0x108   :  { %v357_v61 = vpop.eup %356  ;;  %v252_v62 = vmul.f32 %v355_v59, %v185_v30 }
 0x109   :  { %v359_v0 = vpop.eup %358  ;;  %v254_v1 = vmul.f32 %v357_v61, %v226_v31 }
 0x10a   :  { %v361_v3 = vpop.eup %360  ;;  %v262_v4 = vadd.f32 %v258_v58, %v252_v62  ;;  %v253_v5 = vmul.f32 %v359_v0, %v187_v34 }
 0x10b   :  { %v264_v6 = vadd.f32 %v260_v60, %v254_v1  ;;  %v255_v7 = vmul.f32 %v361_v3, %v228_v35 }
 0x10c   :  { %v263_v8 = vadd.f32 %v259_v63, %v253_v5 }
 0x10d   :  { %v265_v9 = vadd.f32 %v261_v2, %v255_v7 }
 0x10e   :  { %v314_v10 = vpack.c.bf16 %v263_v8, %v262_v4 }
 0x10f   :  { %v315_v11 = vpack.c.bf16 %v265_v9, %v264_v6 }
 0x110   :  { %282 = vst [vmem:[%s464_s4] sm:$0xff] %v314_v10 }
 0x111   :  { %283 = vst [vmem:[%s464_s4 + $0x8] sm:$0xff] %v315_v11 }

// kernel: _lambda_.41
= control target key start
LH: loop header
LB: loop body
LE: loop exit
PB: predicated region body
PF: predicated region fallthrough
CT: control target
= control target key end

     0   :  { %vm48_vm0 = vcmask 1043456   ;;  %v441_v2 = vmov 0   ;;  %vm44_vm1 = vcmask 64512   ;;  %s552_s1 = inlined_call_operand.vmem [shape: bf16[8,512], index: 1, kind: input, shape index: {}]   ;;  %s553_s3 = inlined_call_operand.vmem [shape: bf16[16,8], index: 3, kind: input, shape index: {}]   ;;  %s554_s0 = inlined_call_operand.vmem [shape: bf16[8,512], index: 0, kind: input, shape index: {}]   ;;  %s555_s4 = inlined_call_operand.vmem [shape: f32[16,1], index: 4, kind: input, shape index: {}]   ;;  %s556_s2 = inlined_call_operand.vmem [shape: bf16[16,8], index: 2, kind: input, shape index: {}]   ;;  %s557_s5 = inlined_call_operand.vmem [shape: bf16[16,512], index: 5, kind: output, shape index: {}]  }
   0x1   :  { %v27_v0 = vld [vmem:[%s552_s1] sm:$0xff]  ;;  %v28_v1 = vld [vmem:[%s552_s1 + $0x8] sm:$0xff]  ;;  %93 = vmatprep.mubr.bf16.mxu0 %v441_v2  ;;  %136 = vmatprep.mubr.bf16.mxu1 %v441_v2 }
   0x2   :  { %v365_v3 = vcombine.high %v27_v0, %v27_v0  ;;  %v367_v4 = vcombine.high %v28_v1, %v28_v1  ;;  %v364_v5 = vcombine.low %v27_v0, %v27_v0  ;;  %v366_v6 = vcombine.low %v28_v1, %v28_v1  ;;  %v23_v7 = vld [vmem:[%s554_s0] sm:$0xff]  ;;  %398 = vset.pattern.permute.xlu0 %v441_v2  ;;  %v24_v9 = vld [vmem:[%s554_s0 + $0x8] sm:$0xff] }
   0x3   :  { %v374_v8 = vcombine.high %v23_v7, %v23_v7  ;;  %v373_v10 = vcombine.low %v23_v7, %v23_v7  ;;  %v403_v13 = vld [vmem:[%s553_s3] sm:$0xff]   ;;  %v376_v14 = vcombine.high %v24_v9, %v24_v9  ;;  %v375_v15 = vcombine.low %v24_v9, %v24_v9  ;;  %v264_v19 = vld [vmem:[%s555_s4 + $0x8] sm:$0xff] }
   0x4   :  { %368 = vmatprep.subr.msk.bf16.mxu0 %vm48_vm0, %v365_v3  ;;  %370 = vmatprep.subr.msk.bf16.mxu1 %vm48_vm0, %v367_v4  ;;  %v50_v11 = vsel %vm48_vm0, %v364_v5, 0  ;;  %v56_v12 = vsel %vm48_vm0, %v366_v6, 0  ;;  %v263_v16 = vld [vmem:[%s555_s4] sm:$0xff] }
   0x5   :  { %62 = vmatpush1.bf16.msra.mxu0 %v50_v11  ;;  %105 = vmatpush1.bf16.msra.mxu1 %v56_v12  ;;  %v166_v17 = vsel %vm48_vm0, %v373_v10, 0  ;;  %v172_v18 = vsel %vm48_vm0, %v375_v15, 0  ;;  %v408_v20 = vld [vmem:[%s556_s2] sm:$0xff]  }
   0x6   :  { %377 = vmatprep.subr.msk.bf16.mxu0 %vm48_vm0, %v374_v8  ;;  %379 = vmatprep.subr.msk.bf16.mxu1 %vm48_vm0, %v376_v14 }
   0x7   :  { %267 = vperm.xlu0 %398, %v263_v16  }
   0x8   :  { %369 = vmatmul.mubr.msk.bf16.vlgmr.msra.gmra.mrb[0].mxu0 %vm44_vm1, %v403_v13  ;;  %371 = vmatmul.mubr.msk.bf16.vlgmr.msra.gmra.mrb[0].mxu1 %vm44_vm1, %v403_v13 }
   0x9   :  { %178 = vmatpush1.bf16.msra.mxu0 %v166_v17  ;;  %221 = vmatpush1.bf16.msra.mxu1 %v172_v18 }
   0xa   :  { %209 = vmatprep.mubr.bf16.mxu0 %v441_v2  ;;  %252 = vmatprep.mubr.bf16.mxu1 %v441_v2 }
   0xb   :  { %272 = vperm.xlu0 %398, %v264_v19  }
  0x14   :  { %378 = vmatmul.mubr.msk.bf16.vlgmr.msra.gmra.mrb[0].mxu0 %vm44_vm1, %v408_v20  ;;  %380 = vmatmul.mubr.msk.bf16.vlgmr.msra.gmra.mrb[0].mxu1 %vm44_vm1, %v408_v20 }
  0x86   :  { %v268_v21 = vpop.permute.xlu0 %267 }
  0x8a   :  { %v273_v22 = vpop.permute.xlu0 %272 }
  0xe7   :  { %v211_v23 = vpop.f32.mrb[0].mxu0  ;;  %v254_v24 = vpop.f32.mrb[0].mxu1 }
  0xe8   :  { %v508_v25 = vadd.f32 %v268_v21, %v211_v23  ;;  %v510_v26 = vadd.f32 %v268_v21, %v254_v24  ;;  %v213_v27 = vpop.f32.mrb[1].mxu0  ;;  %v256_v28 = vpop.f32.mrb[1].mxu1 }
  0xe9   :  { %v512_v29 = vadd.f32 %v268_v21, %v213_v27  ;;  %v514_v30 = vadd.f32 %v268_v21, %v256_v28  ;;  %v215_v31 = vpop.f32.mrb[2].mxu0  ;;  %v258_v32 = vpop.f32.mrb[2].mxu1 }
  0xea   :  { %v283_v33 = vsub.f32 0.0, %v508_v25  ;;  %v285_v34 = vsub.f32 0.0, %v510_v26  ;;  %v518_v35 = vadd.f32 %v273_v22, %v215_v31  ;;  %v520_v36 = vadd.f32 %v273_v22, %v258_v32  ;;  %v217_v37 = vpop.f32.mrb[3].mxu0  ;;  %v260_v38 = vpop.f32.mrb[3].mxu1 }
  0xeb   :  { %v284_v39 = vsub.f32 0.0, %v512_v29  ;;  %v286_v40 = vsub.f32 0.0, %v514_v30  ;;  %v524_v41 = vadd.f32 %v273_v22, %v217_v37  ;;  %v526_v42 = vadd.f32 %v273_v22, %v260_v38 }
  0xec   :  { %v291_v43 = vmul.f32 1.442695, %v283_v33  ;;  %v295_v44 = vmul.f32 1.442695, %v285_v34  ;;  %v287_v45 = vsub.f32 0.0, %v518_v35  ;;  %v289_v46 = vsub.f32 0.0, %v520_v36 }
  0xed   :  { %v293_v47 = vmul.f32 1.442695, %v284_v39  ;;  %v297_v48 = vmul.f32 1.442695, %v286_v40  ;;  %v288_v49 = vsub.f32 0.0, %v524_v41  ;;  %v290_v50 = vsub.f32 0.0, %v526_v42 }
  0xee   :  { %409 = vpow2.f32 %v291_v43  ;;  %v299_v51 = vmul.f32 1.442695, %v287_v45  ;;  %v303_v52 = vmul.f32 1.442695, %v289_v46 }
  0xef   :  { %411 = vpow2.f32 %v295_v44  ;;  %v301_v53 = vmul.f32 1.442695, %v288_v49  ;;  %v305_v54 = vmul.f32 1.442695, %v290_v50 }
  0xf0   :  { %413 = vpow2.f32 %v293_v47 }
  0xf1   :  { %415 = vpow2.f32 %v297_v48 }
  0xf2   :  { %417 = vpow2.f32 %v299_v51 }
  0xf3   :  { %419 = vpow2.f32 %v303_v52 }
  0xf4   :  { %421 = vpow2.f32 %v301_v53 }
  0xf5   :  { %423 = vpow2.f32 %v305_v54 }
  0xf8   :  { %v410_v55 = vpop.eup %409 }
  0xf9   :  { %v412_v56 = vpop.eup %411  ;;  %v307_v57 = vadd.f32 1.0, %v410_v55 }
  0xfa   :  { %v414_v58 = vpop.eup %413  ;;  %v309_v59 = vadd.f32 1.0, %v412_v56 }
  0xfb   :  { %v416_v60 = vpop.eup %415  ;;  %425 = vrcp.f32 %v307_v57  ;;  %v308_v61 = vadd.f32 1.0, %v414_v58 }
  0xfc   :  { %v418_v62 = vpop.eup %417  ;;  %427 = vrcp.f32 %v309_v59  ;;  %v310_v63 = vadd.f32 1.0, %v416_v60 }
  0xfd   :  { %v420_v0 = vpop.eup %419  ;;  %429 = vrcp.f32 %v308_v61  ;;  %v311_v1 = vadd.f32 1.0, %v418_v62 }
  0xfe   :  { %v422_v2 = vpop.eup %421  ;;  %431 = vrcp.f32 %v310_v63  ;;  %v313_v3 = vadd.f32 1.0, %v420_v0 }
  0xff   :  { %v424_v4 = vpop.eup %423  ;;  %433 = vrcp.f32 %v311_v1  ;;  %v312_v5 = vadd.f32 1.0, %v422_v2 }
 0x100   :  { %435 = vrcp.f32 %v313_v3  ;;  %v314_v6 = vadd.f32 1.0, %v424_v4 }
 0x101   :  { %437 = vrcp.f32 %v312_v5 }
 0x102   :  { %439 = vrcp.f32 %v314_v6 }
 0x105   :  { %v426_v7 = vpop.eup %425 }
 0x106   :  { %v428_v8 = vpop.eup %427  ;;  %v323_v9 = vmul.f32 %v426_v7, %v508_v25 }
 0x107   :  { %v430_v10 = vpop.eup %429  ;;  %v325_v11 = vmul.f32 %v428_v8, %v510_v26 }
 0x108   :  { %v432_v12 = vpop.eup %431  ;;  %v324_v13 = vmul.f32 %v430_v10, %v512_v29 }
 0x109   :  { %v434_v14 = vpop.eup %433  ;;  %v326_v15 = vmul.f32 %v432_v12, %v514_v30 }
 0x10a   :  { %v436_v16 = vpop.eup %435  ;;  %v385_v17 = vpack.c.bf16 %v324_v13, %v323_v9  ;;  %v327_v18 = vmul.f32 %v434_v14, %v518_v35 }
 0x10b   :  { %v438_v19 = vpop.eup %437  ;;  %v386_v20 = vpack.c.bf16 %v326_v15, %v325_v11  ;;  %v329_v21 = vmul.f32 %v436_v16, %v520_v36 }
 0x10c   :  { %v440_v22 = vpop.eup %439  ;;  %355 = vst [vmem:[%s557_s5] sm:$0xff] %v385_v17  ;;  %v328_v23 = vmul.f32 %v438_v19, %v524_v41 }
 0x10d   :  { %356 = vst [vmem:[%s557_s5 + $0x8] sm:$0xff] %v386_v20  ;;  %v330_v24 = vmul.f32 %v440_v22, %v526_v42 }
 0x10e   :  { %v387_v25 = vpack.c.bf16 %v328_v23, %v327_v18 }
 0x10f   :  { %v388_v26 = vpack.c.bf16 %v330_v24, %v329_v21 }
 0x110   :  { %357 = vst [vmem:[%s557_s5 + $0x10] sm:$0xff] %v387_v25 }
 0x111   :  { %358 = vst [vmem:[%s557_s5 + $0x18] sm:$0xff] %v388_v26 }

// kernel: _lambda_.45
= control target key start
LH: loop header
LB: loop body
LE: loop exit
PB: predicated region body
PF: predicated region fallthrough
CT: control target
= control target key end

     0   :  { %v147_v0 = vmov 0.0   ;;  %vm148_vm0 = vmmov 0   ;;  %v149_v3 = vmov 0   ;;  %vm42_vm1 = vcmask 130048   ;;  %s185_s0 = inlined_call_operand.vmem [shape: bf16[16,128], index: 0, kind: input, shape index: {}]   ;;  %s186_s1 = inlined_call_operand.vmem [shape: bf16[16,16], index: 1, kind: input, shape index: {}]   ;;  %s187_s2 = inlined_call_operand.vmem [shape: f32[16,1], index: 2, kind: input, shape index: {}]   ;;  %s188_s3 = inlined_call_operand.vmem [shape: bf16[16,128], index: 3, kind: output, shape index: {}]  }
   0x1   :  { %127 = vmatprep.subr.bf16.mxu0 %v147_v0  ;;  %v137_v1 = vld [vmem:[%s185_s0] sm:$0xff]   ;;  %129 = vmatprep.mubr.msk.bf16.mxu0 %vm148_vm0, %v147_v0  ;;  %v20_v5 = vld [vmem:[%s187_s2 + $0x8] sm:$0xff] }
   0x2   :  { %v138_v2 = vld [vmem:[%s186_s1] sm:$0xff]   ;;  %136 = vset.pattern.permute.xlu0 %v149_v3  ;;  %128 = vmatpush3.bf16.msra.mxu0 %v137_v1 }
   0x3   :  { %v19_v4 = vld [vmem:[%s187_s2] sm:$0xff] }
   0x4   :  { %23 = vperm.xlu0 %136, %v19_v4  }
   0x5   :  { %130 = vmatmul.mubr.msk.bf16.vlgmr.msra.gmra.mrb[0].mxu0 %vm42_vm1, %v138_v2 }
   0x8   :  { %28 = vperm.xlu0 %136, %v20_v5  }
  0x83   :  { %v24_v6 = vpop.permute.xlu0 %23 }
  0x87   :  { %v29_v10 = vpop.permute.xlu0 %28 }
  0xd8   :  { %v80_v7 = vpop.f32.mrb[0].mxu0 }
  0xd9   :  { %v81_v8 = vadd.f32 %v80_v7, %v24_v6  ;;  %v131_v9 = vpop.f32.mrb[1].mxu0 }
  0xda   :  { %v83_v11 = vpop.f32.mrb[2].mxu0 }
  0xdb   :  { %v87_v12 = vsub.f32 0.0, %v81_v8  ;;  %v84_v13 = vadd.f32 %v83_v11, %v29_v10  ;;  %v132_v14 = vpop.f32.mrb[3].mxu0 }
  0xdd   :  { %v89_v15 = vmul.f32 1.442695, %v87_v12  ;;  %v88_v16 = vsub.f32 0.0, %v84_v13 }
  0xdf   :  { %139 = vpow2.f32 %v89_v15  ;;  %v91_v17 = vmul.f32 1.442695, %v88_v16 }
  0xe1   :  { %141 = vpow2.f32 %v91_v17 }
  0xe9   :  { %v140_v18 = vpop.eup %139 }
  0xea   :  { %v93_v19 = vadd.f32 1.0, %v140_v18 }
  0xeb   :  { %v142_v20 = vpop.eup %141 }
  0xec   :  { %143 = vrcp.f32 %v93_v19  ;;  %v94_v21 = vadd.f32 1.0, %v142_v20 }
  0xee   :  { %145 = vrcp.f32 %v94_v21 }
  0xf6   :  { %v144_v22 = vpop.eup %143 }
  0xf7   :  { %v97_v24 = vmul.f32 %v144_v22, %v81_v8 }
  0xf8   :  { %v146_v23 = vpop.eup %145 }
  0xf9   :  { %v98_v25 = vmul.f32 %v146_v23, %v84_v13 }
  0xfb   :  { %v123_v26 = vpack.c.bf16 %v98_v25, %v97_v24 }
  0xfd   :  { %124 = vst [vmem:[%s188_s3] sm:$0xff] %v123_v26  }

// kernel: _lambda_.43
= control target key start
LH: loop header
LB: loop body
LE: loop exit
PB: predicated region body
PF: predicated region fallthrough
CT: control target
= control target key end

     0   :  { %v160_v0 = vmov 0.0   ;;  %vm161_vm0 = vmmov 0   ;;  %v162_v2 = vmov 0   ;;  %vm50_vm1 = vcmask 261120   ;;  %s201_s0 = inlined_call_operand.vmem [shape: bf16[32,128], index: 0, kind: input, shape index: {}]   ;;  %s202_s2 = inlined_call_operand.vmem [shape: f32[16,1], index: 2, kind: input, shape index: {}]   ;;  %s203_s1 = inlined_call_operand.vmem [shape: bf16[16,32], index: 1, kind: input, shape index: {}]   ;;  %s204_s3 = inlined_call_operand.vmem [shape: bf16[16,128], index: 3, kind: output, shape index: {}]  }
   0x1   :  { %137 = vmatprep.subr.bf16.mxu0 %v160_v0  ;;  %v149_v1 = vld [vmem:[%s201_s0] sm:$0xff]   ;;  %141 = vmatprep.mubr.msk.bf16.mxu0 %vm161_vm0, %v160_v0  ;;  %v150_v3 = vld [vmem:[%s201_s0 + $0x8] sm:$0xff]  }
   0x2   :  { %148 = vset.pattern.permute.xlu0 %v162_v2  ;;  %138 = vmatpush3.bf16.msra.mxu0 %v149_v1  ;;  %v21_v4 = vld [vmem:[%s202_s2] sm:$0xff]  ;;  %v22_v6 = vld [vmem:[%s202_s2 + $0x8] sm:$0xff] }
   0x3   :  { %139 = vmatprep.subr.bf16.mxu0 %v160_v0  ;;  %25 = vperm.xlu0 %148, %v21_v4   ;;  %v151_v5 = vld [vmem:[%s203_s1] sm:$0xff]  }
   0x6   :  { %140 = vmatpush3.bf16.msra.mxu0 %v150_v3 }
   0x7   :  { %30 = vperm.xlu0 %148, %v22_v6  }
   0x9   :  { %142 = vmatmul.mubr.msk.bf16.vlgmr.msra.gmra.mrb[0].mxu0 %vm50_vm1, %v151_v5 }
  0x82   :  { %v26_v7 = vpop.permute.xlu0 %25 }
  0x86   :  { %v31_v11 = vpop.permute.xlu0 %30 }
  0xdc   :  { %v88_v8 = vpop.f32.mrb[0].mxu0 }
  0xdd   :  { %v89_v9 = vadd.f32 %v88_v8, %v26_v7  ;;  %v143_v10 = vpop.f32.mrb[1].mxu0 }
  0xde   :  { %v91_v12 = vpop.f32.mrb[2].mxu0 }
  0xdf   :  { %v95_v13 = vsub.f32 0.0, %v89_v9  ;;  %v92_v14 = vadd.f32 %v91_v12, %v31_v11  ;;  %v144_v15 = vpop.f32.mrb[3].mxu0 }
  0xe1   :  { %v97_v16 = vmul.f32 1.442695, %v95_v13  ;;  %v96_v17 = vsub.f32 0.0, %v92_v14 }
  0xe3   :  { %152 = vpow2.f32 %v97_v16  ;;  %v99_v18 = vmul.f32 1.442695, %v96_v17 }
  0xe5   :  { %154 = vpow2.f32 %v99_v18 }
  0xed   :  { %v153_v19 = vpop.eup %152 }
  0xee   :  { %v101_v20 = vadd.f32 1.0, %v153_v19 }
  0xef   :  { %v155_v21 = vpop.eup %154 }
  0xf0   :  { %156 = vrcp.f32 %v101_v20  ;;  %v102_v22 = vadd.f32 1.0, %v155_v21 }
  0xf2   :  { %158 = vrcp.f32 %v102_v22 }
  0xfa   :  { %v157_v23 = vpop.eup %156 }
  0xfb   :  { %v105_v25 = vmul.f32 %v157_v23, %v89_v9 }
  0xfc   :  { %v159_v24 = vpop.eup %158 }
  0xfd   :  { %v106_v26 = vmul.f32 %v159_v24, %v92_v14 }
  0xff   :  { %v132_v27 = vpack.c.bf16 %v106_v26, %v105_v25 }
 0x101   :  { %133 = vst [vmem:[%s204_s3] sm:$0xff] %v132_v27  }

// kernel: _lambda_.42
= control target key start
LH: loop header
LB: loop body
LE: loop exit
PB: predicated region body
PF: predicated region fallthrough
CT: control target
= control target key end

     0   :  { %v323_v0 = vmov 0   ;;  %vm133_vm0 = vcmask 130048   ;;  %s401_s0 = inlined_call_operand.vmem [shape: bf16[144,128], index: 0, kind: input, shape index: {}]   ;;  %s402_s1 = inlined_call_operand.vmem [shape: bf16[32,144], index: 1, kind: input, shape index: {}]   ;;  %s403_s2 = inlined_call_operand.vmem [shape: f32[32,1], index: 2, kind: input, shape index: {}]   ;;  %s404_s3 = inlined_call_operand.vmem [shape: bf16[32,128], index: 3, kind: output, shape index: {}]  }
   0x1   :  { %140 = vmatprep.subr.bf16.mxu0 %v323_v0  ;;  %271 = vmatprep.subr.bf16.mxu1 %v323_v0  ;;  %v292_v1 = vld [vmem:[%s401_s0] sm:$0xff]   ;;  %v293_v2 = vld [vmem:[%s401_s0 + $0x8] sm:$0xff]   ;;  %v294_v3 = vld [vmem:[%s401_s0 + $0x10] sm:$0xff]  }
   0x2   :  { %291 = vset.pattern.permute.xlu1 %v323_v0  ;;  %290 = vset.pattern.permute.xlu0 %v323_v0  ;;  %v295_v4 = vld [vmem:[%s401_s0 + $0x18] sm:$0xff]   ;;  %v303_v5 = vld [vmem:[%s402_s1 + $0x4] ss:$8 sps:$4 sm:$0xff]   ;;  %v39_v7 = vld [vmem:[%s403_s2 + $0x10] sm:$0xff] }
   0x3   :  { %141 = vmatpush1.bf16.msra.mxu0 %v292_v1  ;;  %280 = vmatpush1.bf16.msra.mxu1 %v292_v1  ;;  %v306_v6 = vld [vmem:[%s402_s1 + $0x14] ss:$8 sps:$4 sm:$0xff]   ;;  %v37_v8 = vld [vmem:[%s403_s2] sm:$0xff]  ;;  %v38_v11 = vld [vmem:[%s403_s2 + $0x8] sm:$0xff] }
   0x4   :  { %142 = vmatprep.subr.bf16.mxu0 %v323_v0  ;;  %272 = vmatprep.subr.bf16.mxu1 %v323_v0  ;;  %v40_v9 = vld [vmem:[%s403_s2 + $0x18] sm:$0xff]  ;;  %v296_v10 = vld [vmem:[%s401_s0 + $0x20] sm:$0xff]   ;;  %v297_v12 = vld [vmem:[%s401_s0 + $0x28] sm:$0xff]  }
   0x5   :  { %250 = vmatprep.mubr.msk.bf16.mxu0 %vm133_vm0, %v303_v5  ;;  %53 = vperm.xlu1 %291, %v39_v7   ;;  %v298_v13 = vld [vmem:[%s401_s0 + $0x30] sm:$0xff]   ;;  %v299_v14 = vld [vmem:[%s401_s0 + $0x38] sm:$0xff]   ;;  %v300_v15 = vld [vmem:[%s401_s0 + $0x40] sm:$0xff]  }
   0x6   :  { %251 = vmatprep.mubr.msk.bf16.mxu1 %vm133_vm0, %v306_v6  ;;  %43 = vperm.xlu0 %290, %v37_v8   ;;  %v301_v16 = vld [vmem:[%s402_s1] ss:$8 sps:$4 sm:$0xff]   ;;  %v304_v17 = vld [vmem:[%s402_s1 + $0x10] ss:$8 sps:$4 sm:$0xff]  }
   0x7   :  { %143 = vmatpush1.bf16.msra.mxu0 %v293_v2  ;;  %281 = vmatpush1.bf16.msra.mxu1 %v293_v2 }
   0x8   :  { %144 = vmatprep.subr.bf16.mxu0 %v323_v0  ;;  %273 = vmatprep.subr.bf16.mxu1 %v323_v0 }
   0x9   :  { %58 = vperm.xlu1 %291, %v40_v9  }
   0xa   :  { %48 = vperm.xlu0 %290, %v38_v11  }
   0xb   :  { %145 = vmatpush1.bf16.msra.mxu0 %v294_v3  ;;  %282 = vmatpush1.bf16.msra.mxu1 %v294_v3 }
   0xc   :  { %146 = vmatprep.subr.bf16.mxu0 %v323_v0  ;;  %274 = vmatprep.subr.bf16.mxu1 %v323_v0 }
   0xf   :  { %147 = vmatpush1.bf16.msra.mxu0 %v295_v4  ;;  %283 = vmatpush1.bf16.msra.mxu1 %v295_v4 }
  0x10   :  { %148 = vmatprep.subr.bf16.mxu0 %v323_v0  ;;  %275 = vmatprep.subr.bf16.mxu1 %v323_v0 }
  0x13   :  { %149 = vmatpush1.bf16.msra.mxu0 %v296_v10  ;;  %284 = vmatpush1.bf16.msra.mxu1 %v296_v10 }
  0x14   :  { %150 = vmatprep.subr.bf16.mxu0 %v323_v0  ;;  %276 = vmatprep.subr.bf16.mxu1 %v323_v0 }
  0x17   :  { %151 = vmatpush1.bf16.msra.mxu0 %v297_v12  ;;  %285 = vmatpush1.bf16.msra.mxu1 %v297_v12 }
  0x18   :  { %152 = vmatprep.subr.bf16.mxu0 %v323_v0  ;;  %277 = vmatprep.subr.bf16.mxu1 %v323_v0 }
  0x1b   :  { %153 = vmatpush1.bf16.msra.mxu0 %v298_v13  ;;  %286 = vmatpush1.bf16.msra.mxu1 %v298_v13 }
  0x1c   :  { %154 = vmatprep.subr.bf16.mxu0 %v323_v0  ;;  %278 = vmatprep.subr.bf16.mxu1 %v323_v0 }
  0x1f   :  { %155 = vmatpush1.bf16.msra.mxu0 %v299_v14  ;;  %287 = vmatpush1.bf16.msra.mxu1 %v299_v14 }
  0x20   :  { %156 = vmatprep.subr.bf16.mxu0 %v323_v0  ;;  %279 = vmatprep.subr.bf16.mxu1 %v323_v0 }
  0x23   :  { %157 = vmatpush1.bf16.msra.mxu0 %v300_v15  ;;  %288 = vmatpush1.bf16.msra.mxu1 %v300_v15 }
  0x26   :  { %173 = vmatmul.mubr.bf16.vlgmr.msra.gmra.mrb[0].mxu0 %v301_v16  ;;  %181 = vmatmul.mubr.bf16.vlgmr.msra.gmra.mrb[0].mxu1 %v304_v17 }
  0x84   :  { %v54_v18 = vpop.permute.xlu1 %53 }
  0x85   :  { %v44_v19 = vpop.permute.xlu0 %43 }
  0x88   :  { %v59_v20 = vpop.permute.xlu1 %58 }
  0x89   :  { %v49_v21 = vpop.permute.xlu0 %48 }
  0xf9   :  { %v174_v22 = vpop.f32.mrb[0].mxu0  ;;  %v182_v23 = vpop.f32.mrb[0].mxu1 }
  0xfa   :  { %v175_v24 = vadd.f32 %v174_v22, %v44_v19  ;;  %v183_v25 = vadd.f32 %v182_v23, %v54_v18  ;;  %v176_v26 = vpop.f32.mrb[1].mxu0  ;;  %v184_v27 = vpop.f32.mrb[1].mxu1 }
  0xfb   :  { %v177_v28 = vpop.f32.mrb[2].mxu0  ;;  %v185_v29 = vpop.f32.mrb[2].mxu1 }
  0xfc   :  { %v189_v30 = vsub.f32 0.0, %v175_v24  ;;  %v191_v31 = vsub.f32 0.0, %v183_v25  ;;  %v178_v32 = vadd.f32 %v177_v28, %v49_v21  ;;  %v186_v33 = vadd.f32 %v185_v29, %v59_v20  ;;  %v179_v34 = vpop.f32.mrb[3].mxu0  ;;  %v187_v35 = vpop.f32.mrb[3].mxu1 }
  0xfe   :  { %v193_v36 = vmul.f32 1.442695, %v189_v30  ;;  %v197_v37 = vmul.f32 1.442695, %v191_v31  ;;  %v190_v38 = vsub.f32 0.0, %v178_v32  ;;  %v192_v39 = vsub.f32 0.0, %v186_v33 }
 0x100   :  { %307 = vpow2.f32 %v193_v36  ;;  %v195_v40 = vmul.f32 1.442695, %v190_v38  ;;  %v199_v41 = vmul.f32 1.442695, %v192_v39 }
 0x101   :  { %309 = vpow2.f32 %v197_v37 }
 0x102   :  { %311 = vpow2.f32 %v195_v40 }
 0x103   :  { %313 = vpow2.f32 %v199_v41 }
 0x10a   :  { %v308_v42 = vpop.eup %307 }
 0x10b   :  { %v310_v43 = vpop.eup %309  ;;  %v201_v44 = vadd.f32 1.0, %v308_v42 }
 0x10c   :  { %v312_v45 = vpop.eup %311  ;;  %v203_v46 = vadd.f32 1.0, %v310_v43 }
 0x10d   :  { %v314_v47 = vpop.eup %313  ;;  %315 = vrcp.f32 %v201_v44  ;;  %v202_v48 = vadd.f32 1.0, %v312_v45 }
 0x10e   :  { %317 = vrcp.f32 %v203_v46  ;;  %v204_v49 = vadd.f32 1.0, %v314_v47 }
 0x10f   :  { %319 = vrcp.f32 %v202_v48 }
 0x110   :  { %321 = vrcp.f32 %v204_v49 }
 0x117   :  { %v316_v50 = vpop.eup %315 }
 0x118   :  { %v318_v51 = vpop.eup %317  ;;  %v209_v54 = vmul.f32 %v316_v50, %v175_v24 }
 0x119   :  { %v320_v52 = vpop.eup %319  ;;  %v211_v56 = vmul.f32 %v318_v51, %v183_v25 }
 0x11a   :  { %v322_v53 = vpop.eup %321  ;;  %v210_v55 = vmul.f32 %v320_v52, %v178_v32 }
 0x11b   :  { %v212_v57 = vmul.f32 %v322_v53, %v186_v33 }
 0x11c   :  { %v263_v58 = vpack.c.bf16 %v210_v55, %v209_v54 }
 0x11d   :  { %v268_v59 = vpack.c.bf16 %v212_v57, %v211_v56 }
 0x11e   :  { %264 = vst [vmem:[%s404_s3] sm:$0xff] %v263_v58  }
 0x11f   :  { %270 = vst [vmem:[%s404_s3 + $0x8] sm:$0xff] %v268_v59  }

// kernel: _lambda_.51
= control target key start
LH: loop header
LB: loop body
LE: loop exit
PB: predicated region body
PF: predicated region fallthrough
CT: control target
= control target key end

     0   :  { %v328_v1 = vmov 0   ;;  %vm49_vm0 = vcmask 130048   ;;  %s395_s1 = inlined_call_operand.vmem [shape: bf16[16,128], index: 1, kind: input, shape index: {}]   ;;  %s396_s0 = inlined_call_operand.vmem [shape: bf16[16,128], index: 0, kind: input, shape index: {}]   ;;  %s397_s3 = inlined_call_operand.vmem [shape: bf16[32,16], index: 3, kind: input, shape index: {}]   ;;  %s398_s2 = inlined_call_operand.vmem [shape: bf16[32,16], index: 2, kind: input, shape index: {}]   ;;  %s399_s4 = inlined_call_operand.vmem [shape: f32[32,1], index: 4, kind: input, shape index: {}]   ;;  %s400_s5 = inlined_call_operand.vmem [shape: bf16[32,128], index: 5, kind: output, shape index: {}]  }
   0x1   :  { %v306_v0 = vld [vmem:[%s395_s1] sm:$0xff]   ;;  %305 = vset.pattern.permute.xlu1 %v328_v1  ;;  %304 = vset.pattern.permute.xlu0 %v328_v1  ;;  %v310_v5 = vld [vmem:[%s397_s3 + $0x8] sm:$0xff]   ;;  %v178_v7 = vld [vmem:[%s399_s4 + $0x10] sm:$0xff] }
   0x2   :  { %v307_v2 = vld [vmem:[%s396_s0] sm:$0xff]   ;;  %287 = vmatprep.subr.bf16.mxu1 %v306_v0  ;;  %v311_v6 = vld [vmem:[%s398_s2 + $0x8] sm:$0xff]   ;;  %192 = vperm.xlu1 %305, %v178_v7   ;;  %v179_v9 = vld [vmem:[%s399_s4 + $0x18] sm:$0xff] }
   0x3   :  { %v308_v3 = vld [vmem:[%s397_s3] sm:$0xff]   ;;  %293 = vmatprep.subr.bf16.mxu0 %v307_v2  ;;  %288 = vmatpush3.bf16.msra.mxu1 %v306_v0  ;;  %v177_v10 = vld [vmem:[%s399_s4 + $0x8] sm:$0xff] }
   0x4   :  { %v309_v4 = vld [vmem:[%s398_s2] sm:$0xff]   ;;  %294 = vmatpush3.bf16.msra.mxu0 %v307_v2  ;;  %289 = vmatprep.mubr.msk.bf16.mxu1 %vm49_vm0, %v308_v3 }
   0x5   :  { %295 = vmatprep.mubr.msk.bf16.mxu0 %vm49_vm0, %v309_v4  ;;  %v176_v8 = vld [vmem:[%s399_s4] sm:$0xff] }
   0x6   :  { %290 = vmatmul.mubr.msk.bf16.vlgmr.msra.gmra.mrb[0].mxu1 %vm49_vm0, %v310_v5  ;;  %182 = vperm.xlu0 %304, %v176_v8  }
   0x7   :  { %296 = vmatmul.mubr.msk.bf16.vlgmr.msra.gmra.mrb[0].mxu0 %vm49_vm0, %v311_v6  ;;  %197 = vperm.xlu1 %305, %v179_v9  }
   0xa   :  { %187 = vperm.xlu0 %304, %v177_v10  }
  0x81   :  { %v193_v11 = vpop.permute.xlu1 %192 }
  0x85   :  { %v183_v12 = vpop.permute.xlu0 %182 }
  0x86   :  { %v198_v25 = vpop.permute.xlu1 %197 }
  0x89   :  { %v188_v29 = vpop.permute.xlu0 %187 }
  0xd9   :  { %v291_v13 = vpop.f32.mrb[0].mxu1 }
  0xda   :  { %v297_v14 = vpop.f32.mrb[0].mxu0  ;;  %v90_v15 = vpop.f32.mrb[1].mxu1 }
  0xdb   :  { %v170_v16 = vadd.f32 %v297_v14, %v291_v13  ;;  %v161_v17 = vpop.f32.mrb[1].mxu0  ;;  %v292_v18 = vpop.f32.mrb[2].mxu1 }
  0xdc   :  { %v162_v19 = vadd.f32 %v161_v17, %v90_v15  ;;  %v298_v20 = vpop.f32.mrb[2].mxu0  ;;  %v93_v21 = vpop.f32.mrb[3].mxu1 }
  0xdd   :  { %v202_v22 = vadd.f32 %v193_v11, %v170_v16  ;;  %v173_v23 = vadd.f32 %v298_v20, %v292_v18  ;;  %v164_v24 = vpop.f32.mrb[3].mxu0 }
  0xde   :  { %v200_v26 = vadd.f32 %v183_v12, %v162_v19  ;;  %v165_v27 = vadd.f32 %v164_v24, %v93_v21 }
  0xdf   :  { %v206_v28 = vsub.f32 0.0, %v202_v22  ;;  %v203_v30 = vadd.f32 %v198_v25, %v173_v23 }
  0xe0   :  { %v204_v31 = vsub.f32 0.0, %v200_v26  ;;  %v201_v32 = vadd.f32 %v188_v29, %v165_v27 }
  0xe1   :  { %v212_v33 = vmul.f32 1.442695, %v206_v28  ;;  %v207_v34 = vsub.f32 0.0, %v203_v30 }
  0xe2   :  { %v208_v35 = vmul.f32 1.442695, %v204_v31  ;;  %v205_v36 = vsub.f32 0.0, %v201_v32 }
  0xe3   :  { %312 = vpow2.f32 %v212_v33  ;;  %v214_v37 = vmul.f32 1.442695, %v207_v34 }
  0xe4   :  { %314 = vpow2.f32 %v208_v35  ;;  %v210_v38 = vmul.f32 1.442695, %v205_v36 }
  0xe5   :  { %316 = vpow2.f32 %v214_v37 }
  0xe6   :  { %318 = vpow2.f32 %v210_v38 }
  0xed   :  { %v313_v39 = vpop.eup %312 }
  0xee   :  { %v315_v40 = vpop.eup %314  ;;  %v218_v41 = vadd.f32 1.0, %v313_v39 }
  0xef   :  { %v317_v42 = vpop.eup %316  ;;  %v216_v43 = vadd.f32 1.0, %v315_v40 }
  0xf0   :  { %v319_v44 = vpop.eup %318  ;;  %320 = vrcp.f32 %v218_v41  ;;  %v219_v45 = vadd.f32 1.0, %v317_v42 }
  0xf1   :  { %322 = vrcp.f32 %v216_v43  ;;  %v217_v46 = vadd.f32 1.0, %v319_v44 }
  0xf2   :  { %324 = vrcp.f32 %v219_v45 }
  0xf3   :  { %326 = vrcp.f32 %v217_v46 }
  0xfa   :  { %v321_v47 = vpop.eup %320 }
  0xfb   :  { %v323_v48 = vpop.eup %322  ;;  %v226_v51 = vmul.f32 %v321_v47, %v202_v22 }
  0xfc   :  { %v325_v49 = vpop.eup %324  ;;  %v224_v53 = vmul.f32 %v323_v48, %v200_v26 }
  0xfd   :  { %v327_v50 = vpop.eup %326  ;;  %v227_v52 = vmul.f32 %v325_v49, %v203_v30 }
  0xfe   :  { %v225_v54 = vmul.f32 %v327_v50, %v201_v32 }
  0xff   :  { %v278_v55 = vpack.c.bf16 %v227_v52, %v226_v51 }
 0x100   :  { %v273_v56 = vpack.c.bf16 %v225_v54, %v224_v53 }
 0x101   :  { %280 = vst [vmem:[%s400_s5 + $0x8] sm:$0xff] %v278_v55  }
 0x102   :  { %274 = vst [vmem:[%s400_s5] sm:$0xff] %v273_v56  }

// kernel: _lambda_.46
= control target key start
LH: loop header
LB: loop body
LE: loop exit
PB: predicated region body
PF: predicated region fallthrough
CT: control target
= control target key end

     0   :  { %v237_v0 = vmov 0   ;;  %vm113_vm0 = vcmask 130048   ;;  %s308_s0 = inlined_call_operand.vmem [shape: bf16[144,128], index: 0, kind: input, shape index: {}]   ;;  %s309_s1 = inlined_call_operand.vmem [shape: bf16[16,144], index: 1, kind: input, shape index: {}]   ;;  %s310_s2 = inlined_call_operand.vmem [shape: f32[16,1], index: 2, kind: input, shape index: {}]   ;;  %s311_s3 = inlined_call_operand.vmem [shape: bf16[16,128], index: 3, kind: input, shape index: {}]   ;;  %s312_s4 = inlined_call_operand.vmem [shape: bf16[16,128], index: 4, kind: output, shape index: {}]  }
   0x1   :  { %117 = vmatprep.subr.bf16.mxu0 %v237_v0  ;;  %v217_v1 = vld [vmem:[%s308_s0] sm:$0xff]   ;;  %216 = vset.pattern.permute.xlu0 %v237_v0  ;;  %v218_v2 = vld [vmem:[%s308_s0 + $0x8] sm:$0xff]   ;;  %v219_v3 = vld [vmem:[%s308_s0 + $0x10] sm:$0xff]  }
   0x2   :  { %118 = vmatpush1.bf16.msra.mxu0 %v217_v1  ;;  %v220_v4 = vld [vmem:[%s308_s0 + $0x18] sm:$0xff]   ;;  %v228_v5 = vld [vmem:[%s309_s1 + $0x4] ss:$8 sps:$4 sm:$0xff]   ;;  %v223_v10 = vld [vmem:[%s308_s0 + $0x30] sm:$0xff]  }
   0x3   :  { %119 = vmatprep.subr.bf16.mxu0 %v237_v0  ;;  %v38_v6 = vld [vmem:[%s310_s2] sm:$0xff]  ;;  %201 = vmatprep.mubr.msk.bf16.mxu0 %vm113_vm0, %v228_v5  ;;  %v39_v7 = vld [vmem:[%s310_s2 + $0x8] sm:$0xff]  ;;  %v224_v11 = vld [vmem:[%s308_s0 + $0x38] sm:$0xff]  }
   0x4   :  { %42 = vperm.xlu0 %216, %v38_v6   ;;  %v221_v8 = vld [vmem:[%s308_s0 + $0x20] sm:$0xff]   ;;  %v222_v9 = vld [vmem:[%s308_s0 + $0x28] sm:$0xff]  }
   0x5   :  { %v225_v12 = vld [vmem:[%s308_s0 + $0x40] sm:$0xff]  }
   0x6   :  { %120 = vmatpush1.bf16.msra.mxu0 %v218_v2  ;;  %v226_v13 = vld [vmem:[%s309_s1] ss:$8 sps:$4 sm:$0xff]  }
   0x7   :  { %121 = vmatprep.subr.bf16.mxu0 %v237_v0  ;;  %v207_v30 = vld [vmem:[%s311_s3] sm:$0xff]  }
   0x8   :  { %47 = vperm.xlu0 %216, %v39_v7   ;;  %v208_v33 = vunpack.c.l.bf16 %v207_v30  ;;  %v209_v34 = vunpack.c.h.bf16 %v207_v30 }
   0xa   :  { %122 = vmatpush1.bf16.msra.mxu0 %v219_v3 }
   0xb   :  { %123 = vmatprep.subr.bf16.mxu0 %v237_v0 }
   0xe   :  { %124 = vmatpush1.bf16.msra.mxu0 %v220_v4 }
   0xf   :  { %125 = vmatprep.subr.bf16.mxu0 %v237_v0 }
  0x12   :  { %126 = vmatpush1.bf16.msra.mxu0 %v221_v8 }
  0x13   :  { %127 = vmatprep.subr.bf16.mxu0 %v237_v0 }
  0x16   :  { %128 = vmatpush1.bf16.msra.mxu0 %v222_v9 }
  0x17   :  { %129 = vmatprep.subr.bf16.mxu0 %v237_v0 }
  0x1a   :  { %130 = vmatpush1.bf16.msra.mxu0 %v223_v10 }
  0x1b   :  { %131 = vmatprep.subr.bf16.mxu0 %v237_v0 }
  0x1e   :  { %132 = vmatpush1.bf16.msra.mxu0 %v224_v11 }
  0x1f   :  { %133 = vmatprep.subr.bf16.mxu0 %v237_v0 }
  0x22   :  { %134 = vmatpush1.bf16.msra.mxu0 %v225_v12 }
  0x25   :  { %150 = vmatmul.mubr.bf16.vlgmr.msra.gmra.mrb[0].mxu0 %v226_v13 }
  0x83   :  { %v43_v14 = vpop.permute.xlu0 %42 }
  0x87   :  { %v48_v18 = vpop.permute.xlu0 %47 }
  0xf8   :  { %v151_v15 = vpop.f32.mrb[0].mxu0 }
  0xf9   :  { %v152_v16 = vadd.f32 %v151_v15, %v43_v14  ;;  %v153_v17 = vpop.f32.mrb[1].mxu0 }
  0xfa   :  { %v154_v19 = vpop.f32.mrb[2].mxu0 }
  0xfb   :  { %v158_v20 = vsub.f32 0.0, %v152_v16  ;;  %v155_v21 = vadd.f32 %v154_v19, %v48_v18  ;;  %v156_v22 = vpop.f32.mrb[3].mxu0 }
  0xfd   :  { %v160_v23 = vmul.f32 1.442695, %v158_v20  ;;  %v159_v24 = vsub.f32 0.0, %v155_v21 }
  0xff   :  { %229 = vpow2.f32 %v160_v23  ;;  %v162_v25 = vmul.f32 1.442695, %v159_v24 }
 0x101   :  { %231 = vpow2.f32 %v162_v25 }
 0x109   :  { %v230_v26 = vpop.eup %229 }
 0x10a   :  { %v164_v27 = vadd.f32 1.0, %v230_v26 }
 0x10b   :  { %v232_v28 = vpop.eup %231 }
 0x10c   :  { %233 = vrcp.f32 %v164_v27  ;;  %v165_v29 = vadd.f32 1.0, %v232_v28 }
 0x10e   :  { %235 = vrcp.f32 %v165_v29 }
 0x116   :  { %v234_v31 = vpop.eup %233 }
 0x117   :  { %v168_v32 = vmul.f32 %v234_v31, %v152_v16 }
 0x118   :  { %v236_v35 = vpop.eup %235 }
 0x119   :  { %v169_v36 = vmul.f32 %v236_v35, %v155_v21  ;;  %v174_v37 = vadd.f32 %v208_v33, %v168_v32 }
 0x11b   :  { %v175_v38 = vadd.f32 %v209_v34, %v169_v36 }
 0x11d   :  { %v213_v39 = vpack.c.bf16 %v175_v38, %v174_v37 }
 0x11f   :  { %214 = vst [vmem:[%s312_s4] sm:$0xff] %v213_v39  }

// kernel: _lambda_.53
= control target key start
LH: loop header
LB: loop body
LE: loop exit
PB: predicated region body
PF: predicated region fallthrough
CT: control target
= control target key end

     0   :  { %v259_v1 = vmov 0   ;;  %vm85_vm0 = vcmask 523264   ;;  %s318_s0 = inlined_call_operand.vmem [shape: bf16[64,128], index: 0, kind: input, shape index: {}]   ;;  %s319_s1 = inlined_call_operand.vmem [shape: bf16[32,64], index: 1, kind: input, shape index: {}]   ;;  %s320_s2 = inlined_call_operand.vmem [shape: f32[32,1], index: 2, kind: input, shape index: {}]   ;;  %s321_s3 = inlined_call_operand.vmem [shape: bf16[32,128], index: 3, kind: output, shape index: {}]  }
   0x1   :  { %v237_v0 = vld [vmem:[%s318_s0] sm:$0xff]   ;;  %236 = vset.pattern.permute.xlu1 %v259_v1  ;;  %235 = vset.pattern.permute.xlu0 %v259_v1  ;;  %v238_v2 = vld [vmem:[%s318_s0 + $0x8] sm:$0xff]   ;;  %v239_v3 = vld [vmem:[%s318_s0 + $0x10] sm:$0xff]  }
   0x2   :  { %222 = vmatprep.subr.bf16.mxu0 %v237_v0  ;;  %v241_v4 = vld [vmem:[%s319_s1] sm:$0xff]   ;;  %v29_v5 = vld [vmem:[%s320_s2 + $0x10] sm:$0xff]  ;;  %v240_v7 = vld [vmem:[%s318_s0 + $0x18] sm:$0xff]  }
   0x3   :  { %223 = vmatpush3.bf16.msra.mxu0 %v237_v0  ;;  %230 = vmatprep.mubr.msk.bf16.mxu0 %vm85_vm0, %v241_v4  ;;  %v27_v6 = vld [vmem:[%s320_s2] sm:$0xff]  ;;  %v30_v8 = vld [vmem:[%s320_s2 + $0x18] sm:$0xff]  ;;  %v28_v9 = vld [vmem:[%s320_s2 + $0x8] sm:$0xff] }
   0x4   :  { %224 = vmatprep.subr.bf16.mxu0 %v238_v2  ;;  %43 = vperm.xlu1 %236, %v29_v5   ;;  %v242_v10 = vld [vmem:[%s319_s1 + $0x8] sm:$0xff]  }
   0x5   :  { %33 = vperm.xlu0 %235, %v27_v6  }
   0x7   :  { %225 = vmatpush3.bf16.msra.mxu0 %v238_v2 }
   0x8   :  { %226 = vmatprep.subr.bf16.mxu0 %v239_v3  ;;  %48 = vperm.xlu1 %236, %v30_v8  }
   0x9   :  { %38 = vperm.xlu0 %235, %v28_v9  }
   0xb   :  { %227 = vmatpush3.bf16.msra.mxu0 %v239_v3 }
   0xc   :  { %228 = vmatprep.subr.bf16.mxu0 %v240_v7 }
   0xf   :  { %229 = vmatpush3.bf16.msra.mxu0 %v240_v7 }
  0x12   :  { %231 = vmatmul.mubr.msk.bf16.vlgmr.msra.gmra.mrb[0].mxu0 %vm85_vm0, %v242_v10 }
  0x83   :  { %v44_v11 = vpop.permute.xlu1 %43 }
  0x84   :  { %v34_v12 = vpop.permute.xlu0 %33 }
  0x87   :  { %v49_v16 = vpop.permute.xlu1 %48 }
  0x88   :  { %v39_v19 = vpop.permute.xlu0 %38 }
  0xe5   :  { %v232_v13 = vpop.f32.mrb[0].mxu0 }
  0xe6   :  { %v135_v14 = vadd.f32 %v232_v13, %v44_v11  ;;  %v126_v15 = vpop.f32.mrb[1].mxu0 }
  0xe7   :  { %v127_v17 = vadd.f32 %v126_v15, %v34_v12  ;;  %v233_v18 = vpop.f32.mrb[2].mxu0 }
  0xe8   :  { %v143_v20 = vsub.f32 0.0, %v135_v14  ;;  %v138_v21 = vadd.f32 %v233_v18, %v49_v16  ;;  %v129_v22 = vpop.f32.mrb[3].mxu0 }
  0xe9   :  { %v141_v23 = vsub.f32 0.0, %v127_v17  ;;  %v130_v24 = vadd.f32 %v129_v22, %v39_v19 }
  0xea   :  { %v149_v25 = vmul.f32 1.442695, %v143_v20  ;;  %v144_v26 = vsub.f32 0.0, %v138_v21 }
  0xeb   :  { %v145_v27 = vmul.f32 1.442695, %v141_v23  ;;  %v142_v28 = vsub.f32 0.0, %v130_v24 }
  0xec   :  { %243 = vpow2.f32 %v149_v25  ;;  %v151_v29 = vmul.f32 1.442695, %v144_v26 }
  0xed   :  { %245 = vpow2.f32 %v145_v27  ;;  %v147_v30 = vmul.f32 1.442695, %v142_v28 }
  0xee   :  { %247 = vpow2.f32 %v151_v29 }
  0xef   :  { %249 = vpow2.f32 %v147_v30 }
  0xf6   :  { %v244_v31 = vpop.eup %243 }
  0xf7   :  { %v246_v32 = vpop.eup %245  ;;  %v155_v33 = vadd.f32 1.0, %v244_v31 }
  0xf8   :  { %v248_v34 = vpop.eup %247  ;;  %v153_v35 = vadd.f32 1.0, %v246_v32 }
  0xf9   :  { %v250_v36 = vpop.eup %249  ;;  %251 = vrcp.f32 %v155_v33  ;;  %v156_v37 = vadd.f32 1.0, %v248_v34 }
  0xfa   :  { %253 = vrcp.f32 %v153_v35  ;;  %v154_v38 = vadd.f32 1.0, %v250_v36 }
  0xfb   :  { %255 = vrcp.f32 %v156_v37 }
  0xfc   :  { %257 = vrcp.f32 %v154_v38 }
 0x103   :  { %v252_v39 = vpop.eup %251 }
 0x104   :  { %v254_v40 = vpop.eup %253  ;;  %v163_v43 = vmul.f32 %v252_v39, %v135_v14 }
 0x105   :  { %v256_v41 = vpop.eup %255  ;;  %v161_v45 = vmul.f32 %v254_v40, %v127_v17 }
 0x106   :  { %v258_v42 = vpop.eup %257  ;;  %v164_v44 = vmul.f32 %v256_v41, %v138_v21 }
 0x107   :  { %v162_v46 = vmul.f32 %v258_v42, %v130_v24 }
 0x108   :  { %v213_v47 = vpack.c.bf16 %v164_v44, %v163_v43 }
 0x109   :  { %v208_v48 = vpack.c.bf16 %v162_v46, %v161_v45 }
 0x10a   :  { %215 = vst [vmem:[%s321_s3 + $0x8] sm:$0xff] %v213_v47  }
 0x10b   :  { %209 = vst [vmem:[%s321_s3] sm:$0xff] %v208_v48  }

// kernel: _lambda_.55
= control target key start
LH: loop header
LB: loop body
LE: loop exit
PB: predicated region body
PF: predicated region fallthrough
CT: control target
= control target key end

     0   :  { %v233_v1 = vmov 0   ;;  %vm69_vm0 = vcmask 261120   ;;  %s286_s0 = inlined_call_operand.vmem [shape: bf16[32,128], index: 0, kind: input, shape index: {}]   ;;  %s287_s1 = inlined_call_operand.vmem [shape: bf16[32,32], index: 1, kind: input, shape index: {}]   ;;  %s288_s2 = inlined_call_operand.vmem [shape: f32[32,1], index: 2, kind: input, shape index: {}]   ;;  %s289_s3 = inlined_call_operand.vmem [shape: bf16[32,128], index: 3, kind: output, shape index: {}]  }
   0x1   :  { %v213_v0 = vld [vmem:[%s286_s0] sm:$0xff]   ;;  %212 = vset.pattern.permute.xlu1 %v233_v1  ;;  %211 = vset.pattern.permute.xlu0 %v233_v1  ;;  %v214_v2 = vld [vmem:[%s286_s0 + $0x8] sm:$0xff]   ;;  %v25_v4 = vld [vmem:[%s288_s2 + $0x10] sm:$0xff] }
   0x2   :  { %202 = vmatprep.subr.bf16.mxu0 %v213_v0  ;;  %v215_v3 = vld [vmem:[%s287_s1] sm:$0xff]   ;;  %39 = vperm.xlu1 %212, %v25_v4   ;;  %v216_v6 = vld [vmem:[%s287_s1 + $0x8] sm:$0xff]   ;;  %v26_v7 = vld [vmem:[%s288_s2 + $0x18] sm:$0xff] }
   0x3   :  { %203 = vmatpush3.bf16.msra.mxu0 %v213_v0  ;;  %206 = vmatprep.mubr.msk.bf16.mxu0 %vm69_vm0, %v215_v3  ;;  %v23_v5 = vld [vmem:[%s288_s2] sm:$0xff]  ;;  %v24_v8 = vld [vmem:[%s288_s2 + $0x8] sm:$0xff] }
   0x4   :  { %204 = vmatprep.subr.bf16.mxu0 %v214_v2  ;;  %29 = vperm.xlu0 %211, %v23_v5  }
   0x6   :  { %44 = vperm.xlu1 %212, %v26_v7  }
   0x7   :  { %205 = vmatpush3.bf16.msra.mxu0 %v214_v2 }
   0x8   :  { %34 = vperm.xlu0 %211, %v24_v8  }
   0xa   :  { %207 = vmatmul.mubr.msk.bf16.vlgmr.msra.gmra.mrb[0].mxu0 %vm69_vm0, %v216_v6 }
  0x81   :  { %v40_v9 = vpop.permute.xlu1 %39 }
  0x83   :  { %v30_v10 = vpop.permute.xlu0 %29 }
  0x85   :  { %v45_v14 = vpop.permute.xlu1 %44 }
  0x87   :  { %v35_v17 = vpop.permute.xlu0 %34 }
  0xdd   :  { %v208_v11 = vpop.f32.mrb[0].mxu0 }
  0xde   :  { %v119_v12 = vadd.f32 %v208_v11, %v40_v9  ;;  %v110_v13 = vpop.f32.mrb[1].mxu0 }
  0xdf   :  { %v111_v15 = vadd.f32 %v110_v13, %v30_v10  ;;  %v209_v16 = vpop.f32.mrb[2].mxu0 }
  0xe0   :  { %v127_v18 = vsub.f32 0.0, %v119_v12  ;;  %v122_v19 = vadd.f32 %v209_v16, %v45_v14  ;;  %v113_v20 = vpop.f32.mrb[3].mxu0 }
  0xe1   :  { %v125_v21 = vsub.f32 0.0, %v111_v15  ;;  %v114_v22 = vadd.f32 %v113_v20, %v35_v17 }
  0xe2   :  { %v133_v23 = vmul.f32 1.442695, %v127_v18  ;;  %v128_v24 = vsub.f32 0.0, %v122_v19 }
  0xe3   :  { %v129_v25 = vmul.f32 1.442695, %v125_v21  ;;  %v126_v26 = vsub.f32 0.0, %v114_v22 }
  0xe4   :  { %217 = vpow2.f32 %v133_v23  ;;  %v135_v27 = vmul.f32 1.442695, %v128_v24 }
  0xe5   :  { %219 = vpow2.f32 %v129_v25  ;;  %v131_v28 = vmul.f32 1.442695, %v126_v26 }
  0xe6   :  { %221 = vpow2.f32 %v135_v27 }
  0xe7   :  { %223 = vpow2.f32 %v131_v28 }
  0xee   :  { %v218_v29 = vpop.eup %217 }
  0xef   :  { %v220_v30 = vpop.eup %219  ;;  %v139_v31 = vadd.f32 1.0, %v218_v29 }
  0xf0   :  { %v222_v32 = vpop.eup %221  ;;  %v137_v33 = vadd.f32 1.0, %v220_v30 }
  0xf1   :  { %v224_v34 = vpop.eup %223  ;;  %225 = vrcp.f32 %v139_v31  ;;  %v140_v35 = vadd.f32 1.0, %v222_v32 }
  0xf2   :  { %227 = vrcp.f32 %v137_v33  ;;  %v138_v36 = vadd.f32 1.0, %v224_v34 }
  0xf3   :  { %229 = vrcp.f32 %v140_v35 }
  0xf4   :  { %231 = vrcp.f32 %v138_v36 }
  0xfb   :  { %v226_v37 = vpop.eup %225 }
  0xfc   :  { %v228_v38 = vpop.eup %227  ;;  %v147_v41 = vmul.f32 %v226_v37, %v119_v12 }
  0xfd   :  { %v230_v39 = vpop.eup %229  ;;  %v145_v43 = vmul.f32 %v228_v38, %v111_v15 }
  0xfe   :  { %v232_v40 = vpop.eup %231  ;;  %v148_v42 = vmul.f32 %v230_v39, %v122_v19 }
  0xff   :  { %v146_v44 = vmul.f32 %v232_v40, %v114_v22 }
 0x100   :  { %v195_v45 = vpack.c.bf16 %v148_v42, %v147_v41 }
 0x101   :  { %v190_v46 = vpack.c.bf16 %v146_v44, %v145_v43 }
 0x102   :  { %197 = vst [vmem:[%s289_s3 + $0x8] sm:$0xff] %v195_v45  }
 0x103   :  { %191 = vst [vmem:[%s289_s3] sm:$0xff] %v190_v46  }

// kernel: _lambda_.52
= control target key start
LH: loop header
LB: loop body
LE: loop exit
PB: predicated region body
PF: predicated region fallthrough
CT: control target
= control target key end

     0   :  { %v734_v1 = vmov 0   ;;  %vm283_vm0 = vcmask 261120   ;;  %s905_s0 = inlined_call_operand.vmem [shape: bf16[288,128], index: 0, kind: input, shape index: {}]   ;;  %s906_s1 = inlined_call_operand.vmem [shape: bf16[64,288], index: 1, kind: input, shape index: {}]   ;;  %s907_s2 = inlined_call_operand.vmem [shape: f32[64,1], index: 2, kind: input, shape index: {}]   ;;  %s908_s3 = inlined_call_operand.vmem [shape: bf16[64,128], index: 3, kind: output, shape index: {}]  }
   0x1   :  { %v668_v0 = vld [vmem:[%s905_s0 + $0x40] sm:$0xff]   ;;  %667 = vset.pattern.permute.xlu1 %v734_v1  ;;  %666 = vset.pattern.permute.xlu0 %v734_v1  ;;  %v670_v3 = vld [vmem:[%s905_s0 + $0x48] sm:$0xff]   ;;  %v672_v5 = vld [vmem:[%s905_s0 + $0x50] sm:$0xff]  }
   0x2   :  { %v669_v2 = vld [vmem:[%s905_s0] sm:$0xff]   ;;  %591 = vmatprep.subr.bf16.mxu0 %v668_v0  ;;  %649 = vmatprep.subr.bf16.mxu1 %v668_v0  ;;  %v671_v4 = vld [vmem:[%s905_s0 + $0x8] sm:$0xff]   ;;  %v673_v6 = vld [vmem:[%s905_s0 + $0x10] sm:$0xff]  }
   0x3   :  { %592 = vmatpush3.bf16.msra.mxu0 %v669_v2  ;;  %657 = vmatpush3.bf16.msra.mxu1 %v669_v2  ;;  %v674_v7 = vld [vmem:[%s905_s0 + $0x58] sm:$0xff]   ;;  %v676_v9 = vld [vmem:[%s905_s0 + $0x60] sm:$0xff]   ;;  %v678_v11 = vld [vmem:[%s905_s0 + $0x68] sm:$0xff]  }
   0x4   :  { %593 = vmatprep.subr.bf16.mxu0 %v670_v3  ;;  %650 = vmatprep.subr.bf16.mxu1 %v670_v3  ;;  %v675_v8 = vld [vmem:[%s905_s0 + $0x18] sm:$0xff]   ;;  %v677_v10 = vld [vmem:[%s905_s0 + $0x20] sm:$0xff]   ;;  %v679_v14 = vld [vmem:[%s905_s0 + $0x28] sm:$0xff]  }
   0x5   :  { %v686_v12 = vld [vmem:[%s906_s1 + $0x4] ss:$12 sps:$4 sm:$0xff]   ;;  %v689_v13 = vld [vmem:[%s906_s1 + $0x4c] ss:$12 sps:$4 sm:$0xff]   ;;  %v687_v23 = vld [vmem:[%s906_s1 + $0x48] ss:$12 sps:$4 sm:$0xff]  }
   0x6   :  { %v680_v15 = vld [vmem:[%s905_s0 + $0x70] sm:$0xff]   ;;  %328 = vmatprep.mubr.bf16.mxu0 %v686_v12  ;;  %352 = vmatprep.mubr.bf16.mxu1 %v689_v13  ;;  %v682_v17 = vld [vmem:[%s905_s0 + $0x78] sm:$0xff]   ;;  %v67_v20 = vld [vmem:[%s907_s2] sm:$0xff] }
   0x7   :  { %594 = vmatpush3.bf16.msra.mxu0 %v671_v4  ;;  %658 = vmatpush3.bf16.msra.mxu1 %v671_v4  ;;  %v681_v16 = vld [vmem:[%s905_s0 + $0x30] sm:$0xff]   ;;  %v683_v18 = vld [vmem:[%s905_s0 + $0x38] sm:$0xff]   ;;  %v690_v21 = vld [vmem:[%s905_s0 + $0x80] sm:$0xff]  }
   0x8   :  { %595 = vmatprep.subr.bf16.mxu0 %v672_v5  ;;  %651 = vmatprep.subr.bf16.mxu1 %v672_v5  ;;  %v69_v19 = vld [vmem:[%s907_s2 + $0x10] sm:$0xff]  ;;  %v684_v22 = vld [vmem:[%s906_s1] ss:$12 sps:$4 sm:$0xff]   ;;  %v70_v24 = vld [vmem:[%s907_s2 + $0x18] sm:$0xff] }
   0x9   :  { %87 = vperm.xlu1 %667, %v69_v19   ;;  %77 = vperm.xlu0 %666, %v67_v20   ;;  %v68_v25 = vld [vmem:[%s907_s2 + $0x8] sm:$0xff]  ;;  %v71_v30 = vld [vmem:[%s907_s2 + $0x20] sm:$0xff]  ;;  %v74_v33 = vld [vmem:[%s907_s2 + $0x38] sm:$0xff] }
   0xa   :  { %v692_v26 = vld [vmem:[%s906_s1 + $0x1c] ss:$12 sps:$4 sm:$0xff]   ;;  %v695_v31 = vld [vmem:[%s906_s1 + $0x18] ss:$12 sps:$4 sm:$0xff]   ;;  %v696_v32 = vld [vmem:[%s906_s1 + $0x20] ss:$12 sps:$4 sm:$0xff]  }
   0xb   :  { %596 = vmatpush3.bf16.msra.mxu0 %v673_v6  ;;  %659 = vmatpush3.bf16.msra.mxu1 %v673_v6  ;;  %v691_v27 = vld [vmem:[%s905_s0 + $0x88] sm:$0xff]   ;;  %v73_v34 = vld [vmem:[%s907_s2 + $0x30] sm:$0xff]  ;;  %v699_v36 = vld [vmem:[%s906_s1 + $0x38] ss:$12 sps:$4 sm:$0xff]  }
   0xc   :  { %597 = vmatprep.subr.bf16.mxu0 %v674_v7  ;;  %652 = vmatprep.subr.bf16.mxu1 %v674_v7  ;;  %v694_v28 = vld [vmem:[%s906_s1 + $0x8] ss:$12 sps:$4 sm:$0xff]   ;;  %v700_v37 = vld [vmem:[%s906_s1 + $0x30] ss:$12 sps:$4 sm:$0xff]  }
   0xd   :  { %92 = vperm.xlu1 %667, %v70_v24   ;;  %82 = vperm.xlu0 %666, %v68_v25   ;;  %v72_v29 = vld [vmem:[%s907_s2 + $0x28] sm:$0xff]  ;;  %v697_v35 = vld [vmem:[%s906_s1 + $0x34] ss:$12 sps:$4 sm:$0xff]   ;;  %v701_v38 = vld [vmem:[%s906_s1 + $0x50] ss:$12 sps:$4 sm:$0xff]  }
   0xf   :  { %598 = vmatpush3.bf16.msra.mxu0 %v675_v8  ;;  %660 = vmatpush3.bf16.msra.mxu1 %v675_v8 }
  0x10   :  { %599 = vmatprep.subr.bf16.mxu0 %v676_v9  ;;  %653 = vmatprep.subr.bf16.mxu1 %v676_v9 }
  0x11   :  { %102 = vperm.xlu1 %667, %v72_v29   ;;  %97 = vperm.xlu0 %666, %v71_v30  }
  0x13   :  { %600 = vmatpush3.bf16.msra.mxu0 %v677_v10  ;;  %661 = vmatpush3.bf16.msra.mxu1 %v677_v10 }
  0x14   :  { %601 = vmatprep.subr.bf16.mxu0 %v678_v11  ;;  %654 = vmatprep.subr.bf16.mxu1 %v678_v11 }
  0x15   :  { %112 = vperm.xlu1 %667, %v74_v33   ;;  %107 = vperm.xlu0 %666, %v73_v34  }
  0x17   :  { %602 = vmatpush3.bf16.msra.mxu0 %v679_v14  ;;  %662 = vmatpush3.bf16.msra.mxu1 %v679_v14 }
  0x18   :  { %603 = vmatprep.subr.bf16.mxu0 %v680_v15  ;;  %655 = vmatprep.subr.bf16.mxu1 %v680_v15 }
  0x1b   :  { %604 = vmatpush3.bf16.msra.mxu0 %v681_v16  ;;  %663 = vmatpush3.bf16.msra.mxu1 %v681_v16 }
  0x1c   :  { %605 = vmatprep.subr.bf16.mxu0 %v682_v17  ;;  %656 = vmatprep.subr.bf16.mxu1 %v682_v17 }
  0x1f   :  { %606 = vmatpush3.bf16.msra.mxu0 %v683_v18  ;;  %664 = vmatpush3.bf16.msra.mxu1 %v683_v18 }
  0x20   :  { %637 = vmatprep.subr.bf16.mxu1 %v690_v21 }
  0x22   :  { %329 = vmatmul.mubr.bf16.vlgmr.msra.gmra.mrb[0].mxu0 %v684_v22  ;;  %353 = vmatmul.mubr.bf16.vlgmr.msra.gmra.mrb[0].mxu1 %v687_v23 }
  0x23   :  { %638 = vmatpush3.bf16.msra.mxu1 %v690_v21  ;;  %336 = vmatprep.mubr.bf16.mxu0 %v692_v26 }
  0x24   :  { %639 = vmatprep.subr.bf16.mxu1 %v691_v27  ;;  %641 = vmatprep.mubr.msk.bf16.mxu1 %vm283_vm0, %v694_v28 }
  0x27   :  { %640 = vmatpush3.bf16.msra.mxu1 %v691_v27 }
  0x2a   :  { %337 = vmatmul.mubr.bf16.gmra.mrb[4].mxu0 %v695_v31  ;;  %642 = vmatmul.mubr.msk.bf16.vlgmr.msra.gmra.mrb[4].mxu1 %vm283_vm0, %v696_v32 }
  0x2b   :  { %344 = vmatprep.mubr.bf16.mxu0 %v697_v35  ;;  %645 = vmatprep.mubr.msk.bf16.mxu1 %vm283_vm0, %v699_v36 }
  0x32   :  { %345 = vmatmul.mubr.bf16.gmra.mrb[8].mxu0 %v700_v37  ;;  %646 = vmatmul.mubr.msk.bf16.gmra.mrb[8].mxu1 %vm283_vm0, %v701_v38 }
  0x88   :  { %v88_v39 = vpop.permute.xlu1 %87  ;;  %v78_v40 = vpop.permute.xlu0 %77 }
  0x8c   :  { %v93_v41 = vpop.permute.xlu1 %92  ;;  %v83_v42 = vpop.permute.xlu0 %82 }
  0x90   :  { %v98_v55 = vpop.permute.xlu0 %97  ;;  %v103_v56 = vpop.permute.xlu1 %102 }
  0x94   :  { %v108_v5 = vpop.permute.xlu0 %107  ;;  %v113_v10 = vpop.permute.xlu1 %112 }
  0xf5   :  { %v607_v43 = vpop.f32.mrb[0].mxu0  ;;  %v625_v44 = vpop.f32.mrb[0].mxu1 }
  0xf6   :  { %v608_v45 = vpop.f32.mrb[1].mxu0  ;;  %v626_v46 = vpop.f32.mrb[1].mxu1 }
  0xf7   :  { %v609_v47 = vadd.f32 %v608_v45, %v607_v43  ;;  %v610_v48 = vpop.f32.mrb[2].mxu0  ;;  %v627_v49 = vadd.f32 %v626_v46, %v625_v44  ;;  %v628_v50 = vpop.f32.mrb[2].mxu1 }
  0xf8   :  { %v611_v51 = vpop.f32.mrb[3].mxu0  ;;  %v629_v52 = vpop.f32.mrb[3].mxu1 }
  0xf9   :  { %v612_v53 = vadd.f32 %v611_v51, %v610_v48  ;;  %v630_v54 = vadd.f32 %v629_v52, %v628_v50  ;;  %v331_v59 = vadd.f32 %v609_v47, %v78_v40  ;;  %v355_v15 = vadd.f32 %v627_v49, %v108_v5 }
  0xfb   :  { %v334_v2 = vadd.f32 %v612_v53, %v83_v42  ;;  %v358_v21 = vadd.f32 %v630_v54, %v113_v10 }
  0xfd   :  { %v613_v57 = vpop.f32.mrb[4].mxu0  ;;  %v643_v58 = vpop.f32.mrb[4].mxu1 }
  0xfe   :  { %v614_v60 = vpop.f32.mrb[5].mxu0  ;;  %v395_v61 = vpop.f32.mrb[5].mxu1 }
  0xff   :  { %v615_v62 = vadd.f32 %v614_v60, %v613_v57  ;;  %v873_v63 = vadd.f32 %v395_v61, %v331_v59  ;;  %v616_v0 = vpop.f32.mrb[6].mxu0  ;;  %v644_v1 = vpop.f32.mrb[6].mxu1 }
 0x100   :  { %v617_v3 = vpop.f32.mrb[7].mxu0  ;;  %v398_v4 = vpop.f32.mrb[7].mxu1 }
 0x101   :  { %v339_v6 = vadd.f32 %v615_v62, %v88_v39  ;;  %v426_v7 = vsub.f32 0.0, %v873_v63  ;;  %v618_v8 = vadd.f32 %v617_v3, %v616_v0  ;;  %v876_v9 = vadd.f32 %v398_v4, %v334_v2 }
 0x103   :  { %v878_v11 = vadd.f32 %v643_v58, %v339_v6  ;;  %v434_v12 = vmul.f32 1.442695, %v426_v7  ;;  %v342_v13 = vadd.f32 %v618_v8, %v93_v41  ;;  %v427_v14 = vsub.f32 0.0, %v876_v9 }
 0x105   :  { %v428_v16 = vsub.f32 0.0, %v878_v11  ;;  %702 = vpow2.f32 %v434_v12  ;;  %v882_v17 = vadd.f32 %v644_v1, %v342_v13  ;;  %v436_v18 = vmul.f32 1.442695, %v427_v14  ;;  %v619_v19 = vpop.f32.mrb[8].mxu0  ;;  %v647_v20 = vpop.f32.mrb[8].mxu1 }
 0x106   :  { %v884_v22 = vadd.f32 %v647_v20, %v355_v15  ;;  %v620_v23 = vpop.f32.mrb[9].mxu0  ;;  %v411_v24 = vpop.f32.mrb[9].mxu1 }
 0x107   :  { %v438_v25 = vmul.f32 1.442695, %v428_v16  ;;  %v429_v26 = vsub.f32 0.0, %v882_v17  ;;  %704 = vpow2.f32 %v436_v18  ;;  %v621_v27 = vadd.f32 %v620_v23, %v619_v19  ;;  %v622_v28 = vpop.f32.mrb[10].mxu0  ;;  %v648_v29 = vpop.f32.mrb[10].mxu1 }
 0x108   :  { %v432_v30 = vsub.f32 0.0, %v884_v22  ;;  %v423_v31 = vadd.f32 %v648_v29, %v358_v21  ;;  %v623_v32 = vpop.f32.mrb[11].mxu0  ;;  %v414_v33 = vpop.f32.mrb[11].mxu1 }
 0x109   :  { %706 = vpow2.f32 %v438_v25  ;;  %v440_v34 = vmul.f32 1.442695, %v429_v26  ;;  %v347_v35 = vadd.f32 %v621_v27, %v98_v55  ;;  %v624_v36 = vadd.f32 %v623_v32, %v622_v28 }
 0x10a   :  { %v446_v37 = vmul.f32 1.442695, %v432_v30  ;;  %v433_v38 = vsub.f32 0.0, %v423_v31 }
 0x10b   :  { %708 = vpow2.f32 %v440_v34  ;;  %v412_v39 = vadd.f32 %v411_v24, %v347_v35  ;;  %v350_v40 = vadd.f32 %v624_v36, %v103_v56 }
 0x10c   :  { %710 = vpow2.f32 %v446_v37  ;;  %v448_v41 = vmul.f32 1.442695, %v433_v38 }
 0x10d   :  { %v430_v42 = vsub.f32 0.0, %v412_v39  ;;  %v415_v43 = vadd.f32 %v414_v33, %v350_v40 }
 0x10e   :  { %712 = vpow2.f32 %v448_v41 }
 0x10f   :  { %v703_v44 = vpop.eup %702  ;;  %v442_v45 = vmul.f32 1.442695, %v430_v42  ;;  %v431_v46 = vsub.f32 0.0, %v415_v43 }
 0x110   :  { %v450_v47 = vadd.f32 1.0, %v703_v44 }
 0x111   :  { %v705_v48 = vpop.eup %704  ;;  %714 = vpow2.f32 %v442_v45  ;;  %v444_v49 = vmul.f32 1.442695, %v431_v46 }
 0x112   :  { %716 = vrcp.f32 %v450_v47  ;;  %v451_v50 = vadd.f32 1.0, %v705_v48 }
 0x113   :  { %v707_v51 = vpop.eup %706  ;;  %718 = vpow2.f32 %v444_v49 }
 0x114   :  { %v452_v52 = vadd.f32 1.0, %v707_v51  ;;  %720 = vrcp.f32 %v451_v50 }
 0x115   :  { %v709_v53 = vpop.eup %708 }
 0x116   :  { %v711_v54 = vpop.eup %710  ;;  %722 = vrcp.f32 %v452_v52  ;;  %v453_v55 = vadd.f32 1.0, %v709_v53 }
 0x117   :  { %v456_v56 = vadd.f32 1.0, %v711_v54 }
 0x118   :  { %v713_v57 = vpop.eup %712  ;;  %724 = vrcp.f32 %v453_v55 }
 0x119   :  { %726 = vrcp.f32 %v456_v56  ;;  %v457_v58 = vadd.f32 1.0, %v713_v57 }
 0x11b   :  { %v715_v59 = vpop.eup %714  ;;  %728 = vrcp.f32 %v457_v58 }
 0x11c   :  { %v717_v60 = vpop.eup %716  ;;  %v454_v61 = vadd.f32 1.0, %v715_v59 }
 0x11d   :  { %v719_v62 = vpop.eup %718  ;;  %v466_v2 = vmul.f32 %v717_v60, %v873_v63 }
 0x11e   :  { %v721_v0 = vpop.eup %720  ;;  %730 = vrcp.f32 %v454_v61  ;;  %v455_v1 = vadd.f32 1.0, %v719_v62 }
 0x11f   :  { %v467_v3 = vmul.f32 %v721_v0, %v876_v9 }
 0x120   :  { %v723_v4 = vpop.eup %722  ;;  %732 = vrcp.f32 %v455_v1 }
 0x121   :  { %v571_v5 = vpack.c.bf16 %v467_v3, %v466_v2  ;;  %v468_v8 = vmul.f32 %v723_v4, %v878_v11 }
 0x122   :  { %v725_v6 = vpop.eup %724 }
 0x123   :  { %v727_v7 = vpop.eup %726  ;;  %v469_v10 = vmul.f32 %v725_v6, %v882_v17  ;;  %572 = vst [vmem:[%s908_s3] sm:$0xff] %v571_v5  }
 0x124   :  { %v472_v14 = vmul.f32 %v727_v7, %v884_v22 }
 0x125   :  { %v729_v12 = vpop.eup %728  ;;  %v576_v13 = vpack.c.bf16 %v469_v10, %v468_v8 }
 0x126   :  { %v473_v63 = vmul.f32 %v729_v12, %v423_v31 }
 0x127   :  { %588 = vst [vmem:[%s908_s3 + $0x8] sm:$0xff] %v576_v13  }
 0x128   :  { %v731_v9 = vpop.eup %730  ;;  %v586_v15 = vpack.c.bf16 %v473_v63, %v472_v14 }
 0x129   :  { %v470_v11 = vmul.f32 %v731_v9, %v412_v39 }
 0x12a   :  { %v733_v16 = vpop.eup %732  ;;  %590 = vst [vmem:[%s908_s3 + $0x18] sm:$0xff] %v586_v15  }
 0x12b   :  { %v471_v17 = vmul.f32 %v733_v16, %v415_v43 }
 0x12d   :  { %v581_v18 = vpack.c.bf16 %v471_v17, %v470_v11 }
 0x12f   :  { %589 = vst [vmem:[%s908_s3 + $0x10] sm:$0xff] %v581_v18  }

// kernel: _lambda_.56
= control target key start
LH: loop header
LB: loop body
LE: loop exit
PB: predicated region body
PF: predicated region fallthrough
CT: control target
= control target key end

     0   :  { %v528_v1 = vmov 0   ;;  %vm224_vm0 = vcmask 261120   ;;  %s652_s0 = inlined_call_operand.vmem [shape: bf16[288,128], index: 0, kind: input, shape index: {}]   ;;  %s653_s1 = inlined_call_operand.vmem [shape: bf16[32,288], index: 1, kind: input, shape index: {}]   ;;  %s654_s2 = inlined_call_operand.vmem [shape: f32[32,1], index: 2, kind: input, shape index: {}]   ;;  %s655_s3 = inlined_call_operand.vmem [shape: bf16[32,128], index: 3, kind: input, shape index: {}]   ;;  %s656_s4 = inlined_call_operand.vmem [shape: bf16[32,128], index: 4, kind: output, shape index: {}]  }
   0x1   :  { %v486_v0 = vld [vmem:[%s652_s0 + $0x40] sm:$0xff]   ;;  %484 = vset.pattern.permute.xlu0 %v528_v1  ;;  %485 = vset.pattern.permute.xlu1 %v528_v1  ;;  %v488_v3 = vld [vmem:[%s652_s0 + $0x48] sm:$0xff]   ;;  %v490_v5 = vld [vmem:[%s652_s0 + $0x50] sm:$0xff]  }
   0x2   :  { %v487_v2 = vld [vmem:[%s652_s0] sm:$0xff]   ;;  %443 = vmatprep.subr.bf16.mxu0 %v486_v0  ;;  %v489_v4 = vld [vmem:[%s652_s0 + $0x8] sm:$0xff]   ;;  %v491_v6 = vld [vmem:[%s652_s0 + $0x10] sm:$0xff]  }
   0x3   :  { %444 = vmatpush3.bf16.msra.mxu0 %v487_v2  ;;  %v492_v7 = vld [vmem:[%s652_s0 + $0x58] sm:$0xff]   ;;  %v494_v9 = vld [vmem:[%s652_s0 + $0x60] sm:$0xff]   ;;  %v496_v12 = vld [vmem:[%s652_s0 + $0x68] sm:$0xff]  }
   0x4   :  { %445 = vmatprep.subr.bf16.mxu0 %v488_v3  ;;  %v493_v8 = vld [vmem:[%s652_s0 + $0x18] sm:$0xff]   ;;  %v495_v10 = vld [vmem:[%s652_s0 + $0x20] sm:$0xff]   ;;  %v497_v13 = vld [vmem:[%s652_s0 + $0x28] sm:$0xff]  }
   0x5   :  { %v501_v11 = vld [vmem:[%s652_s0 + $0x80] sm:$0xff]   ;;  %v498_v14 = vld [vmem:[%s652_s0 + $0x70] sm:$0xff]   ;;  %v506_v16 = vld [vmem:[%s652_s0 + $0x88] sm:$0xff]  }
   0x6   :  { %475 = vmatprep.subr.bf16.mxu1 %v501_v11  ;;  %v505_v15 = vld [vmem:[%s653_s1 + $0x4] ss:$12 sps:$4 sm:$0xff]   ;;  %v507_v17 = vld [vmem:[%s653_s1 + $0x8] ss:$12 sps:$4 sm:$0xff]   ;;  %v508_v18 = vld [vmem:[%s653_s1 + $0x20] ss:$12 sps:$4 sm:$0xff]  }
   0x7   :  { %446 = vmatpush3.bf16.msra.mxu0 %v489_v4  ;;  %476 = vmatpush3.bf16.msra.mxu1 %v501_v11  ;;  %v62_v19 = vld [vmem:[%s654_s2] sm:$0xff]  ;;  %v499_v20 = vld [vmem:[%s652_s0 + $0x30] sm:$0xff]   ;;  %v500_v22 = vld [vmem:[%s652_s0 + $0x78] sm:$0xff]  }
   0x8   :  { %447 = vmatprep.subr.bf16.mxu0 %v490_v5  ;;  %263 = vmatprep.mubr.bf16.mxu0 %v505_v15  ;;  %v64_v21 = vld [vmem:[%s654_s2 + $0x10] sm:$0xff]  ;;  %v63_v23 = vld [vmem:[%s654_s2 + $0x8] sm:$0xff]  ;;  %v65_v24 = vld [vmem:[%s654_s2 + $0x18] sm:$0xff] }
   0x9   :  { %477 = vmatprep.subr.bf16.mxu1 %v506_v16  ;;  %479 = vmatprep.mubr.msk.bf16.mxu1 %vm224_vm0, %v507_v17  ;;  %v502_v25 = vld [vmem:[%s652_s0 + $0x38] sm:$0xff]   ;;  %v503_v26 = vld [vmem:[%s653_s1] ss:$12 sps:$4 sm:$0xff]  }
   0xa   :  { %68 = vperm.xlu0 %484, %v62_v19   ;;  %78 = vperm.xlu1 %485, %v64_v21   ;;  %v509_v27 = vld [vmem:[%s653_s1 + $0x1c] ss:$12 sps:$4 sm:$0xff]   ;;  %v511_v28 = vld [vmem:[%s653_s1 + $0x18] ss:$12 sps:$4 sm:$0xff]  }
   0xb   :  { %448 = vmatpush3.bf16.msra.mxu0 %v491_v6  ;;  %478 = vmatpush3.bf16.msra.mxu1 %v506_v16 }
   0xc   :  { %449 = vmatprep.subr.bf16.mxu0 %v492_v7 }
   0xe   :  { %480 = vmatmul.mubr.msk.bf16.vlgmr.msra.gmra.mrb[0].mxu1 %vm224_vm0, %v508_v18  ;;  %73 = vperm.xlu0 %484, %v63_v23   ;;  %v441_v18 = vld [vmem:[%s655_s3 + $0x8] sm:$0xff]  }
   0xf   :  { %450 = vmatpush3.bf16.msra.mxu0 %v493_v8  ;;  %83 = vperm.xlu1 %485, %v65_v24   ;;  %v424_v8 = vld [vmem:[%s655_s3] sm:$0xff]   ;;  %v430_v23 = vunpack.c.h.bf16 %v441_v18 }
  0x10   :  { %451 = vmatprep.subr.bf16.mxu0 %v494_v9 }
  0x13   :  { %452 = vmatpush3.bf16.msra.mxu0 %v495_v10 }
  0x14   :  { %453 = vmatprep.subr.bf16.mxu0 %v496_v12  ;;  %v425_v12 = vunpack.c.l.bf16 %v424_v8 }
  0x17   :  { %454 = vmatpush3.bf16.msra.mxu0 %v497_v13  ;;  %v426_v13 = vunpack.c.h.bf16 %v424_v8 }
  0x18   :  { %455 = vmatprep.subr.bf16.mxu0 %v498_v14 }
  0x1b   :  { %456 = vmatpush3.bf16.msra.mxu0 %v499_v20 }
  0x1c   :  { %457 = vmatprep.subr.bf16.mxu0 %v500_v22  ;;  %v429_v22 = vunpack.c.l.bf16 %v441_v18 }
  0x1f   :  { %458 = vmatpush3.bf16.msra.mxu0 %v502_v25 }
  0x22   :  { %264 = vmatmul.mubr.bf16.vlgmr.msra.gmra.mrb[0].mxu0 %v503_v26 }
  0x23   :  { %271 = vmatprep.mubr.bf16.mxu0 %v509_v27 }
  0x2a   :  { %272 = vmatmul.mubr.bf16.gmra.mrb[4].mxu0 %v511_v28 }
  0x89   :  { %v69_v33 = vpop.permute.xlu0 %68  ;;  %v79_v44 = vpop.permute.xlu1 %78 }
  0x8d   :  { %v74_v39 = vpop.permute.xlu0 %73 }
  0x8e   :  { %v84_v57 = vpop.permute.xlu1 %83 }
  0xe1   :  { %v481_v29 = vpop.f32.mrb[0].mxu1 }
  0xe2   :  { %v314_v30 = vpop.f32.mrb[1].mxu1 }
  0xe3   :  { %v482_v31 = vpop.f32.mrb[2].mxu1 }
  0xe4   :  { %v317_v32 = vpop.f32.mrb[3].mxu1 }
  0xf5   :  { %v459_v34 = vpop.f32.mrb[0].mxu0 }
  0xf6   :  { %v460_v35 = vpop.f32.mrb[1].mxu0 }
  0xf7   :  { %v461_v36 = vadd.f32 %v460_v35, %v459_v34  ;;  %v462_v37 = vpop.f32.mrb[2].mxu0 }
  0xf8   :  { %v463_v38 = vpop.f32.mrb[3].mxu0 }
  0xf9   :  { %v464_v40 = vadd.f32 %v463_v38, %v462_v37  ;;  %v266_v41 = vadd.f32 %v461_v36, %v69_v33 }
  0xfb   :  { %v269_v42 = vadd.f32 %v464_v40, %v74_v39  ;;  %v315_v43 = vadd.f32 %v314_v30, %v266_v41 }
  0xfd   :  { %v329_v45 = vsub.f32 0.0, %v315_v43  ;;  %v318_v46 = vadd.f32 %v317_v32, %v269_v42  ;;  %v465_v47 = vpop.f32.mrb[4].mxu0 }
  0xfe   :  { %v466_v48 = vpop.f32.mrb[5].mxu0 }
  0xff   :  { %v333_v49 = vmul.f32 1.442695, %v329_v45  ;;  %v330_v50 = vsub.f32 0.0, %v318_v46  ;;  %v467_v51 = vadd.f32 %v466_v48, %v465_v47  ;;  %v468_v52 = vpop.f32.mrb[6].mxu0 }
 0x100   :  { %v469_v53 = vpop.f32.mrb[7].mxu0 }
 0x101   :  { %512 = vpow2.f32 %v333_v49  ;;  %v335_v54 = vmul.f32 1.442695, %v330_v50  ;;  %v274_v55 = vadd.f32 %v467_v51, %v79_v44  ;;  %v470_v56 = vadd.f32 %v469_v53, %v468_v52 }
 0x103   :  { %514 = vpow2.f32 %v335_v54  ;;  %v323_v58 = vadd.f32 %v481_v29, %v274_v55  ;;  %v277_v59 = vadd.f32 %v470_v56, %v84_v57 }
 0x105   :  { %v331_v60 = vsub.f32 0.0, %v323_v58  ;;  %v326_v61 = vadd.f32 %v482_v31, %v277_v59 }
 0x107   :  { %v337_v62 = vmul.f32 1.442695, %v331_v60  ;;  %v332_v63 = vsub.f32 0.0, %v326_v61 }
 0x109   :  { %516 = vpow2.f32 %v337_v62  ;;  %v339_v0 = vmul.f32 1.442695, %v332_v63 }
 0x10b   :  { %v513_v1 = vpop.eup %512  ;;  %518 = vpow2.f32 %v339_v0 }
 0x10c   :  { %v341_v2 = vadd.f32 1.0, %v513_v1 }
 0x10d   :  { %v515_v3 = vpop.eup %514 }
 0x10e   :  { %520 = vrcp.f32 %v341_v2  ;;  %v342_v4 = vadd.f32 1.0, %v515_v3 }
 0x110   :  { %522 = vrcp.f32 %v342_v4 }
 0x113   :  { %v517_v5 = vpop.eup %516 }
 0x114   :  { %v343_v6 = vadd.f32 1.0, %v517_v5 }
 0x115   :  { %v519_v7 = vpop.eup %518 }
 0x116   :  { %524 = vrcp.f32 %v343_v6  ;;  %v344_v9 = vadd.f32 1.0, %v519_v7 }
 0x118   :  { %v521_v10 = vpop.eup %520  ;;  %526 = vrcp.f32 %v344_v9 }
 0x119   :  { %v349_v11 = vmul.f32 %v521_v10, %v315_v43 }
 0x11a   :  { %v523_v14 = vpop.eup %522 }
 0x11b   :  { %v350_v15 = vmul.f32 %v523_v14, %v318_v46  ;;  %v361_v16 = vadd.f32 %v425_v12, %v349_v11 }
 0x11d   :  { %v362_v17 = vadd.f32 %v426_v13, %v350_v15 }
 0x11f   :  { %v434_v19 = vpack.c.bf16 %v362_v17, %v361_v16 }
 0x120   :  { %v525_v20 = vpop.eup %524 }
 0x121   :  { %435 = vst [vmem:[%s656_s4] sm:$0xff] %v434_v19   ;;  %v351_v21 = vmul.f32 %v525_v20, %v323_v58 }
 0x122   :  { %v527_v24 = vpop.eup %526 }
 0x123   :  { %v352_v25 = vmul.f32 %v527_v24, %v326_v61  ;;  %v363_v26 = vadd.f32 %v429_v22, %v351_v21 }
 0x125   :  { %v364_v27 = vadd.f32 %v430_v23, %v352_v25 }
 0x127   :  { %v439_v28 = vpack.c.bf16 %v364_v27, %v363_v26 }
 0x129   :  { %442 = vst [vmem:[%s656_s4 + $0x8] sm:$0xff] %v439_v28  }

// kernel: _lambda_.61
= control target key start
LH: loop header
LB: loop body
LE: loop exit
PB: predicated region body
PF: predicated region fallthrough
CT: control target
= control target key end

     0   :  { %v562_v1 = vmov 0   ;;  %vm77_vm0 = vcmask 261120   ;;  %s689_s1 = inlined_call_operand.vmem [shape: bf16[32,128], index: 1, kind: input, shape index: {}]   ;;  %s690_s0 = inlined_call_operand.vmem [shape: bf16[32,128], index: 0, kind: input, shape index: {}]   ;;  %s691_s3 = inlined_call_operand.vmem [shape: bf16[64,32], index: 3, kind: input, shape index: {}]   ;;  %s692_s2 = inlined_call_operand.vmem [shape: bf16[64,32], index: 2, kind: input, shape index: {}]   ;;  %s693_s4 = inlined_call_operand.vmem [shape: f32[64,1], index: 4, kind: input, shape index: {}]   ;;  %s694_s5 = inlined_call_operand.vmem [shape: bf16[64,128], index: 5, kind: output, shape index: {}]  }
   0x1   :  { %v518_v0 = vld [vmem:[%s689_s1] sm:$0xff]   ;;  %517 = vset.pattern.permute.xlu1 %v562_v1  ;;  %516 = vset.pattern.permute.xlu0 %v562_v1  ;;  %v520_v3 = vld [vmem:[%s689_s1 + $0x8] sm:$0xff]   ;;  %v526_v9 = vld [vmem:[%s691_s3 + $0x10] sm:$0xff]  }
   0x2   :  { %v519_v2 = vld [vmem:[%s690_s0] sm:$0xff]   ;;  %483 = vmatprep.subr.bf16.mxu1 %v518_v0  ;;  %v521_v4 = vld [vmem:[%s690_s0 + $0x8] sm:$0xff]   ;;  %v527_v10 = vld [vmem:[%s692_s2 + $0x10] sm:$0xff]  }
   0x3   :  { %495 = vmatprep.subr.bf16.mxu0 %v519_v2  ;;  %484 = vmatpush3.bf16.msra.mxu1 %v518_v0  ;;  %v522_v5 = vld [vmem:[%s691_s3] sm:$0xff]   ;;  %v524_v7 = vld [vmem:[%s691_s3 + $0x8] sm:$0xff]   ;;  %v266_v11 = vld [vmem:[%s693_s4 + $0x10] sm:$0xff] }
   0x4   :  { %496 = vmatpush3.bf16.msra.mxu0 %v519_v2  ;;  %485 = vmatprep.subr.bf16.mxu1 %v520_v3  ;;  %v523_v6 = vld [vmem:[%s692_s2] sm:$0xff]   ;;  %v525_v8 = vld [vmem:[%s692_s2 + $0x8] sm:$0xff]   ;;  %v528_v13 = vld [vmem:[%s691_s3 + $0x18] sm:$0xff]  }
   0x5   :  { %497 = vmatprep.subr.bf16.mxu0 %v521_v4  ;;  %487 = vmatprep.mubr.msk.bf16.mxu1 %vm77_vm0, %v522_v5  ;;  %v264_v12 = vld [vmem:[%s693_s4] sm:$0xff]  ;;  %v267_v14 = vld [vmem:[%s693_s4 + $0x18] sm:$0xff]  ;;  %v265_v15 = vld [vmem:[%s693_s4 + $0x8] sm:$0xff] }
   0x6   :  { %499 = vmatprep.mubr.msk.bf16.mxu0 %vm77_vm0, %v523_v6  ;;  %284 = vperm.xlu1 %517, %v266_v11   ;;  %v529_v16 = vld [vmem:[%s692_s2 + $0x18] sm:$0xff]   ;;  %v269_v17 = vld [vmem:[%s693_s4 + $0x28] sm:$0xff]  ;;  %v268_v18 = vld [vmem:[%s693_s4 + $0x20] sm:$0xff] }
   0x7   :  { %486 = vmatpush3.bf16.msra.mxu1 %v520_v3  ;;  %274 = vperm.xlu0 %516, %v264_v12   ;;  %v271_v19 = vld [vmem:[%s693_s4 + $0x38] sm:$0xff]  ;;  %v270_v20 = vld [vmem:[%s693_s4 + $0x30] sm:$0xff] }
   0x8   :  { %498 = vmatpush3.bf16.msra.mxu0 %v521_v4 }
   0xa   :  { %488 = vmatmul.mubr.msk.bf16.vlgmr.msra.gmra.mrb[0].mxu1 %vm77_vm0, %v524_v7  ;;  %289 = vperm.xlu1 %517, %v267_v14  }
   0xb   :  { %500 = vmatmul.mubr.msk.bf16.vlgmr.msra.gmra.mrb[0].mxu0 %vm77_vm0, %v525_v8  ;;  %491 = vmatprep.mubr.msk.bf16.mxu1 %vm77_vm0, %v526_v9 }
   0xc   :  { %503 = vmatprep.mubr.msk.bf16.mxu0 %vm77_vm0, %v527_v10  ;;  %279 = vperm.xlu0 %516, %v265_v15  }
   0xe   :  { %299 = vperm.xlu1 %517, %v269_v17  }
  0x10   :  { %294 = vperm.xlu0 %516, %v268_v18  }
  0x12   :  { %492 = vmatmul.mubr.msk.bf16.gmra.mrb[4].mxu1 %vm77_vm0, %v528_v13  ;;  %309 = vperm.xlu1 %517, %v271_v19  }
  0x13   :  { %504 = vmatmul.mubr.msk.bf16.gmra.mrb[4].mxu0 %vm77_vm0, %v529_v16 }
  0x14   :  { %304 = vperm.xlu0 %516, %v270_v20  }
  0x85   :  { %v285_v22 = vpop.permute.xlu1 %284 }
  0x86   :  { %v275_v21 = vpop.permute.xlu0 %274 }
  0x89   :  { %v290_v24 = vpop.permute.xlu1 %289 }
  0x8b   :  { %v280_v23 = vpop.permute.xlu0 %279 }
  0x8d   :  { %v300_v42 = vpop.permute.xlu1 %299 }
  0x8f   :  { %v295_v25 = vpop.permute.xlu0 %294 }
  0x91   :  { %v310_v0 = vpop.permute.xlu1 %309 }
  0x93   :  { %v305_v46 = vpop.permute.xlu0 %304 }
  0xdd   :  { %v489_v26 = vpop.f32.mrb[0].mxu1 }
  0xde   :  { %v501_v27 = vpop.f32.mrb[0].mxu0  ;;  %v124_v28 = vpop.f32.mrb[1].mxu1 }
  0xdf   :  { %v242_v29 = vadd.f32 %v501_v27, %v489_v26  ;;  %v233_v30 = vpop.f32.mrb[1].mxu0  ;;  %v490_v31 = vpop.f32.mrb[2].mxu1 }
  0xe0   :  { %v234_v32 = vadd.f32 %v233_v30, %v124_v28  ;;  %v502_v33 = vpop.f32.mrb[2].mxu0  ;;  %v127_v34 = vpop.f32.mrb[3].mxu1 }
  0xe1   :  { %v661_v35 = vadd.f32 %v285_v22, %v242_v29  ;;  %v245_v36 = vadd.f32 %v502_v33, %v490_v31  ;;  %v236_v37 = vpop.f32.mrb[3].mxu0 }
  0xe2   :  { %v663_v38 = vadd.f32 %v275_v21, %v234_v32  ;;  %v237_v39 = vadd.f32 %v236_v37, %v127_v34 }
  0xe3   :  { %v322_v40 = vsub.f32 0.0, %v661_v35  ;;  %v666_v41 = vadd.f32 %v290_v24, %v245_v36 }
  0xe4   :  { %v320_v43 = vsub.f32 0.0, %v663_v38  ;;  %v669_v44 = vadd.f32 %v280_v23, %v237_v39 }
  0xe5   :  { %v332_v45 = vmul.f32 1.442695, %v322_v40  ;;  %v323_v47 = vsub.f32 0.0, %v666_v41  ;;  %v493_v48 = vpop.f32.mrb[4].mxu1 }
  0xe6   :  { %v328_v49 = vmul.f32 1.442695, %v320_v43  ;;  %v321_v50 = vsub.f32 0.0, %v669_v44  ;;  %v505_v51 = vpop.f32.mrb[4].mxu0  ;;  %v140_v52 = vpop.f32.mrb[5].mxu1 }
  0xe7   :  { %530 = vpow2.f32 %v332_v45  ;;  %v334_v53 = vmul.f32 1.442695, %v323_v47  ;;  %v258_v54 = vadd.f32 %v505_v51, %v493_v48  ;;  %v249_v55 = vpop.f32.mrb[5].mxu0  ;;  %v494_v56 = vpop.f32.mrb[6].mxu1 }
  0xe8   :  { %532 = vpow2.f32 %v328_v49  ;;  %v330_v57 = vmul.f32 1.442695, %v321_v50  ;;  %v250_v58 = vadd.f32 %v249_v55, %v140_v52  ;;  %v506_v59 = vpop.f32.mrb[6].mxu0  ;;  %v143_v60 = vpop.f32.mrb[7].mxu1 }
  0xe9   :  { %534 = vpow2.f32 %v334_v53  ;;  %v318_v61 = vadd.f32 %v305_v46, %v258_v54  ;;  %v261_v62 = vadd.f32 %v506_v59, %v494_v56  ;;  %v252_v63 = vpop.f32.mrb[7].mxu0 }
  0xea   :  { %536 = vpow2.f32 %v330_v57  ;;  %v316_v1 = vadd.f32 %v295_v25, %v250_v58  ;;  %v253_v2 = vadd.f32 %v252_v63, %v143_v60 }
  0xeb   :  { %v326_v3 = vsub.f32 0.0, %v318_v61  ;;  %v319_v4 = vadd.f32 %v310_v0, %v261_v62 }
  0xec   :  { %v324_v5 = vsub.f32 0.0, %v316_v1  ;;  %v317_v6 = vadd.f32 %v300_v42, %v253_v2 }
  0xed   :  { %v340_v7 = vmul.f32 1.442695, %v326_v3  ;;  %v327_v8 = vsub.f32 0.0, %v319_v4 }
  0xee   :  { %v336_v9 = vmul.f32 1.442695, %v324_v5  ;;  %v325_v10 = vsub.f32 0.0, %v317_v6 }
  0xef   :  { %538 = vpow2.f32 %v340_v7  ;;  %v342_v11 = vmul.f32 1.442695, %v327_v8 }
  0xf0   :  { %540 = vpow2.f32 %v336_v9  ;;  %v338_v12 = vmul.f32 1.442695, %v325_v10 }
  0xf1   :  { %v531_v13 = vpop.eup %530  ;;  %542 = vpow2.f32 %v342_v11 }
  0xf2   :  { %v533_v14 = vpop.eup %532  ;;  %v346_v15 = vadd.f32 1.0, %v531_v13  ;;  %544 = vpow2.f32 %v338_v12 }
  0xf3   :  { %v535_v16 = vpop.eup %534  ;;  %v344_v17 = vadd.f32 1.0, %v533_v14 }
  0xf4   :  { %v537_v18 = vpop.eup %536  ;;  %546 = vrcp.f32 %v346_v15  ;;  %v347_v19 = vadd.f32 1.0, %v535_v16 }
  0xf5   :  { %548 = vrcp.f32 %v344_v17  ;;  %v345_v20 = vadd.f32 1.0, %v537_v18 }
  0xf6   :  { %550 = vrcp.f32 %v347_v19 }
  0xf7   :  { %552 = vrcp.f32 %v345_v20 }
  0xf9   :  { %v539_v21 = vpop.eup %538 }
  0xfa   :  { %v541_v22 = vpop.eup %540  ;;  %v350_v23 = vadd.f32 1.0, %v539_v21 }
  0xfb   :  { %v543_v24 = vpop.eup %542  ;;  %v348_v25 = vadd.f32 1.0, %v541_v22 }
  0xfc   :  { %v545_v26 = vpop.eup %544  ;;  %554 = vrcp.f32 %v350_v23  ;;  %v351_v27 = vadd.f32 1.0, %v543_v24 }
  0xfd   :  { %556 = vrcp.f32 %v348_v25  ;;  %v349_v28 = vadd.f32 1.0, %v545_v26 }
  0xfe   :  { %v547_v29 = vpop.eup %546  ;;  %558 = vrcp.f32 %v351_v27 }
  0xff   :  { %v549_v30 = vpop.eup %548  ;;  %560 = vrcp.f32 %v349_v28  ;;  %v362_v33 = vmul.f32 %v547_v29, %v661_v35 }
 0x100   :  { %v551_v31 = vpop.eup %550  ;;  %v360_v36 = vmul.f32 %v549_v30, %v663_v38 }
 0x101   :  { %v553_v32 = vpop.eup %552  ;;  %v363_v34 = vmul.f32 %v551_v31, %v666_v41 }
 0x102   :  { %v361_v37 = vmul.f32 %v553_v32, %v669_v44 }
 0x103   :  { %v456_v39 = vpack.c.bf16 %v363_v34, %v362_v33 }
 0x104   :  { %v451_v40 = vpack.c.bf16 %v361_v37, %v360_v36 }
 0x105   :  { %468 = vst [vmem:[%s694_s5 + $0x8] sm:$0xff] %v456_v39  }
 0x106   :  { %v555_v42 = vpop.eup %554  ;;  %452 = vst [vmem:[%s694_s5] sm:$0xff] %v451_v40  }
 0x107   :  { %v557_v43 = vpop.eup %556  ;;  %v366_v46 = vmul.f32 %v555_v42, %v318_v61 }
 0x108   :  { %v559_v45 = vpop.eup %558  ;;  %v364_v47 = vmul.f32 %v557_v43, %v316_v1 }
 0x109   :  { %v561_v35 = vpop.eup %560  ;;  %v367_v41 = vmul.f32 %v559_v45, %v319_v4 }
 0x10a   :  { %v365_v38 = vmul.f32 %v561_v35, %v317_v6 }
 0x10b   :  { %v466_v48 = vpack.c.bf16 %v367_v41, %v366_v46 }
 0x10c   :  { %v461_v44 = vpack.c.bf16 %v365_v38, %v364_v47 }
 0x10d   :  { %470 = vst [vmem:[%s694_s5 + $0x18] sm:$0xff] %v466_v48  }
 0x10e   :  { %469 = vst [vmem:[%s694_s5 + $0x10] sm:$0xff] %v461_v44  }

// kernel: _lambda_.63
= control target key start
LH: loop header
LB: loop body
LE: loop exit
PB: predicated region body
PF: predicated region fallthrough
CT: control target
= control target key end

     0   :  { %v466_v1 = vmov 0   ;;  %s579_s0 = inlined_call_operand.vmem [shape: bf16[128,128], index: 0, kind: input, shape index: {}]   ;;  %s580_s1 = inlined_call_operand.vmem [shape: bf16[64,128], index: 1, kind: input, shape index: {}]   ;;  %s581_s2 = inlined_call_operand.vmem [shape: f32[64,1], index: 2, kind: input, shape index: {}]   ;;  %s582_s3 = inlined_call_operand.vmem [shape: bf16[64,128], index: 3, kind: output, shape index: {}]  }
   0x1   :  { %v422_v0 = vld [vmem:[%s579_s0] sm:$0xff]   ;;  %421 = vset.pattern.permute.xlu1 %v466_v1  ;;  %420 = vset.pattern.permute.xlu0 %v466_v1  ;;  %v423_v2 = vld [vmem:[%s579_s0 + $0x8] sm:$0xff]   ;;  %v424_v3 = vld [vmem:[%s579_s0 + $0x10] sm:$0xff]  }
   0x2   :  { %379 = vmatprep.subr.bf16.mxu0 %v422_v0  ;;  %403 = vmatprep.subr.bf16.mxu1 %v422_v0  ;;  %v425_v4 = vld [vmem:[%s579_s0 + $0x18] sm:$0xff]   ;;  %v430_v5 = vld [vmem:[%s580_s1] sm:$0xff]   ;;  %v431_v6 = vld [vmem:[%s580_s1 + $0x10] sm:$0xff]  }
   0x3   :  { %380 = vmatpush3.bf16.msra.mxu0 %v422_v0  ;;  %411 = vmatpush3.bf16.msra.mxu1 %v422_v0  ;;  %v426_v7 = vld [vmem:[%s579_s0 + $0x20] sm:$0xff]   ;;  %v41_v8 = vld [vmem:[%s581_s2 + $0x10] sm:$0xff]  ;;  %v42_v10 = vld [vmem:[%s581_s2 + $0x18] sm:$0xff] }
   0x4   :  { %381 = vmatprep.subr.bf16.mxu0 %v423_v2  ;;  %404 = vmatprep.subr.bf16.mxu1 %v423_v2  ;;  %v39_v9 = vld [vmem:[%s581_s2] sm:$0xff]  ;;  %v40_v11 = vld [vmem:[%s581_s2 + $0x8] sm:$0xff]  ;;  %v428_v15 = vld [vmem:[%s579_s0 + $0x30] sm:$0xff]  }
   0x5   :  { %395 = vmatprep.mubr.bf16.mxu0 %v430_v5  ;;  %399 = vmatprep.mubr.bf16.mxu1 %v431_v6  ;;  %v427_v12 = vld [vmem:[%s579_s0 + $0x28] sm:$0xff]   ;;  %v43_v14 = vld [vmem:[%s581_s2 + $0x20] sm:$0xff]  ;;  %v46_v16 = vld [vmem:[%s581_s2 + $0x38] sm:$0xff] }
   0x6   :  { %59 = vperm.xlu1 %421, %v41_v8   ;;  %49 = vperm.xlu0 %420, %v39_v9   ;;  %v44_v13 = vld [vmem:[%s581_s2 + $0x28] sm:$0xff]  ;;  %v45_v17 = vld [vmem:[%s581_s2 + $0x30] sm:$0xff]  ;;  %v429_v18 = vld [vmem:[%s579_s0 + $0x38] sm:$0xff]  }
   0x7   :  { %382 = vmatpush3.bf16.msra.mxu0 %v423_v2  ;;  %412 = vmatpush3.bf16.msra.mxu1 %v423_v2  ;;  %v432_v19 = vld [vmem:[%s580_s1 + $0x8] sm:$0xff]   ;;  %v433_v20 = vld [vmem:[%s580_s1 + $0x18] sm:$0xff]  }
   0x8   :  { %383 = vmatprep.subr.bf16.mxu0 %v424_v3  ;;  %405 = vmatprep.subr.bf16.mxu1 %v424_v3 }
   0xa   :  { %64 = vperm.xlu1 %421, %v42_v10   ;;  %54 = vperm.xlu0 %420, %v40_v11  }
   0xb   :  { %384 = vmatpush3.bf16.msra.mxu0 %v424_v3  ;;  %413 = vmatpush3.bf16.msra.mxu1 %v424_v3 }
   0xc   :  { %385 = vmatprep.subr.bf16.mxu0 %v425_v4  ;;  %406 = vmatprep.subr.bf16.mxu1 %v425_v4 }
   0xe   :  { %74 = vperm.xlu1 %421, %v44_v13   ;;  %69 = vperm.xlu0 %420, %v43_v14  }
   0xf   :  { %386 = vmatpush3.bf16.msra.mxu0 %v425_v4  ;;  %414 = vmatpush3.bf16.msra.mxu1 %v425_v4 }
  0x10   :  { %387 = vmatprep.subr.bf16.mxu0 %v426_v7  ;;  %407 = vmatprep.subr.bf16.mxu1 %v426_v7 }
  0x12   :  { %84 = vperm.xlu1 %421, %v46_v16   ;;  %79 = vperm.xlu0 %420, %v45_v17  }
  0x13   :  { %388 = vmatpush3.bf16.msra.mxu0 %v426_v7  ;;  %415 = vmatpush3.bf16.msra.mxu1 %v426_v7 }
  0x14   :  { %389 = vmatprep.subr.bf16.mxu0 %v427_v12  ;;  %408 = vmatprep.subr.bf16.mxu1 %v427_v12 }
  0x17   :  { %390 = vmatpush3.bf16.msra.mxu0 %v427_v12  ;;  %416 = vmatpush3.bf16.msra.mxu1 %v427_v12 }
  0x18   :  { %391 = vmatprep.subr.bf16.mxu0 %v428_v15  ;;  %409 = vmatprep.subr.bf16.mxu1 %v428_v15 }
  0x1b   :  { %392 = vmatpush3.bf16.msra.mxu0 %v428_v15  ;;  %417 = vmatpush3.bf16.msra.mxu1 %v428_v15 }
  0x1c   :  { %393 = vmatprep.subr.bf16.mxu0 %v429_v18  ;;  %410 = vmatprep.subr.bf16.mxu1 %v429_v18 }
  0x1f   :  { %394 = vmatpush3.bf16.msra.mxu0 %v429_v18  ;;  %418 = vmatpush3.bf16.msra.mxu1 %v429_v18 }
  0x22   :  { %396 = vmatmul.mubr.bf16.vlgmr.msra.gmra.mrb[0].mxu0 %v432_v19  ;;  %400 = vmatmul.mubr.bf16.vlgmr.msra.gmra.mrb[0].mxu1 %v433_v20 }
  0x85   :  { %v60_v21 = vpop.permute.xlu1 %59  ;;  %v50_v22 = vpop.permute.xlu0 %49 }
  0x89   :  { %v65_v23 = vpop.permute.xlu1 %64  ;;  %v55_v24 = vpop.permute.xlu0 %54 }
  0x8d   :  { %v75_v25 = vpop.permute.xlu1 %74  ;;  %v70_v26 = vpop.permute.xlu0 %69 }
  0x91   :  { %v85_v27 = vpop.permute.xlu1 %84  ;;  %v80_v28 = vpop.permute.xlu0 %79 }
  0xf5   :  { %v397_v29 = vpop.f32.mrb[0].mxu0  ;;  %v401_v30 = vpop.f32.mrb[0].mxu1 }
  0xf6   :  { %v547_v31 = vadd.f32 %v397_v29, %v60_v21  ;;  %v549_v32 = vadd.f32 %v401_v30, %v80_v28  ;;  %v193_v33 = vpop.f32.mrb[1].mxu0  ;;  %v209_v34 = vpop.f32.mrb[1].mxu1 }
  0xf7   :  { %v551_v35 = vadd.f32 %v193_v33, %v50_v22  ;;  %v553_v36 = vadd.f32 %v209_v34, %v70_v26  ;;  %v398_v37 = vpop.f32.mrb[2].mxu0  ;;  %v402_v38 = vpop.f32.mrb[2].mxu1 }
  0xf8   :  { %v226_v39 = vsub.f32 0.0, %v547_v31  ;;  %v230_v40 = vsub.f32 0.0, %v549_v32  ;;  %v205_v41 = vadd.f32 %v398_v37, %v65_v23  ;;  %v221_v42 = vadd.f32 %v402_v38, %v85_v27  ;;  %v196_v43 = vpop.f32.mrb[3].mxu0  ;;  %v212_v44 = vpop.f32.mrb[3].mxu1 }
  0xf9   :  { %v224_v45 = vsub.f32 0.0, %v551_v35  ;;  %v228_v46 = vsub.f32 0.0, %v553_v36  ;;  %v197_v47 = vadd.f32 %v196_v43, %v55_v24  ;;  %v559_v48 = vadd.f32 %v212_v44, %v75_v25 }
  0xfa   :  { %v236_v49 = vmul.f32 1.442695, %v226_v39  ;;  %v244_v50 = vmul.f32 1.442695, %v230_v40  ;;  %v227_v51 = vsub.f32 0.0, %v205_v41  ;;  %v231_v52 = vsub.f32 0.0, %v221_v42 }
  0xfb   :  { %v232_v53 = vmul.f32 1.442695, %v224_v45  ;;  %v240_v54 = vmul.f32 1.442695, %v228_v46  ;;  %v225_v55 = vsub.f32 0.0, %v197_v47  ;;  %v229_v56 = vsub.f32 0.0, %v559_v48 }
  0xfc   :  { %434 = vpow2.f32 %v236_v49  ;;  %v238_v57 = vmul.f32 1.442695, %v227_v51  ;;  %v246_v58 = vmul.f32 1.442695, %v231_v52 }
  0xfd   :  { %436 = vpow2.f32 %v244_v50  ;;  %v234_v59 = vmul.f32 1.442695, %v225_v55  ;;  %v242_v60 = vmul.f32 1.442695, %v229_v56 }
  0xfe   :  { %438 = vpow2.f32 %v232_v53 }
  0xff   :  { %440 = vpow2.f32 %v240_v54 }
 0x100   :  { %442 = vpow2.f32 %v238_v57 }
 0x101   :  { %444 = vpow2.f32 %v246_v58 }
 0x102   :  { %446 = vpow2.f32 %v234_v59 }
 0x103   :  { %448 = vpow2.f32 %v242_v60 }
 0x106   :  { %v435_v61 = vpop.eup %434 }
 0x107   :  { %v437_v62 = vpop.eup %436  ;;  %v250_v63 = vadd.f32 1.0, %v435_v61 }
 0x108   :  { %v439_v0 = vpop.eup %438  ;;  %v254_v1 = vadd.f32 1.0, %v437_v62 }
 0x109   :  { %v441_v2 = vpop.eup %440  ;;  %450 = vrcp.f32 %v250_v63  ;;  %v248_v3 = vadd.f32 1.0, %v439_v0 }
 0x10a   :  { %v443_v4 = vpop.eup %442  ;;  %452 = vrcp.f32 %v254_v1  ;;  %v252_v5 = vadd.f32 1.0, %v441_v2 }
 0x10b   :  { %v445_v6 = vpop.eup %444  ;;  %454 = vrcp.f32 %v248_v3  ;;  %v251_v7 = vadd.f32 1.0, %v443_v4 }
 0x10c   :  { %v447_v8 = vpop.eup %446  ;;  %456 = vrcp.f32 %v252_v5  ;;  %v255_v9 = vadd.f32 1.0, %v445_v6 }
 0x10d   :  { %v449_v10 = vpop.eup %448  ;;  %458 = vrcp.f32 %v251_v7  ;;  %v249_v11 = vadd.f32 1.0, %v447_v8 }
 0x10e   :  { %460 = vrcp.f32 %v255_v9  ;;  %v253_v12 = vadd.f32 1.0, %v449_v10 }
 0x10f   :  { %462 = vrcp.f32 %v249_v11 }
 0x110   :  { %464 = vrcp.f32 %v253_v12 }
 0x113   :  { %v451_v13 = vpop.eup %450 }
 0x114   :  { %v453_v14 = vpop.eup %452  ;;  %v266_v19 = vmul.f32 %v451_v13, %v547_v31 }
 0x115   :  { %v455_v15 = vpop.eup %454  ;;  %v270_v22 = vmul.f32 %v453_v14, %v549_v32 }
 0x116   :  { %v457_v16 = vpop.eup %456  ;;  %v264_v25 = vmul.f32 %v455_v15, %v551_v35 }
 0x117   :  { %v459_v17 = vpop.eup %458  ;;  %v268_v28 = vmul.f32 %v457_v16, %v553_v36 }
 0x118   :  { %v461_v18 = vpop.eup %460  ;;  %v267_v20 = vmul.f32 %v459_v17, %v205_v41 }
 0x119   :  { %v463_v21 = vpop.eup %462  ;;  %v271_v23 = vmul.f32 %v461_v18, %v221_v42 }
 0x11a   :  { %v465_v24 = vpop.eup %464  ;;  %v352_v26 = vpack.c.bf16 %v267_v20, %v266_v19  ;;  %v265_v27 = vmul.f32 %v463_v21, %v197_v47 }
 0x11b   :  { %v362_v29 = vpack.c.bf16 %v271_v23, %v270_v22  ;;  %v269_v30 = vmul.f32 %v465_v24, %v559_v48 }
 0x11c   :  { %364 = vst [vmem:[%s582_s3 + $0x8] sm:$0xff] %v352_v26   ;;  %v347_v31 = vpack.c.bf16 %v265_v27, %v264_v25 }
 0x11d   :  { %366 = vst [vmem:[%s582_s3 + $0x18] sm:$0xff] %v362_v29   ;;  %v357_v32 = vpack.c.bf16 %v269_v30, %v268_v28 }
 0x11e   :  { %348 = vst [vmem:[%s582_s3] sm:$0xff] %v347_v31  }
 0x11f   :  { %365 = vst [vmem:[%s582_s3 + $0x10] sm:$0xff] %v357_v32  }

// kernel: _lambda_.62
= control target key start
LH: loop header
LB: loop body
LE: loop exit
PB: predicated region body
PF: predicated region fallthrough
CT: control target
= control target key end

     0   :  { %v1637_v1 = vmov 0   ;;  %vm647_vm0 = vcmask 523264   ;;  %s2066_s0 = inlined_call_operand.vmem [shape: bf16[576,128], index: 0, kind: input, shape index: {}]   ;;  %s2067_s1 = inlined_call_operand.vmem [shape: bf16[128,576], index: 1, kind: input, shape index: {}]   ;;  %s2068_s2 = inlined_call_operand.vmem [shape: f32[128,1], index: 2, kind: input, shape index: {}]   ;;  %s2069_s3 = inlined_call_operand.vmem [shape: bf16[128,128], index: 3, kind: output, shape index: {}]  }
   0x1   :  { %v1481_v0 = vld [vmem:[%s2066_s0 + $0x40] sm:$0xff]   ;;  %1479 = vset.pattern.permute.xlu0 %v1637_v1  ;;  %1480 = vset.pattern.permute.xlu1 %v1637_v1  ;;  %v1485_v5 = vld [vmem:[%s2066_s0 + $0x48] sm:$0xff]   ;;  %v1489_v9 = vld [vmem:[%s2066_s0 + $0x50] sm:$0xff]  }
   0x2   :  { %v1482_v2 = vld [vmem:[%s2066_s0 + $0xc0] sm:$0xff]   ;;  %1306 = vmatprep.subr.bf16.mxu0 %v1481_v0  ;;  %v1486_v6 = vld [vmem:[%s2066_s0 + $0xc8] sm:$0xff]   ;;  %v1490_v10 = vld [vmem:[%s2066_s0 + $0xd0] sm:$0xff]  }
   0x3   :  { %v1483_v3 = vld [vmem:[%s2066_s0] sm:$0xff]   ;;  %1370 = vmatprep.subr.bf16.mxu1 %v1482_v2  ;;  %v1487_v7 = vld [vmem:[%s2066_s0 + $0x8] sm:$0xff]   ;;  %v1491_v11 = vld [vmem:[%s2066_s0 + $0x10] sm:$0xff]  }
   0x4   :  { %v1484_v4 = vld [vmem:[%s2066_s0 + $0x80] sm:$0xff]   ;;  %1307 = vmatpush3.bf16.msra.mxu0 %v1483_v3  ;;  %v1488_v8 = vld [vmem:[%s2066_s0 + $0x88] sm:$0xff]   ;;  %v1492_v12 = vld [vmem:[%s2066_s0 + $0x90] sm:$0xff]  }
   0x5   :  { %1371 = vmatpush3.bf16.msra.mxu1 %v1484_v4  ;;  %1308 = vmatprep.subr.bf16.mxu0 %v1485_v5  ;;  %v1493_v13 = vld [vmem:[%s2066_s0 + $0x58] sm:$0xff]   ;;  %v1497_v17 = vld [vmem:[%s2066_s0 + $0x60] sm:$0xff]   ;;  %v1501_v21 = vld [vmem:[%s2066_s0 + $0x68] sm:$0xff]  }
   0x6   :  { %1372 = vmatprep.subr.bf16.mxu1 %v1486_v6  ;;  %v1494_v14 = vld [vmem:[%s2066_s0 + $0xd8] sm:$0xff]   ;;  %v1498_v18 = vld [vmem:[%s2066_s0 + $0xe0] sm:$0xff]   ;;  %v1502_v22 = vld [vmem:[%s2066_s0 + $0xe8] sm:$0xff]  }
   0x7   :  { %v1495_v15 = vld [vmem:[%s2066_s0 + $0x18] sm:$0xff]   ;;  %v1499_v19 = vld [vmem:[%s2066_s0 + $0x20] sm:$0xff]   ;;  %v1503_v23 = vld [vmem:[%s2066_s0 + $0x28] sm:$0xff]  }
   0x8   :  { %1309 = vmatpush3.bf16.msra.mxu0 %v1487_v7  ;;  %v1496_v16 = vld [vmem:[%s2066_s0 + $0x98] sm:$0xff]   ;;  %v1500_v20 = vld [vmem:[%s2066_s0 + $0xa0] sm:$0xff]   ;;  %v1504_v24 = vld [vmem:[%s2066_s0 + $0xa8] sm:$0xff]  }
   0x9   :  { %1373 = vmatpush3.bf16.msra.mxu1 %v1488_v8  ;;  %1310 = vmatprep.subr.bf16.mxu0 %v1489_v9  ;;  %v1505_v25 = vld [vmem:[%s2066_s0 + $0x70] sm:$0xff]   ;;  %v1509_v29 = vld [vmem:[%s2066_s0 + $0x78] sm:$0xff]   ;;  %v1518_v36 = vld [vmem:[%s2067_s1 + $0xc] ss:$20 sps:$4 sm:$0xff]  }
   0xa   :  { %1374 = vmatprep.subr.bf16.mxu1 %v1490_v10  ;;  %v1506_v26 = vld [vmem:[%s2066_s0 + $0xf0] sm:$0xff]   ;;  %v1510_v30 = vld [vmem:[%s2066_s0 + $0xf8] sm:$0xff]   ;;  %v1519_v37 = vld [vmem:[%s2066_s0 + $0x100] sm:$0xff]   ;;  %801 = vmatprep.mubr.bf16.mxu1 %v1518_v36 }
   0xb   :  { %v1507_v27 = vld [vmem:[%s2066_s0 + $0x30] sm:$0xff]   ;;  %v1511_v31 = vld [vmem:[%s2066_s0 + $0x38] sm:$0xff]   ;;  %v1520_v38 = vld [vmem:[%s2067_s1 + $0x2c] ss:$20 sps:$4 sm:$0xff]  }
   0xc   :  { %1311 = vmatpush3.bf16.msra.mxu0 %v1491_v11  ;;  %v1508_v28 = vld [vmem:[%s2066_s0 + $0xb0] sm:$0xff]   ;;  %v1512_v32 = vld [vmem:[%s2066_s0 + $0xb8] sm:$0xff]   ;;  %v1532_v43 = vld [vmem:[%s2066_s0 + $0x108] sm:$0xff]  }
   0xd   :  { %1375 = vmatpush3.bf16.msra.mxu1 %v1492_v12  ;;  %1312 = vmatprep.subr.bf16.mxu0 %v1493_v13  ;;  %v1513_v33 = vld [vmem:[%s2067_s1] ss:$20 sps:$4 sm:$0xff]   ;;  %v1515_v34 = vld [vmem:[%s2067_s1 + $0x4] ss:$20 sps:$4 sm:$0xff]   ;;  %v1516_v35 = vld [vmem:[%s2067_s1 + $0x8] ss:$20 sps:$4 sm:$0xff]  }
   0xe   :  { %1376 = vmatprep.subr.bf16.mxu1 %v1494_v14  ;;  %704 = vmatprep.mubr.bf16.mxu0 %v1515_v34  ;;  %v1522_v39 = vld [vmem:[%s2067_s1 + $0x34] ss:$20 sps:$4 sm:$0xff]   ;;  %v1525_v41 = vld [vmem:[%s2067_s1 + $0x30] ss:$20 sps:$4 sm:$0xff]   ;;  %v1531_v46 = vld [vmem:[%s2067_s1 + $0x58] ss:$20 sps:$4 sm:$0xff]  }
   0xf   :  { %v1524_v40 = vld [vmem:[%s2067_s1 + $0x28] ss:$20 sps:$4 sm:$0xff]   ;;  %v1530_v45 = vld [vmem:[%s2067_s1 + $0x50] ss:$20 sps:$4 sm:$0xff]   ;;  %v1537_v51 = vld [vmem:[%s2067_s1 + $0x78] ss:$20 sps:$4 sm:$0xff]  }
  0x10   :  { %1313 = vmatpush3.bf16.msra.mxu0 %v1495_v15  ;;  %v1526_v42 = vld [vmem:[%s2067_s1 + $0x54] ss:$20 sps:$4 sm:$0xff]   ;;  %v1528_v44 = vld [vmem:[%s2067_s1 + $0x5c] ss:$20 sps:$4 sm:$0xff]   ;;  %v1535_v49 = vld [vmem:[%s2067_s1 + $0x84] ss:$20 sps:$4 sm:$0xff]  }
  0x11   :  { %1377 = vmatpush3.bf16.msra.mxu1 %v1496_v16  ;;  %1314 = vmatprep.subr.bf16.mxu0 %v1497_v17  ;;  %v1545_v47 = vld [vmem:[%s2066_s0 + $0x110] sm:$0xff]   ;;  %v1558_v50 = vld [vmem:[%s2066_s0 + $0x118] sm:$0xff]   ;;  %v1541_v54 = vld [vmem:[%s2067_s1 + $0xac] ss:$20 sps:$4 sm:$0xff]  }
  0x12   :  { %1378 = vmatprep.subr.bf16.mxu1 %v1498_v18  ;;  %v1533_v48 = vld [vmem:[%s2067_s1 + $0x7c] ss:$20 sps:$4 sm:$0xff]   ;;  %v1538_v52 = vld [vmem:[%s2067_s1 + $0x80] ss:$20 sps:$4 sm:$0xff]   ;;  %v1539_v53 = vld [vmem:[%s2067_s1 + $0xa4] ss:$20 sps:$4 sm:$0xff]  }
  0x13   :  { %v1543_v55 = vld [vmem:[%s2067_s1 + $0xa0] ss:$20 sps:$4 sm:$0xff]   ;;  %v1544_v56 = vld [vmem:[%s2067_s1 + $0xa8] ss:$20 sps:$4 sm:$0xff]   ;;  %v1551_v2 = vld [vmem:[%s2067_s1 + $0xd0] ss:$20 sps:$4 sm:$0xff]  }
  0x14   :  { %1315 = vmatpush3.bf16.msra.mxu0 %v1499_v19  ;;  %v1546_v57 = vld [vmem:[%s2067_s1 + $0xcc] ss:$20 sps:$4 sm:$0xff]   ;;  %v1548_v59 = vld [vmem:[%s2067_s1 + $0xd4] ss:$20 sps:$4 sm:$0xff]   ;;  %v138_v62 = vld [vmem:[%s2068_s2 + $0x18] sm:$0xff] }
  0x15   :  { %1379 = vmatpush3.bf16.msra.mxu1 %v1500_v20  ;;  %1316 = vmatprep.subr.bf16.mxu0 %v1501_v21  ;;  %v135_v58 = vld [vmem:[%s2068_s2] sm:$0xff]  ;;  %v137_v60 = vld [vmem:[%s2068_s2 + $0x10] sm:$0xff]  ;;  %v136_v61 = vld [vmem:[%s2068_s2 + $0x8] sm:$0xff] }
  0x16   :  { %1380 = vmatprep.subr.bf16.mxu1 %v1502_v22  ;;  %153 = vperm.xlu0 %1479, %v135_v58   ;;  %v139_v63 = vld [vmem:[%s2068_s2 + $0x20] sm:$0xff]  ;;  %v1550_v0 = vld [vmem:[%s2067_s1 + $0xc8] ss:$20 sps:$4 sm:$0xff]   ;;  %v141_v5 = vld [vmem:[%s2068_s2 + $0x30] sm:$0xff] }
  0x17   :  { %163 = vperm.xlu1 %1480, %v137_v60   ;;  %v140_v1 = vld [vmem:[%s2068_s2 + $0x28] sm:$0xff]  ;;  %v1554_v4 = vld [vmem:[%s2067_s1 + $0xfc] ss:$20 sps:$4 sm:$0xff]   ;;  %v143_v7 = vld [vmem:[%s2068_s2 + $0x40] sm:$0xff] }
  0x18   :  { %1317 = vmatpush3.bf16.msra.mxu0 %v1503_v23  ;;  %v1552_v3 = vld [vmem:[%s2067_s1 + $0xf4] ss:$20 sps:$4 sm:$0xff]   ;;  %v142_v6 = vld [vmem:[%s2068_s2 + $0x38] sm:$0xff]  ;;  %v1556_v8 = vld [vmem:[%s2067_s1 + $0xf0] ss:$20 sps:$4 sm:$0xff]  }
  0x19   :  { %1381 = vmatpush3.bf16.msra.mxu1 %v1504_v24  ;;  %1318 = vmatprep.subr.bf16.mxu0 %v1505_v25  ;;  %v144_v9 = vld [vmem:[%s2068_s2 + $0x48] sm:$0xff]  ;;  %v1559_v11 = vld [vmem:[%s2067_s1 + $0x11c] ss:$20 sps:$4 sm:$0xff]   ;;  %v1561_v12 = vld [vmem:[%s2067_s1 + $0x124] ss:$20 sps:$4 sm:$0xff]  }
  0x1a   :  { %1382 = vmatprep.subr.bf16.mxu1 %v1506_v26  ;;  %158 = vperm.xlu0 %1479, %v136_v61   ;;  %v1557_v10 = vld [vmem:[%s2067_s1 + $0xf8] ss:$20 sps:$4 sm:$0xff]   ;;  %v145_v13 = vld [vmem:[%s2068_s2 + $0x50] sm:$0xff]  ;;  %v147_v15 = vld [vmem:[%s2068_s2 + $0x60] sm:$0xff] }
  0x1b   :  { %168 = vperm.xlu1 %1480, %v138_v62   ;;  %v146_v14 = vld [vmem:[%s2068_s2 + $0x58] sm:$0xff]  ;;  %v148_v17 = vld [vmem:[%s2068_s2 + $0x68] sm:$0xff]  ;;  %v1564_v18 = vld [vmem:[%s2067_s1 + $0x120] ss:$20 sps:$4 sm:$0xff]  }
  0x1c   :  { %1319 = vmatpush3.bf16.msra.mxu0 %v1507_v27  ;;  %v1563_v16 = vld [vmem:[%s2067_s1 + $0x118] ss:$20 sps:$4 sm:$0xff]   ;;  %v1565_v19 = vld [vmem:[%s2067_s1 + $0x10] ss:$20 sps:$4 sm:$0xff]   ;;  %v1569_v25 = vld [vmem:[%s2067_s1 + $0x60] ss:$20 sps:$4 sm:$0xff]  }
  0x1d   :  { %1383 = vmatpush3.bf16.msra.mxu1 %v1508_v28  ;;  %1320 = vmatprep.subr.bf16.mxu0 %v1509_v29  ;;  %v1566_v20 = vld [vmem:[%s2067_s1 + $0xb0] ss:$20 sps:$4 sm:$0xff]   ;;  %v150_v22 = vld [vmem:[%s2068_s2 + $0x78] sm:$0xff]  ;;  %v1570_v26 = vld [vmem:[%s2067_s1 + $0x100] ss:$20 sps:$4 sm:$0xff]  }
  0x1e   :  { %1384 = vmatprep.subr.bf16.mxu1 %v1510_v30  ;;  %173 = vperm.xlu0 %1479, %v139_v63   ;;  %v149_v21 = vld [vmem:[%s2068_s2 + $0x70] sm:$0xff]  ;;  %v1567_v23 = vld [vmem:[%s2067_s1 + $0x38] ss:$20 sps:$4 sm:$0xff]   ;;  %v1571_v27 = vld [vmem:[%s2067_s1 + $0x88] ss:$20 sps:$4 sm:$0xff]  }
  0x1f   :  { %178 = vperm.xlu1 %1480, %v140_v1   ;;  %v1568_v24 = vld [vmem:[%s2067_s1 + $0xd8] ss:$20 sps:$4 sm:$0xff]   ;;  %v1572_v28 = vld [vmem:[%s2067_s1 + $0x128] ss:$20 sps:$4 sm:$0xff]  }
  0x20   :  { %1321 = vmatpush3.bf16.msra.mxu0 %v1511_v31 }
  0x21   :  { %1385 = vmatpush3.bf16.msra.mxu1 %v1512_v32  ;;  %1446 = vmatprep.subr.bf16.mxu0 %v1519_v37 }
  0x22   :  { %1470 = vmatprep.subr.bf16.mxu1 %v1519_v37  ;;  %183 = vperm.xlu0 %1479, %v141_v5  }
  0x23   :  { %705 = vmatmul.mubr.bf16.vlgmr.msra.gmra.mrb[0].mxu0 %v1513_v33  ;;  %188 = vperm.xlu1 %1480, %v142_v6  }
  0x24   :  { %802 = vmatmul.mubr.bf16.vlgmr.msra.gmra.mrb[0].mxu1 %v1516_v35  ;;  %1447 = vmatpush3.bf16.msra.mxu0 %v1519_v37 }
  0x25   :  { %1474 = vmatpush3.bf16.msra.mxu1 %v1519_v37  ;;  %712 = vmatprep.mubr.bf16.mxu0 %v1520_v38 }
  0x26   :  { %809 = vmatprep.mubr.bf16.mxu1 %v1522_v39  ;;  %1448 = vmatprep.subr.bf16.mxu0 %v1532_v43 }
  0x27   :  { %1471 = vmatprep.subr.bf16.mxu1 %v1532_v43  ;;  %193 = vperm.xlu0 %1479, %v143_v7  }
  0x28   :  { %1449 = vmatpush3.bf16.msra.mxu0 %v1532_v43  ;;  %198 = vperm.xlu1 %1480, %v144_v9  }
  0x29   :  { %1475 = vmatpush3.bf16.msra.mxu1 %v1532_v43  ;;  %1450 = vmatprep.subr.bf16.mxu0 %v1545_v47 }
  0x2a   :  { %1472 = vmatprep.subr.bf16.mxu1 %v1545_v47 }
  0x2b   :  { %713 = vmatmul.mubr.bf16.gmra.mrb[4].mxu0 %v1524_v40  ;;  %203 = vperm.xlu0 %1479, %v145_v13  }
  0x2c   :  { %810 = vmatmul.mubr.bf16.gmra.mrb[4].mxu1 %v1525_v41  ;;  %720 = vmatprep.mubr.bf16.mxu0 %v1526_v42 }
  0x2d   :  { %817 = vmatprep.mubr.bf16.mxu1 %v1528_v44  ;;  %1451 = vmatpush3.bf16.msra.mxu0 %v1545_v47 }
  0x2e   :  { %1476 = vmatpush3.bf16.msra.mxu1 %v1545_v47  ;;  %1452 = vmatprep.subr.bf16.mxu0 %v1558_v50 }
  0x2f   :  { %1473 = vmatprep.subr.bf16.mxu1 %v1558_v50  ;;  %208 = vperm.xlu1 %1480, %v146_v14  }
  0x30   :  { %213 = vperm.xlu0 %1479, %v147_v15  }
  0x31   :  { %1453 = vmatpush3.bf16.msra.mxu0 %v1558_v50 }
  0x32   :  { %1477 = vmatpush3.bf16.msra.mxu1 %v1558_v50 }
  0x33   :  { %721 = vmatmul.mubr.bf16.gmra.mrb[8].mxu0 %v1530_v45  ;;  %218 = vperm.xlu1 %1480, %v148_v17  }
  0x34   :  { %818 = vmatmul.mubr.bf16.gmra.mrb[8].mxu1 %v1531_v46  ;;  %728 = vmatprep.mubr.bf16.mxu0 %v1533_v48 }
  0x35   :  { %825 = vmatprep.mubr.bf16.mxu1 %v1535_v49  ;;  %223 = vperm.xlu0 %1479, %v149_v21  }
  0x37   :  { %228 = vperm.xlu1 %1480, %v150_v22  }
  0x3b   :  { %729 = vmatmul.mubr.bf16.gmra.mrb[12].mxu0 %v1537_v51 }
  0x3c   :  { %826 = vmatmul.mubr.bf16.gmra.mrb[12].mxu1 %v1538_v52  ;;  %736 = vmatprep.mubr.bf16.mxu0 %v1539_v53 }
  0x3d   :  { %833 = vmatprep.mubr.bf16.mxu1 %v1541_v54 }
  0x43   :  { %737 = vmatmul.mubr.bf16.gmra.mrb[16].mxu0 %v1543_v55 }
  0x44   :  { %834 = vmatmul.mubr.bf16.gmra.mrb[16].mxu1 %v1544_v56  ;;  %744 = vmatprep.mubr.bf16.mxu0 %v1546_v57 }
  0x45   :  { %841 = vmatprep.mubr.bf16.mxu1 %v1548_v59 }
  0x4b   :  { %745 = vmatmul.mubr.bf16.gmra.mrb[20].mxu0 %v1550_v0 }
  0x4c   :  { %842 = vmatmul.mubr.bf16.gmra.mrb[20].mxu1 %v1551_v2  ;;  %752 = vmatprep.mubr.bf16.mxu0 %v1552_v3 }
  0x4d   :  { %849 = vmatprep.mubr.bf16.mxu1 %v1554_v4 }
  0x53   :  { %753 = vmatmul.mubr.bf16.gmra.mrb[24].mxu0 %v1556_v8 }
  0x54   :  { %850 = vmatmul.mubr.bf16.gmra.mrb[24].mxu1 %v1557_v10  ;;  %760 = vmatprep.mubr.bf16.mxu0 %v1559_v11 }
  0x55   :  { %857 = vmatprep.mubr.bf16.mxu1 %v1561_v12 }
  0x5b   :  { %761 = vmatmul.mubr.bf16.gmra.mrb[28].mxu0 %v1563_v16 }
  0x5c   :  { %858 = vmatmul.mubr.bf16.gmra.mrb[28].mxu1 %v1564_v18  ;;  %1454 = vmatprep.mubr.msk.bf16.mxu0 %vm647_vm0, %v1565_v19 }
  0x5d   :  { %1462 = vmatprep.mubr.msk.bf16.mxu1 %vm647_vm0, %v1566_v20 }
  0x63   :  { %1455 = vmatmul.mubr.msk.bf16.vlgmr.msra.gmra.mrb[32].mxu0 %vm647_vm0, %v1567_v23 }
  0x64   :  { %1463 = vmatmul.mubr.msk.bf16.vlgmr.msra.gmra.mrb[32].mxu1 %vm647_vm0, %v1568_v24  ;;  %1458 = vmatprep.mubr.msk.bf16.mxu0 %vm647_vm0, %v1569_v25 }
  0x65   :  { %1466 = vmatprep.mubr.msk.bf16.mxu1 %vm647_vm0, %v1570_v26 }
  0x6b   :  { %1459 = vmatmul.mubr.msk.bf16.gmra.mrb[36].mxu0 %vm647_vm0, %v1571_v27 }
  0x6c   :  { %1467 = vmatmul.mubr.msk.bf16.gmra.mrb[36].mxu1 %vm647_vm0, %v1572_v28 }
  0x95   :  { %v154_v29 = vpop.permute.xlu0 %153 }
  0x96   :  { %v164_v30 = vpop.permute.xlu1 %163 }
  0x99   :  { %v159_v32 = vpop.permute.xlu0 %158 }
  0x9a   :  { %v169_v48 = vpop.permute.xlu1 %168 }
  0x9d   :  { %v174_v0 = vpop.permute.xlu0 %173 }
  0x9e   :  { %v179_v2 = vpop.permute.xlu1 %178 }
  0xa1   :  { %v184_v19 = vpop.permute.xlu0 %183 }
  0xf6   :  { %v1322_v31 = vpop.f32.mrb[0].mxu0 }
  0xf7   :  { %v1386_v33 = vpop.f32.mrb[0].mxu1  ;;  %v1323_v34 = vpop.f32.mrb[1].mxu0 }
  0xf8   :  { %v1324_v35 = vadd.f32 %v1323_v34, %v1322_v31  ;;  %v1387_v36 = vpop.f32.mrb[1].mxu1  ;;  %v1325_v37 = vpop.f32.mrb[2].mxu0 }
  0xf9   :  { %v1388_v38 = vadd.f32 %v1387_v36, %v1386_v33  ;;  %v1389_v39 = vpop.f32.mrb[2].mxu1  ;;  %v1326_v40 = vpop.f32.mrb[3].mxu0 }
  0xfa   :  { %v707_v41 = vadd.f32 %v1324_v35, %v154_v29  ;;  %v1327_v42 = vadd.f32 %v1326_v40, %v1325_v37  ;;  %v1390_v43 = vpop.f32.mrb[3].mxu1  ;;  %v189_v33 = vpop.permute.xlu1 %188 }
  0xfb   :  { %v1391_v44 = vadd.f32 %v1390_v43, %v1389_v39  ;;  %v194_v36 = vpop.permute.xlu0 %193 }
  0xfc   :  { %v710_v45 = vadd.f32 %v1327_v42, %v159_v32  ;;  %v1942_v46 = vadd.f32 %v1388_v38, %v707_v41 }
  0xfe   :  { %v1328_v47 = vpop.f32.mrb[4].mxu0  ;;  %v1944_v49 = vadd.f32 %v1391_v44, %v710_v45 }
  0xff   :  { %v1392_v50 = vpop.f32.mrb[4].mxu1  ;;  %v1329_v51 = vpop.f32.mrb[5].mxu0 }
 0x100   :  { %v1330_v52 = vadd.f32 %v1329_v51, %v1328_v47  ;;  %v1393_v53 = vpop.f32.mrb[5].mxu1  ;;  %v1331_v54 = vpop.f32.mrb[6].mxu0 }
 0x101   :  { %v1394_v55 = vadd.f32 %v1393_v53, %v1392_v50  ;;  %v1395_v56 = vpop.f32.mrb[6].mxu1  ;;  %v1332_v57 = vpop.f32.mrb[7].mxu0 }
 0x102   :  { %v715_v58 = vadd.f32 %v1330_v52, %v164_v30  ;;  %v1333_v59 = vadd.f32 %v1332_v57, %v1331_v54  ;;  %v1396_v60 = vpop.f32.mrb[7].mxu1  ;;  %v199_v52 = vpop.permute.xlu1 %198 }
 0x103   :  { %v1397_v61 = vadd.f32 %v1396_v60, %v1395_v56  ;;  %v204_v56 = vpop.permute.xlu0 %203 }
 0x104   :  { %v718_v62 = vadd.f32 %v1333_v59, %v169_v48  ;;  %v1946_v63 = vadd.f32 %v1394_v55, %v715_v58 }
 0x106   :  { %v1334_v1 = vpop.f32.mrb[8].mxu0  ;;  %v1948_v3 = vadd.f32 %v1397_v61, %v718_v62 }
 0x107   :  { %v1398_v4 = vpop.f32.mrb[8].mxu1  ;;  %v1335_v5 = vpop.f32.mrb[9].mxu0 }
 0x108   :  { %v1336_v6 = vadd.f32 %v1335_v5, %v1334_v1  ;;  %v1399_v7 = vpop.f32.mrb[9].mxu1  ;;  %v1337_v8 = vpop.f32.mrb[10].mxu0 }
 0x109   :  { %v1400_v9 = vadd.f32 %v1399_v7, %v1398_v4  ;;  %v1401_v10 = vpop.f32.mrb[10].mxu1  ;;  %v1338_v11 = vpop.f32.mrb[11].mxu0 }
 0x10a   :  { %v723_v12 = vadd.f32 %v1336_v6, %v174_v0  ;;  %v1339_v13 = vadd.f32 %v1338_v11, %v1337_v8  ;;  %v1402_v14 = vpop.f32.mrb[11].mxu1  ;;  %v209_v8 = vpop.permute.xlu1 %208 }
 0x10b   :  { %v1403_v15 = vadd.f32 %v1402_v14, %v1401_v10 }
 0x10c   :  { %v726_v16 = vadd.f32 %v1339_v13, %v179_v2  ;;  %v1950_v17 = vadd.f32 %v1400_v9, %v723_v12  ;;  %v214_v12 = vpop.permute.xlu0 %213 }
 0x10e   :  { %v1340_v18 = vpop.f32.mrb[12].mxu0  ;;  %v1952_v20 = vadd.f32 %v1403_v15, %v726_v16 }
 0x10f   :  { %v1404_v21 = vpop.f32.mrb[12].mxu1  ;;  %v1341_v22 = vpop.f32.mrb[13].mxu0 }
 0x110   :  { %v1342_v23 = vadd.f32 %v1341_v22, %v1340_v18  ;;  %v1405_v24 = vpop.f32.mrb[13].mxu1  ;;  %v1343_v25 = vpop.f32.mrb[14].mxu0 }
 0x111   :  { %v1406_v26 = vadd.f32 %v1405_v24, %v1404_v21  ;;  %v1407_v27 = vpop.f32.mrb[14].mxu1  ;;  %v1344_v28 = vpop.f32.mrb[15].mxu0 }
 0x112   :  { %v731_v29 = vadd.f32 %v1342_v23, %v184_v19  ;;  %v1345_v30 = vadd.f32 %v1344_v28, %v1343_v25  ;;  %v1408_v31 = vpop.f32.mrb[15].mxu1  ;;  %v219_v28 = vpop.permute.xlu1 %218 }
 0x113   :  { %v1409_v32 = vadd.f32 %v1408_v31, %v1407_v27 }
 0x114   :  { %v734_v34 = vadd.f32 %v1345_v30, %v189_v33  ;;  %v1954_v35 = vadd.f32 %v1406_v26, %v731_v29 }
 0x116   :  { %v1346_v37 = vpop.f32.mrb[16].mxu0  ;;  %v1956_v38 = vadd.f32 %v1409_v32, %v734_v34  ;;  %v224_v32 = vpop.permute.xlu0 %223 }
 0x117   :  { %v1410_v39 = vpop.f32.mrb[16].mxu1  ;;  %v1347_v40 = vpop.f32.mrb[17].mxu0 }
 0x118   :  { %v1348_v41 = vadd.f32 %v1347_v40, %v1346_v37  ;;  %v1411_v42 = vpop.f32.mrb[17].mxu1  ;;  %v1349_v43 = vpop.f32.mrb[18].mxu0 }
 0x119   :  { %v1412_v44 = vadd.f32 %v1411_v42, %v1410_v39  ;;  %v1413_v45 = vpop.f32.mrb[18].mxu1  ;;  %v1350_v47 = vpop.f32.mrb[19].mxu0 }
 0x11a   :  { %v739_v48 = vadd.f32 %v1348_v41, %v194_v36  ;;  %v1351_v50 = vadd.f32 %v1350_v47, %v1349_v43  ;;  %v1414_v51 = vpop.f32.mrb[19].mxu1 }
 0x11b   :  { %v1415_v53 = vadd.f32 %v1414_v51, %v1413_v45 }
 0x11c   :  { %v742_v54 = vadd.f32 %v1351_v50, %v199_v52  ;;  %v1958_v55 = vadd.f32 %v1412_v44, %v739_v48  ;;  %v229_v50 = vpop.permute.xlu1 %228 }
 0x11e   :  { %v1352_v57 = vpop.f32.mrb[20].mxu0  ;;  %v1960_v58 = vadd.f32 %v1415_v53, %v742_v54 }
 0x11f   :  { %v1416_v59 = vpop.f32.mrb[20].mxu1  ;;  %v1353_v60 = vpop.f32.mrb[21].mxu0 }
 0x120   :  { %v1354_v61 = vadd.f32 %v1353_v60, %v1352_v57  ;;  %v1417_v62 = vpop.f32.mrb[21].mxu1  ;;  %v1355_v0 = vpop.f32.mrb[22].mxu0 }
 0x121   :  { %v1418_v1 = vadd.f32 %v1417_v62, %v1416_v59  ;;  %v1419_v2 = vpop.f32.mrb[22].mxu1  ;;  %v1356_v4 = vpop.f32.mrb[23].mxu0 }
 0x122   :  { %v747_v5 = vadd.f32 %v1354_v61, %v204_v56  ;;  %v1357_v6 = vadd.f32 %v1356_v4, %v1355_v0  ;;  %v1420_v7 = vpop.f32.mrb[23].mxu1 }
 0x123   :  { %v1421_v9 = vadd.f32 %v1420_v7, %v1419_v2 }
 0x124   :  { %v750_v10 = vadd.f32 %v1357_v6, %v209_v8  ;;  %v844_v11 = vadd.f32 %v1418_v1, %v747_v5 }
 0x126   :  { %v1358_v13 = vpop.f32.mrb[24].mxu0  ;;  %v847_v14 = vadd.f32 %v1421_v9, %v750_v10 }
 0x127   :  { %v1422_v15 = vpop.f32.mrb[24].mxu1  ;;  %v1359_v16 = vpop.f32.mrb[25].mxu0 }
 0x128   :  { %v1360_v18 = vadd.f32 %v1359_v16, %v1358_v13  ;;  %v1423_v19 = vpop.f32.mrb[25].mxu1  ;;  %v1361_v21 = vpop.f32.mrb[26].mxu0 }
 0x129   :  { %v1424_v22 = vadd.f32 %v1423_v19, %v1422_v15  ;;  %v1425_v23 = vpop.f32.mrb[26].mxu1  ;;  %v1362_v24 = vpop.f32.mrb[27].mxu0 }
 0x12a   :  { %v755_v25 = vadd.f32 %v1360_v18, %v214_v12  ;;  %v1363_v26 = vadd.f32 %v1362_v24, %v1361_v21  ;;  %v1426_v27 = vpop.f32.mrb[27].mxu1 }
 0x12b   :  { %v1427_v29 = vadd.f32 %v1426_v27, %v1425_v23 }
 0x12c   :  { %v758_v30 = vadd.f32 %v1363_v26, %v219_v28  ;;  %v1962_v31 = vadd.f32 %v1424_v22, %v755_v25 }
 0x12e   :  { %v1364_v33 = vpop.f32.mrb[28].mxu0  ;;  %v1964_v34 = vadd.f32 %v1427_v29, %v758_v30 }
 0x12f   :  { %v1428_v36 = vpop.f32.mrb[28].mxu1  ;;  %v1365_v37 = vpop.f32.mrb[29].mxu0 }
 0x130   :  { %v1366_v39 = vadd.f32 %v1365_v37, %v1364_v33  ;;  %v1429_v40 = vpop.f32.mrb[29].mxu1  ;;  %v1367_v41 = vpop.f32.mrb[30].mxu0 }
 0x131   :  { %v1430_v42 = vadd.f32 %v1429_v40, %v1428_v36  ;;  %v1431_v43 = vpop.f32.mrb[30].mxu1  ;;  %v1368_v44 = vpop.f32.mrb[31].mxu0 }
 0x132   :  { %v763_v45 = vadd.f32 %v1366_v39, %v224_v32  ;;  %v1369_v47 = vadd.f32 %v1368_v44, %v1367_v41  ;;  %v1432_v48 = vpop.f32.mrb[31].mxu1 }
 0x133   :  { %v1433_v51 = vadd.f32 %v1432_v48, %v1431_v43 }
 0x134   :  { %v766_v52 = vadd.f32 %v1369_v47, %v229_v50  ;;  %v860_v53 = vadd.f32 %v1430_v42, %v763_v45 }
 0x136   :  { %v1456_v54 = vpop.f32.mrb[32].mxu0  ;;  %v863_v56 = vadd.f32 %v1433_v51, %v766_v52 }
 0x137   :  { %v1967_v57 = vadd.f32 %v1456_v54, %v1946_v63  ;;  %v1464_v59 = vpop.f32.mrb[32].mxu1  ;;  %v900_v60 = vpop.f32.mrb[33].mxu0 }
 0x138   :  { %v1969_v61 = vadd.f32 %v1464_v59, %v844_v11  ;;  %v1972_v62 = vadd.f32 %v900_v60, %v1942_v46  ;;  %v932_v0 = vpop.f32.mrb[33].mxu1  ;;  %v1457_v1 = vpop.f32.mrb[34].mxu0 }
 0x139   :  { %v965_v2 = vsub.f32 0.0, %v1967_v57  ;;  %v1976_v4 = vadd.f32 %v932_v0, %v1958_v55  ;;  %v1979_v5 = vadd.f32 %v1457_v1, %v1948_v3  ;;  %v1465_v6 = vpop.f32.mrb[34].mxu1  ;;  %v903_v63 = vpop.f32.mrb[35].mxu0 }
 0x13a   :  { %v973_v7 = vsub.f32 0.0, %v1969_v61  ;;  %v963_v8 = vsub.f32 0.0, %v1972_v62  ;;  %v1983_v9 = vadd.f32 %v1465_v6, %v847_v14  ;;  %v1986_v46 = vadd.f32 %v903_v63, %v1944_v49  ;;  %v935_v10 = vpop.f32.mrb[35].mxu1 }
 0x13b   :  { %v983_v11 = vmul.f32 1.442695, %v965_v2  ;;  %v971_v12 = vsub.f32 0.0, %v1976_v4  ;;  %v966_v55 = vsub.f32 0.0, %v1979_v5  ;;  %v1991_v3 = vadd.f32 %v935_v10, %v1960_v58 }
 0x13c   :  { %v999_v13 = vmul.f32 1.442695, %v973_v7  ;;  %v979_v15 = vmul.f32 1.442695, %v963_v8  ;;  %v974_v16 = vsub.f32 0.0, %v1983_v9  ;;  %v964_v18 = vsub.f32 0.0, %v1986_v46 }
 0x13d   :  { %1573 = vpow2.f32 %v983_v11  ;;  %v995_v14 = vmul.f32 1.442695, %v971_v12  ;;  %v985_v19 = vmul.f32 1.442695, %v966_v55  ;;  %v972_v49 = vsub.f32 0.0, %v1991_v3 }
 0x13e   :  { %1575 = vpow2.f32 %v999_v13  ;;  %v1001_v21 = vmul.f32 1.442695, %v974_v16  ;;  %v1460_v22 = vpop.f32.mrb[36].mxu0  ;;  %v981_v23 = vmul.f32 1.442695, %v964_v18 }
 0x13f   :  { %1577 = vpow2.f32 %v979_v15  ;;  %v1997_v24 = vadd.f32 %v1460_v22, %v1954_v35  ;;  %v1468_v58 = vpop.f32.mrb[36].mxu1  ;;  %v916_v25 = vpop.f32.mrb[37].mxu0  ;;  %v997_v26 = vmul.f32 1.442695, %v972_v49 }
 0x140   :  { %1579 = vpow2.f32 %v995_v14  ;;  %v1999_v27 = vadd.f32 %v1468_v58, %v860_v53  ;;  %v2002_v28 = vadd.f32 %v916_v25, %v1950_v17  ;;  %v948_v29 = vpop.f32.mrb[37].mxu1  ;;  %v1461_v30 = vpop.f32.mrb[38].mxu0 }
 0x141   :  { %1581 = vpow2.f32 %v985_v19  ;;  %v969_v32 = vsub.f32 0.0, %v1997_v24  ;;  %v2006_v33 = vadd.f32 %v948_v29, %v1962_v31  ;;  %v2009_v35 = vadd.f32 %v1461_v30, %v1956_v38  ;;  %v1469_v36 = vpop.f32.mrb[38].mxu1  ;;  %v919_v37 = vpop.f32.mrb[39].mxu0 }
 0x142   :  { %1583 = vpow2.f32 %v1001_v21  ;;  %v977_v39 = vsub.f32 0.0, %v1999_v27  ;;  %v967_v40 = vsub.f32 0.0, %v2002_v28  ;;  %v2013_v17 = vadd.f32 %v1469_v36, %v863_v56  ;;  %v951_v41 = vpop.f32.mrb[39].mxu1 }
 0x143   :  { %1585 = vpow2.f32 %v981_v23  ;;  %v991_v42 = vmul.f32 1.442695, %v969_v32  ;;  %v970_v43 = vsub.f32 0.0, %v2009_v35  ;;  %v2017_v45 = vadd.f32 %v919_v37, %v1952_v20 }
 0x144   :  { %1587 = vpow2.f32 %v997_v26  ;;  %v1007_v31 = vmul.f32 1.442695, %v977_v39  ;;  %v987_v44 = vmul.f32 1.442695, %v967_v40  ;;  %v2020_v47 = vadd.f32 %v951_v41, %v1964_v34 }
 0x145   :  { %1589 = vpow2.f32 %v991_v42  ;;  %v993_v38 = vmul.f32 1.442695, %v970_v43  ;;  %v975_v59 = vsub.f32 0.0, %v2006_v33  ;;  %v978_v11 = vsub.f32 0.0, %v2013_v17 }
 0x146   :  { %1591 = vpow2.f32 %v1007_v31  ;;  %v968_v55 = vsub.f32 0.0, %v2017_v45  ;;  %v976_v15 = vsub.f32 0.0, %v2020_v47 }
 0x147   :  { %v1574_v48 = vpop.eup %1573  ;;  %1593 = vpow2.f32 %v987_v44  ;;  %v1003_v7 = vmul.f32 1.442695, %v975_v59  ;;  %v1009_v14 = vmul.f32 1.442695, %v978_v11 }
 0x148   :  { %v1576_v50 = vpop.eup %1575  ;;  %v1013_v51 = vadd.f32 1.0, %v1574_v48  ;;  %1595 = vpow2.f32 %v993_v38  ;;  %v989_v21 = vmul.f32 1.442695, %v968_v55  ;;  %v1005_v23 = vmul.f32 1.442695, %v976_v15 }
 0x149   :  { %v1578_v52 = vpop.eup %1577  ;;  %v1021_v53 = vadd.f32 1.0, %v1576_v50 }
 0x14a   :  { %v1580_v54 = vpop.eup %1579  ;;  %1597 = vrcp.f32 %v1013_v51  ;;  %v1011_v56 = vadd.f32 1.0, %v1578_v52 }
 0x14b   :  { %v1582_v60 = vpop.eup %1581  ;;  %1599 = vrcp.f32 %v1021_v53  ;;  %v1019_v20 = vadd.f32 1.0, %v1580_v54 }
 0x14c   :  { %v1584_v0 = vpop.eup %1583  ;;  %1601 = vrcp.f32 %v1011_v56  ;;  %v1014_v34 = vadd.f32 1.0, %v1582_v60 }
 0x14d   :  { %v1586_v1 = vpop.eup %1585  ;;  %1603 = vrcp.f32 %v1019_v20  ;;  %v1022_v2 = vadd.f32 1.0, %v1584_v0 }
 0x14e   :  { %v1588_v6 = vpop.eup %1587  ;;  %1605 = vrcp.f32 %v1014_v34  ;;  %v1012_v63 = vadd.f32 1.0, %v1586_v1 }
 0x14f   :  { %v1590_v8 = vpop.eup %1589  ;;  %1607 = vrcp.f32 %v1022_v2  ;;  %v1020_v10 = vadd.f32 1.0, %v1588_v6 }
 0x150   :  { %1609 = vrcp.f32 %v1012_v63  ;;  %v1017_v12 = vadd.f32 1.0, %v1590_v8  ;;  %v1592_v13 = vpop.eup %1591 }
 0x151   :  { %1611 = vrcp.f32 %v1020_v10  ;;  %v1594_v16 = vpop.eup %1593 }
 0x152   :  { %1613 = vpow2.f32 %v1003_v7  ;;  %v1596_v18 = vpop.eup %1595 }
 0x153   :  { %1615 = vrcp.f32 %v1017_v12  ;;  %v1018_v49 = vadd.f32 1.0, %v1596_v18 }
 0x154   :  { %v1598_v19 = vpop.eup %1597 }
 0x155   :  { %v1600_v22 = vpop.eup %1599  ;;  %1617 = vrcp.f32 %v1018_v49  ;;  %v1045_v30 = vmul.f32 %v1598_v19, %v1967_v57 }
 0x156   :  { %v1602_v58 = vpop.eup %1601  ;;  %1619 = vpow2.f32 %v1009_v14  ;;  %v1053_v37 = vmul.f32 %v1600_v22, %v1969_v61  ;;  %v1025_v61 = vadd.f32 1.0, %v1592_v13 }
 0x157   :  { %v1604_v25 = vpop.eup %1603  ;;  %1621 = vpow2.f32 %v989_v21  ;;  %v1043_v41 = vmul.f32 %v1602_v58, %v1972_v62 }
 0x158   :  { %v1606_v26 = vpop.eup %1605  ;;  %1623 = vpow2.f32 %v1005_v23  ;;  %v1051_v44 = vmul.f32 %v1604_v25, %v1976_v4 }
 0x159   :  { %v1608_v29 = vpop.eup %1607  ;;  %v1046_v32 = vmul.f32 %v1606_v26, %v1979_v5  ;;  %1625 = vrcp.f32 %v1025_v61 }
 0x15a   :  { %v1610_v36 = vpop.eup %1609  ;;  %v1054_v39 = vmul.f32 %v1608_v29, %v1983_v9  ;;  %v1015_v9 = vadd.f32 1.0, %v1594_v16 }
 0x15b   :  { %v1612_v40 = vpop.eup %1611  ;;  %v1267_v42 = vpack.c.bf16 %v1046_v32, %v1045_v30  ;;  %v1044_v43 = vmul.f32 %v1610_v36, %v1986_v46 }
 0x15c   :  { %v1614_v31 = vpop.eup %1613  ;;  %v1287_v38 = vpack.c.bf16 %v1054_v39, %v1053_v37  ;;  %v1052_v57 = vmul.f32 %v1612_v40, %v1991_v3  ;;  %1627 = vrcp.f32 %v1015_v9 }
 0x15d   :  { %1299 = vst [vmem:[%s2069_s3 + $0x8] sm:$0xff] %v1267_v42   ;;  %v1262_v5 = vpack.c.bf16 %v1044_v43, %v1043_v41  ;;  %v1616_v48 = vpop.eup %1615  ;;  %v1023_v4 = vadd.f32 1.0, %v1614_v31 }
 0x15e   :  { %1303 = vst [vmem:[%s2069_s3 + $0x28] sm:$0xff] %v1287_v38   ;;  %v1282_v62 = vpack.c.bf16 %v1052_v57, %v1051_v44  ;;  %v1049_v50 = vmul.f32 %v1616_v48, %v1997_v24 }
 0x15f   :  { %1263 = vst [vmem:[%s2069_s3] sm:$0xff] %v1262_v5   ;;  %v1618_v46 = vpop.eup %1617  ;;  %1629 = vrcp.f32 %v1023_v4 }
 0x160   :  { %1302 = vst [vmem:[%s2069_s3 + $0x20] sm:$0xff] %v1282_v62   ;;  %v1620_v3 = vpop.eup %1619  ;;  %v1050_v51 = vmul.f32 %v1618_v46, %v2009_v35 }
 0x161   :  { %v1622_v52 = vpop.eup %1621  ;;  %v1026_v53 = vadd.f32 1.0, %v1620_v3 }
 0x162   :  { %v1624_v54 = vpop.eup %1623  ;;  %v1277_v56 = vpack.c.bf16 %v1050_v51, %v1049_v50  ;;  %v1016_v59 = vadd.f32 1.0, %v1622_v52 }
 0x163   :  { %1631 = vrcp.f32 %v1026_v53  ;;  %v1024_v60 = vadd.f32 1.0, %v1624_v54  ;;  %v1626_v20 = vpop.eup %1625 }
 0x164   :  { %1301 = vst [vmem:[%s2069_s3 + $0x18] sm:$0xff] %v1277_v56   ;;  %1633 = vrcp.f32 %v1016_v59  ;;  %v1057_v1 = vmul.f32 %v1626_v20, %v1999_v27 }
 0x165   :  { %1635 = vrcp.f32 %v1024_v60 }
 0x166   :  { %v1628_v24 = vpop.eup %1627 }
 0x167   :  { %v1047_v63 = vmul.f32 %v1628_v24, %v2002_v28 }
 0x169   :  { %v1630_v0 = vpop.eup %1629 }
 0x16a   :  { %v1055_v8 = vmul.f32 %v1630_v0, %v2006_v33 }
 0x16d   :  { %v1632_v34 = vpop.eup %1631 }
 0x16e   :  { %v1634_v35 = vpop.eup %1633  ;;  %v1058_v2 = vmul.f32 %v1632_v34, %v2013_v17 }
 0x16f   :  { %v1636_v6 = vpop.eup %1635  ;;  %v1048_v7 = vmul.f32 %v1634_v35, %v2017_v45 }
 0x170   :  { %v1297_v10 = vpack.c.bf16 %v1058_v2, %v1057_v1  ;;  %v1056_v11 = vmul.f32 %v1636_v6, %v2020_v47 }
 0x171   :  { %v1272_v12 = vpack.c.bf16 %v1048_v7, %v1047_v63 }
 0x172   :  { %1305 = vst [vmem:[%s2069_s3 + $0x38] sm:$0xff] %v1297_v10   ;;  %v1292_v55 = vpack.c.bf16 %v1056_v11, %v1055_v8 }
 0x173   :  { %1300 = vst [vmem:[%s2069_s3 + $0x10] sm:$0xff] %v1272_v12  }
 0x174   :  { %1304 = vst [vmem:[%s2069_s3 + $0x30] sm:$0xff] %v1292_v55  }

// kernel: _lambda_.67
= control target key start
LH: loop header
LB: loop body
LE: loop exit
PB: predicated region body
PF: predicated region fallthrough
CT: control target
= control target key end

     0   :  { %v419_v1 = vmov 0   ;;  %vm123_vm0 = vcmask 523264   ;;  %s524_s0 = inlined_call_operand.vmem [shape: bf16[64,128], index: 0, kind: input, shape index: {}]   ;;  %s525_s1 = inlined_call_operand.vmem [shape: bf16[64,64], index: 1, kind: input, shape index: {}]   ;;  %s526_s2 = inlined_call_operand.vmem [shape: f32[64,1], index: 2, kind: input, shape index: {}]   ;;  %s527_s3 = inlined_call_operand.vmem [shape: bf16[64,128], index: 3, kind: output, shape index: {}]  }
   0x1   :  { %v379_v0 = vld [vmem:[%s524_s0] sm:$0xff]   ;;  %378 = vset.pattern.permute.xlu1 %v419_v1  ;;  %377 = vset.pattern.permute.xlu0 %v419_v1  ;;  %v380_v2 = vld [vmem:[%s524_s0 + $0x8] sm:$0xff]   ;;  %v381_v3 = vld [vmem:[%s524_s0 + $0x10] sm:$0xff]  }
   0x2   :  { %352 = vmatprep.subr.bf16.mxu0 %v379_v0  ;;  %368 = vmatprep.subr.bf16.mxu1 %v379_v0  ;;  %v383_v4 = vld [vmem:[%s525_s1] sm:$0xff]   ;;  %v384_v5 = vld [vmem:[%s525_s1 + $0x10] sm:$0xff]   ;;  %v382_v6 = vld [vmem:[%s524_s0 + $0x18] sm:$0xff]  }
   0x3   :  { %353 = vmatpush3.bf16.msra.mxu0 %v379_v0  ;;  %372 = vmatpush3.bf16.msra.mxu1 %v379_v0  ;;  %v33_v7 = vld [vmem:[%s526_s2 + $0x10] sm:$0xff]  ;;  %v31_v8 = vld [vmem:[%s526_s2] sm:$0xff]  ;;  %v34_v9 = vld [vmem:[%s526_s2 + $0x18] sm:$0xff] }
   0x4   :  { %354 = vmatprep.subr.bf16.mxu0 %v380_v2  ;;  %369 = vmatprep.subr.bf16.mxu1 %v380_v2  ;;  %v32_v10 = vld [vmem:[%s526_s2 + $0x8] sm:$0xff]  ;;  %v386_v12 = vld [vmem:[%s525_s1 + $0x18] sm:$0xff]   ;;  %v35_v14 = vld [vmem:[%s526_s2 + $0x20] sm:$0xff] }
   0x5   :  { %360 = vmatprep.mubr.msk.bf16.mxu0 %vm123_vm0, %v383_v4  ;;  %364 = vmatprep.mubr.msk.bf16.mxu1 %vm123_vm0, %v384_v5  ;;  %v385_v11 = vld [vmem:[%s525_s1 + $0x8] sm:$0xff]   ;;  %v38_v15 = vld [vmem:[%s526_s2 + $0x38] sm:$0xff]  ;;  %v37_v16 = vld [vmem:[%s526_s2 + $0x30] sm:$0xff] }
   0x6   :  { %51 = vperm.xlu1 %378, %v33_v7   ;;  %41 = vperm.xlu0 %377, %v31_v8   ;;  %v36_v13 = vld [vmem:[%s526_s2 + $0x28] sm:$0xff] }
   0x7   :  { %355 = vmatpush3.bf16.msra.mxu0 %v380_v2  ;;  %373 = vmatpush3.bf16.msra.mxu1 %v380_v2 }
   0x8   :  { %356 = vmatprep.subr.bf16.mxu0 %v381_v3  ;;  %370 = vmatprep.subr.bf16.mxu1 %v381_v3 }
   0xa   :  { %56 = vperm.xlu1 %378, %v34_v9   ;;  %46 = vperm.xlu0 %377, %v32_v10  }
   0xb   :  { %357 = vmatpush3.bf16.msra.mxu0 %v381_v3  ;;  %374 = vmatpush3.bf16.msra.mxu1 %v381_v3 }
   0xc   :  { %358 = vmatprep.subr.bf16.mxu0 %v382_v6  ;;  %371 = vmatprep.subr.bf16.mxu1 %v382_v6 }
   0xe   :  { %66 = vperm.xlu1 %378, %v36_v13   ;;  %61 = vperm.xlu0 %377, %v35_v14  }
   0xf   :  { %359 = vmatpush3.bf16.msra.mxu0 %v382_v6  ;;  %375 = vmatpush3.bf16.msra.mxu1 %v382_v6 }
  0x12   :  { %361 = vmatmul.mubr.msk.bf16.vlgmr.msra.gmra.mrb[0].mxu0 %vm123_vm0, %v385_v11  ;;  %365 = vmatmul.mubr.msk.bf16.vlgmr.msra.gmra.mrb[0].mxu1 %vm123_vm0, %v386_v12 }
  0x13   :  { %76 = vperm.xlu1 %378, %v38_v15   ;;  %71 = vperm.xlu0 %377, %v37_v16  }
  0x85   :  { %v52_v17 = vpop.permute.xlu1 %51  ;;  %v42_v18 = vpop.permute.xlu0 %41 }
  0x89   :  { %v57_v19 = vpop.permute.xlu1 %56  ;;  %v47_v20 = vpop.permute.xlu0 %46 }
  0x8d   :  { %v67_v21 = vpop.permute.xlu1 %66  ;;  %v62_v22 = vpop.permute.xlu0 %61 }
  0x92   :  { %v77_v23 = vpop.permute.xlu1 %76  ;;  %v72_v24 = vpop.permute.xlu0 %71 }
  0xe5   :  { %v362_v25 = vpop.f32.mrb[0].mxu0  ;;  %v366_v26 = vpop.f32.mrb[0].mxu1 }
  0xe6   :  { %v492_v27 = vadd.f32 %v362_v25, %v52_v17  ;;  %v494_v28 = vadd.f32 %v366_v26, %v72_v24  ;;  %v170_v29 = vpop.f32.mrb[1].mxu0  ;;  %v186_v30 = vpop.f32.mrb[1].mxu1 }
  0xe7   :  { %v496_v31 = vadd.f32 %v170_v29, %v42_v18  ;;  %v498_v32 = vadd.f32 %v186_v30, %v62_v22  ;;  %v363_v33 = vpop.f32.mrb[2].mxu0  ;;  %v367_v34 = vpop.f32.mrb[2].mxu1 }
  0xe8   :  { %v203_v35 = vsub.f32 0.0, %v492_v27  ;;  %v207_v36 = vsub.f32 0.0, %v494_v28  ;;  %v182_v37 = vadd.f32 %v363_v33, %v57_v19  ;;  %v198_v38 = vadd.f32 %v367_v34, %v77_v23  ;;  %v173_v39 = vpop.f32.mrb[3].mxu0  ;;  %v189_v40 = vpop.f32.mrb[3].mxu1 }
  0xe9   :  { %v201_v41 = vsub.f32 0.0, %v496_v31  ;;  %v205_v42 = vsub.f32 0.0, %v498_v32  ;;  %v174_v43 = vadd.f32 %v173_v39, %v47_v20  ;;  %v504_v44 = vadd.f32 %v189_v40, %v67_v21 }
  0xea   :  { %v213_v45 = vmul.f32 1.442695, %v203_v35  ;;  %v221_v46 = vmul.f32 1.442695, %v207_v36  ;;  %v204_v47 = vsub.f32 0.0, %v182_v37  ;;  %v208_v48 = vsub.f32 0.0, %v198_v38 }
  0xeb   :  { %v209_v49 = vmul.f32 1.442695, %v201_v41  ;;  %v217_v50 = vmul.f32 1.442695, %v205_v42  ;;  %v202_v51 = vsub.f32 0.0, %v174_v43  ;;  %v206_v52 = vsub.f32 0.0, %v504_v44 }
  0xec   :  { %387 = vpow2.f32 %v213_v45  ;;  %v215_v53 = vmul.f32 1.442695, %v204_v47  ;;  %v223_v54 = vmul.f32 1.442695, %v208_v48 }
  0xed   :  { %389 = vpow2.f32 %v221_v46  ;;  %v211_v55 = vmul.f32 1.442695, %v202_v51  ;;  %v219_v56 = vmul.f32 1.442695, %v206_v52 }
  0xee   :  { %391 = vpow2.f32 %v209_v49 }
  0xef   :  { %393 = vpow2.f32 %v217_v50 }
  0xf0   :  { %395 = vpow2.f32 %v215_v53 }
  0xf1   :  { %397 = vpow2.f32 %v223_v54 }
  0xf2   :  { %399 = vpow2.f32 %v211_v55 }
  0xf3   :  { %401 = vpow2.f32 %v219_v56 }
  0xf6   :  { %v388_v57 = vpop.eup %387 }
  0xf7   :  { %v390_v58 = vpop.eup %389  ;;  %v227_v59 = vadd.f32 1.0, %v388_v57 }
  0xf8   :  { %v392_v60 = vpop.eup %391  ;;  %v231_v61 = vadd.f32 1.0, %v390_v58 }
  0xf9   :  { %v394_v62 = vpop.eup %393  ;;  %403 = vrcp.f32 %v227_v59  ;;  %v225_v63 = vadd.f32 1.0, %v392_v60 }
  0xfa   :  { %v396_v0 = vpop.eup %395  ;;  %405 = vrcp.f32 %v231_v61  ;;  %v229_v1 = vadd.f32 1.0, %v394_v62 }
  0xfb   :  { %v398_v2 = vpop.eup %397  ;;  %407 = vrcp.f32 %v225_v63  ;;  %v228_v3 = vadd.f32 1.0, %v396_v0 }
  0xfc   :  { %v400_v4 = vpop.eup %399  ;;  %409 = vrcp.f32 %v229_v1  ;;  %v232_v5 = vadd.f32 1.0, %v398_v2 }
  0xfd   :  { %v402_v6 = vpop.eup %401  ;;  %411 = vrcp.f32 %v228_v3  ;;  %v226_v7 = vadd.f32 1.0, %v400_v4 }
  0xfe   :  { %413 = vrcp.f32 %v232_v5  ;;  %v230_v8 = vadd.f32 1.0, %v402_v6 }
  0xff   :  { %415 = vrcp.f32 %v226_v7 }
 0x100   :  { %417 = vrcp.f32 %v230_v8 }
 0x103   :  { %v404_v9 = vpop.eup %403 }
 0x104   :  { %v406_v10 = vpop.eup %405  ;;  %v243_v15 = vmul.f32 %v404_v9, %v492_v27 }
 0x105   :  { %v408_v11 = vpop.eup %407  ;;  %v247_v18 = vmul.f32 %v406_v10, %v494_v28 }
 0x106   :  { %v410_v12 = vpop.eup %409  ;;  %v241_v21 = vmul.f32 %v408_v11, %v496_v31 }
 0x107   :  { %v412_v13 = vpop.eup %411  ;;  %v245_v24 = vmul.f32 %v410_v12, %v498_v32 }
 0x108   :  { %v414_v14 = vpop.eup %413  ;;  %v244_v16 = vmul.f32 %v412_v13, %v182_v37 }
 0x109   :  { %v416_v17 = vpop.eup %415  ;;  %v248_v19 = vmul.f32 %v414_v14, %v198_v38 }
 0x10a   :  { %v418_v20 = vpop.eup %417  ;;  %v329_v22 = vpack.c.bf16 %v244_v16, %v243_v15  ;;  %v242_v23 = vmul.f32 %v416_v17, %v174_v43 }
 0x10b   :  { %v339_v25 = vpack.c.bf16 %v248_v19, %v247_v18  ;;  %v246_v26 = vmul.f32 %v418_v20, %v504_v44 }
 0x10c   :  { %341 = vst [vmem:[%s527_s3 + $0x8] sm:$0xff] %v329_v22   ;;  %v324_v27 = vpack.c.bf16 %v242_v23, %v241_v21 }
 0x10d   :  { %343 = vst [vmem:[%s527_s3 + $0x18] sm:$0xff] %v339_v25   ;;  %v334_v28 = vpack.c.bf16 %v246_v26, %v245_v24 }
 0x10e   :  { %325 = vst [vmem:[%s527_s3] sm:$0xff] %v324_v27  }
 0x10f   :  { %342 = vst [vmem:[%s527_s3 + $0x10] sm:$0xff] %v334_v28  }

// kernel: _lambda_.64
= control target key start
LH: loop header
LB: loop body
LE: loop exit
PB: predicated region body
PF: predicated region fallthrough
CT: control target
= control target key end

     0   :  { %v1660_v1 = vmov 0   ;;  %vm145_vm0 = vcmask 523264   ;;  %s2032_s1 = inlined_call_operand.vmem [shape: bf16[64,128], index: 1, kind: input, shape index: {}]   ;;  %s2033_s2 = inlined_call_operand.vmem [shape: bf16[64,128], index: 2, kind: input, shape index: {}]   ;;  %s2034_s5 = inlined_call_operand.vmem [shape: bf16[128,64], index: 5, kind: input, shape index: {}]   ;;  %s2035_s6 = inlined_call_operand.vmem [shape: bf16[128,64], index: 6, kind: input, shape index: {}]   ;;  %s2036_s0 = inlined_call_operand.vmem [shape: bf16[64,128], index: 0, kind: input, shape index: {}]   ;;  %s2037_s3 = inlined_call_operand.vmem [shape: bf16[64,128], index: 3, kind: input, shape index: {}]   ;;  %s2038_s4 = inlined_call_operand.vmem [shape: bf16[128,64], index: 4, kind: input, shape index: {}]   ;;  %s2039_s7 = inlined_call_operand.vmem [shape: bf16[128,64], index: 7, kind: input, shape index: {}]   ;;  %s2040_s8 = inlined_call_operand.vmem [shape: f32[128,1], index: 8, kind: input, shape index: {}]   ;;  %s2041_s9 = inlined_call_operand.vmem [shape: bf16[128,128], index: 9, kind: output, shape index: {}]  }
   0x1   :  { %v1548_v0 = vld [vmem:[%s2032_s1] sm:$0xff]   ;;  %1547 = vset.pattern.permute.xlu1 %v1660_v1  ;;  %1546 = vset.pattern.permute.xlu0 %v1660_v1  ;;  %v1550_v3 = vld [vmem:[%s2032_s1 + $0x8] sm:$0xff]   ;;  %v1552_v5 = vld [vmem:[%s2032_s1 + $0x10] sm:$0xff]  }
   0x2   :  { %v1549_v2 = vld [vmem:[%s2033_s2] sm:$0xff]   ;;  %1401 = vmatprep.subr.bf16.mxu1 %v1548_v0  ;;  %v1551_v4 = vld [vmem:[%s2033_s2 + $0x8] sm:$0xff]   ;;  %v1553_v6 = vld [vmem:[%s2033_s2 + $0x10] sm:$0xff]  }
   0x3   :  { %1449 = vmatprep.subr.bf16.mxu0 %v1549_v2  ;;  %1402 = vmatpush3.bf16.msra.mxu1 %v1548_v0  ;;  %v1554_v7 = vld [vmem:[%s2032_s1 + $0x18] sm:$0xff]   ;;  %v1556_v9 = vld [vmem:[%s2034_s5] sm:$0xff]   ;;  %v1558_v11 = vld [vmem:[%s2034_s5 + $0x8] sm:$0xff]  }
   0x4   :  { %1450 = vmatpush3.bf16.msra.mxu0 %v1549_v2  ;;  %1403 = vmatprep.subr.bf16.mxu1 %v1550_v3  ;;  %v1555_v8 = vld [vmem:[%s2033_s2 + $0x18] sm:$0xff]   ;;  %v1557_v10 = vld [vmem:[%s2035_s6] sm:$0xff]   ;;  %v1560_v14 = vld [vmem:[%s2035_s6 + $0x8] sm:$0xff]  }
   0x5   :  { %1451 = vmatprep.subr.bf16.mxu0 %v1551_v4  ;;  %1409 = vmatprep.mubr.msk.bf16.mxu1 %vm145_vm0, %v1556_v9  ;;  %v1559_v12 = vld [vmem:[%s2036_s0] sm:$0xff]   ;;  %v1562_v15 = vld [vmem:[%s2034_s5 + $0x10] sm:$0xff]   ;;  %v1565_v17 = vld [vmem:[%s2036_s0 + $0x8] sm:$0xff]  }
   0x6   :  { %1457 = vmatprep.mubr.msk.bf16.mxu0 %vm145_vm0, %v1557_v10  ;;  %v1561_v13 = vld [vmem:[%s2037_s3] sm:$0xff]   ;;  %v1563_v16 = vld [vmem:[%s2035_s6 + $0x10] sm:$0xff]   ;;  %v1567_v18 = vld [vmem:[%s2037_s3 + $0x8] sm:$0xff]  }
   0x7   :  { %1404 = vmatpush3.bf16.msra.mxu1 %v1550_v3  ;;  %v1564_v19 = vld [vmem:[%s2034_s5 + $0x18] sm:$0xff]   ;;  %v1568_v21 = vld [vmem:[%s2034_s5 + $0x20] sm:$0xff]   ;;  %v1571_v22 = vld [vmem:[%s2036_s0 + $0x10] sm:$0xff]  }
   0x8   :  { %1452 = vmatpush3.bf16.msra.mxu0 %v1551_v4  ;;  %1405 = vmatprep.subr.bf16.mxu1 %v1552_v5  ;;  %v1566_v20 = vld [vmem:[%s2035_s6 + $0x18] sm:$0xff]   ;;  %v1569_v23 = vld [vmem:[%s2035_s6 + $0x20] sm:$0xff]   ;;  %v1573_v24 = vld [vmem:[%s2037_s3 + $0x10] sm:$0xff]  }
   0x9   :  { %1453 = vmatprep.subr.bf16.mxu0 %v1553_v6  ;;  %v1570_v25 = vld [vmem:[%s2034_s5 + $0x28] sm:$0xff]   ;;  %v1577_v27 = vld [vmem:[%s2036_s0 + $0x18] sm:$0xff]   ;;  %v1574_v28 = vld [vmem:[%s2034_s5 + $0x30] sm:$0xff]  }
   0xa   :  { %v1572_v26 = vld [vmem:[%s2035_s6 + $0x28] sm:$0xff]   ;;  %v1579_v29 = vld [vmem:[%s2037_s3 + $0x18] sm:$0xff]   ;;  %v1575_v30 = vld [vmem:[%s2035_s6 + $0x30] sm:$0xff]  }
   0xb   :  { %1406 = vmatpush3.bf16.msra.mxu1 %v1552_v5  ;;  %v1576_v31 = vld [vmem:[%s2034_s5 + $0x38] sm:$0xff]   ;;  %v1580_v33 = vld [vmem:[%s2038_s4] sm:$0xff]   ;;  %v1582_v35 = vld [vmem:[%s2038_s4 + $0x8] sm:$0xff]  }
   0xc   :  { %1454 = vmatpush3.bf16.msra.mxu0 %v1553_v6  ;;  %1407 = vmatprep.subr.bf16.mxu1 %v1554_v7  ;;  %v1578_v32 = vld [vmem:[%s2035_s6 + $0x38] sm:$0xff]   ;;  %v1581_v34 = vld [vmem:[%s2039_s7] sm:$0xff]   ;;  %v1583_v36 = vld [vmem:[%s2039_s7 + $0x8] sm:$0xff]  }
   0xd   :  { %1455 = vmatprep.subr.bf16.mxu0 %v1555_v8  ;;  %v1584_v37 = vld [vmem:[%s2038_s4 + $0x10] sm:$0xff]   ;;  %v902_v40 = vld [vmem:[%s2040_s8] sm:$0xff]  ;;  %v905_v41 = vld [vmem:[%s2040_s8 + $0x18] sm:$0xff] }
   0xe   :  { %v1585_v38 = vld [vmem:[%s2039_s7 + $0x10] sm:$0xff]   ;;  %920 = vperm.xlu0 %1546, %v902_v40   ;;  %v903_v42 = vld [vmem:[%s2040_s8 + $0x8] sm:$0xff]  ;;  %v1586_v43 = vld [vmem:[%s2038_s4 + $0x18] sm:$0xff]  }
   0xf   :  { %1408 = vmatpush3.bf16.msra.mxu1 %v1554_v7  ;;  %v904_v39 = vld [vmem:[%s2040_s8 + $0x10] sm:$0xff]  ;;  %v907_v44 = vld [vmem:[%s2040_s8 + $0x28] sm:$0xff]  ;;  %v906_v45 = vld [vmem:[%s2040_s8 + $0x20] sm:$0xff] }
  0x10   :  { %1456 = vmatpush3.bf16.msra.mxu0 %v1555_v8  ;;  %1425 = vmatprep.subr.bf16.mxu1 %v1559_v12  ;;  %v1587_v46 = vld [vmem:[%s2039_s7 + $0x18] sm:$0xff]   ;;  %v1588_v47 = vld [vmem:[%s2038_s4 + $0x20] sm:$0xff]   ;;  %v908_v50 = vld [vmem:[%s2040_s8 + $0x30] sm:$0xff] }
  0x11   :  { %1473 = vmatprep.subr.bf16.mxu0 %v1561_v13  ;;  %930 = vperm.xlu1 %1547, %v904_v39   ;;  %v1589_v48 = vld [vmem:[%s2039_s7 + $0x20] sm:$0xff]   ;;  %v909_v49 = vld [vmem:[%s2040_s8 + $0x38] sm:$0xff]  ;;  %v1590_v51 = vld [vmem:[%s2038_s4 + $0x28] sm:$0xff]  }
  0x12   :  { %1410 = vmatmul.mubr.msk.bf16.vlgmr.msra.gmra.mrb[0].mxu1 %vm145_vm0, %v1558_v11  ;;  %925 = vperm.xlu0 %1546, %v903_v42   ;;  %v911_v52 = vld [vmem:[%s2040_s8 + $0x48] sm:$0xff]  ;;  %v910_v53 = vld [vmem:[%s2040_s8 + $0x40] sm:$0xff]  ;;  %v1592_v55 = vld [vmem:[%s2038_s4 + $0x30] sm:$0xff]  }
  0x13   :  { %1458 = vmatmul.mubr.msk.bf16.vlgmr.msra.gmra.mrb[0].mxu0 %vm145_vm0, %v1560_v14  ;;  %1426 = vmatpush3.bf16.msra.mxu1 %v1559_v12  ;;  %v1591_v54 = vld [vmem:[%s2039_s7 + $0x28] sm:$0xff]   ;;  %v1593_v56 = vld [vmem:[%s2039_s7 + $0x30] sm:$0xff]   ;;  %v913_v57 = vld [vmem:[%s2040_s8 + $0x58] sm:$0xff] }
  0x14   :  { %1474 = vmatpush3.bf16.msra.mxu0 %v1561_v13  ;;  %1413 = vmatprep.mubr.msk.bf16.mxu1 %vm145_vm0, %v1562_v15  ;;  %v912_v58 = vld [vmem:[%s2040_s8 + $0x50] sm:$0xff]  ;;  %v1594_v59 = vld [vmem:[%s2038_s4 + $0x38] sm:$0xff]   ;;  %v915_v60 = vld [vmem:[%s2040_s8 + $0x68] sm:$0xff] }
  0x15   :  { %1461 = vmatprep.mubr.msk.bf16.mxu0 %vm145_vm0, %v1563_v16  ;;  %1427 = vmatprep.subr.bf16.mxu1 %v1565_v17  ;;  %v914_v61 = vld [vmem:[%s2040_s8 + $0x60] sm:$0xff]  ;;  %v1595_v62 = vld [vmem:[%s2039_s7 + $0x38] sm:$0xff]   ;;  %v916_v0 = vld [vmem:[%s2040_s8 + $0x70] sm:$0xff] }
  0x16   :  { %1475 = vmatprep.subr.bf16.mxu0 %v1567_v18  ;;  %935 = vperm.xlu1 %1547, %v905_v41   ;;  %v917_v63 = vld [vmem:[%s2040_s8 + $0x78] sm:$0xff] }
  0x17   :  { %1428 = vmatpush3.bf16.msra.mxu1 %v1565_v17  ;;  %940 = vperm.xlu0 %1546, %v906_v45  }
  0x18   :  { %1476 = vmatpush3.bf16.msra.mxu0 %v1567_v18  ;;  %1429 = vmatprep.subr.bf16.mxu1 %v1571_v22 }
  0x19   :  { %1477 = vmatprep.subr.bf16.mxu0 %v1573_v24 }
  0x1a   :  { %1414 = vmatmul.mubr.msk.bf16.gmra.mrb[4].mxu1 %vm145_vm0, %v1564_v19  ;;  %945 = vperm.xlu1 %1547, %v907_v44  }
  0x1b   :  { %1462 = vmatmul.mubr.msk.bf16.gmra.mrb[4].mxu0 %vm145_vm0, %v1566_v20  ;;  %1417 = vmatprep.mubr.msk.bf16.mxu1 %vm145_vm0, %v1568_v21 }
  0x1c   :  { %1465 = vmatprep.mubr.msk.bf16.mxu0 %vm145_vm0, %v1569_v23  ;;  %1430 = vmatpush3.bf16.msra.mxu1 %v1571_v22 }
  0x1d   :  { %1478 = vmatpush3.bf16.msra.mxu0 %v1573_v24  ;;  %1431 = vmatprep.subr.bf16.mxu1 %v1577_v27 }
  0x1e   :  { %1479 = vmatprep.subr.bf16.mxu0 %v1579_v29  ;;  %955 = vperm.xlu1 %1547, %v909_v49  }
  0x1f   :  { %950 = vperm.xlu0 %1546, %v908_v50  }
  0x20   :  { %1432 = vmatpush3.bf16.msra.mxu1 %v1577_v27 }
  0x21   :  { %1480 = vmatpush3.bf16.msra.mxu0 %v1579_v29 }
  0x22   :  { %1418 = vmatmul.mubr.msk.bf16.gmra.mrb[8].mxu1 %vm145_vm0, %v1570_v25  ;;  %965 = vperm.xlu1 %1547, %v911_v52  }
  0x23   :  { %1466 = vmatmul.mubr.msk.bf16.gmra.mrb[8].mxu0 %vm145_vm0, %v1572_v26  ;;  %1421 = vmatprep.mubr.msk.bf16.mxu1 %vm145_vm0, %v1574_v28 }
  0x24   :  { %1469 = vmatprep.mubr.msk.bf16.mxu0 %vm145_vm0, %v1575_v30  ;;  %960 = vperm.xlu0 %1546, %v910_v53  }
  0x26   :  { %975 = vperm.xlu1 %1547, %v913_v57  }
  0x28   :  { %970 = vperm.xlu0 %1546, %v912_v58  }
  0x2a   :  { %1422 = vmatmul.mubr.msk.bf16.gmra.mrb[12].mxu1 %vm145_vm0, %v1576_v31  ;;  %985 = vperm.xlu1 %1547, %v915_v60  }
  0x2b   :  { %1470 = vmatmul.mubr.msk.bf16.gmra.mrb[12].mxu0 %vm145_vm0, %v1578_v32  ;;  %1433 = vmatprep.mubr.msk.bf16.mxu1 %vm145_vm0, %v1580_v33 }
  0x2c   :  { %1481 = vmatprep.mubr.msk.bf16.mxu0 %vm145_vm0, %v1581_v34  ;;  %980 = vperm.xlu0 %1546, %v914_v61  }
  0x2e   :  { %995 = vperm.xlu1 %1547, %v917_v63  }
  0x30   :  { %990 = vperm.xlu0 %1546, %v916_v0  }
  0x32   :  { %1434 = vmatmul.mubr.msk.bf16.vlgmr.msra.gmra.mrb[0].mxu1 %vm145_vm0, %v1582_v35 }
  0x33   :  { %1482 = vmatmul.mubr.msk.bf16.vlgmr.msra.gmra.mrb[0].mxu0 %vm145_vm0, %v1583_v36  ;;  %1437 = vmatprep.mubr.msk.bf16.mxu1 %vm145_vm0, %v1584_v37 }
  0x34   :  { %1485 = vmatprep.mubr.msk.bf16.mxu0 %vm145_vm0, %v1585_v38 }
  0x3a   :  { %1438 = vmatmul.mubr.msk.bf16.gmra.mrb[4].mxu1 %vm145_vm0, %v1586_v43 }
  0x3b   :  { %1486 = vmatmul.mubr.msk.bf16.gmra.mrb[4].mxu0 %vm145_vm0, %v1587_v46  ;;  %1441 = vmatprep.mubr.msk.bf16.mxu1 %vm145_vm0, %v1588_v47 }
  0x3c   :  { %1489 = vmatprep.mubr.msk.bf16.mxu0 %vm145_vm0, %v1589_v48 }
  0x42   :  { %1442 = vmatmul.mubr.msk.bf16.gmra.mrb[8].mxu1 %vm145_vm0, %v1590_v51 }
  0x43   :  { %1490 = vmatmul.mubr.msk.bf16.gmra.mrb[8].mxu0 %vm145_vm0, %v1591_v54  ;;  %1445 = vmatprep.mubr.msk.bf16.mxu1 %vm145_vm0, %v1592_v55 }
  0x44   :  { %1493 = vmatprep.mubr.msk.bf16.mxu0 %vm145_vm0, %v1593_v56 }
  0x4a   :  { %1446 = vmatmul.mubr.msk.bf16.gmra.mrb[12].mxu1 %vm145_vm0, %v1594_v59 }
  0x4b   :  { %1494 = vmatmul.mubr.msk.bf16.gmra.mrb[12].mxu0 %vm145_vm0, %v1595_v62 }
  0x8d   :  { %v921_v1 = vpop.permute.xlu0 %920 }
  0x90   :  { %v931_v2 = vpop.permute.xlu1 %930 }
  0x91   :  { %v926_v3 = vpop.permute.xlu0 %925 }
  0x95   :  { %v936_v4 = vpop.permute.xlu1 %935 }
  0x96   :  { %v941_v5 = vpop.permute.xlu0 %940 }
  0x99   :  { %v946_v6 = vpop.permute.xlu1 %945 }
  0x9d   :  { %v956_v8 = vpop.permute.xlu1 %955 }
  0x9e   :  { %v951_v7 = vpop.permute.xlu0 %950 }
  0xa1   :  { %v1944_v26 = vpop.permute.xlu1 %965 }
  0xa3   :  { %v1935_v9 = vpop.permute.xlu0 %960 }
  0xa5   :  { %v976_v52 = vpop.permute.xlu1 %975 }
  0xa7   :  { %v971_v29 = vpop.permute.xlu0 %970 }
  0xab   :  { %v1961_v55 = vpop.permute.xlu0 %980 }
 0x105   :  { %v1435_v10 = vpop.f32.mrb[0].mxu1 }
 0x106   :  { %v1483_v11 = vpop.f32.mrb[0].mxu0  ;;  %v389_v12 = vpop.f32.mrb[1].mxu1 }
 0x107   :  { %v1497_v13 = vadd.f32 %v1483_v11, %v1435_v10  ;;  %v823_v14 = vpop.f32.mrb[1].mxu0  ;;  %v1436_v15 = vpop.f32.mrb[2].mxu1 }
 0x108   :  { %v1498_v16 = vadd.f32 %v823_v14, %v389_v12  ;;  %v1484_v17 = vpop.f32.mrb[2].mxu0  ;;  %v392_v18 = vpop.f32.mrb[3].mxu1 }
 0x109   :  { %v1937_v19 = vadd.f32 %v1497_v13, %v931_v2  ;;  %v1499_v20 = vadd.f32 %v1484_v17, %v1436_v15  ;;  %v826_v21 = vpop.f32.mrb[3].mxu0 }
 0x10a   :  { %v1939_v22 = vadd.f32 %v1498_v16, %v921_v1  ;;  %v1500_v23 = vadd.f32 %v826_v21, %v392_v18 }
 0x10b   :  { %v1016_v24 = vsub.f32 0.0, %v1937_v19  ;;  %v1942_v25 = vadd.f32 %v1499_v20, %v936_v4 }
 0x10c   :  { %v1014_v27 = vsub.f32 0.0, %v1939_v22  ;;  %v1947_v28 = vadd.f32 %v1500_v23, %v926_v3  ;;  %v986_v23 = vpop.permute.xlu1 %985 }
 0x10d   :  { %v1034_v30 = vmul.f32 1.442695, %v1016_v24  ;;  %v1017_v31 = vsub.f32 0.0, %v1942_v25  ;;  %v1439_v32 = vpop.f32.mrb[4].mxu1 }
 0x10e   :  { %v1030_v33 = vmul.f32 1.442695, %v1014_v27  ;;  %v1015_v34 = vsub.f32 0.0, %v1947_v28  ;;  %v1487_v35 = vpop.f32.mrb[4].mxu0  ;;  %v405_v36 = vpop.f32.mrb[5].mxu1 }
 0x10f   :  { %1596 = vpow2.f32 %v1034_v30  ;;  %v1036_v37 = vmul.f32 1.442695, %v1017_v31  ;;  %v1501_v38 = vadd.f32 %v1487_v35, %v1439_v32  ;;  %v839_v39 = vpop.f32.mrb[5].mxu0  ;;  %v1440_v40 = vpop.f32.mrb[6].mxu1 }
 0x110   :  { %1598 = vpow2.f32 %v1030_v33  ;;  %v1032_v41 = vmul.f32 1.442695, %v1015_v34  ;;  %v1502_v42 = vadd.f32 %v839_v39, %v405_v36  ;;  %v1488_v43 = vpop.f32.mrb[6].mxu0  ;;  %v408_v44 = vpop.f32.mrb[7].mxu1 }
 0x111   :  { %1600 = vpow2.f32 %v1036_v37  ;;  %v1951_v45 = vadd.f32 %v1501_v38, %v951_v7  ;;  %v1503_v46 = vadd.f32 %v1488_v43, %v1440_v40  ;;  %v842_v47 = vpop.f32.mrb[7].mxu0  ;;  %v991_v30 = vpop.permute.xlu0 %990 }
 0x112   :  { %1602 = vpow2.f32 %v1032_v41  ;;  %v1953_v48 = vadd.f32 %v1502_v42, %v941_v5  ;;  %v1504_v49 = vadd.f32 %v842_v47, %v408_v44 }
 0x113   :  { %v1020_v50 = vsub.f32 0.0, %v1951_v45  ;;  %v1956_v51 = vadd.f32 %v1503_v46, %v956_v8 }
 0x114   :  { %v1018_v53 = vsub.f32 0.0, %v1953_v48  ;;  %v1959_v54 = vadd.f32 %v1504_v49, %v946_v6 }
 0x115   :  { %v1042_v56 = vmul.f32 1.442695, %v1020_v50  ;;  %v1021_v57 = vsub.f32 0.0, %v1956_v51  ;;  %v1443_v58 = vpop.f32.mrb[8].mxu1 }
 0x116   :  { %v1038_v59 = vmul.f32 1.442695, %v1018_v53  ;;  %v1019_v60 = vsub.f32 0.0, %v1959_v54  ;;  %v1491_v61 = vpop.f32.mrb[8].mxu0  ;;  %v421_v62 = vpop.f32.mrb[9].mxu1 }
 0x117   :  { %1604 = vpow2.f32 %v1042_v56  ;;  %v1044_v63 = vmul.f32 1.442695, %v1021_v57  ;;  %v1505_v0 = vadd.f32 %v1491_v61, %v1443_v58  ;;  %v855_v1 = vpop.f32.mrb[9].mxu0  ;;  %v1444_v2 = vpop.f32.mrb[10].mxu1 }
 0x118   :  { %1606 = vpow2.f32 %v1038_v59  ;;  %v1040_v3 = vmul.f32 1.442695, %v1019_v60  ;;  %v1506_v4 = vadd.f32 %v855_v1, %v421_v62  ;;  %v1492_v5 = vpop.f32.mrb[10].mxu0  ;;  %v424_v6 = vpop.f32.mrb[11].mxu1 }
 0x119   :  { %v1597_v7 = vpop.eup %1596  ;;  %1608 = vpow2.f32 %v1044_v63  ;;  %v1965_v8 = vadd.f32 %v1505_v0, %v971_v29  ;;  %v1507_v10 = vadd.f32 %v1492_v5, %v1444_v2  ;;  %v858_v11 = vpop.f32.mrb[11].mxu0 }
 0x11a   :  { %v1599_v12 = vpop.eup %1598  ;;  %v1064_v13 = vadd.f32 1.0, %v1597_v7  ;;  %1610 = vpow2.f32 %v1040_v3  ;;  %v1968_v14 = vadd.f32 %v1506_v4, %v1935_v9  ;;  %v1508_v15 = vadd.f32 %v858_v11, %v424_v6  ;;  %v996_v53 = vpop.permute.xlu1 %995 }
 0x11b   :  { %v1601_v16 = vpop.eup %1600  ;;  %v1062_v17 = vadd.f32 1.0, %v1599_v12  ;;  %v1024_v18 = vsub.f32 0.0, %v1965_v8  ;;  %v1971_v20 = vadd.f32 %v1507_v10, %v976_v52 }
 0x11c   :  { %v1603_v21 = vpop.eup %1602  ;;  %1612 = vrcp.f32 %v1064_v13  ;;  %v1065_v24 = vadd.f32 1.0, %v1601_v16  ;;  %v1022_v27 = vsub.f32 0.0, %v1968_v14  ;;  %v1975_v29 = vadd.f32 %v1508_v15, %v1944_v26 }
 0x11d   :  { %1614 = vrcp.f32 %v1062_v17  ;;  %v1063_v9 = vadd.f32 1.0, %v1603_v21  ;;  %v1050_v31 = vmul.f32 1.442695, %v1024_v18  ;;  %v1025_v32 = vsub.f32 0.0, %v1971_v20  ;;  %v1447_v33 = vpop.f32.mrb[12].mxu1 }
 0x11e   :  { %1616 = vrcp.f32 %v1065_v24  ;;  %v1046_v34 = vmul.f32 1.442695, %v1022_v27  ;;  %v1023_v35 = vsub.f32 0.0, %v1975_v29  ;;  %v1495_v36 = vpop.f32.mrb[12].mxu0  ;;  %v437_v37 = vpop.f32.mrb[13].mxu1 }
 0x11f   :  { %1618 = vrcp.f32 %v1063_v9  ;;  %v1052_v38 = vmul.f32 1.442695, %v1025_v32  ;;  %v1509_v39 = vadd.f32 %v1495_v36, %v1447_v33  ;;  %v871_v40 = vpop.f32.mrb[13].mxu0  ;;  %v1448_v41 = vpop.f32.mrb[14].mxu1 }
 0x120   :  { %1620 = vpow2.f32 %v1050_v31  ;;  %v1048_v26 = vmul.f32 1.442695, %v1023_v35  ;;  %v1510_v42 = vadd.f32 %v871_v40, %v437_v37  ;;  %v1496_v43 = vpop.f32.mrb[14].mxu0  ;;  %v440_v44 = vpop.f32.mrb[15].mxu1 }
 0x121   :  { %v1605_v46 = vpop.eup %1604  ;;  %1622 = vpow2.f32 %v1046_v34  ;;  %v1979_v47 = vadd.f32 %v1509_v39, %v991_v30  ;;  %v1511_v49 = vadd.f32 %v1496_v43, %v1448_v41  ;;  %v874_v50 = vpop.f32.mrb[15].mxu0 }
 0x122   :  { %v1607_v52 = vpop.eup %1606  ;;  %v1068_v56 = vadd.f32 1.0, %v1605_v46  ;;  %1624 = vpow2.f32 %v1052_v38  ;;  %v1982_v57 = vadd.f32 %v1510_v42, %v1961_v55  ;;  %v1512_v58 = vadd.f32 %v874_v50, %v440_v44 }
 0x123   :  { %v1609_v59 = vpop.eup %1608  ;;  %v1066_v60 = vadd.f32 1.0, %v1607_v52  ;;  %1626 = vpow2.f32 %v1048_v26  ;;  %v1028_v61 = vsub.f32 0.0, %v1979_v47  ;;  %v1985_v62 = vadd.f32 %v1511_v49, %v996_v53 }
 0x124   :  { %v1611_v63 = vpop.eup %1610  ;;  %1628 = vrcp.f32 %v1068_v56  ;;  %v1069_v0 = vadd.f32 1.0, %v1609_v59  ;;  %v1026_v1 = vsub.f32 0.0, %v1982_v57  ;;  %v1988_v2 = vadd.f32 %v1512_v58, %v986_v23 }
 0x125   :  { %1630 = vrcp.f32 %v1066_v60  ;;  %v1067_v3 = vadd.f32 1.0, %v1611_v63  ;;  %v1058_v4 = vmul.f32 1.442695, %v1028_v61  ;;  %v1029_v55 = vsub.f32 0.0, %v1985_v62 }
 0x126   :  { %v1613_v5 = vpop.eup %1612  ;;  %1632 = vrcp.f32 %v1069_v0  ;;  %v1054_v6 = vmul.f32 1.442695, %v1026_v1  ;;  %v1027_v7 = vsub.f32 0.0, %v1988_v2 }
 0x127   :  { %v1615_v10 = vpop.eup %1614  ;;  %1634 = vrcp.f32 %v1067_v3  ;;  %v1060_v11 = vmul.f32 1.442695, %v1029_v55  ;;  %v1096_v16 = vmul.f32 %v1613_v5, %v1937_v19 }
 0x128   :  { %v1617_v12 = vpop.eup %1616  ;;  %1636 = vpow2.f32 %v1058_v4  ;;  %v1056_v13 = vmul.f32 1.442695, %v1027_v7  ;;  %v1094_v21 = vmul.f32 %v1615_v10, %v1939_v22 }
 0x129   :  { %v1619_v15 = vpop.eup %1618  ;;  %v1097_v17 = vmul.f32 %v1617_v12, %v1942_v25  ;;  %1638 = vpow2.f32 %v1054_v6 }
 0x12a   :  { %v1621_v18 = vpop.eup %1620  ;;  %v1095_v23 = vmul.f32 %v1619_v15, %v1947_v28  ;;  %1640 = vpow2.f32 %v1060_v11 }
 0x12b   :  { %v1623_v24 = vpop.eup %1622  ;;  %v1314_v27 = vpack.c.bf16 %v1097_v17, %v1096_v16  ;;  %v1072_v30 = vadd.f32 1.0, %v1621_v18  ;;  %1642 = vpow2.f32 %v1056_v13 }
 0x12c   :  { %v1625_v9 = vpop.eup %1624  ;;  %v1309_v31 = vpack.c.bf16 %v1095_v23, %v1094_v21  ;;  %v1070_v32 = vadd.f32 1.0, %v1623_v24 }
 0x12d   :  { %v1627_v33 = vpop.eup %1626  ;;  %1346 = vst [vmem:[%s2041_s9 + $0x8] sm:$0xff] %v1314_v27   ;;  %1644 = vrcp.f32 %v1072_v30  ;;  %v1073_v19 = vadd.f32 1.0, %v1625_v9 }
 0x12e   :  { %v1629_v25 = vpop.eup %1628  ;;  %1310 = vst [vmem:[%s2041_s9] sm:$0xff] %v1309_v31   ;;  %1646 = vrcp.f32 %v1070_v32  ;;  %v1071_v22 = vadd.f32 1.0, %v1627_v33 }
 0x12f   :  { %v1631_v28 = vpop.eup %1630  ;;  %1648 = vrcp.f32 %v1073_v19  ;;  %v1100_v36 = vmul.f32 %v1629_v25, %v1951_v45 }
 0x130   :  { %v1633_v34 = vpop.eup %1632  ;;  %1650 = vrcp.f32 %v1071_v22  ;;  %v1098_v39 = vmul.f32 %v1631_v28, %v1953_v48 }
 0x131   :  { %v1635_v35 = vpop.eup %1634  ;;  %v1101_v37 = vmul.f32 %v1633_v34, %v1956_v51 }
 0x132   :  { %v1637_v38 = vpop.eup %1636  ;;  %v1099_v40 = vmul.f32 %v1635_v35, %v1959_v54 }
 0x133   :  { %v1639_v41 = vpop.eup %1638  ;;  %v1324_v26 = vpack.c.bf16 %v1101_v37, %v1100_v36  ;;  %v1076_v42 = vadd.f32 1.0, %v1637_v38 }
 0x134   :  { %v1641_v43 = vpop.eup %1640  ;;  %v1319_v44 = vpack.c.bf16 %v1099_v40, %v1098_v39  ;;  %v1074_v46 = vadd.f32 1.0, %v1639_v41 }
 0x135   :  { %v1643_v49 = vpop.eup %1642  ;;  %1348 = vst [vmem:[%s2041_s9 + $0x18] sm:$0xff] %v1324_v26   ;;  %1652 = vrcp.f32 %v1076_v42  ;;  %v1077_v45 = vadd.f32 1.0, %v1641_v43 }
 0x136   :  { %1347 = vst [vmem:[%s2041_s9 + $0x10] sm:$0xff] %v1319_v44   ;;  %1654 = vrcp.f32 %v1074_v46  ;;  %v1075_v48 = vadd.f32 1.0, %v1643_v49 }
 0x137   :  { %v1645_v51 = vpop.eup %1644  ;;  %1656 = vrcp.f32 %v1077_v45 }
 0x138   :  { %v1647_v54 = vpop.eup %1646  ;;  %1658 = vrcp.f32 %v1075_v48  ;;  %v1104_v53 = vmul.f32 %v1645_v51, %v1965_v8 }
 0x139   :  { %v1649_v50 = vpop.eup %1648  ;;  %v1102_v58 = vmul.f32 %v1647_v54, %v1968_v14 }
 0x13a   :  { %v1651_v52 = vpop.eup %1650  ;;  %v1105_v56 = vmul.f32 %v1649_v50, %v1971_v20 }
 0x13b   :  { %v1103_v59 = vmul.f32 %v1651_v52, %v1975_v29 }
 0x13c   :  { %v1334_v60 = vpack.c.bf16 %v1105_v56, %v1104_v53 }
 0x13d   :  { %v1329_v61 = vpack.c.bf16 %v1103_v59, %v1102_v58 }
 0x13e   :  { %1350 = vst [vmem:[%s2041_s9 + $0x28] sm:$0xff] %v1334_v60  }
 0x13f   :  { %v1653_v63 = vpop.eup %1652  ;;  %1349 = vst [vmem:[%s2041_s9 + $0x20] sm:$0xff] %v1329_v61  }
 0x140   :  { %v1655_v0 = vpop.eup %1654  ;;  %v1108_v20 = vmul.f32 %v1653_v63, %v1979_v47 }
 0x141   :  { %v1657_v1 = vpop.eup %1656  ;;  %v1106_v29 = vmul.f32 %v1655_v0, %v1982_v57 }
 0x142   :  { %v1659_v8 = vpop.eup %1658  ;;  %v1109_v14 = vmul.f32 %v1657_v1, %v1985_v62 }
 0x143   :  { %v1107_v3 = vmul.f32 %v1659_v8, %v1988_v2 }
 0x144   :  { %v1344_v4 = vpack.c.bf16 %v1109_v14, %v1108_v20 }
 0x145   :  { %v1339_v55 = vpack.c.bf16 %v1107_v3, %v1106_v29 }
 0x146   :  { %1352 = vst [vmem:[%s2041_s9 + $0x38] sm:$0xff] %v1344_v4  }
 0x147   :  { %1351 = vst [vmem:[%s2041_s9 + $0x30] sm:$0xff] %v1339_v55  }

// kernel: _lambda_.69
= control target key start
LH: loop header
LB: loop body
LE: loop exit
PB: predicated region body
PF: predicated region fallthrough
CT: control target
= control target key end

     0   :  { %v1030_v1 = vmov 0   ;;  %vm133_vm0 = vcmask 523264   ;;  %s1294_s1 = inlined_call_operand.vmem [shape: bf16[64,128], index: 1, kind: input, shape index: {}]   ;;  %s1295_s0 = inlined_call_operand.vmem [shape: bf16[64,128], index: 0, kind: input, shape index: {}]   ;;  %s1296_s3 = inlined_call_operand.vmem [shape: bf16[128,64], index: 3, kind: input, shape index: {}]   ;;  %s1297_s2 = inlined_call_operand.vmem [shape: bf16[128,64], index: 2, kind: input, shape index: {}]   ;;  %s1298_s4 = inlined_call_operand.vmem [shape: f32[128,1], index: 4, kind: input, shape index: {}]   ;;  %s1299_s5 = inlined_call_operand.vmem [shape: bf16[128,128], index: 5, kind: output, shape index: {}]  }
   0x1   :  { %v942_v0 = vld [vmem:[%s1294_s1] sm:$0xff]   ;;  %941 = vset.pattern.permute.xlu1 %v1030_v1  ;;  %940 = vset.pattern.permute.xlu0 %v1030_v1  ;;  %v944_v3 = vld [vmem:[%s1294_s1 + $0x8] sm:$0xff]   ;;  %v946_v5 = vld [vmem:[%s1294_s1 + $0x10] sm:$0xff]  }
   0x2   :  { %v943_v2 = vld [vmem:[%s1295_s0] sm:$0xff]   ;;  %875 = vmatprep.subr.bf16.mxu1 %v942_v0  ;;  %v945_v4 = vld [vmem:[%s1295_s0 + $0x8] sm:$0xff]   ;;  %v947_v6 = vld [vmem:[%s1295_s0 + $0x10] sm:$0xff]  }
   0x3   :  { %899 = vmatprep.subr.bf16.mxu0 %v943_v2  ;;  %876 = vmatpush3.bf16.msra.mxu1 %v942_v0  ;;  %v948_v7 = vld [vmem:[%s1294_s1 + $0x18] sm:$0xff]   ;;  %v950_v9 = vld [vmem:[%s1296_s3] sm:$0xff]   ;;  %v952_v11 = vld [vmem:[%s1296_s3 + $0x8] sm:$0xff]  }
   0x4   :  { %900 = vmatpush3.bf16.msra.mxu0 %v943_v2  ;;  %877 = vmatprep.subr.bf16.mxu1 %v944_v3  ;;  %v949_v8 = vld [vmem:[%s1295_s0 + $0x18] sm:$0xff]   ;;  %v951_v10 = vld [vmem:[%s1297_s2] sm:$0xff]   ;;  %v953_v12 = vld [vmem:[%s1297_s2 + $0x8] sm:$0xff]  }
   0x5   :  { %901 = vmatprep.subr.bf16.mxu0 %v945_v4  ;;  %883 = vmatprep.mubr.msk.bf16.mxu1 %vm133_vm0, %v950_v9  ;;  %v954_v13 = vld [vmem:[%s1296_s3 + $0x10] sm:$0xff]   ;;  %v956_v15 = vld [vmem:[%s1296_s3 + $0x18] sm:$0xff]   ;;  %v958_v17 = vld [vmem:[%s1296_s3 + $0x20] sm:$0xff]  }
   0x6   :  { %907 = vmatprep.mubr.msk.bf16.mxu0 %vm133_vm0, %v951_v10  ;;  %v955_v14 = vld [vmem:[%s1297_s2 + $0x10] sm:$0xff]   ;;  %v957_v16 = vld [vmem:[%s1297_s2 + $0x18] sm:$0xff]   ;;  %v959_v18 = vld [vmem:[%s1297_s2 + $0x20] sm:$0xff]  }
   0x7   :  { %878 = vmatpush3.bf16.msra.mxu1 %v944_v3  ;;  %v442_v19 = vld [vmem:[%s1298_s4 + $0x10] sm:$0xff]  ;;  %v440_v20 = vld [vmem:[%s1298_s4] sm:$0xff]  ;;  %v443_v21 = vld [vmem:[%s1298_s4 + $0x18] sm:$0xff] }
   0x8   :  { %902 = vmatpush3.bf16.msra.mxu0 %v945_v4  ;;  %879 = vmatprep.subr.bf16.mxu1 %v946_v5  ;;  %v441_v22 = vld [vmem:[%s1298_s4 + $0x8] sm:$0xff]  ;;  %v444_v25 = vld [vmem:[%s1298_s4 + $0x20] sm:$0xff]  ;;  %v962_v27 = vld [vmem:[%s1296_s3 + $0x30] sm:$0xff]  }
   0x9   :  { %903 = vmatprep.subr.bf16.mxu0 %v947_v6  ;;  %468 = vperm.xlu1 %941, %v442_v19   ;;  %v960_v23 = vld [vmem:[%s1296_s3 + $0x28] sm:$0xff]   ;;  %v963_v28 = vld [vmem:[%s1297_s2 + $0x30] sm:$0xff]   ;;  %v447_v29 = vld [vmem:[%s1298_s4 + $0x38] sm:$0xff] }
   0xa   :  { %458 = vperm.xlu0 %940, %v440_v20   ;;  %v445_v24 = vld [vmem:[%s1298_s4 + $0x28] sm:$0xff]  ;;  %v446_v30 = vld [vmem:[%s1298_s4 + $0x30] sm:$0xff]  ;;  %v964_v31 = vld [vmem:[%s1296_s3 + $0x38] sm:$0xff]  }
   0xb   :  { %880 = vmatpush3.bf16.msra.mxu1 %v946_v5  ;;  %v961_v26 = vld [vmem:[%s1297_s2 + $0x28] sm:$0xff]   ;;  %v448_v33 = vld [vmem:[%s1298_s4 + $0x40] sm:$0xff]  ;;  %v965_v34 = vld [vmem:[%s1297_s2 + $0x38] sm:$0xff]  }
   0xc   :  { %904 = vmatpush3.bf16.msra.mxu0 %v947_v6  ;;  %881 = vmatprep.subr.bf16.mxu1 %v948_v7  ;;  %v449_v32 = vld [vmem:[%s1298_s4 + $0x48] sm:$0xff]  ;;  %v451_v35 = vld [vmem:[%s1298_s4 + $0x58] sm:$0xff]  ;;  %v450_v36 = vld [vmem:[%s1298_s4 + $0x50] sm:$0xff] }
   0xd   :  { %905 = vmatprep.subr.bf16.mxu0 %v949_v8  ;;  %473 = vperm.xlu1 %941, %v443_v21   ;;  %v453_v37 = vld [vmem:[%s1298_s4 + $0x68] sm:$0xff]  ;;  %v452_v38 = vld [vmem:[%s1298_s4 + $0x60] sm:$0xff]  ;;  %v455_v39 = vld [vmem:[%s1298_s4 + $0x78] sm:$0xff] }
   0xe   :  { %463 = vperm.xlu0 %940, %v441_v22   ;;  %v454_v40 = vld [vmem:[%s1298_s4 + $0x70] sm:$0xff] }
   0xf   :  { %882 = vmatpush3.bf16.msra.mxu1 %v948_v7 }
  0x10   :  { %906 = vmatpush3.bf16.msra.mxu0 %v949_v8 }
  0x11   :  { %483 = vperm.xlu1 %941, %v445_v24  }
  0x12   :  { %884 = vmatmul.mubr.msk.bf16.vlgmr.msra.gmra.mrb[0].mxu1 %vm133_vm0, %v952_v11  ;;  %478 = vperm.xlu0 %940, %v444_v25  }
  0x13   :  { %908 = vmatmul.mubr.msk.bf16.vlgmr.msra.gmra.mrb[0].mxu0 %vm133_vm0, %v953_v12  ;;  %887 = vmatprep.mubr.msk.bf16.mxu1 %vm133_vm0, %v954_v13 }
  0x14   :  { %911 = vmatprep.mubr.msk.bf16.mxu0 %vm133_vm0, %v955_v14 }
  0x15   :  { %493 = vperm.xlu1 %941, %v447_v29  }
  0x16   :  { %488 = vperm.xlu0 %940, %v446_v30  }
  0x19   :  { %503 = vperm.xlu1 %941, %v449_v32  }
  0x1a   :  { %888 = vmatmul.mubr.msk.bf16.gmra.mrb[4].mxu1 %vm133_vm0, %v956_v15  ;;  %498 = vperm.xlu0 %940, %v448_v33  }
  0x1b   :  { %912 = vmatmul.mubr.msk.bf16.gmra.mrb[4].mxu0 %vm133_vm0, %v957_v16  ;;  %891 = vmatprep.mubr.msk.bf16.mxu1 %vm133_vm0, %v958_v17 }
  0x1c   :  { %915 = vmatprep.mubr.msk.bf16.mxu0 %vm133_vm0, %v959_v18 }
  0x1d   :  { %513 = vperm.xlu1 %941, %v451_v35  }
  0x1e   :  { %508 = vperm.xlu0 %940, %v450_v36  }
  0x21   :  { %523 = vperm.xlu1 %941, %v453_v37  }
  0x22   :  { %892 = vmatmul.mubr.msk.bf16.gmra.mrb[8].mxu1 %vm133_vm0, %v960_v23  ;;  %518 = vperm.xlu0 %940, %v452_v38  }
  0x23   :  { %916 = vmatmul.mubr.msk.bf16.gmra.mrb[8].mxu0 %vm133_vm0, %v961_v26  ;;  %895 = vmatprep.mubr.msk.bf16.mxu1 %vm133_vm0, %v962_v27 }
  0x24   :  { %919 = vmatprep.mubr.msk.bf16.mxu0 %vm133_vm0, %v963_v28 }
  0x25   :  { %533 = vperm.xlu1 %941, %v455_v39  }
  0x26   :  { %528 = vperm.xlu0 %940, %v454_v40  }
  0x2a   :  { %896 = vmatmul.mubr.msk.bf16.gmra.mrb[12].mxu1 %vm133_vm0, %v964_v31 }
  0x2b   :  { %920 = vmatmul.mubr.msk.bf16.gmra.mrb[12].mxu0 %vm133_vm0, %v965_v34 }
  0x88   :  { %v469_v42 = vpop.permute.xlu1 %468 }
  0x89   :  { %v459_v41 = vpop.permute.xlu0 %458 }
  0x8c   :  { %v474_v44 = vpop.permute.xlu1 %473 }
  0x8d   :  { %v464_v43 = vpop.permute.xlu0 %463 }
  0x90   :  { %v484_v46 = vpop.permute.xlu1 %483 }
  0x91   :  { %v479_v45 = vpop.permute.xlu0 %478 }
  0x94   :  { %v494_v48 = vpop.permute.xlu1 %493 }
  0x95   :  { %v489_v47 = vpop.permute.xlu0 %488 }
  0x98   :  { %v1206_v2 = vpop.permute.xlu1 %503 }
  0x99   :  { %v1197_v49 = vpop.permute.xlu0 %498 }
  0x9c   :  { %v514_v28 = vpop.permute.xlu1 %513 }
  0x9d   :  { %v509_v5 = vpop.permute.xlu0 %508 }
  0xa1   :  { %v1223_v31 = vpop.permute.xlu0 %518 }
  0xe5   :  { %v885_v50 = vpop.f32.mrb[0].mxu1 }
  0xe6   :  { %v909_v51 = vpop.f32.mrb[0].mxu0  ;;  %v192_v52 = vpop.f32.mrb[1].mxu1 }
  0xe7   :  { %v386_v53 = vadd.f32 %v909_v51, %v885_v50  ;;  %v377_v54 = vpop.f32.mrb[1].mxu0  ;;  %v886_v55 = vpop.f32.mrb[2].mxu1 }
  0xe8   :  { %v378_v56 = vadd.f32 %v377_v54, %v192_v52  ;;  %v910_v57 = vpop.f32.mrb[2].mxu0  ;;  %v195_v58 = vpop.f32.mrb[3].mxu1 }
  0xe9   :  { %v1199_v59 = vadd.f32 %v469_v42, %v386_v53  ;;  %v389_v60 = vadd.f32 %v910_v57, %v886_v55  ;;  %v380_v61 = vpop.f32.mrb[3].mxu0 }
  0xea   :  { %v1201_v62 = vadd.f32 %v459_v41, %v378_v56  ;;  %v381_v63 = vadd.f32 %v380_v61, %v195_v58 }
  0xeb   :  { %v554_v0 = vsub.f32 0.0, %v1199_v59  ;;  %v1204_v1 = vadd.f32 %v474_v44, %v389_v60 }
  0xec   :  { %v552_v3 = vsub.f32 0.0, %v1201_v62  ;;  %v1209_v4 = vadd.f32 %v464_v43, %v381_v63  ;;  %v524_v63 = vpop.permute.xlu1 %523 }
  0xed   :  { %v572_v6 = vmul.f32 1.442695, %v554_v0  ;;  %v555_v7 = vsub.f32 0.0, %v1204_v1  ;;  %v889_v8 = vpop.f32.mrb[4].mxu1 }
  0xee   :  { %v568_v9 = vmul.f32 1.442695, %v552_v3  ;;  %v553_v10 = vsub.f32 0.0, %v1209_v4  ;;  %v913_v11 = vpop.f32.mrb[4].mxu0  ;;  %v208_v12 = vpop.f32.mrb[5].mxu1 }
  0xef   :  { %966 = vpow2.f32 %v572_v6  ;;  %v574_v13 = vmul.f32 1.442695, %v555_v7  ;;  %v402_v14 = vadd.f32 %v913_v11, %v889_v8  ;;  %v393_v15 = vpop.f32.mrb[5].mxu0  ;;  %v890_v16 = vpop.f32.mrb[6].mxu1 }
  0xf0   :  { %968 = vpow2.f32 %v568_v9  ;;  %v570_v17 = vmul.f32 1.442695, %v553_v10  ;;  %v394_v18 = vadd.f32 %v393_v15, %v208_v12  ;;  %v914_v19 = vpop.f32.mrb[6].mxu0  ;;  %v211_v20 = vpop.f32.mrb[7].mxu1 }
  0xf1   :  { %970 = vpow2.f32 %v574_v13  ;;  %v1213_v21 = vadd.f32 %v489_v47, %v402_v14  ;;  %v405_v22 = vadd.f32 %v914_v19, %v890_v16  ;;  %v396_v23 = vpop.f32.mrb[7].mxu0  ;;  %v529_v6 = vpop.permute.xlu0 %528 }
  0xf2   :  { %972 = vpow2.f32 %v570_v17  ;;  %v1215_v24 = vadd.f32 %v479_v45, %v394_v18  ;;  %v397_v25 = vadd.f32 %v396_v23, %v211_v20 }
  0xf3   :  { %v558_v26 = vsub.f32 0.0, %v1213_v21  ;;  %v1218_v27 = vadd.f32 %v494_v48, %v405_v22 }
  0xf4   :  { %v556_v29 = vsub.f32 0.0, %v1215_v24  ;;  %v1221_v30 = vadd.f32 %v484_v46, %v397_v25 }
  0xf5   :  { %v580_v32 = vmul.f32 1.442695, %v558_v26  ;;  %v559_v33 = vsub.f32 0.0, %v1218_v27  ;;  %v893_v34 = vpop.f32.mrb[8].mxu1 }
  0xf6   :  { %v576_v35 = vmul.f32 1.442695, %v556_v29  ;;  %v557_v36 = vsub.f32 0.0, %v1221_v30  ;;  %v917_v37 = vpop.f32.mrb[8].mxu0  ;;  %v224_v38 = vpop.f32.mrb[9].mxu1 }
  0xf7   :  { %974 = vpow2.f32 %v580_v32  ;;  %v582_v39 = vmul.f32 1.442695, %v559_v33  ;;  %v418_v40 = vadd.f32 %v917_v37, %v893_v34  ;;  %v409_v41 = vpop.f32.mrb[9].mxu0  ;;  %v894_v42 = vpop.f32.mrb[10].mxu1 }
  0xf8   :  { %976 = vpow2.f32 %v576_v35  ;;  %v578_v43 = vmul.f32 1.442695, %v557_v36  ;;  %v410_v44 = vadd.f32 %v409_v41, %v224_v38  ;;  %v918_v45 = vpop.f32.mrb[10].mxu0  ;;  %v227_v46 = vpop.f32.mrb[11].mxu1 }
  0xf9   :  { %v967_v47 = vpop.eup %966  ;;  %978 = vpow2.f32 %v582_v39  ;;  %v1227_v48 = vadd.f32 %v509_v5, %v418_v40  ;;  %v421_v50 = vadd.f32 %v918_v45, %v894_v42  ;;  %v412_v51 = vpop.f32.mrb[11].mxu0 }
  0xfa   :  { %v969_v52 = vpop.eup %968  ;;  %v602_v53 = vadd.f32 1.0, %v967_v47  ;;  %980 = vpow2.f32 %v578_v43  ;;  %v1230_v54 = vadd.f32 %v1197_v49, %v410_v44  ;;  %v413_v55 = vadd.f32 %v412_v51, %v227_v46  ;;  %v534_v29 = vpop.permute.xlu1 %533 }
  0xfb   :  { %v971_v56 = vpop.eup %970  ;;  %v600_v57 = vadd.f32 1.0, %v969_v52  ;;  %v562_v58 = vsub.f32 0.0, %v1227_v48  ;;  %v1233_v60 = vadd.f32 %v514_v28, %v421_v50 }
  0xfc   :  { %v973_v61 = vpop.eup %972  ;;  %982 = vrcp.f32 %v602_v53  ;;  %v603_v0 = vadd.f32 1.0, %v971_v56  ;;  %v560_v3 = vsub.f32 0.0, %v1230_v54  ;;  %v1237_v5 = vadd.f32 %v1206_v2, %v413_v55 }
  0xfd   :  { %984 = vrcp.f32 %v600_v57  ;;  %v601_v49 = vadd.f32 1.0, %v973_v61  ;;  %v588_v7 = vmul.f32 1.442695, %v562_v58  ;;  %v563_v8 = vsub.f32 0.0, %v1233_v60  ;;  %v897_v9 = vpop.f32.mrb[12].mxu1 }
  0xfe   :  { %986 = vrcp.f32 %v603_v0  ;;  %v584_v10 = vmul.f32 1.442695, %v560_v3  ;;  %v561_v11 = vsub.f32 0.0, %v1237_v5  ;;  %v921_v12 = vpop.f32.mrb[12].mxu0  ;;  %v240_v13 = vpop.f32.mrb[13].mxu1 }
  0xff   :  { %988 = vrcp.f32 %v601_v49  ;;  %v590_v14 = vmul.f32 1.442695, %v563_v8  ;;  %v434_v15 = vadd.f32 %v921_v12, %v897_v9  ;;  %v425_v16 = vpop.f32.mrb[13].mxu0  ;;  %v898_v17 = vpop.f32.mrb[14].mxu1 }
 0x100   :  { %990 = vpow2.f32 %v588_v7  ;;  %v586_v2 = vmul.f32 1.442695, %v561_v11  ;;  %v426_v18 = vadd.f32 %v425_v16, %v240_v13  ;;  %v922_v19 = vpop.f32.mrb[14].mxu0  ;;  %v243_v20 = vpop.f32.mrb[15].mxu1 }
 0x101   :  { %v975_v22 = vpop.eup %974  ;;  %992 = vpow2.f32 %v584_v10  ;;  %v1241_v23 = vadd.f32 %v529_v6, %v434_v15  ;;  %v437_v25 = vadd.f32 %v922_v19, %v898_v17  ;;  %v428_v26 = vpop.f32.mrb[15].mxu0 }
 0x102   :  { %v977_v28 = vpop.eup %976  ;;  %v606_v32 = vadd.f32 1.0, %v975_v22  ;;  %994 = vpow2.f32 %v590_v14  ;;  %v1244_v33 = vadd.f32 %v1223_v31, %v426_v18  ;;  %v429_v34 = vadd.f32 %v428_v26, %v243_v20 }
 0x103   :  { %v979_v35 = vpop.eup %978  ;;  %v604_v36 = vadd.f32 1.0, %v977_v28  ;;  %996 = vpow2.f32 %v586_v2  ;;  %v566_v37 = vsub.f32 0.0, %v1241_v23  ;;  %v1247_v38 = vadd.f32 %v534_v29, %v437_v25 }
 0x104   :  { %v981_v39 = vpop.eup %980  ;;  %998 = vrcp.f32 %v606_v32  ;;  %v607_v40 = vadd.f32 1.0, %v979_v35  ;;  %v564_v41 = vsub.f32 0.0, %v1244_v33  ;;  %v1250_v42 = vadd.f32 %v524_v63, %v429_v34 }
 0x105   :  { %1000 = vrcp.f32 %v604_v36  ;;  %v605_v43 = vadd.f32 1.0, %v981_v39  ;;  %v596_v44 = vmul.f32 1.442695, %v566_v37  ;;  %v567_v31 = vsub.f32 0.0, %v1247_v38 }
 0x106   :  { %v983_v45 = vpop.eup %982  ;;  %1002 = vrcp.f32 %v607_v40  ;;  %v592_v46 = vmul.f32 1.442695, %v564_v41  ;;  %v565_v47 = vsub.f32 0.0, %v1250_v42 }
 0x107   :  { %v985_v50 = vpop.eup %984  ;;  %1004 = vrcp.f32 %v605_v43  ;;  %v598_v51 = vmul.f32 1.442695, %v567_v31  ;;  %v634_v56 = vmul.f32 %v983_v45, %v1199_v59 }
 0x108   :  { %v987_v52 = vpop.eup %986  ;;  %1006 = vpow2.f32 %v596_v44  ;;  %v594_v53 = vmul.f32 1.442695, %v565_v47  ;;  %v632_v61 = vmul.f32 %v985_v50, %v1201_v62 }
 0x109   :  { %v989_v55 = vpop.eup %988  ;;  %v635_v57 = vmul.f32 %v987_v52, %v1204_v1  ;;  %1008 = vpow2.f32 %v592_v46 }
 0x10a   :  { %v991_v58 = vpop.eup %990  ;;  %v633_v63 = vmul.f32 %v989_v55, %v1209_v4  ;;  %1010 = vpow2.f32 %v598_v51 }
 0x10b   :  { %v993_v0 = vpop.eup %992  ;;  %v812_v3 = vpack.c.bf16 %v635_v57, %v634_v56  ;;  %v610_v6 = vadd.f32 1.0, %v991_v58  ;;  %1012 = vpow2.f32 %v594_v53 }
 0x10c   :  { %v995_v49 = vpop.eup %994  ;;  %v807_v7 = vpack.c.bf16 %v633_v63, %v632_v61  ;;  %v608_v8 = vadd.f32 1.0, %v993_v0 }
 0x10d   :  { %v997_v9 = vpop.eup %996  ;;  %844 = vst [vmem:[%s1299_s5 + $0x8] sm:$0xff] %v812_v3   ;;  %1014 = vrcp.f32 %v610_v6  ;;  %v611_v59 = vadd.f32 1.0, %v995_v49 }
 0x10e   :  { %v999_v1 = vpop.eup %998  ;;  %808 = vst [vmem:[%s1299_s5] sm:$0xff] %v807_v7   ;;  %1016 = vrcp.f32 %v608_v8  ;;  %v609_v62 = vadd.f32 1.0, %v997_v9 }
 0x10f   :  { %v1001_v4 = vpop.eup %1000  ;;  %1018 = vrcp.f32 %v611_v59  ;;  %v638_v12 = vmul.f32 %v999_v1, %v1213_v21 }
 0x110   :  { %v1003_v10 = vpop.eup %1002  ;;  %1020 = vrcp.f32 %v609_v62  ;;  %v636_v15 = vmul.f32 %v1001_v4, %v1215_v24 }
 0x111   :  { %v1005_v11 = vpop.eup %1004  ;;  %v639_v13 = vmul.f32 %v1003_v10, %v1218_v27 }
 0x112   :  { %v1007_v14 = vpop.eup %1006  ;;  %v637_v16 = vmul.f32 %v1005_v11, %v1221_v30 }
 0x113   :  { %v1009_v17 = vpop.eup %1008  ;;  %v822_v2 = vpack.c.bf16 %v639_v13, %v638_v12  ;;  %v614_v18 = vadd.f32 1.0, %v1007_v14 }
 0x114   :  { %v1011_v19 = vpop.eup %1010  ;;  %v817_v20 = vpack.c.bf16 %v637_v16, %v636_v15  ;;  %v612_v22 = vadd.f32 1.0, %v1009_v17 }
 0x115   :  { %v1013_v25 = vpop.eup %1012  ;;  %846 = vst [vmem:[%s1299_s5 + $0x18] sm:$0xff] %v822_v2   ;;  %1022 = vrcp.f32 %v614_v18  ;;  %v615_v21 = vadd.f32 1.0, %v1011_v19 }
 0x116   :  { %845 = vst [vmem:[%s1299_s5 + $0x10] sm:$0xff] %v817_v20   ;;  %1024 = vrcp.f32 %v612_v22  ;;  %v613_v24 = vadd.f32 1.0, %v1013_v25 }
 0x117   :  { %v1015_v27 = vpop.eup %1014  ;;  %1026 = vrcp.f32 %v615_v21 }
 0x118   :  { %v1017_v30 = vpop.eup %1016  ;;  %1028 = vrcp.f32 %v613_v24  ;;  %v642_v29 = vmul.f32 %v1015_v27, %v1227_v48 }
 0x119   :  { %v1019_v26 = vpop.eup %1018  ;;  %v640_v34 = vmul.f32 %v1017_v30, %v1230_v54 }
 0x11a   :  { %v1021_v28 = vpop.eup %1020  ;;  %v643_v32 = vmul.f32 %v1019_v26, %v1233_v60 }
 0x11b   :  { %v641_v35 = vmul.f32 %v1021_v28, %v1237_v5 }
 0x11c   :  { %v832_v36 = vpack.c.bf16 %v643_v32, %v642_v29 }
 0x11d   :  { %v827_v37 = vpack.c.bf16 %v641_v35, %v640_v34 }
 0x11e   :  { %848 = vst [vmem:[%s1299_s5 + $0x28] sm:$0xff] %v832_v36  }
 0x11f   :  { %v1023_v39 = vpop.eup %1022  ;;  %847 = vst [vmem:[%s1299_s5 + $0x20] sm:$0xff] %v827_v37  }
 0x120   :  { %v1025_v40 = vpop.eup %1024  ;;  %v646_v60 = vmul.f32 %v1023_v39, %v1241_v23 }
 0x121   :  { %v1027_v41 = vpop.eup %1026  ;;  %v644_v5 = vmul.f32 %v1025_v40, %v1244_v33 }
 0x122   :  { %v1029_v48 = vpop.eup %1028  ;;  %v647_v54 = vmul.f32 %v1027_v41, %v1247_v38 }
 0x123   :  { %v645_v43 = vmul.f32 %v1029_v48, %v1250_v42 }
 0x124   :  { %v842_v44 = vpack.c.bf16 %v647_v54, %v646_v60 }
 0x125   :  { %v837_v31 = vpack.c.bf16 %v645_v43, %v644_v5 }
 0x126   :  { %850 = vst [vmem:[%s1299_s5 + $0x38] sm:$0xff] %v842_v44  }
 0x127   :  { %849 = vst [vmem:[%s1299_s5 + $0x30] sm:$0xff] %v837_v31  }

// kernel: _lambda_.68
= control target key start
LH: loop header
LB: loop body
LE: loop exit
PB: predicated region body
PF: predicated region fallthrough
CT: control target
= control target key end

     0   :  { %v1085_v1 = vmov 0   ;;  %vm475_vm0 = vcmask 523264   ;;  %s1337_s0 = inlined_call_operand.vmem [shape: bf16[576,128], index: 0, kind: input, shape index: {}]   ;;  %s1338_s1 = inlined_call_operand.vmem [shape: bf16[64,576], index: 1, kind: input, shape index: {}]   ;;  %s1339_s2 = inlined_call_operand.vmem [shape: f32[64,1], index: 2, kind: input, shape index: {}]   ;;  %s1340_s3 = inlined_call_operand.vmem [shape: bf16[64,128], index: 3, kind: output, shape index: {}]  }
   0x1   :  { %v989_v0 = vld [vmem:[%s1337_s0 + $0x40] sm:$0xff]   ;;  %987 = vset.pattern.permute.xlu0 %v1085_v1  ;;  %988 = vset.pattern.permute.xlu1 %v1085_v1  ;;  %v993_v5 = vld [vmem:[%s1337_s0 + $0x48] sm:$0xff]   ;;  %v997_v9 = vld [vmem:[%s1337_s0 + $0x50] sm:$0xff]  }
   0x2   :  { %v990_v2 = vld [vmem:[%s1337_s0 + $0xc0] sm:$0xff]   ;;  %874 = vmatprep.subr.bf16.mxu0 %v989_v0  ;;  %v994_v6 = vld [vmem:[%s1337_s0 + $0xc8] sm:$0xff]   ;;  %v998_v10 = vld [vmem:[%s1337_s0 + $0xd0] sm:$0xff]  }
   0x3   :  { %v991_v3 = vld [vmem:[%s1337_s0] sm:$0xff]   ;;  %914 = vmatprep.subr.bf16.mxu1 %v990_v2  ;;  %v995_v7 = vld [vmem:[%s1337_s0 + $0x8] sm:$0xff]   ;;  %v999_v11 = vld [vmem:[%s1337_s0 + $0x10] sm:$0xff]  }
   0x4   :  { %v992_v4 = vld [vmem:[%s1337_s0 + $0x80] sm:$0xff]   ;;  %875 = vmatpush3.bf16.msra.mxu0 %v991_v3  ;;  %v996_v8 = vld [vmem:[%s1337_s0 + $0x88] sm:$0xff]   ;;  %v1000_v12 = vld [vmem:[%s1337_s0 + $0x90] sm:$0xff]  }
   0x5   :  { %915 = vmatpush3.bf16.msra.mxu1 %v992_v4  ;;  %876 = vmatprep.subr.bf16.mxu0 %v993_v5  ;;  %v1001_v13 = vld [vmem:[%s1337_s0 + $0x58] sm:$0xff]   ;;  %v1005_v17 = vld [vmem:[%s1337_s0 + $0x60] sm:$0xff]   ;;  %v1009_v21 = vld [vmem:[%s1337_s0 + $0x68] sm:$0xff]  }
   0x6   :  { %916 = vmatprep.subr.bf16.mxu1 %v994_v6  ;;  %v1002_v14 = vld [vmem:[%s1337_s0 + $0xd8] sm:$0xff]   ;;  %v1006_v18 = vld [vmem:[%s1337_s0 + $0xe0] sm:$0xff]   ;;  %v1010_v22 = vld [vmem:[%s1337_s0 + $0xe8] sm:$0xff]  }
   0x7   :  { %v1003_v15 = vld [vmem:[%s1337_s0 + $0x18] sm:$0xff]   ;;  %v1007_v19 = vld [vmem:[%s1337_s0 + $0x20] sm:$0xff]   ;;  %v1011_v23 = vld [vmem:[%s1337_s0 + $0x28] sm:$0xff]  }
   0x8   :  { %877 = vmatpush3.bf16.msra.mxu0 %v995_v7  ;;  %v1004_v16 = vld [vmem:[%s1337_s0 + $0x98] sm:$0xff]   ;;  %v1008_v20 = vld [vmem:[%s1337_s0 + $0xa0] sm:$0xff]   ;;  %v1012_v24 = vld [vmem:[%s1337_s0 + $0xa8] sm:$0xff]  }
   0x9   :  { %917 = vmatpush3.bf16.msra.mxu1 %v996_v8  ;;  %878 = vmatprep.subr.bf16.mxu0 %v997_v9  ;;  %v1013_v25 = vld [vmem:[%s1337_s0 + $0x70] sm:$0xff]   ;;  %v1017_v29 = vld [vmem:[%s1337_s0 + $0x78] sm:$0xff]   ;;  %v1026_v36 = vld [vmem:[%s1338_s1 + $0xc] ss:$20 sps:$4 sm:$0xff]  }
   0xa   :  { %918 = vmatprep.subr.bf16.mxu1 %v998_v10  ;;  %v1014_v26 = vld [vmem:[%s1337_s0 + $0xf0] sm:$0xff]   ;;  %v1018_v30 = vld [vmem:[%s1337_s0 + $0xf8] sm:$0xff]   ;;  %v1027_v37 = vld [vmem:[%s1337_s0 + $0x100] sm:$0xff]   ;;  %585 = vmatprep.mubr.bf16.mxu1 %v1026_v36 }
   0xb   :  { %v1015_v27 = vld [vmem:[%s1337_s0 + $0x30] sm:$0xff]   ;;  %v1019_v31 = vld [vmem:[%s1337_s0 + $0x38] sm:$0xff]   ;;  %v1028_v38 = vld [vmem:[%s1338_s1 + $0x2c] ss:$20 sps:$4 sm:$0xff]  }
   0xc   :  { %879 = vmatpush3.bf16.msra.mxu0 %v999_v11  ;;  %v1016_v28 = vld [vmem:[%s1337_s0 + $0xb0] sm:$0xff]   ;;  %v1020_v32 = vld [vmem:[%s1337_s0 + $0xb8] sm:$0xff]   ;;  %v1034_v40 = vld [vmem:[%s1337_s0 + $0x108] sm:$0xff]  }
   0xd   :  { %919 = vmatpush3.bf16.msra.mxu1 %v1000_v12  ;;  %880 = vmatprep.subr.bf16.mxu0 %v1001_v13  ;;  %v1021_v33 = vld [vmem:[%s1338_s1] ss:$20 sps:$4 sm:$0xff]   ;;  %v1023_v34 = vld [vmem:[%s1338_s1 + $0x4] ss:$20 sps:$4 sm:$0xff]   ;;  %v1024_v35 = vld [vmem:[%s1338_s1 + $0x8] ss:$20 sps:$4 sm:$0xff]  }
   0xe   :  { %920 = vmatprep.subr.bf16.mxu1 %v1002_v14  ;;  %520 = vmatprep.mubr.bf16.mxu0 %v1023_v34  ;;  %v1030_v39 = vld [vmem:[%s1338_s1 + $0x34] ss:$20 sps:$4 sm:$0xff]   ;;  %v1033_v42 = vld [vmem:[%s1338_s1 + $0x30] ss:$20 sps:$4 sm:$0xff]   ;;  %v1048_v46 = vld [vmem:[%s1337_s0 + $0x118] sm:$0xff]  }
   0xf   :  { %v1032_v41 = vld [vmem:[%s1338_s1 + $0x28] ss:$20 sps:$4 sm:$0xff]   ;;  %v1041_v45 = vld [vmem:[%s1337_s0 + $0x110] sm:$0xff]   ;;  %v1040_v48 = vld [vmem:[%s1338_s1 + $0x58] ss:$20 sps:$4 sm:$0xff]  }
  0x10   :  { %881 = vmatpush3.bf16.msra.mxu0 %v1003_v15  ;;  %v1035_v43 = vld [vmem:[%s1338_s1 + $0x54] ss:$20 sps:$4 sm:$0xff]   ;;  %v1037_v44 = vld [vmem:[%s1338_s1 + $0x5c] ss:$20 sps:$4 sm:$0xff]   ;;  %v1044_v50 = vld [vmem:[%s1338_s1 + $0x84] ss:$20 sps:$4 sm:$0xff]  }
  0x11   :  { %921 = vmatpush3.bf16.msra.mxu1 %v1004_v16  ;;  %882 = vmatprep.subr.bf16.mxu0 %v1005_v17  ;;  %v1039_v47 = vld [vmem:[%s1338_s1 + $0x50] ss:$20 sps:$4 sm:$0xff]   ;;  %v112_v53 = vld [vmem:[%s1339_s2 + $0x8] sm:$0xff]  ;;  %v114_v54 = vld [vmem:[%s1339_s2 + $0x18] sm:$0xff] }
  0x12   :  { %922 = vmatprep.subr.bf16.mxu1 %v1006_v18  ;;  %v1042_v49 = vld [vmem:[%s1338_s1 + $0x7c] ss:$20 sps:$4 sm:$0xff]   ;;  %v111_v51 = vld [vmem:[%s1339_s2] sm:$0xff]  ;;  %v1046_v55 = vld [vmem:[%s1338_s1 + $0x78] ss:$20 sps:$4 sm:$0xff]  }
  0x13   :  { %v113_v52 = vld [vmem:[%s1339_s2 + $0x10] sm:$0xff]  ;;  %121 = vperm.xlu0 %987, %v111_v51   ;;  %v115_v58 = vld [vmem:[%s1339_s2 + $0x20] sm:$0xff]  ;;  %v116_v60 = vld [vmem:[%s1339_s2 + $0x28] sm:$0xff] }
  0x14   :  { %883 = vmatpush3.bf16.msra.mxu0 %v1007_v19  ;;  %131 = vperm.xlu1 %988, %v113_v52   ;;  %v1047_v56 = vld [vmem:[%s1338_s1 + $0x80] ss:$20 sps:$4 sm:$0xff]   ;;  %v1049_v57 = vld [vmem:[%s1338_s1 + $0x10] ss:$20 sps:$4 sm:$0xff]   ;;  %v118_v62 = vld [vmem:[%s1339_s2 + $0x38] sm:$0xff] }
  0x15   :  { %923 = vmatpush3.bf16.msra.mxu1 %v1008_v20  ;;  %884 = vmatprep.subr.bf16.mxu0 %v1009_v21  ;;  %v1050_v59 = vld [vmem:[%s1338_s1 + $0x60] ss:$20 sps:$4 sm:$0xff]   ;;  %v1051_v63 = vld [vmem:[%s1338_s1 + $0x38] ss:$20 sps:$4 sm:$0xff]   ;;  %v1052_v0 = vld [vmem:[%s1338_s1 + $0x88] ss:$20 sps:$4 sm:$0xff]  }
  0x16   :  { %924 = vmatprep.subr.bf16.mxu1 %v1010_v22  ;;  %v117_v61 = vld [vmem:[%s1339_s2 + $0x30] sm:$0xff] }
  0x17   :  { %126 = vperm.xlu0 %987, %v112_v53  }
  0x18   :  { %885 = vmatpush3.bf16.msra.mxu0 %v1011_v23  ;;  %136 = vperm.xlu1 %988, %v114_v54  }
  0x19   :  { %925 = vmatpush3.bf16.msra.mxu1 %v1012_v24  ;;  %886 = vmatprep.subr.bf16.mxu0 %v1013_v25 }
  0x1a   :  { %926 = vmatprep.subr.bf16.mxu1 %v1014_v26 }
  0x1b   :  { %141 = vperm.xlu0 %987, %v115_v58  }
  0x1c   :  { %887 = vmatpush3.bf16.msra.mxu0 %v1015_v27  ;;  %146 = vperm.xlu1 %988, %v116_v60  }
  0x1d   :  { %927 = vmatpush3.bf16.msra.mxu1 %v1016_v28  ;;  %888 = vmatprep.subr.bf16.mxu0 %v1017_v29 }
  0x1e   :  { %928 = vmatprep.subr.bf16.mxu1 %v1018_v30 }
  0x1f   :  { %151 = vperm.xlu0 %987, %v117_v61  }
  0x20   :  { %889 = vmatpush3.bf16.msra.mxu0 %v1019_v31  ;;  %156 = vperm.xlu1 %988, %v118_v62  }
  0x21   :  { %929 = vmatpush3.bf16.msra.mxu1 %v1020_v32  ;;  %962 = vmatprep.subr.bf16.mxu0 %v1027_v37 }
  0x22   :  { %978 = vmatprep.subr.bf16.mxu1 %v1027_v37 }
  0x23   :  { %521 = vmatmul.mubr.bf16.vlgmr.msra.gmra.mrb[0].mxu0 %v1021_v33 }
  0x24   :  { %586 = vmatmul.mubr.bf16.vlgmr.msra.gmra.mrb[0].mxu1 %v1024_v35  ;;  %963 = vmatpush3.bf16.msra.mxu0 %v1027_v37 }
  0x25   :  { %982 = vmatpush3.bf16.msra.mxu1 %v1027_v37  ;;  %528 = vmatprep.mubr.bf16.mxu0 %v1028_v38 }
  0x26   :  { %593 = vmatprep.mubr.bf16.mxu1 %v1030_v39  ;;  %964 = vmatprep.subr.bf16.mxu0 %v1034_v40 }
  0x27   :  { %979 = vmatprep.subr.bf16.mxu1 %v1034_v40 }
  0x28   :  { %965 = vmatpush3.bf16.msra.mxu0 %v1034_v40 }
  0x29   :  { %983 = vmatpush3.bf16.msra.mxu1 %v1034_v40  ;;  %966 = vmatprep.subr.bf16.mxu0 %v1041_v45 }
  0x2a   :  { %980 = vmatprep.subr.bf16.mxu1 %v1041_v45 }
  0x2b   :  { %529 = vmatmul.mubr.bf16.gmra.mrb[4].mxu0 %v1032_v41 }
  0x2c   :  { %594 = vmatmul.mubr.bf16.gmra.mrb[4].mxu1 %v1033_v42  ;;  %536 = vmatprep.mubr.bf16.mxu0 %v1035_v43 }
  0x2d   :  { %601 = vmatprep.mubr.bf16.mxu1 %v1037_v44  ;;  %967 = vmatpush3.bf16.msra.mxu0 %v1041_v45 }
  0x2e   :  { %984 = vmatpush3.bf16.msra.mxu1 %v1041_v45  ;;  %968 = vmatprep.subr.bf16.mxu0 %v1048_v46 }
  0x2f   :  { %981 = vmatprep.subr.bf16.mxu1 %v1048_v46 }
  0x31   :  { %969 = vmatpush3.bf16.msra.mxu0 %v1048_v46 }
  0x32   :  { %985 = vmatpush3.bf16.msra.mxu1 %v1048_v46 }
  0x33   :  { %537 = vmatmul.mubr.bf16.gmra.mrb[8].mxu0 %v1039_v47 }
  0x34   :  { %602 = vmatmul.mubr.bf16.gmra.mrb[8].mxu1 %v1040_v48  ;;  %544 = vmatprep.mubr.bf16.mxu0 %v1042_v49 }
  0x35   :  { %609 = vmatprep.mubr.bf16.mxu1 %v1044_v50 }
  0x3b   :  { %545 = vmatmul.mubr.bf16.gmra.mrb[12].mxu0 %v1046_v55 }
  0x3c   :  { %610 = vmatmul.mubr.bf16.gmra.mrb[12].mxu1 %v1047_v56  ;;  %970 = vmatprep.mubr.msk.bf16.mxu0 %vm475_vm0, %v1049_v57 }
  0x3d   :  { %974 = vmatprep.mubr.msk.bf16.mxu1 %vm475_vm0, %v1050_v59 }
  0x43   :  { %971 = vmatmul.mubr.msk.bf16.vlgmr.msra.gmra.mrb[16].mxu0 %vm475_vm0, %v1051_v63 }
  0x44   :  { %975 = vmatmul.mubr.msk.bf16.vlgmr.msra.gmra.mrb[16].mxu1 %vm475_vm0, %v1052_v0 }
  0x92   :  { %v122_v1 = vpop.permute.xlu0 %121 }
  0x93   :  { %v132_v18 = vpop.permute.xlu1 %131 }
  0x96   :  { %v127_v3 = vpop.permute.xlu0 %126 }
  0x97   :  { %v137_v33 = vpop.permute.xlu1 %136 }
  0x9a   :  { %v142_v36 = vpop.permute.xlu0 %141 }
  0x9b   :  { %v147_v50 = vpop.permute.xlu1 %146 }
  0x9e   :  { %v152_v54 = vpop.permute.xlu0 %151 }
  0xf6   :  { %v890_v2 = vpop.f32.mrb[0].mxu0 }
  0xf7   :  { %v930_v4 = vpop.f32.mrb[0].mxu1  ;;  %v891_v5 = vpop.f32.mrb[1].mxu0 }
  0xf8   :  { %v892_v6 = vadd.f32 %v891_v5, %v890_v2  ;;  %v931_v7 = vpop.f32.mrb[1].mxu1  ;;  %v893_v8 = vpop.f32.mrb[2].mxu0 }
  0xf9   :  { %v932_v9 = vadd.f32 %v931_v7, %v930_v4  ;;  %v933_v10 = vpop.f32.mrb[2].mxu1  ;;  %v894_v11 = vpop.f32.mrb[3].mxu0 }
  0xfa   :  { %v523_v12 = vadd.f32 %v892_v6, %v122_v1  ;;  %v895_v13 = vadd.f32 %v894_v11, %v893_v8  ;;  %v934_v14 = vpop.f32.mrb[3].mxu1  ;;  %v157_v4 = vpop.permute.xlu1 %156 }
  0xfb   :  { %v935_v15 = vadd.f32 %v934_v14, %v933_v10 }
  0xfc   :  { %v526_v16 = vadd.f32 %v895_v13, %v127_v3  ;;  %v588_v17 = vadd.f32 %v932_v9, %v523_v12 }
  0xfe   :  { %v896_v19 = vpop.f32.mrb[4].mxu0  ;;  %v1302_v20 = vadd.f32 %v935_v15, %v526_v16 }
  0xff   :  { %v936_v21 = vpop.f32.mrb[4].mxu1  ;;  %v897_v22 = vpop.f32.mrb[5].mxu0 }
 0x100   :  { %v898_v23 = vadd.f32 %v897_v22, %v896_v19  ;;  %v937_v24 = vpop.f32.mrb[5].mxu1  ;;  %v899_v25 = vpop.f32.mrb[6].mxu0 }
 0x101   :  { %v938_v26 = vadd.f32 %v937_v24, %v936_v21  ;;  %v939_v27 = vpop.f32.mrb[6].mxu1  ;;  %v900_v28 = vpop.f32.mrb[7].mxu0 }
 0x102   :  { %v531_v29 = vadd.f32 %v898_v23, %v132_v18  ;;  %v901_v30 = vadd.f32 %v900_v28, %v899_v25  ;;  %v940_v31 = vpop.f32.mrb[7].mxu1 }
 0x103   :  { %v941_v32 = vadd.f32 %v940_v31, %v939_v27 }
 0x104   :  { %v534_v34 = vadd.f32 %v901_v30, %v137_v33  ;;  %v596_v35 = vadd.f32 %v938_v26, %v531_v29 }
 0x106   :  { %v902_v37 = vpop.f32.mrb[8].mxu0  ;;  %v599_v38 = vadd.f32 %v941_v32, %v534_v34 }
 0x107   :  { %v942_v39 = vpop.f32.mrb[8].mxu1  ;;  %v903_v40 = vpop.f32.mrb[9].mxu0 }
 0x108   :  { %v904_v41 = vadd.f32 %v903_v40, %v902_v37  ;;  %v943_v42 = vpop.f32.mrb[9].mxu1  ;;  %v905_v43 = vpop.f32.mrb[10].mxu0 }
 0x109   :  { %v944_v44 = vadd.f32 %v943_v42, %v942_v39  ;;  %v945_v45 = vpop.f32.mrb[10].mxu1  ;;  %v906_v46 = vpop.f32.mrb[11].mxu0 }
 0x10a   :  { %v539_v47 = vadd.f32 %v904_v41, %v142_v36  ;;  %v907_v48 = vadd.f32 %v906_v46, %v905_v43  ;;  %v946_v49 = vpop.f32.mrb[11].mxu1 }
 0x10b   :  { %v947_v51 = vadd.f32 %v946_v49, %v945_v45 }
 0x10c   :  { %v542_v52 = vadd.f32 %v907_v48, %v147_v50  ;;  %v604_v53 = vadd.f32 %v944_v44, %v539_v47 }
 0x10e   :  { %v908_v55 = vpop.f32.mrb[12].mxu0  ;;  %v607_v56 = vadd.f32 %v947_v51, %v542_v52 }
 0x10f   :  { %v948_v57 = vpop.f32.mrb[12].mxu1  ;;  %v909_v58 = vpop.f32.mrb[13].mxu0 }
 0x110   :  { %v910_v59 = vadd.f32 %v909_v58, %v908_v55  ;;  %v949_v60 = vpop.f32.mrb[13].mxu1  ;;  %v911_v61 = vpop.f32.mrb[14].mxu0 }
 0x111   :  { %v950_v62 = vadd.f32 %v949_v60, %v948_v57  ;;  %v951_v63 = vpop.f32.mrb[14].mxu1  ;;  %v912_v0 = vpop.f32.mrb[15].mxu0 }
 0x112   :  { %v547_v1 = vadd.f32 %v910_v59, %v152_v54  ;;  %v913_v2 = vadd.f32 %v912_v0, %v911_v61  ;;  %v952_v3 = vpop.f32.mrb[15].mxu1 }
 0x113   :  { %v953_v5 = vadd.f32 %v952_v3, %v951_v63 }
 0x114   :  { %v550_v6 = vadd.f32 %v913_v2, %v157_v4  ;;  %v612_v7 = vadd.f32 %v950_v62, %v547_v1 }
 0x116   :  { %v972_v8 = vpop.f32.mrb[16].mxu0  ;;  %v615_v9 = vadd.f32 %v953_v5, %v550_v6 }
 0x117   :  { %v1304_v10 = vadd.f32 %v972_v8, %v596_v35  ;;  %v976_v11 = vpop.f32.mrb[16].mxu1  ;;  %v652_v12 = vpop.f32.mrb[17].mxu0 }
 0x118   :  { %v1306_v13 = vadd.f32 %v976_v11, %v612_v7  ;;  %v1308_v14 = vadd.f32 %v652_v12, %v588_v17  ;;  %v668_v15 = vpop.f32.mrb[17].mxu1  ;;  %v973_v16 = vpop.f32.mrb[18].mxu0 }
 0x119   :  { %v685_v18 = vsub.f32 0.0, %v1304_v10  ;;  %v1311_v19 = vadd.f32 %v668_v15, %v604_v53  ;;  %v664_v21 = vadd.f32 %v973_v16, %v599_v38  ;;  %v977_v22 = vpop.f32.mrb[18].mxu1  ;;  %v655_v23 = vpop.f32.mrb[19].mxu0 }
 0x11a   :  { %v689_v24 = vsub.f32 0.0, %v1306_v13  ;;  %v683_v25 = vsub.f32 0.0, %v1308_v14  ;;  %v680_v26 = vadd.f32 %v977_v22, %v615_v9  ;;  %v1316_v27 = vadd.f32 %v655_v23, %v1302_v20  ;;  %v671_v28 = vpop.f32.mrb[19].mxu1 }
 0x11b   :  { %v695_v17 = vmul.f32 1.442695, %v685_v18  ;;  %v687_v29 = vsub.f32 0.0, %v1311_v19  ;;  %v686_v30 = vsub.f32 0.0, %v664_v21  ;;  %v672_v31 = vadd.f32 %v671_v28, %v607_v56 }
 0x11c   :  { %v703_v32 = vmul.f32 1.442695, %v689_v24  ;;  %v691_v33 = vmul.f32 1.442695, %v683_v25  ;;  %v690_v34 = vsub.f32 0.0, %v680_v26  ;;  %v684_v35 = vsub.f32 0.0, %v1316_v27 }
 0x11d   :  { %1053 = vpow2.f32 %v695_v17  ;;  %v699_v36 = vmul.f32 1.442695, %v687_v29  ;;  %v697_v37 = vmul.f32 1.442695, %v686_v30  ;;  %v688_v38 = vsub.f32 0.0, %v672_v31 }
 0x11e   :  { %1055 = vpow2.f32 %v703_v32  ;;  %v705_v39 = vmul.f32 1.442695, %v690_v34  ;;  %v693_v20 = vmul.f32 1.442695, %v684_v35 }
 0x11f   :  { %1057 = vpow2.f32 %v691_v33  ;;  %v701_v40 = vmul.f32 1.442695, %v688_v38 }
 0x120   :  { %1059 = vpow2.f32 %v699_v36 }
 0x121   :  { %1061 = vpow2.f32 %v697_v37 }
 0x122   :  { %1063 = vpow2.f32 %v705_v39 }
 0x123   :  { %1065 = vpow2.f32 %v693_v20 }
 0x124   :  { %1067 = vpow2.f32 %v701_v40 }
 0x127   :  { %v1054_v41 = vpop.eup %1053 }
 0x128   :  { %v1056_v42 = vpop.eup %1055  ;;  %v709_v43 = vadd.f32 1.0, %v1054_v41 }
 0x129   :  { %v1058_v44 = vpop.eup %1057  ;;  %v713_v45 = vadd.f32 1.0, %v1056_v42 }
 0x12a   :  { %v1060_v46 = vpop.eup %1059  ;;  %1069 = vrcp.f32 %v709_v43  ;;  %v707_v47 = vadd.f32 1.0, %v1058_v44 }
 0x12b   :  { %v1062_v48 = vpop.eup %1061  ;;  %1071 = vrcp.f32 %v713_v45  ;;  %v711_v49 = vadd.f32 1.0, %v1060_v46 }
 0x12c   :  { %v1064_v50 = vpop.eup %1063  ;;  %1073 = vrcp.f32 %v707_v47  ;;  %v710_v51 = vadd.f32 1.0, %v1062_v48 }
 0x12d   :  { %v1066_v52 = vpop.eup %1065  ;;  %1075 = vrcp.f32 %v711_v49  ;;  %v714_v53 = vadd.f32 1.0, %v1064_v50 }
 0x12e   :  { %v1068_v54 = vpop.eup %1067  ;;  %1077 = vrcp.f32 %v710_v51  ;;  %v708_v55 = vadd.f32 1.0, %v1066_v52 }
 0x12f   :  { %1079 = vrcp.f32 %v714_v53  ;;  %v712_v56 = vadd.f32 1.0, %v1068_v54 }
 0x130   :  { %1081 = vrcp.f32 %v708_v55 }
 0x131   :  { %1083 = vrcp.f32 %v712_v56 }
 0x134   :  { %v1070_v57 = vpop.eup %1069 }
 0x135   :  { %v1072_v58 = vpop.eup %1071  ;;  %v725_v63 = vmul.f32 %v1070_v57, %v1304_v10 }
 0x136   :  { %v1074_v59 = vpop.eup %1073  ;;  %v729_v2 = vmul.f32 %v1072_v58, %v1306_v13 }
 0x137   :  { %v1076_v60 = vpop.eup %1075  ;;  %v723_v5 = vmul.f32 %v1074_v59, %v1308_v14 }
 0x138   :  { %v1078_v61 = vpop.eup %1077  ;;  %v727_v8 = vmul.f32 %v1076_v60, %v1311_v19 }
 0x139   :  { %v1080_v62 = vpop.eup %1079  ;;  %v726_v0 = vmul.f32 %v1078_v61, %v664_v21 }
 0x13a   :  { %v1082_v1 = vpop.eup %1081  ;;  %v730_v3 = vmul.f32 %v1080_v62, %v680_v26 }
 0x13b   :  { %v1084_v4 = vpop.eup %1083  ;;  %v859_v6 = vpack.c.bf16 %v726_v0, %v725_v63  ;;  %v724_v7 = vmul.f32 %v1082_v1, %v1316_v27 }
 0x13c   :  { %v869_v9 = vpack.c.bf16 %v730_v3, %v729_v2  ;;  %v728_v11 = vmul.f32 %v1084_v4, %v672_v31 }
 0x13d   :  { %871 = vst [vmem:[%s1340_s3 + $0x8] sm:$0xff] %v859_v6   ;;  %v854_v10 = vpack.c.bf16 %v724_v7, %v723_v5 }
 0x13e   :  { %873 = vst [vmem:[%s1340_s3 + $0x18] sm:$0xff] %v869_v9   ;;  %v864_v12 = vpack.c.bf16 %v728_v11, %v727_v8 }
 0x13f   :  { %855 = vst [vmem:[%s1340_s3] sm:$0xff] %v854_v10  }
 0x140   :  { %872 = vst [vmem:[%s1340_s3 + $0x10] sm:$0xff] %v864_v12  }

</bundles_post_ra>
